<compile_context>
chip_gen: v7x
topology: tpu7x:2x2x1
jax: 0.10.0
libtpu: 0.0.40
codegen_flags: <defaults>
</compile_context>

<pallas_src>
import jax
import jax.numpy as jnp
from jax.experimental import pallas as pl
from jax.experimental.pallas import tpu as pltpu


def hide_kernel(x_ref, w1_ref, b1_ref, w2_ref, b2_ref, w3_ref, b3_ref, out_ref):
    # x_ref:  (M, 32)        flat-padded im2col input: 18 taps | mask | zeros
    # w1_ref: (32, 64)       layer-1 weights, rows 18..31 are zero
    # b1_ref: (1, 64)
    # w2_ref: (3, 192, 64)   layer-2 weights, [dx, dy*64+ci, co]
    # b2_ref: (1, 64)
    # w3_ref: (192, 8)       layer-3 weights, [dy*64+ci, dx] (cols 3..7 zero)
    # b3_ref: (1, 1)
    # out_ref:(B, Hp, Wp)    full padded plane, Wp on lanes
    B, Hp, Wp = out_ref.shape
    Rp = Hp * Wp
    M = B * Rp                         # == x_ref.shape[0]

    def roll_rows(v, shift):           # circular roll along the flat row axis
        return pltpu.roll(v, shift % M, axis=0)

    xb = x_ref[...]                    # (M, 32)
    mask = xb[:, 18:19]                # (M, 1): 1.0 on real pixels, 0.0 on halo

    # ---- layer 1: one (M,32)x(32,64) matmul + bias + ReLU + halo re-zero ----
    a1 = jnp.dot(xb, w1_ref[...], preferred_element_type=jnp.float32)
    a1 = jnp.maximum(a1 + b1_ref[...], 0.0) * mask                   # (M, 64)

    # ---- layer 2: vertical taps folded into K=192; dx taps via 2 rolls ------
    p_cat = jnp.concatenate(
        [roll_rows(a1, Wp), a1, roll_rows(a1, -Wp)], axis=1)          # (M, 192)
    acc = roll_rows(
        jnp.dot(p_cat, w2_ref[0], preferred_element_type=jnp.float32), 1)
    acc = acc + jnp.dot(p_cat, w2_ref[1], preferred_element_type=jnp.float32)
    acc = acc + roll_rows(
        jnp.dot(p_cat, w2_ref[2], preferred_element_type=jnp.float32), -1)
    a2 = jnp.maximum(acc + b2_ref[...], 0.0) * mask                   # (M, 64)

    # ---- layer 3 on the MXU: (M,192)x(192,8), roll + lane-select + reduce ---
    a2_cat = jnp.concatenate(
        [roll_rows(a2, Wp), a2, roll_rows(a2, -Wp)], axis=1)          # (M, 192)
    t3 = jnp.dot(a2_cat, w3_ref[...], preferred_element_type=jnp.float32)  # (M, 8)
    lane = jax.lax.broadcasted_iota(jnp.int32, t3.shape, 1)
    comb = jnp.where(lane == 0, roll_rows(t3, 1),
                     jnp.where(lane == 2, roll_rows(t3, -1), t3))     # (M, 8)

    # Tiny per-image tail: plane reshape (layout-preserving since Wp%8==0),
    # 8-lane reduce puts Wp on lanes, then bias + sigmoid + full-row store.
    for b in range(B):
        cb = comb[b * Rp:(b + 1) * Rp].reshape(Hp, Wp, 8)
        plane = jnp.sum(cb, axis=-1) + b3_ref[...]                    # (Hp, Wp)
        out_ref[b] = jax.nn.sigmoid(plane)


def _round_up(x, m):
    return ((x + m - 1) // m) * m


def hide_forward(cover, secret, params, *, batch_block=2):
    """cover, secret: (N, 1, H, W) float32 (NCHW).  Returns (N, 1, H, W)."""
    w1, b1, w2, b2, w3, b3 = params
    N, _, H, W = cover.shape
    Hp = H + 2
    Wp = _round_up(W + 2, 8)
    Rp = Hp * Wp
    B = min(batch_block, N)
    while N % B:
        B -= 1
    M = B * Rp
    assert Wp % 8 == 0 and Wp >= W + 2          # flat-roll correctness invariant

    # NHWC, zero-padded into the (Hp, Wp) plane; real pixels at [1:H+1, 1:W+1].
    x = jnp.concatenate([cover, secret], axis=1)                   # (N, 2, H, W)
    x = jnp.transpose(x, (0, 2, 3, 1)).astype(jnp.float32)         # (N, H, W, 2)
    xpad = jnp.pad(x, ((0, 0), (1, 1), (1, Wp - W - 1), (0, 0)))   # (N, Hp, Wp, 2)

    # im2col for layer 1: 9 shifted views, taps (dy,dx)-major, cin-minor.
    taps = [jnp.roll(xpad, (1 - dy, 1 - dx), axis=(1, 2))
            for dy in range(3) for dx in range(3)]
    xcol = jnp.stack(taps, axis=3).reshape(N, Hp, Wp, 18)

    # Validity mask rides in lane 18 of the (padded to 32) layer-1 operand.
    row_ok = (jnp.arange(Hp) >= 1) & (jnp.arange(Hp) <= H)
    col_ok = (jnp.arange(Wp) >= 1) & (jnp.arange(Wp) <= W)
    maskp = (row_ok[:, None] & col_ok[None, :]).astype(jnp.float32)  # (Hp, Wp)
    maskp = jnp.broadcast_to(maskp[None, :, :, None], (N, Hp, Wp, 1))
    xin = jnp.concatenate(
        [xcol, maskp, jnp.zeros((N, Hp, Wp, 13), jnp.float32)], axis=-1)
    xin = xin.reshape(N * Rp, 32)

    # Weight repacking for the fat-K formulations.
    w1p = jnp.zeros((32, 64), jnp.float32).at[:18].set(w1.reshape(18, 64))
    w2k = jnp.transpose(w2, (1, 0, 2, 3)).reshape(3, 192, 64)    # [dx, dy*64+ci, co]
    w3c = jnp.zeros((192, 8), jnp.float32).at[:, :3].set(
        jnp.transpose(w3, (0, 2, 1, 3)).reshape(192, 3))         # [dy*64+ci, dx]
    b3m = b3.reshape(1, 1)

    out = pl.pallas_call(
        hide_kernel,
        out_shape=jax.ShapeDtypeStruct((N, Hp, Wp), jnp.float32),
        grid_spec=pltpu.PrefetchScalarGridSpec(
            num_scalar_prefetch=0,
            grid=(N // B,),
            in_specs=[
                pl.BlockSpec((M, 32), lambda nb: (nb, 0)),
                pl.BlockSpec((32, 64), lambda nb: (0, 0)),
                pl.BlockSpec((1, 64), lambda nb: (0, 0)),
                pl.BlockSpec((3, 192, 64), lambda nb: (0, 0, 0)),
                pl.BlockSpec((1, 64), lambda nb: (0, 0)),
                pl.BlockSpec((192, 8), lambda nb: (0, 0)),
                pl.BlockSpec((1, 1), lambda nb: (0, 0)),
            ],
            out_specs=pl.BlockSpec((B, Hp, Wp), lambda nb: (nb, 0, 0)),
        ),
        compiler_params=pltpu.CompilerParams(
            dimension_semantics=("parallel",),
            vmem_limit_bytes=32 * 1024 * 1024),
    )(xin, w1p, b1, w2k, b2, w3c, b3m)

    # Strip the halo ring in XLA and restore NCHW.
    return out[:, 1:H + 1, 1:W + 1][:, None, :, :]


def init_params(key):
    """Deterministic params; weights (kh, kw, Cin, Cout), biases (1, Cout)."""
    def conv_init(key, cin, cout):
        kw_key, b_key = jax.random.split(key)
        bound = 1.0 / jnp.sqrt(cin * 3.0 * 3.0)
        w = jax.random.uniform(kw_key, (3, 3, cin, cout), jnp.float32,
                               minval=-bound, maxval=bound)
        b = jax.random.uniform(b_key, (1, cout), jnp.float32,
                               minval=-bound, maxval=bound)
        return w, b

    k1, k2, k3 = jax.random.split(key, 3)
    w1, b1 = conv_init(k1, 2, 64)
    w2, b2 = conv_init(k2, 64, 64)
    w3, b3 = conv_init(k3, 64, 1)
    return (w1, b1, w2, b2, w3, b3)


def ref_forward(cover, secret, params):
    """Pure-JAX reference (same math as the PyTorch module)."""
    w1, b1, w2, b2, w3, b3 = params
    x = jnp.concatenate([cover, secret], axis=1)                 # NCHW

    def conv(x, w, b):
        y = jax.lax.conv_general_dilated(
            x, w, window_strides=(1, 1), padding=((1, 1), (1, 1)),
            dimension_numbers=("NCHW", "HWIO", "NCHW"),
            precision=jax.lax.Precision.HIGHEST)
        return y + b.reshape(1, -1, 1, 1)

    y = jax.nn.relu(conv(x, w1, b1))
    y = jax.nn.relu(conv(y, w2, b2))
    y = jax.nn.sigmoid(conv(y, w3, b3))
    return y


if __name__ == "__main__":
    key = jax.random.PRNGKey(0)
    k_param, k_cover, k_secret = jax.random.split(key, 3)

    N, H, W = 4, 16, 16
    cover = jax.random.uniform(k_cover, (N, 1, H, W), jnp.float32)
    secret = jax.random.uniform(k_secret, (N, 1, H, W), jnp.float32)
    params = init_params(k_param)

    container = jax.block_until_ready(
        hide_forward(cover, secret, params, batch_block=2))
    expected = jax.block_until_ready(ref_forward(cover, secret, params))

    assert container.shape == (N, 1, H, W)
    max_err = float(jnp.max(jnp.abs(container - expected)))
    assert jnp.allclose(container, expected, rtol=2e-3, atol=2e-3), (
        f"mismatch vs reference: max err {max_err}")

    print("KERNEL_OK")
</pallas_src>

<mosaic_0001>
module attributes {stable_mosaic.version = 11 : i64} {
  func.func @hide_kernel(%arg0: i32, %arg1: memref<864x32xf32, #tpu.memory_space<vmem>>, %arg2: memref<32x64xf32, #tpu.memory_space<vmem>>, %arg3: memref<1x64xf32, #tpu.memory_space<vmem>>, %arg4: memref<3x192x64xf32, #tpu.memory_space<vmem>>, %arg5: memref<1x64xf32, #tpu.memory_space<vmem>>, %arg6: memref<192x8xf32, #tpu.memory_space<vmem>>, %arg7: memref<1x1xf32, #tpu.memory_space<vmem>>, %arg8: memref<2x18x24xf32, #tpu.memory_space<vmem>>) attributes {dimension_semantics = [#tpu.dimension_semantics<parallel>], iteration_bounds = array<i64: 2>, scalar_prefetch = 0 : i64, scratch_operands = 0 : i64, tpu.core_type = #tpu.core_type<tc>, window_params = [{transform_indices = @transform_0, window_bounds = array<i64: 864, 32>}, {pipeline_mode = #tpu.pipeline_mode<synchronous>, transform_indices = @transform_1, window_bounds = array<i64: 32, 64>}, {pipeline_mode = #tpu.pipeline_mode<synchronous>, transform_indices = @transform_2, window_bounds = array<i64: 1, 64>}, {pipeline_mode = #tpu.pipeline_mode<synchronous>, transform_indices = @transform_3, window_bounds = array<i64: 3, 192, 64>}, {pipeline_mode = #tpu.pipeline_mode<synchronous>, transform_indices = @transform_4, window_bounds = array<i64: 1, 64>}, {pipeline_mode = #tpu.pipeline_mode<synchronous>, transform_indices = @transform_5, window_bounds = array<i64: 192, 8>}, {pipeline_mode = #tpu.pipeline_mode<synchronous>, transform_indices = @transform_6, window_bounds = array<i64: 1, 1>}, {transform_indices = @transform_7, window_bounds = array<i64: 2, 18, 24>}]} {
    %c0 = arith.constant 0 : index
    %c0_0 = arith.constant 0 : index
    %0 = vector.load %arg1[%c0, %c0_0] : memref<864x32xf32, #tpu.memory_space<vmem>>, vector<864x32xf32>
    %1 = vector.extract_strided_slice %0 {offsets = [0, 18], sizes = [864, 1], strides = [1, 1]} : vector<864x32xf32> to vector<864x1xf32>
    %c0_1 = arith.constant 0 : index
    %c0_2 = arith.constant 0 : index
    %2 = vector.load %arg2[%c0_1, %c0_2] : memref<32x64xf32, #tpu.memory_space<vmem>>, vector<32x64xf32>
    %cst = arith.constant dense<0.000000e+00> : vector<864x64xf32>
    %3 = tpu.matmul %0, %2, %cst {dimension_numbers = #tpu.dot_dimension_numbers<[1], [0], [0], [1], [0, 0, 1, 1], [], []>} : vector<864x32xf32>, vector<32x64xf32>, vector<864x64xf32> -> vector<864x64xf32>
    %c0_3 = arith.constant 0 : index
    %c0_4 = arith.constant 0 : index
    %4 = vector.load %arg3[%c0_3, %c0_4] : memref<1x64xf32, #tpu.memory_space<vmem>>, vector<1x64xf32>
    %5 = vector.broadcast %4 : vector<1x64xf32> to vector<864x64xf32>
    %6 = arith.addf %3, %5 : vector<864x64xf32>
    %cst_5 = arith.constant 0.000000e+00 : f32
    %7 = vector.broadcast %cst_5 : f32 to vector<864x64xf32>
    %8 = arith.maximumf %6, %7 : vector<864x64xf32>
    %9 = vector.broadcast %1 : vector<864x1xf32> to vector<864x64xf32>
    %10 = arith.mulf %8, %9 : vector<864x64xf32>
    %c24_i32 = arith.constant 24 : i32
    %11 = tpu.dynamic_rotate %10 by %c24_i32 dim 0 : vector<864x64xf32>, i32 -> vector<864x64xf32>
    %c840_i32 = arith.constant 840 : i32
    %12 = tpu.dynamic_rotate %10 by %c840_i32 dim 0 : vector<864x64xf32>, i32 -> vector<864x64xf32>
    %13 = tpu.concatenate %11, %10, %12 in 1 : vector<864x64xf32>, vector<864x64xf32>, vector<864x64xf32> -> vector<864x192xf32>
    %c0_6 = arith.constant 0 : index
    %c0_7 = arith.constant 0 : index
    %c0_8 = arith.constant 0 : index
    %14 = vector.load %arg4[%c0_6, %c0_7, %c0_8] : memref<3x192x64xf32, #tpu.memory_space<vmem>>, vector<1x192x64xf32>
    %15 = vector.shape_cast %14 : vector<1x192x64xf32> to vector<192x64xf32>
    %cst_9 = arith.constant dense<0.000000e+00> : vector<864x64xf32>
    %16 = tpu.matmul %13, %15, %cst_9 {dimension_numbers = #tpu.dot_dimension_numbers<[1], [0], [0], [1], [0, 0, 1, 1], [], []>} : vector<864x192xf32>, vector<192x64xf32>, vector<864x64xf32> -> vector<864x64xf32>
    %c1_i32 = arith.constant 1 : i32
    %17 = tpu.dynamic_rotate %16 by %c1_i32 dim 0 : vector<864x64xf32>, i32 -> vector<864x64xf32>
    %c1 = arith.constant 1 : index
    %c0_10 = arith.constant 0 : index
    %c0_11 = arith.constant 0 : index
    %18 = vector.load %arg4[%c1, %c0_10, %c0_11] : memref<3x192x64xf32, #tpu.memory_space<vmem>>, vector<1x192x64xf32>
    %19 = vector.shape_cast %18 : vector<1x192x64xf32> to vector<192x64xf32>
    %cst_12 = arith.constant dense<0.000000e+00> : vector<864x64xf32>
    %20 = tpu.matmul %13, %19, %cst_12 {dimension_numbers = #tpu.dot_dimension_numbers<[1], [0], [0], [1], [0, 0, 1, 1], [], []>} : vector<864x192xf32>, vector<192x64xf32>, vector<864x64xf32> -> vector<864x64xf32>
    %21 = arith.addf %17, %20 : vector<864x64xf32>
    %c2 = arith.constant 2 : index
    %c0_13 = arith.constant 0 : index
    %c0_14 = arith.constant 0 : index
    %22 = vector.load %arg4[%c2, %c0_13, %c0_14] : memref<3x192x64xf32, #tpu.memory_space<vmem>>, vector<1x192x64xf32>
    %23 = vector.shape_cast %22 : vector<1x192x64xf32> to vector<192x64xf32>
    %cst_15 = arith.constant dense<0.000000e+00> : vector<864x64xf32>
    %24 = tpu.matmul %13, %23, %cst_15 {dimension_numbers = #tpu.dot_dimension_numbers<[1], [0], [0], [1], [0, 0, 1, 1], [], []>} : vector<864x192xf32>, vector<192x64xf32>, vector<864x64xf32> -> vector<864x64xf32>
    %c863_i32 = arith.constant 863 : i32
    %25 = tpu.dynamic_rotate %24 by %c863_i32 dim 0 : vector<864x64xf32>, i32 -> vector<864x64xf32>
    %26 = arith.addf %21, %25 : vector<864x64xf32>
    %c0_16 = arith.constant 0 : index
    %c0_17 = arith.constant 0 : index
    %27 = vector.load %arg5[%c0_16, %c0_17] : memref<1x64xf32, #tpu.memory_space<vmem>>, vector<1x64xf32>
    %28 = vector.broadcast %27 : vector<1x64xf32> to vector<864x64xf32>
    %29 = arith.addf %26, %28 : vector<864x64xf32>
    %cst_18 = arith.constant 0.000000e+00 : f32
    %30 = vector.broadcast %cst_18 : f32 to vector<864x64xf32>
    %31 = arith.maximumf %29, %30 : vector<864x64xf32>
    %32 = vector.broadcast %1 : vector<864x1xf32> to vector<864x64xf32>
    %33 = arith.mulf %31, %32 : vector<864x64xf32>
    %c24_i32_19 = arith.constant 24 : i32
    %34 = tpu.dynamic_rotate %33 by %c24_i32_19 dim 0 : vector<864x64xf32>, i32 -> vector<864x64xf32>
    %c840_i32_20 = arith.constant 840 : i32
    %35 = tpu.dynamic_rotate %33 by %c840_i32_20 dim 0 : vector<864x64xf32>, i32 -> vector<864x64xf32>
    %36 = tpu.concatenate %34, %33, %35 in 1 : vector<864x64xf32>, vector<864x64xf32>, vector<864x64xf32> -> vector<864x192xf32>
    %c0_21 = arith.constant 0 : index
    %c0_22 = arith.constant 0 : index
    %37 = vector.load %arg6[%c0_21, %c0_22] : memref<192x8xf32, #tpu.memory_space<vmem>>, vector<192x8xf32>
    %cst_23 = arith.constant dense<0.000000e+00> : vector<864x8xf32>
    %38 = tpu.matmul %36, %37, %cst_23 {dimension_numbers = #tpu.dot_dimension_numbers<[1], [0], [0], [1], [0, 0, 1, 1], [], []>} : vector<864x192xf32>, vector<192x8xf32>, vector<864x8xf32> -> vector<864x8xf32>
    %39 = tpu.iota {dimensions = array<i32: 1>} : vector<864x8xi32>
    %c0_i32 = arith.constant 0 : i32
    %40 = vector.broadcast %c0_i32 : i32 to vector<864x8xi32>
    %41 = arith.cmpi eq, %39, %40 : vector<864x8xi32>
    %c1_i32_24 = arith.constant 1 : i32
    %42 = tpu.dynamic_rotate %38 by %c1_i32_24 dim 0 : vector<864x8xf32>, i32 -> vector<864x8xf32>
    %c2_i32 = arith.constant 2 : i32
    %43 = vector.broadcast %c2_i32 : i32 to vector<864x8xi32>
    %44 = arith.cmpi eq, %39, %43 : vector<864x8xi32>
    %c863_i32_25 = arith.constant 863 : i32
    %45 = tpu.dynamic_rotate %38 by %c863_i32_25 dim 0 : vector<864x8xf32>, i32 -> vector<864x8xf32>
    %46 = arith.select %44, %45, %38 : vector<864x8xi1>, vector<864x8xf32>
    %47 = arith.select %41, %42, %46 : vector<864x8xi1>, vector<864x8xf32>
    %48 = vector.extract_strided_slice %47 {offsets = [0, 0], sizes = [432, 8], strides = [1, 1]} : vector<864x8xf32> to vector<432x8xf32>
    %49 = vector.shape_cast %48 : vector<432x8xf32> to vector<18x24x8xf32>
    %cst_26 = arith.constant dense<0.000000e+00> : vector<18x24xf32>
    %50 = vector.multi_reduction <add>, %49, %cst_26 [2] : vector<18x24x8xf32> to vector<18x24xf32>
    %c0_27 = arith.constant 0 : index
    %c0_28 = arith.constant 0 : index
    %51 = vector.load %arg7[%c0_27, %c0_28] : memref<1x1xf32, #tpu.memory_space<vmem>>, vector<1x1xf32>
    %52 = vector.broadcast %51 : vector<1x1xf32> to vector<18x24xf32>
    %53 = arith.addf %50, %52 : vector<18x24xf32>
    %54 = arith.negf %53 : vector<18x24xf32>
    %55 = math.exp %54 : vector<18x24xf32>
    %cst_29 = arith.constant 1.000000e+00 : f32
    %56 = vector.broadcast %cst_29 : f32 to vector<18x24xf32>
    %57 = arith.addf %56, %55 : vector<18x24xf32>
    %58 = arith.divf %56, %57 : vector<18x24xf32>
    %c0_30 = arith.constant 0 : index
    %c0_31 = arith.constant 0 : index
    %c0_32 = arith.constant 0 : index
    %59 = vector.load %arg8[%c0_30, %c0_31, %c0_32] : memref<2x18x24xf32, #tpu.memory_space<vmem>>, vector<1x18x24xf32>
    %60 = vector.shape_cast %59 : vector<1x18x24xf32> to vector<18x24xf32>
    %61 = vector.shape_cast %58 : vector<18x24xf32> to vector<1x18x24xf32>
    tpu.vector_store %arg8[%c0_30, %c0_31, %c0_32], %61 {strides = array<i32>} : memref<2x18x24xf32, #tpu.memory_space<vmem>>, vector<1x18x24xf32>,
    %62 = vector.extract_strided_slice %47 {offsets = [432, 0], sizes = [432, 8], strides = [1, 1]} : vector<864x8xf32> to vector<432x8xf32>
    %63 = vector.shape_cast %62 : vector<432x8xf32> to vector<18x24x8xf32>
    %cst_33 = arith.constant dense<0.000000e+00> : vector<18x24xf32>
    %64 = vector.multi_reduction <add>, %63, %cst_33 [2] : vector<18x24x8xf32> to vector<18x24xf32>
    %c0_34 = arith.constant 0 : index
    %c0_35 = arith.constant 0 : index
    %65 = vector.load %arg7[%c0_34, %c0_35] : memref<1x1xf32, #tpu.memory_space<vmem>>, vector<1x1xf32>
    %66 = vector.broadcast %65 : vector<1x1xf32> to vector<18x24xf32>
    %67 = arith.addf %64, %66 : vector<18x24xf32>
    %68 = arith.negf %67 : vector<18x24xf32>
    %69 = math.exp %68 : vector<18x24xf32>
    %cst_36 = arith.constant 1.000000e+00 : f32
    %70 = vector.broadcast %cst_36 : f32 to vector<18x24xf32>
    %71 = arith.addf %70, %69 : vector<18x24xf32>
    %72 = arith.divf %70, %71 : vector<18x24xf32>
    %c1_37 = arith.constant 1 : index
    %c0_38 = arith.constant 0 : index
    %c0_39 = arith.constant 0 : index
    %73 = vector.load %arg8[%c1_37, %c0_38, %c0_39] : memref<2x18x24xf32, #tpu.memory_space<vmem>>, vector<1x18x24xf32>
    %74 = vector.shape_cast %73 : vector<1x18x24xf32> to vector<18x24xf32>
    %75 = vector.shape_cast %72 : vector<18x24xf32> to vector<1x18x24xf32>
    tpu.vector_store %arg8[%c1_37, %c0_38, %c0_39], %75 {strides = array<i32>} : memref<2x18x24xf32, #tpu.memory_space<vmem>>, vector<1x18x24xf32>,
    return
  }
  func.func @transform_0(%arg0: i32) -> (i32, i32) {
    %c0_i32 = arith.constant 0 : i32
    %c0_i32_0 = arith.constant 0 : i32
    return %arg0, %c0_i32 : i32, i32
  }
  func.func @transform_1(%arg0: i32) -> (i32, i32) {
    %c0_i32 = arith.constant 0 : i32
    %c0_i32_0 = arith.constant 0 : i32
    %c0_i32_1 = arith.constant 0 : i32
    return %c0_i32, %c0_i32_0 : i32, i32
  }
  func.func @transform_2(%arg0: i32) -> (i32, i32) {
    %c0_i32 = arith.constant 0 : i32
    %c0_i32_0 = arith.constant 0 : i32
    %c0_i32_1 = arith.constant 0 : i32
    return %c0_i32, %c0_i32_0 : i32, i32
  }
  func.func @transform_3(%arg0: i32) -> (i32, i32, i32) {
    %c0_i32 = arith.constant 0 : i32
    %c0_i32_0 = arith.constant 0 : i32
    %c0_i32_1 = arith.constant 0 : i32
    %c0_i32_2 = arith.constant 0 : i32
    return %c0_i32, %c0_i32_0, %c0_i32_1 : i32, i32, i32
  }
  func.func @transform_4(%arg0: i32) -> (i32, i32) {
    %c0_i32 = arith.constant 0 : i32
    %c0_i32_0 = arith.constant 0 : i32
    %c0_i32_1 = arith.constant 0 : i32
    return %c0_i32, %c0_i32_0 : i32, i32
  }
  func.func @transform_5(%arg0: i32) -> (i32, i32) {
    %c0_i32 = arith.constant 0 : i32
    %c0_i32_0 = arith.constant 0 : i32
    %c0_i32_1 = arith.constant 0 : i32
    return %c0_i32, %c0_i32_0 : i32, i32
  }
  func.func @transform_6(%arg0: i32) -> (i32, i32) {
    %c0_i32 = arith.constant 0 : i32
    %c0_i32_0 = arith.constant 0 : i32
    %c0_i32_1 = arith.constant 0 : i32
    return %c0_i32, %c0_i32_0 : i32, i32
  }
  func.func @transform_7(%arg0: i32) -> (i32, i32, i32) {
    %c0_i32 = arith.constant 0 : i32
    %c0_i32_0 = arith.constant 0 : i32
    %c0_i32_1 = arith.constant 0 : i32
    return %arg0, %c0_i32, %c0_i32_0 : i32, i32, i32
  }
}

</mosaic_0001>

<bundles_post_ra>
// kernel: tpu_custom_call.1
= control target key start
LH: loop header
LB: loop body
LE: loop exit
PB: predicated region body
PF: predicated region fallthrough
CT: control target
= control target key end

     0   :  { %s11159_s26 = smov 0   ;;  %s18262_s0 = inlined_call_operand.vmem [shape: f32[1728,32], index: 0, kind: input, shape index: {}]   ;;  %s18263_s1 = inlined_call_operand.vmem [shape: f32[32,64], index: 1, kind: input, shape index: {}]   ;;  %s18264_s2 = inlined_call_operand.vmem [shape: f32[1,64], index: 2, kind: input, shape index: {}]   ;;  %s18265_s3 = inlined_call_operand.vmem [shape: f32[3,192,64], index: 3, kind: input, shape index: {}]   ;;  %s18266_s4 = inlined_call_operand.vmem [shape: f32[1,64], index: 4, kind: input, shape index: {}]   ;;  %s18267_s5 = inlined_call_operand.vmem [shape: f32[192,8], index: 5, kind: input, shape index: {}]   ;;  %s18268_s6 = inlined_call_operand.<no memory space> [shape: f32[1,1], index: 6, kind: input, shape index: {}]   ;;  %s18269_s7 = inlined_call_operand.vmem [shape: f32[4,18,24], index: 7, kind: output, shape index: {}]  }
   0x1   :  { %v12_v0 = vstv %s18268_s6 }
   0x2   :  { %13 = vst [vmem:[#allocation2] sm:$0x1] %v12_v0 }
   0x3 LB: > { %s9476_s27 = sadd.s32 4294967295, %s11110_s26   ;;  %p9480_p0 = scmp.ge.s32.totalorder %s11110_s26, 1  ;;  %s11110_s26 = sphi %s11159_s26, %s19_s26  }
   0x4   : > { %p240_p1 = scmp.lt.s32.totalorder %s11110_s26, 3 }
   0x6   : > { %p241_p2 = pnand %p9480_p0, %p240_p1 }
   0x8   : > { %244 = sbr.rel (%p241_p2) target bundleno = 2374 (0x946), region = 48 }
   0xf   : > { %v394_v1 = vld [vmem:[%s18263_s1] sm:$0xff]  ;;  %v395_v2 = vld [vmem:[%s18263_s1 + $0x8] sm:$0xff]  ;;  %v396_v3 = vld [vmem:[%s18263_s1 + $0x10] sm:$0xff]  ;;  %s273_s10 = smul.u32 108, %s9476_s27  ;;  %v11112_v6 = vmov 18   ;;  %vm405_vm0 = vcmask 261120  }
  0x10   : > { %v10471_v4 = vpack.c.bf16 %v395_v2, %v394_v1  ;;  %v397_v5 = vld [vmem:[%s18263_s1 + $0x18] sm:$0xff]  ;;  %10641 = vset.pattern.permute.xlu1 %v11112_v6  ;;  %10640 = vset.pattern.permute.xlu0 %v11112_v6  ;;  %s11114_s9 = smov 64   ;;  %vm2415_vm1 = vcmask 523264   ;;  %vm7649_vm6 = vcmask 64512   ;;  %vm8263_vm7 = vcmask 130112  }
  0x11   : > { %v10475_v7 = vpack.c.bf16 %v397_v5, %v396_v3  ;;  %p274_p3 = scmp.lt.s32.totalorder %s273_s10, 215  ;;  %vm8270_vm8 = vcmask 195712   ;;  %vm8510_vm9 = vcmask 1041409   ;;  %vm8512_vm10 = vcmask 1042434  }
  0x12   : > { %10472 = vmatprep.subr.bf16.mxu0 %v10471_v4  ;;  %10623 = vmatprep.subr.bf16.mxu1 %v10471_v4  ;;  %vm8514_vm11 = vcmask 1043459   ;;  %vm8516_vm12 = vcmask 1044484   ;;  %vm8518_vm13 = vcmask 1045509   ;;  %vm8520_vm14 = vcmask 1046534  }
  0x13   : > { %10474 = vmatpush3.bf16.msra.mxu0 %v10471_v4  ;;  %10625 = vmatpush3.bf16.msra.mxu1 %v10471_v4  ;;  %s19833_s10 = smov (!%p274_p3, %s273_s10), 215  ;;  %vm8522_vm15 = vcmask 1047559  }
  0x14   : > { %10476 = vmatprep.subr.bf16.mxu0 %v10475_v7  ;;  %10624 = vmatprep.subr.bf16.mxu1 %v10475_v7  ;;  %s9481_s13 = sshll.u32 %s19833_s10, 3 }
  0x15   : > { %s11184_s16 = scalar_lea.vmem %s18262_s0, %s9481_s13 }
  0x16   : > { %v288_v8 = vld [vmem:[%s11184_s16 + $0x10] sm:$0xff]  ;;  %v286_v9 = vld [vmem:[%s11184_s16] sm:$0xff]  ;;  %v287_v11 = vld [vmem:[%s11184_s16 + $0x8] sm:$0xff] }
  0x17   : > { %10478 = vmatpush3.bf16.msra.mxu0 %v10475_v7  ;;  %10626 = vmatpush3.bf16.msra.mxu1 %v10475_v7  ;;  %v11189_v10 = vld [vmem:[%s11184_s16 + $0x1b0] sm:$0xff]  ;;  %v11194_v12 = vld [vmem:[%s11184_s16 + $0x1b8] sm:$0xff]  ;;  %v11200_v14 = vld [vmem:[%s11184_s16 + $0x1c0] sm:$0xff] }
  0x18   : > { %1452 = vperm.xlu1 %10641, %v288_v8   ;;  %10309 = vmatprep.mubr.msk.f32.mxu0 %vm405_vm0, %v286_v9  ;;  %v289_v13 = vld [vmem:[%s11184_s16 + $0x18] sm:$0xff]  ;;  %v11209_v15 = vld [vmem:[%s11184_s16 + $0x1c8] sm:$0xff]  ;;  %v290_v16 = vld [vmem:[%s11184_s16 + $0x20] sm:$0xff] }
  0x19   : > { %10390 = vmatprep.mubr.msk.f32.mxu1 %vm405_vm0, %v11189_v10  ;;  %1444 = vperm.xlu0 %10640, %v286_v9   ;;  %v11213_v17 = vld [vmem:[%s11184_s16 + $0x1d0] sm:$0xff]  ;;  %v291_v18 = vld [vmem:[%s11184_s16 + $0x28] sm:$0xff]  ;;  %v11223_v19 = vld [vmem:[%s11184_s16 + $0x1d8] sm:$0xff] }
  0x1a   : > { %10310 = vmatmul.mubr.msk.f32.vlgmr.msra.gmra.mrb[0].mxu0 %vm405_vm0, %v287_v11  ;;  %10391 = vmatmul.mubr.msk.f32.vlgmr.msra.gmra.mrb[0].mxu1 %vm405_vm0, %v11194_v12  ;;  %v292_v20 = vld [vmem:[%s11184_s16 + $0x30] sm:$0xff]  ;;  %v11227_v21 = vld [vmem:[%s11184_s16 + $0x1e0] sm:$0xff]  ;;  %v293_v22 = vld [vmem:[%s11184_s16 + $0x38] sm:$0xff] }
  0x1b   : > { %10312 = vmatprep.mubr.msk.f32.mxu0 %vm405_vm0, %v288_v8  ;;  %10393 = vmatprep.mubr.msk.f32.mxu1 %vm405_vm0, %v11200_v14  ;;  %v11237_v23 = vld [vmem:[%s11184_s16 + $0x1e8] sm:$0xff]  ;;  %v294_v24 = vld [vmem:[%s11184_s16 + $0x40] sm:$0xff]  ;;  %v11241_v25 = vld [vmem:[%s11184_s16 + $0x1f0] sm:$0xff] }
  0x1c   : > { %1456 = vperm.xlu1 %10641, %v289_v13   ;;  %v295_v26 = vld [vmem:[%s11184_s16 + $0x48] sm:$0xff]  ;;  %v11251_v27 = vld [vmem:[%s11184_s16 + $0x1f8] sm:$0xff]  ;;  %v296_v28 = vld [vmem:[%s11184_s16 + $0x50] sm:$0xff] }
  0x1d   : > { %1448 = vperm.xlu0 %10640, %v287_v11   ;;  %v11255_v29 = vld [vmem:[%s11184_s16 + $0x200] sm:$0xff]  ;;  %v297_v30 = vld [vmem:[%s11184_s16 + $0x58] sm:$0xff]  ;;  %v11265_v31 = vld [vmem:[%s11184_s16 + $0x208] sm:$0xff] }
  0x1e   : > { %10313 = vmatmul.mubr.msk.f32.gmra.mrb[2].mxu0 %vm405_vm0, %v289_v13  ;;  %10394 = vmatmul.mubr.msk.f32.gmra.mrb[2].mxu1 %vm405_vm0, %v11209_v15  ;;  %v298_v32 = vld [vmem:[%s11184_s16 + $0x60] sm:$0xff]  ;;  %v11269_v33 = vld [vmem:[%s11184_s16 + $0x210] sm:$0xff]  ;;  %v299_v34 = vld [vmem:[%s11184_s16 + $0x68] sm:$0xff] }
  0x1f   : > { %10315 = vmatprep.mubr.msk.f32.mxu0 %vm405_vm0, %v290_v16  ;;  %10396 = vmatprep.mubr.msk.f32.mxu1 %vm405_vm0, %v11213_v17  ;;  %v11279_v35 = vld [vmem:[%s11184_s16 + $0x218] sm:$0xff]  ;;  %v300_v36 = vld [vmem:[%s11184_s16 + $0x70] sm:$0xff]  ;;  %v11283_v37 = vld [vmem:[%s11184_s16 + $0x220] sm:$0xff] }
  0x20   : > { %1464 = vperm.xlu1 %10641, %v291_v18   ;;  %v11286_v38 = vld [vmem:[%s11184_s16 + $0x348] sm:$0xff]  ;;  %v301_v39 = vld [vmem:[%s11184_s16 + $0x78] sm:$0xff]  ;;  %v302_v41 = vld [vmem:[%s11184_s16 + $0x80] sm:$0xff] }
  0x21   : > { %1460 = vperm.xlu0 %10640, %v290_v16   ;;  %v11296_v40 = vld [vmem:[%s11184_s16 + $0x228] sm:$0xff]  ;;  %v11301_v42 = vld [vmem:[%s11184_s16 + $0x230] sm:$0xff]  ;;  %v11314_v45 = vld [vmem:[%s11184_s16 + $0x238] sm:$0xff] }
  0x22   : > { %10316 = vmatmul.mubr.msk.f32.gmra.mrb[4].mxu0 %vm405_vm0, %v291_v18  ;;  %10397 = vmatmul.mubr.msk.f32.gmra.mrb[4].mxu1 %vm405_vm0, %v11223_v19  ;;  %v11304_v43 = vld [vmem:[%s11184_s16 + $0x350] sm:$0xff]  ;;  %v303_v44 = vld [vmem:[%s11184_s16 + $0x88] sm:$0xff]  ;;  %v11319_v47 = vld [vmem:[%s11184_s16 + $0x240] sm:$0xff] }
  0x23   : > { %10318 = vmatprep.mubr.msk.f32.mxu0 %vm405_vm0, %v292_v20  ;;  %10399 = vmatprep.mubr.msk.f32.mxu1 %vm405_vm0, %v11227_v21  ;;  %v304_v46 = vld [vmem:[%s11184_s16 + $0x90] sm:$0xff]  ;;  %v11322_v48 = vld [vmem:[%s11184_s16 + $0x358] sm:$0xff]  ;;  %v11332_v50 = vld [vmem:[%s11184_s16 + $0x248] sm:$0xff] }
  0x24   : > { %1472 = vperm.xlu1 %10641, %v293_v22   ;;  %v305_v49 = vld [vmem:[%s11184_s16 + $0x98] sm:$0xff]  ;;  %v306_v51 = vld [vmem:[%s11184_s16 + $0xa0] sm:$0xff]  ;;  %v11337_v52 = vld [vmem:[%s11184_s16 + $0x250] sm:$0xff] }
  0x25   : > { %1468 = vperm.xlu0 %10640, %v292_v20   ;;  %v307_v53 = vld [vmem:[%s11184_s16 + $0xa8] sm:$0xff]  ;;  %v11347_v54 = vld [vmem:[%s11184_s16 + $0x258] sm:$0xff]  ;;  %v308_v55 = vld [vmem:[%s11184_s16 + $0xb0] sm:$0xff] }
  0x26   : > { %10319 = vmatmul.mubr.msk.f32.gmra.mrb[6].mxu0 %vm405_vm0, %v293_v22  ;;  %10400 = vmatmul.mubr.msk.f32.gmra.mrb[6].mxu1 %vm405_vm0, %v11237_v23  ;;  %v11351_v56 = vld [vmem:[%s11184_s16 + $0x260] sm:$0xff]  ;;  %v309_v57 = vld [vmem:[%s11184_s16 + $0xb8] sm:$0xff]  ;;  %v11361_v58 = vld [vmem:[%s11184_s16 + $0x268] sm:$0xff] }
  0x27   : > { %10321 = vmatprep.mubr.msk.f32.mxu0 %vm405_vm0, %v294_v24  ;;  %10402 = vmatprep.mubr.msk.f32.mxu1 %vm405_vm0, %v11241_v25  ;;  %v310_v59 = vld [vmem:[%s11184_s16 + $0xc0] sm:$0xff]  ;;  %v11365_v60 = vld [vmem:[%s11184_s16 + $0x270] sm:$0xff]  ;;  %v311_v61 = vld [vmem:[%s11184_s16 + $0xc8] sm:$0xff] }
  0x28   : > { %1480 = vperm.xlu1 %10641, %v295_v26   ;;  %v11375_v62 = vld [vmem:[%s11184_s16 + $0x278] sm:$0xff]  ;;  %v312_v63 = vld [vmem:[%s11184_s16 + $0xd0] sm:$0xff]  ;;  %v11379_v0 = vld [vmem:[%s11184_s16 + $0x280] sm:$0xff] }
  0x29   : > { %1476 = vperm.xlu0 %10640, %v294_v24   ;;  %v11388_v1 = vld [vmem:[%s11184_s16 + $0xd8] sm:$0xff]  ;;  %v367_v2 = vld [vmem:[%s11184_s16 + $0x288] sm:$0xff]  ;;  %v11392_v3 = vld [vmem:[%s11184_s16 + $0xe0] sm:$0xff] }
  0x2a   : > { %10322 = vmatmul.mubr.msk.f32.gmra.mrb[8].mxu0 %vm405_vm0, %v295_v26  ;;  %10403 = vmatmul.mubr.msk.f32.gmra.mrb[8].mxu1 %vm405_vm0, %v11251_v27  ;;  %v368_v4 = vld [vmem:[%s11184_s16 + $0x290] sm:$0xff]  ;;  %v11402_v5 = vld [vmem:[%s11184_s16 + $0xe8] sm:$0xff]  ;;  %v369_v6 = vld [vmem:[%s11184_s16 + $0x298] sm:$0xff] }
  0x2b   : > { %10324 = vmatprep.mubr.msk.f32.mxu0 %vm405_vm0, %v296_v28  ;;  %10405 = vmatprep.mubr.msk.f32.mxu1 %vm405_vm0, %v11255_v29  ;;  %v11406_v7 = vld [vmem:[%s11184_s16 + $0xf0] sm:$0xff]  ;;  %v370_v8 = vld [vmem:[%s11184_s16 + $0x2a0] sm:$0xff]  ;;  %v11416_v9 = vld [vmem:[%s11184_s16 + $0xf8] sm:$0xff] }
  0x2c   : > { %1488 = vperm.xlu1 %10641, %v297_v30   ;;  %v371_v11 = vld [vmem:[%s11184_s16 + $0x2a8] sm:$0xff]  ;;  %v11420_v13 = vld [vmem:[%s11184_s16 + $0x100] sm:$0xff]  ;;  %v372_v16 = vld [vmem:[%s11184_s16 + $0x2b0] sm:$0xff] }
  0x2d   : > { %1484 = vperm.xlu0 %10640, %v296_v28   ;;  %v11430_v18 = vld [vmem:[%s11184_s16 + $0x108] sm:$0xff]  ;;  %v373_v20 = vld [vmem:[%s11184_s16 + $0x2b8] sm:$0xff]  ;;  %v11434_v22 = vld [vmem:[%s11184_s16 + $0x110] sm:$0xff] }
  0x2e   : > { %10325 = vmatmul.mubr.msk.f32.gmra.mrb[10].mxu0 %vm405_vm0, %v297_v30  ;;  %10406 = vmatmul.mubr.msk.f32.gmra.mrb[10].mxu1 %vm405_vm0, %v11265_v31  ;;  %v374_v24 = vld [vmem:[%s11184_s16 + $0x2c0] sm:$0xff]  ;;  %v11444_v26 = vld [vmem:[%s11184_s16 + $0x118] sm:$0xff]  ;;  %v375_v28 = vld [vmem:[%s11184_s16 + $0x2c8] sm:$0xff] }
  0x2f   : > { %10327 = vmatprep.mubr.msk.f32.mxu0 %vm405_vm0, %v298_v32  ;;  %10408 = vmatprep.mubr.msk.f32.mxu1 %vm405_vm0, %v11269_v33  ;;  %v11448_v30 = vld [vmem:[%s11184_s16 + $0x120] sm:$0xff] }
  0x30   : > { %1496 = vperm.xlu1 %10641, %v299_v34  }
  0x31   : > { %1492 = vperm.xlu0 %10640, %v298_v32   ;;  %v376_v32 = vld [vmem:[%s11184_s16 + $0x2d0] sm:$0xff] }
  0x32   : > { %10328 = vmatmul.mubr.msk.f32.gmra.mrb[12].mxu0 %vm405_vm0, %v299_v34  ;;  %10409 = vmatmul.mubr.msk.f32.gmra.mrb[12].mxu1 %vm405_vm0, %v11279_v35  ;;  %v11458_v34 = vld [vmem:[%s11184_s16 + $0x128] sm:$0xff] }
  0x33   : > { %10330 = vmatprep.mubr.msk.f32.mxu0 %vm405_vm0, %v300_v36  ;;  %10411 = vmatprep.mubr.msk.f32.mxu1 %vm405_vm0, %v11283_v37 }
  0x34   : > { %1864 = vperm.xlu1 %10641, %v11286_v38  }
  0x35   : > { %1500 = vperm.xlu0 %10640, %v300_v36   ;;  %v377_v36 = vld [vmem:[%s11184_s16 + $0x2d8] sm:$0xff] }
  0x36   : > { %10331 = vmatmul.mubr.msk.f32.gmra.mrb[14].mxu0 %vm405_vm0, %v301_v39  ;;  %10412 = vmatmul.mubr.msk.f32.gmra.mrb[14].mxu1 %vm405_vm0, %v11296_v40 }
  0x37   : > { %10333 = vmatprep.mubr.msk.f32.mxu0 %vm405_vm0, %v302_v41  ;;  %10414 = vmatprep.mubr.msk.f32.mxu1 %vm405_vm0, %v11301_v42 }
  0x38   : > { %1868 = vperm.xlu1 %10641, %v11304_v43  }
  0x39   : > { %1504 = vperm.xlu0 %10640, %v301_v39   ;;  %v11462_v39 = vld [vmem:[%s11184_s16 + $0x130] sm:$0xff] }
  0x3a   : > { %10334 = vmatmul.mubr.msk.f32.gmra.mrb[16].mxu0 %vm405_vm0, %v303_v44  ;;  %10415 = vmatmul.mubr.msk.f32.gmra.mrb[16].mxu1 %vm405_vm0, %v11314_v45 }
  0x3b   : > { %10336 = vmatprep.mubr.msk.f32.mxu0 %vm405_vm0, %v304_v46  ;;  %10417 = vmatprep.mubr.msk.f32.mxu1 %vm405_vm0, %v11319_v47 }
  0x3c   : > { %1872 = vperm.xlu1 %10641, %v11322_v48  }
  0x3d   : > { %1508 = vperm.xlu0 %10640, %v302_v41   ;;  %v378_v41 = vld [vmem:[%s11184_s16 + $0x2e0] sm:$0xff] }
  0x3e   : > { %10337 = vmatmul.mubr.msk.f32.gmra.mrb[18].mxu0 %vm405_vm0, %v305_v49  ;;  %10418 = vmatmul.mubr.msk.f32.gmra.mrb[18].mxu1 %vm405_vm0, %v11332_v50 }
  0x3f   : > { %10339 = vmatprep.mubr.msk.f32.mxu0 %vm405_vm0, %v306_v51  ;;  %10420 = vmatprep.mubr.msk.f32.mxu1 %vm405_vm0, %v11337_v52 }
  0x40   : > { %1512 = vperm.xlu1 %10641, %v303_v44   ;;  %v11472_v44 = vld [vmem:[%s11184_s16 + $0x138] sm:$0xff] }
  0x42   : > { %10340 = vmatmul.mubr.msk.f32.gmra.mrb[20].mxu0 %vm405_vm0, %v307_v53  ;;  %10421 = vmatmul.mubr.msk.f32.gmra.mrb[20].mxu1 %vm405_vm0, %v11347_v54 }
  0x43   : > { %10342 = vmatprep.mubr.msk.f32.mxu0 %vm405_vm0, %v308_v55  ;;  %10423 = vmatprep.mubr.msk.f32.mxu1 %vm405_vm0, %v11351_v56 }
  0x44   : > { %1516 = vperm.xlu1 %10641, %v304_v46   ;;  %v379_v46 = vld [vmem:[%s11184_s16 + $0x2e8] sm:$0xff] }
  0x46   : > { %10343 = vmatmul.mubr.msk.f32.gmra.mrb[22].mxu0 %vm405_vm0, %v309_v57  ;;  %10424 = vmatmul.mubr.msk.f32.gmra.mrb[22].mxu1 %vm405_vm0, %v11361_v58 }
  0x47   : > { %10345 = vmatprep.mubr.msk.f32.mxu0 %vm405_vm0, %v310_v59  ;;  %10426 = vmatprep.mubr.msk.f32.mxu1 %vm405_vm0, %v11365_v60 }
  0x48   : > { %1520 = vperm.xlu1 %10641, %v305_v49   ;;  %v11476_v49 = vld [vmem:[%s11184_s16 + $0x140] sm:$0xff] }
  0x4a   : > { %10346 = vmatmul.mubr.msk.f32.gmra.mrb[24].mxu0 %vm405_vm0, %v311_v61  ;;  %10427 = vmatmul.mubr.msk.f32.gmra.mrb[24].mxu1 %vm405_vm0, %v11375_v62 }
  0x4b   : > { %10348 = vmatprep.mubr.msk.f32.mxu0 %vm405_vm0, %v312_v63  ;;  %10429 = vmatprep.mubr.msk.f32.mxu1 %vm405_vm0, %v11379_v0 }
  0x4c   : > { %1524 = vperm.xlu1 %10641, %v306_v51   ;;  %v380_v51 = vld [vmem:[%s11184_s16 + $0x2f0] sm:$0xff] }
  0x4e   : > { %10349 = vmatmul.mubr.msk.f32.gmra.mrb[26].mxu0 %vm405_vm0, %v11388_v1  ;;  %10430 = vmatmul.mubr.msk.f32.gmra.mrb[26].mxu1 %vm405_vm0, %v367_v2  ;;  %v384_v2 = vld [vmem:[%s11184_s16 + $0x310] sm:$0xff] }
  0x4f   : > { %10351 = vmatprep.mubr.msk.f32.mxu0 %vm405_vm0, %v11392_v3  ;;  %10432 = vmatprep.mubr.msk.f32.mxu1 %vm405_vm0, %v368_v4  ;;  %v11516_v4 = vld [vmem:[%s11184_s16 + $0x168] sm:$0xff] }
  0x50   : > { %1528 = vperm.xlu1 %10641, %v307_v53   ;;  %v11486_v53 = vld [vmem:[%s11184_s16 + $0x148] sm:$0xff] }
  0x52   : > { %10352 = vmatmul.mubr.msk.f32.gmra.mrb[28].mxu0 %vm405_vm0, %v11402_v5  ;;  %10433 = vmatmul.mubr.msk.f32.gmra.mrb[28].mxu1 %vm405_vm0, %v369_v6  ;;  %v11521_v6 = vld [vmem:[%s11184_s16 + $0x170] sm:$0xff] }
  0x53   : > { %10354 = vmatprep.mubr.msk.f32.mxu0 %vm405_vm0, %v11406_v7  ;;  %10435 = vmatprep.mubr.msk.f32.mxu1 %vm405_vm0, %v370_v8  ;;  %v386_v8 = vld [vmem:[%s11184_s16 + $0x320] sm:$0xff] }
  0x54   : > { %1532 = vperm.xlu1 %10641, %v308_v55   ;;  %v381_v55 = vld [vmem:[%s11184_s16 + $0x2f8] sm:$0xff] }
  0x56   : > { %10355 = vmatmul.mubr.msk.f32.gmra.mrb[30].mxu0 %vm405_vm0, %v11416_v9  ;;  %10436 = vmatmul.mubr.msk.f32.gmra.mrb[30].mxu1 %vm405_vm0, %v371_v11  ;;  %v11531_v11 = vld [vmem:[%s11184_s16 + $0x178] sm:$0xff] }
  0x57   : > { %10357 = vmatprep.mubr.msk.f32.mxu0 %vm405_vm0, %v11420_v13  ;;  %10438 = vmatprep.mubr.msk.f32.mxu1 %vm405_vm0, %v372_v16  ;;  %v11536_v16 = vld [vmem:[%s11184_s16 + $0x180] sm:$0xff] }
  0x58   : > { %1536 = vperm.xlu1 %10641, %v309_v57   ;;  %v11491_v57 = vld [vmem:[%s11184_s16 + $0x150] sm:$0xff] }
  0x5a   : > { %10358 = vmatmul.mubr.msk.f32.gmra.mrb[32].mxu0 %vm405_vm0, %v11430_v18  ;;  %10439 = vmatmul.mubr.msk.f32.gmra.mrb[32].mxu1 %vm405_vm0, %v373_v20  ;;  %v388_v20 = vld [vmem:[%s11184_s16 + $0x330] sm:$0xff] }
  0x5b   : > { %10360 = vmatprep.mubr.msk.f32.mxu0 %vm405_vm0, %v11434_v22  ;;  %10441 = vmatprep.mubr.msk.f32.mxu1 %vm405_vm0, %v374_v24  ;;  %v11546_v24 = vld [vmem:[%s11184_s16 + $0x188] sm:$0xff] }
  0x5c   : > { %1540 = vperm.xlu1 %10641, %v310_v59   ;;  %v382_v59 = vld [vmem:[%s11184_s16 + $0x300] sm:$0xff] }
  0x5e   : > { %10361 = vmatmul.mubr.msk.f32.gmra.mrb[34].mxu0 %vm405_vm0, %v11444_v26  ;;  %10442 = vmatmul.mubr.msk.f32.gmra.mrb[34].mxu1 %vm405_vm0, %v375_v28  ;;  %v389_v28 = vld [vmem:[%s11184_s16 + $0x338] sm:$0xff] }
  0x5f   : > { %10363 = vmatprep.mubr.msk.f32.mxu0 %vm405_vm0, %v11448_v30  ;;  %10444 = vmatprep.mubr.msk.f32.mxu1 %vm405_vm0, %v376_v32  ;;  %v390_v32 = vld [vmem:[%s11184_s16 + $0x340] sm:$0xff] }
  0x60   : > { %1544 = vperm.xlu1 %10641, %v311_v61   ;;  %v11501_v61 = vld [vmem:[%s11184_s16 + $0x158] sm:$0xff] }
  0x62   : > { %10364 = vmatmul.mubr.msk.f32.gmra.mrb[36].mxu0 %vm405_vm0, %v11458_v34  ;;  %10445 = vmatmul.mubr.msk.f32.gmra.mrb[36].mxu1 %vm405_vm0, %v377_v36  ;;  %v11561_v36 = vld [vmem:[%s11184_s16 + $0x198] sm:$0xff] }
  0x63   : > { %10366 = vmatprep.mubr.msk.f32.mxu0 %vm405_vm0, %v11462_v39  ;;  %10447 = vmatprep.mubr.msk.f32.mxu1 %vm405_vm0, %v378_v41  ;;  %v11565_v41 = vld [vmem:[%s11184_s16 + $0x1a0] sm:$0xff] }
  0x64   : > { %1548 = vperm.xlu1 %10641, %v312_v63   ;;  %v383_v63 = vld [vmem:[%s11184_s16 + $0x308] sm:$0xff] }
  0x66   : > { %10367 = vmatmul.mubr.msk.f32.gmra.mrb[38].mxu0 %vm405_vm0, %v11472_v44  ;;  %10448 = vmatmul.mubr.msk.f32.gmra.mrb[38].mxu1 %vm405_vm0, %v379_v46  ;;  %v18270_v46 = vmov 0.0|0.0  }
  0x67   : > { %10369 = vmatprep.mubr.msk.f32.mxu0 %vm405_vm0, %v11476_v49  ;;  %10450 = vmatprep.mubr.msk.f32.mxu1 %vm405_vm0, %v380_v51 }
  0x68   : > { %1552 = vperm.xlu1 %10641, %v11388_v1   ;;  %v11506_v1 = vld [vmem:[%s11184_s16 + $0x160] sm:$0xff]  ;;  %10479 = vmatprep.subr.bf16.mxu1 %v18270_v46 }
  0x69   : > { %10515 = vmatprep.subr.bf16.mxu0 %v18270_v46 }
  0x6a   : > { %10370 = vmatmul.mubr.msk.f32.gmra.mrb[40].mxu0 %vm405_vm0, %v11486_v53  ;;  %10451 = vmatmul.mubr.msk.f32.gmra.mrb[40].mxu1 %vm405_vm0, %v381_v55 }
  0x6b   : > { %10372 = vmatprep.mubr.msk.f32.mxu0 %vm405_vm0, %v11491_v57  ;;  %10453 = vmatprep.mubr.msk.f32.mxu1 %vm405_vm0, %v382_v59 }
  0x6c   : > { %1556 = vperm.xlu1 %10641, %v11392_v3   ;;  %v385_v3 = vld [vmem:[%s11184_s16 + $0x318] sm:$0xff] }
  0x6e   : > { %10373 = vmatmul.mubr.msk.f32.gmra.mrb[42].mxu0 %vm405_vm0, %v11501_v61  ;;  %10454 = vmatmul.mubr.msk.f32.gmra.mrb[42].mxu1 %vm405_vm0, %v383_v63  ;;  %v2531_v63 = vld [vmem:[%s18265_s3 + $0x38] sm:$0xff] }
  0x6f   : > { %10375 = vmatprep.mubr.msk.f32.mxu0 %vm405_vm0, %v11506_v1  ;;  %10456 = vmatprep.mubr.msk.f32.mxu1 %vm405_vm0, %v384_v2 }
  0x70   : > { %1560 = vperm.xlu1 %10641, %v11402_v5   ;;  %v387_v5 = vld [vmem:[%s11184_s16 + $0x328] sm:$0xff] }
  0x72   : > { %10376 = vmatmul.mubr.msk.f32.gmra.mrb[44].mxu0 %vm405_vm0, %v11516_v4  ;;  %10457 = vmatmul.mubr.msk.f32.gmra.mrb[44].mxu1 %vm405_vm0, %v385_v3  ;;  %v2532_v3 = vld [vmem:[%s18265_s3 + $0x40] sm:$0xff] }
  0x73   : > { %10378 = vmatprep.mubr.msk.f32.mxu0 %vm405_vm0, %v11521_v6  ;;  %10459 = vmatprep.mubr.msk.f32.mxu1 %vm405_vm0, %v386_v8 }
  0x74   : > { %1564 = vperm.xlu1 %10641, %v11406_v7   ;;  %v11551_v7 = vld [vmem:[%s11184_s16 + $0x190] sm:$0xff] }
  0x76   : > { %10379 = vmatmul.mubr.msk.f32.gmra.mrb[46].mxu0 %vm405_vm0, %v11531_v11  ;;  %10460 = vmatmul.mubr.msk.f32.gmra.mrb[46].mxu1 %vm405_vm0, %v387_v5 }
  0x77   : > { %10381 = vmatprep.mubr.msk.f32.mxu0 %vm405_vm0, %v11536_v16  ;;  %10462 = vmatprep.mubr.msk.f32.mxu1 %vm405_vm0, %v388_v20  ;;  %v2534_v20 = vld [vmem:[%s18265_s3 + $0x50] sm:$0xff] }
  0x78   : > { %1568 = vperm.xlu1 %10641, %v11416_v9   ;;  %v11576_v9 = vld [vmem:[%s11184_s16 + $0x1a8] sm:$0xff] }
  0x7a   : > { %10382 = vmatmul.mubr.msk.f32.gmra.mrb[48].mxu0 %vm405_vm0, %v11546_v24  ;;  %10463 = vmatmul.mubr.msk.f32.gmra.mrb[48].mxu1 %vm405_vm0, %v389_v28  ;;  %v2535_v28 = vld [vmem:[%s18265_s3 + $0x58] sm:$0xff] }
  0x7b   : > { %10384 = vmatprep.mubr.msk.f32.mxu0 %vm405_vm0, %v11551_v7  ;;  %10465 = vmatprep.mubr.msk.f32.mxu1 %vm405_vm0, %v390_v32 }
  0x7c   : > { %1572 = vperm.xlu1 %10641, %v11420_v13  }
  0x7e   : > { %10385 = vmatmul.mubr.msk.f32.gmra.mrb[50].mxu0 %vm405_vm0, %v11561_v36  ;;  %10466 = vmatmul.mubr.msk.f32.gmra.mrb[50].mxu1 %vm405_vm0, %v11286_v38  ;;  %v2524_v38 = vld [vmem:[%s18265_s3] sm:$0xff] }
  0x7f   : > { %10387 = vmatprep.mubr.msk.f32.mxu0 %vm405_vm0, %v11565_v41  ;;  %10468 = vmatprep.mubr.msk.f32.mxu1 %vm405_vm0, %v11304_v43  ;;  %v2525_v43 = vld [vmem:[%s18265_s3 + $0x8] sm:$0xff] }
  0x80   : > { %1576 = vperm.xlu1 %10641, %v11430_v18   ;;  %v10480_v13 = vpack.c.bf16 %v2525_v43, %v2524_v38  ;;  %v2527_v18 = vld [vmem:[%s18265_s3 + $0x18] sm:$0xff]  ;;  %v2536_v38 = vld [vmem:[%s18265_s3 + $0x60] sm:$0xff]  ;;  %v2537_v43 = vld [vmem:[%s18265_s3 + $0x68] sm:$0xff] }
  0x82   : > { %10388 = vmatmul.mubr.msk.f32.gmra.mrb[52].mxu0 %vm405_vm0, %v11576_v9  ;;  %10469 = vmatmul.mubr.msk.f32.gmra.mrb[52].mxu1 %vm405_vm0, %v11322_v48  ;;  %v2526_v48 = vld [vmem:[%s18265_s3 + $0x10] sm:$0xff]  ;;  %vm8535_vm0 = vcmask 195584  }
  0x83   : > { %10481 = vmatpush1.bf16.msra.mxu1 %v10480_v13  ;;  %v10483_v51 = vpack.c.bf16 %v2527_v18, %v2526_v48  ;;  %v10498_v13 = vpack.c.bf16 %v2537_v43, %v2536_v38  ;;  %v9710_v38 = vld [vmem:[%s18265_s3 + $0x108] sm:$0xff] }
  0x84   : > { %1580 = vperm.xlu1 %10641, %v11434_v22   ;;  %10482 = vmatprep.subr.bf16.mxu1 %v18270_v46  ;;  %v2528_v22 = vld [vmem:[%s18265_s3 + $0x20] sm:$0xff] }
  0x87   : > { %10484 = vmatpush1.bf16.msra.mxu1 %v10483_v51  ;;  %v9703_v51 = vld [vmem:[%s18265_s3 + $0xd0] sm:$0xff] }
  0x88   : > { %1584 = vperm.xlu1 %10641, %v11444_v26   ;;  %10485 = vmatprep.subr.bf16.mxu1 %v18270_v46  ;;  %v2529_v26 = vld [vmem:[%s18265_s3 + $0x28] sm:$0xff] }
  0x89   : > { %v10486_v55 = vpack.c.bf16 %v2529_v26, %v2528_v22 }
  0x8b   : > { %10487 = vmatpush1.bf16.msra.mxu1 %v10486_v55  ;;  %v2538_v55 = vld [vmem:[%s18265_s3 + $0x70] sm:$0xff] }
  0x8c   : > { %1588 = vperm.xlu1 %10641, %v11448_v30   ;;  %10488 = vmatprep.subr.bf16.mxu1 %v18270_v46 }
  0x90   : > { %1592 = vperm.xlu1 %10641, %v11458_v34   ;;  %v2530_v34 = vld [vmem:[%s18265_s3 + $0x30] sm:$0xff] }
  0x94   : > { %1596 = vperm.xlu1 %10641, %v11462_v39   ;;  %v10489_v39 = vpack.c.bf16 %v2531_v63, %v2530_v34  ;;  %v2539_v34 = vld [vmem:[%s18265_s3 + $0x78] sm:$0xff]  ;;  %v9705_v63 = vld [vmem:[%s18265_s3 + $0xe0] sm:$0xff] }
  0x96   : > { %10490 = vmatpush1.bf16.msra.mxu1 %v10489_v39  ;;  %v9706_v39 = vld [vmem:[%s18265_s3 + $0xe8] sm:$0xff] }
  0x97   : > { %v11610_v59 = vpop.permute.xlu1 %1452  ;;  %10491 = vmatprep.subr.bf16.mxu1 %v18270_v46 }
  0x98   : > { %18723 = vst [vmem:[#allocation3_spill] sm:$0xff] %v11610_v59  ;;  %1600 = vperm.xlu1 %10641, %v11472_v44  }
  0x9b   : > { %v11614_v30 = vpop.permute.xlu1 %1456 }
  0x9c   : > { %18724 = vst [vmem:[#allocation4_spill] sm:$0xff] %v11614_v30  ;;  %1604 = vperm.xlu1 %10641, %v11476_v49   ;;  %v2533_v49 = vld [vmem:[%s18265_s3 + $0x48] sm:$0xff] }
  0x9d   : > { %v10492_v5 = vpack.c.bf16 %v2533_v49, %v2532_v3  ;;  %v10522_v3 = vpack.c.bf16 %v9706_v39, %v9705_v63  ;;  %v2542_v63 = vld [vmem:[%s18265_s3 + $0x90] sm:$0xff] }
  0x9e   : > { %v9715_v39 = vld [vmem:[%s18265_s3 + $0x130] sm:$0xff] }
  0x9f   : > { %v11623_v2 = vpop.permute.xlu1 %1464  ;;  %10493 = vmatpush1.bf16.msra.mxu1 %v10492_v5  ;;  %v9707_v5 = vld [vmem:[%s18265_s3 + $0xf0] sm:$0xff] }
  0xa0   : > { %18725 = vst [vmem:[#allocation5_spill] sm:$0xff] %v11623_v2  ;;  %1608 = vperm.xlu1 %10641, %v11486_v53   ;;  %10494 = vmatprep.subr.bf16.mxu1 %v18270_v46 }
  0xa3   : > { %v11627_v44 = vpop.permute.xlu1 %1472 }
  0xa4   : > { %18726 = vst [vmem:[#allocation6_spill] sm:$0xff] %v11627_v44  ;;  %1612 = vperm.xlu1 %10641, %v11491_v57  }
  0xa7   : > { %v11636_v8 = vpop.permute.xlu1 %1480 }
  0xa8   : > { %18727 = vst [vmem:[#allocation7_spill] sm:$0xff] %v11636_v8  ;;  %1616 = vperm.xlu1 %10641, %v11501_v61   ;;  %v10495_v61 = vpack.c.bf16 %v2535_v28, %v2534_v20 }
  0xaa   : > { %10496 = vmatpush1.bf16.msra.mxu1 %v10495_v61  ;;  %v9709_v61 = vld [vmem:[%s18265_s3 + $0x100] sm:$0xff] }
  0xab   : > { %v11640_v53 = vpop.permute.xlu1 %1488  ;;  %10497 = vmatprep.subr.bf16.mxu1 %v18270_v46  ;;  %v10528_v43 = vpack.c.bf16 %v9710_v38, %v9709_v61 }
  0xac   : > { %18728 = vst [vmem:[#allocation8_spill] sm:$0xff] %v11640_v53  ;;  %1620 = vperm.xlu1 %10641, %v11506_v1  }
  0xae   : > { %10499 = vmatpush1.bf16.msra.mxu1 %v10498_v13 }
  0xaf   : > { %v11643_v57 = vpop.permute.xlu1 %1496  ;;  %10500 = vmatprep.subr.bf16.mxu1 %v18270_v46 }
  0xb0   : > { %18729 = vst [vmem:[#allocation9_spill] sm:$0xff] %v11643_v57  ;;  %1624 = vperm.xlu1 %10641, %v11516_v4   ;;  %v9701_v4 = vld [vmem:[%s18265_s3 + $0xc0] sm:$0xff] }
  0xb3   : > { %v11652_v32 = vpop.permute.xlu1 %1864 }
  0xb4   : > { %18730 = vst [vmem:[#allocation10_spill] sm:$0xff] %v11652_v32  ;;  %1628 = vperm.xlu1 %10641, %v11521_v6   ;;  %v9702_v6 = vld [vmem:[%s18265_s3 + $0xc8] sm:$0xff] }
  0xb5   : > { %v10516_v48 = vpack.c.bf16 %v9702_v6, %v9701_v4  ;;  %v2541_v4 = vld [vmem:[%s18265_s3 + $0x88] sm:$0xff] }
  0xb7   : > { %v11656_v1 = vpop.permute.xlu1 %1868  ;;  %10517 = vmatpush1.bf16.msra.mxu0 %v10516_v48  ;;  %v9711_v48 = vld [vmem:[%s18265_s3 + $0x110] sm:$0xff] }
  0xb8   : > { %18731 = vst [vmem:[#allocation11_spill] sm:$0xff] %v11656_v1  ;;  %1632 = vperm.xlu1 %10641, %v11531_v11   ;;  %v9704_v11 = vld [vmem:[%s18265_s3 + $0xd8] sm:$0xff]  ;;  %10518 = vmatprep.subr.bf16.mxu0 %v18270_v46 }
  0xb9   : > { %v10519_v22 = vpack.c.bf16 %v9704_v11, %v9703_v51 }
  0xbb   : > { %v11671_v18 = vpop.permute.xlu1 %1872  ;;  %10520 = vmatpush1.bf16.msra.mxu0 %v10519_v22  ;;  %v9713_v22 = vld [vmem:[%s18265_s3 + $0x120] sm:$0xff] }
  0xbc   : > { %18732 = vst [vmem:[#allocation12_spill] sm:$0xff] %v11671_v18  ;;  %1636 = vperm.xlu1 %10641, %v11536_v16   ;;  %v10501_v16 = vpack.c.bf16 %v2539_v34, %v2538_v55  ;;  %10521 = vmatprep.subr.bf16.mxu0 %v18270_v46  ;;  %v9714_v55 = vld [vmem:[%s18265_s3 + $0x128] sm:$0xff] }
  0xbe   : > { %10502 = vmatpush1.bf16.msra.mxu1 %v10501_v16  ;;  %v2543_v16 = vld [vmem:[%s18265_s3 + $0x98] sm:$0xff] }
  0xbf   : > { %v11682_v26 = vpop.permute.xlu1 %1512  ;;  %10523 = vmatpush1.bf16.msra.mxu0 %v10522_v3  ;;  %10503 = vmatprep.subr.bf16.mxu1 %v18270_v46  ;;  %v9716_v3 = vld [vmem:[%s18265_s3 + $0x138] sm:$0xff] }
  0xc0   : > { %18733 = vst [vmem:[#allocation13_spill] sm:$0xff] %v11682_v26  ;;  %1640 = vperm.xlu1 %10641, %v11546_v24   ;;  %v9708_v24 = vld [vmem:[%s18265_s3 + $0xf8] sm:$0xff]  ;;  %10524 = vmatprep.subr.bf16.mxu0 %v18270_v46 }
  0xc1   : > { %v10525_v20 = vpack.c.bf16 %v9708_v24, %v9707_v5  ;;  %v10537_v5 = vpack.c.bf16 %v9716_v3, %v9715_v39  ;;  %v9724_v39 = vld [vmem:[%s18265_s3 + $0x178] sm:$0xff] }
  0xc3   : > { %v11698_v49 = vpop.permute.xlu1 %1516  ;;  %10526 = vmatpush1.bf16.msra.mxu0 %v10525_v20  ;;  %v9717_v20 = vld [vmem:[%s18265_s3 + $0x140] sm:$0xff] }
  0xc4   : > { %18734 = vst [vmem:[#allocation14_spill] sm:$0xff] %v11698_v49  ;;  %1644 = vperm.xlu1 %10641, %v11551_v7   ;;  %10527 = vmatprep.subr.bf16.mxu0 %v18270_v46  ;;  %v2540_v7 = vld [vmem:[%s18265_s3 + $0x80] sm:$0xff] }
  0xc5   : > { %v10504_v6 = vpack.c.bf16 %v2541_v4, %v2540_v7  ;;  %v2545_v7 = vld [vmem:[%s18265_s3 + $0xa8] sm:$0xff]  ;;  %v9719_v4 = vld [vmem:[%s18265_s3 + $0x150] sm:$0xff] }
  0xc7   : > { %v11709_v28 = vpop.permute.xlu1 %1520  ;;  %10529 = vmatpush1.bf16.msra.mxu0 %v10528_v43  ;;  %10505 = vmatpush1.bf16.msra.mxu1 %v10504_v6  ;;  %v2544_v43 = vld [vmem:[%s18265_s3 + $0xa0] sm:$0xff]  ;;  %v9720_v6 = vld [vmem:[%s18265_s3 + $0x158] sm:$0xff] }
  0xc8   : > { %18735 = vst [vmem:[#allocation15_spill] sm:$0xff] %v11709_v28  ;;  %1648 = vperm.xlu1 %10641, %v11561_v36   ;;  %v9712_v36 = vld [vmem:[%s18265_s3 + $0x118] sm:$0xff]  ;;  %10530 = vmatprep.subr.bf16.mxu0 %v18270_v46 }
  0xc9   : > { %v10531_v51 = vpack.c.bf16 %v9712_v36, %v9711_v48  ;;  %10506 = vmatprep.subr.bf16.mxu1 %v18270_v46  ;;  %v10543_v48 = vpack.c.bf16 %v9720_v6, %v9719_v4 }
  0xcb   : > { %v11725_v13 = vpop.permute.xlu1 %1524  ;;  %10532 = vmatpush1.bf16.msra.mxu0 %v10531_v51  ;;  %v9721_v51 = vld [vmem:[%s18265_s3 + $0x160] sm:$0xff] }
  0xcc   : > { %18736 = vst [vmem:[#allocation16_spill] sm:$0xff] %v11725_v13  ;;  %1652 = vperm.xlu1 %10641, %v11565_v41   ;;  %10533 = vmatprep.subr.bf16.mxu0 %v18270_v46  ;;  %v10534_v41 = vpack.c.bf16 %v9714_v55, %v9713_v22  ;;  %v2546_v22 = vld [vmem:[%s18265_s3 + $0xb0] sm:$0xff]  ;;  %v2547_v55 = vld [vmem:[%s18265_s3 + $0xb8] sm:$0xff] }
  0xcf   : > { %v11736_v11 = vpop.permute.xlu1 %1528  ;;  %10535 = vmatpush1.bf16.msra.mxu0 %v10534_v41 }
  0xd0   : > { %18737 = vst [vmem:[#allocation17_spill] sm:$0xff] %v11736_v11  ;;  %1656 = vperm.xlu1 %10641, %v11576_v9   ;;  %v10507_v9 = vpack.c.bf16 %v2543_v16, %v2542_v63  ;;  %10536 = vmatprep.subr.bf16.mxu0 %v18270_v46  ;;  %v10513_v63 = vpack.c.bf16 %v2547_v55, %v2546_v22 }
  0xd2   : > { %10508 = vmatpush1.bf16.msra.mxu1 %v10507_v9 }
  0xd3   : > { %v11746_v34 = vpop.permute.xlu1 %1532  ;;  %10509 = vmatprep.subr.bf16.mxu1 %v18270_v46  ;;  %10538 = vmatpush1.bf16.msra.mxu0 %v10537_v5  ;;  %v11821_v5 = vpop.permute.xlu0 %1444 }
  0xd4   : > { %18738 = vst [vmem:[#allocation18_spill] sm:$0xff] %v11746_v34  ;;  %1660 = vperm.xlu1 %10641, %v11189_v10   ;;  %v9718_v10 = vld [vmem:[%s18265_s3 + $0x148] sm:$0xff]  ;;  %10539 = vmatprep.subr.bf16.mxu0 %v18270_v46  ;;  %18744 = vst [vmem:[#allocation24_spill] sm:$0xff] %v11821_v5 }
  0xd5   : > { %v10540_v61 = vpack.c.bf16 %v9718_v10, %v9717_v20 }
  0xd7   : > { %v11762_v24 = vpop.permute.xlu1 %1536  ;;  %10541 = vmatpush1.bf16.msra.mxu0 %v10540_v61  ;;  %v11839_v6 = vpop.permute.xlu0 %1448 }
  0xd8   : > { %18739 = vst [vmem:[#allocation19_spill] sm:$0xff] %v11762_v24  ;;  %1664 = vperm.xlu1 %10641, %v11194_v12   ;;  %v10510_v12 = vpack.c.bf16 %v2545_v7, %v2544_v43  ;;  %10542 = vmatprep.subr.bf16.mxu0 %v18270_v46  ;;  %18749 = vst [vmem:[#allocation29_spill] sm:$0xff] %v11839_v6 }
  0xda   : > { %10511 = vmatpush1.bf16.msra.mxu1 %v10510_v12 }
  0xdb   : > { %v11773_v38 = vpop.permute.xlu1 %1540  ;;  %10544 = vmatpush1.bf16.msra.mxu0 %v10543_v48  ;;  %10512 = vmatprep.subr.bf16.mxu1 %v18270_v46 }
  0xdc   : > { %18740 = vst [vmem:[#allocation20_spill] sm:$0xff] %v11773_v38  ;;  %1668 = vperm.xlu1 %10641, %v11200_v14   ;;  %v9722_v14 = vld [vmem:[%s18265_s3 + $0x168] sm:$0xff]  ;;  %10545 = vmatprep.subr.bf16.mxu0 %v18270_v46 }
  0xdd   : > { %v10546_v41 = vpack.c.bf16 %v9722_v14, %v9721_v51 }
  0xde   : > { %10514 = vmatpush1.bf16.msra.mxu1 %v10513_v63 }
  0xdf   : > { %v11789_v36 = vpop.permute.xlu1 %1544  ;;  %10547 = vmatpush1.bf16.msra.mxu0 %v10546_v41  ;;  %10551 = vmatprep.subr.bf16.mxu1 %v18270_v46 }
  0xe0   : > { %18741 = vst [vmem:[#allocation21_spill] sm:$0xff] %v11789_v36  ;;  %1672 = vperm.xlu1 %10641, %v11209_v15   ;;  %v9723_v15 = vld [vmem:[%s18265_s3 + $0x170] sm:$0xff]  ;;  %10548 = vmatprep.subr.bf16.mxu0 %v18270_v46 }
  0xe1   : > { %v10549_v9 = vpack.c.bf16 %v9724_v39, %v9723_v15 }
  0xe3   : > { %v11806_v16 = vpop.permute.xlu1 %1548  ;;  %10550 = vmatpush1.bf16.msra.mxu0 %v10549_v9 }
  0xe4   : > { %18742 = vst [vmem:[#allocation22_spill] sm:$0xff] %v11806_v16  ;;  %1676 = vperm.xlu1 %10641, %v11213_v17   ;;  %10587 = vmatprep.subr.bf16.mxu0 %v18270_v46  ;;  %v11829_v17 = vld [vmem:[%s18264_s2] ss:$0 sm:$0xff] }
  0xe7   : > { %v11817_v3 = vpop.permute.xlu1 %1552 }
  0xe8   : > { %18743 = vst [vmem:[#allocation23_spill] sm:$0xff] %v11817_v3  ;;  %1680 = vperm.xlu1 %10641, %v11223_v19  }
  0xeb   : > { %v11823_v20 = vpop.permute.xlu1 %1556 }
  0xec   : > { %18745 = vst [vmem:[#allocation25_spill] sm:$0xff] %v11823_v20  ;;  %1684 = vperm.xlu1 %10641, %v11227_v21  }
  0xed   : > { %v10311_v10 = vpop.f32.mrb[0].mxu0  ;;  %v11831_v61 = vpop.f32.mrb[0].mxu1 }
  0xee   : > { %18746 = vst [vmem:[#allocation26_spill] sm:$0xff] %v11831_v61  ;;  %v796_v43 = vpop.f32.mrb[1].mxu0  ;;  %v11833_v7 = vpop.f32.mrb[1].mxu1  ;;  %v802_v19 = vadd.f32 %v10311_v10, %v11829_v17 }
  0xef   : > { %18747 = vst [vmem:[#allocation27_spill] sm:$0xff] %v11833_v7  ;;  %v797_v4 = vadd.f32 %v11829_v17, %v796_v43  ;;  %v11837_v12 = vpop.permute.xlu1 %1560 }
  0xf0   : > { %18748 = vst [vmem:[#allocation28_spill] sm:$0xff] %v11837_v12  ;;  %1688 = vperm.xlu1 %10641, %v11237_v23   ;;  %v1336_v41 = vmax.f32 %v802_v19, 0.0 }
  0xf1   : > { %v1335_v21 = vmax.f32 %v797_v4, 0.0  ;;  %v10314_v48 = vpop.f32.mrb[2].mxu0  ;;  %v11842_v51 = vpop.f32.mrb[2].mxu1 }
  0xf2   : > { %18750 = vst [vmem:[#allocation30_spill] sm:$0xff] %v11842_v51  ;;  %v812_v14 = vadd.f32 %v10314_v48, %v11829_v17  ;;  %v806_v22 = vpop.f32.mrb[3].mxu0  ;;  %v11845_v55 = vpop.f32.mrb[3].mxu1  ;;  %v11864_v48 = vmul.f32 %v11839_v6, %v1336_v41 }
  0xf3   : > { %18751 = vst [vmem:[#allocation31_spill] sm:$0xff] %v11845_v55  ;;  %v11848_v63 = vmul.f32 %v11821_v5, %v1335_v21  ;;  %v11850_v15 = vpop.permute.xlu1 %1564  ;;  %v807_v39 = vadd.f32 %v11829_v17, %v806_v22 }
  0xf4   : > { %18753 = vst [vmem:[#allocation33_spill] sm:$0xff] %v11850_v15  ;;  %v1338_v9 = vmax.f32 %v812_v14, 0.0  ;;  %1692 = vperm.xlu1 %10641, %v11241_v25   ;;  %18757 = vst [vmem:[#allocation37_spill] sm:$0xff] %v11864_v48  ;;  %v11868_v25 = vpop.permute.xlu0 %1460 }
  0xf5   : > { %18752 = vst [vmem:[#allocation32_spill] sm:$0xff] %v11848_v63  ;;  %v1337_v23 = vmax.f32 %v807_v39, 0.0  ;;  %v10317_v10 = vpop.f32.mrb[4].mxu0  ;;  %2091 = vrot.lane.b32.xlu0 %v11848_v63, %s11114_s9  ;;  %v11856_v43 = vpop.f32.mrb[4].mxu1  ;;  %18759 = vst [vmem:[#allocation39_spill] sm:$0xff] %v11868_v25 }
  0xf6   : > { %18754 = vst [vmem:[#allocation34_spill] sm:$0xff] %v11856_v43  ;;  %v11859_v19 = vmul.f32 %v11614_v30, %v1338_v9  ;;  %v816_v4 = vpop.f32.mrb[5].mxu0  ;;  %v11861_v21 = vpop.f32.mrb[5].mxu1 }
  0xf7   : > { %18756 = vst [vmem:[#allocation36_spill] sm:$0xff] %v11861_v21  ;;  %v11866_v14 = vpop.permute.xlu1 %1568  ;;  %v11874_v22 = vmul.f32 %v11610_v59, %v1337_v23 }
  0xf8   : > { %18755 = vst [vmem:[#allocation35_spill] sm:$0xff] %v11859_v19  ;;  %18758 = vst [vmem:[#allocation38_spill] sm:$0xff] %v11866_v14  ;;  %1696 = vperm.xlu1 %10641, %v11251_v27   ;;  %9593 = vmatprep.mubr.msk.f32.mxu1 %vm2415_vm1, %v11859_v19  ;;  %v817_v27 = vadd.f32 %v11829_v17, %v816_v4 }
  0xf9   : > { %18760 = vst [vmem:[#allocation40_spill] sm:$0xff] %v11874_v22  ;;  %v10320_v39 = vpop.f32.mrb[6].mxu0  ;;  %2093 = vrot.lane.b32.xlu0 %v11864_v48, %s11114_s9  ;;  %9725 = vmatprep.mubr.msk.f32.mxu0 %vm2415_vm1, %v11859_v19  ;;  %v11880_v41 = vpop.f32.mrb[6].mxu1 }
  0xfa   : > { %18761 = vst [vmem:[#allocation41_spill] sm:$0xff] %v11880_v41  ;;  %v826_v9 = vpop.f32.mrb[7].mxu0  ;;  %v11882_v46 = vpop.f32.mrb[7].mxu1  ;;  %v822_v41 = vadd.f32 %v10317_v10, %v11829_v17  ;;  %v1339_v43 = vmax.f32 %v817_v27, 0.0 }
  0xfb   : > { %18762 = vst [vmem:[#allocation42_spill] sm:$0xff] %v11882_v46  ;;  %v11885_v30 = vpop.permute.xlu1 %1572  ;;  %v11897_v46 = vpop.permute.xlu0 %1468  ;;  %v827_v10 = vadd.f32 %v11829_v17, %v826_v9 }
  0xfc   : > { %18763 = vst [vmem:[#allocation43_spill] sm:$0xff] %v11885_v30  ;;  %1700 = vperm.xlu1 %10641, %v11255_v29   ;;  %18767 = vst [vmem:[#allocation47_spill] sm:$0xff] %v11897_v46  ;;  %v1340_v55 = vmax.f32 %v822_v41, 0.0 }
  0xfd   : > { %v10323_v23 = vpop.f32.mrb[8].mxu0  ;;  %2095 = vrot.lane.b32.xlu0 %v11874_v22, %s11114_s9  ;;  %v11890_v59 = vpop.f32.mrb[8].mxu1  ;;  %v1341_v9 = vmax.f32 %v827_v10, 0.0 }
  0xfe   : > { %18764 = vst [vmem:[#allocation44_spill] sm:$0xff] %v11890_v59  ;;  %v836_v6 = vpop.f32.mrb[9].mxu0  ;;  %v11892_v5 = vpop.f32.mrb[9].mxu1  ;;  %v11922_v41 = vmul.f32 %v11623_v2, %v1340_v55 }
  0xff   : > { %18765 = vst [vmem:[#allocation45_spill] sm:$0xff] %v11892_v5  ;;  %v11895_v21 = vpop.permute.xlu1 %1576  ;;  %v11907_v5 = vmul.f32 %v11868_v25, %v1339_v43  ;;  %v832_v43 = vadd.f32 %v10320_v39, %v11829_v17  ;;  %v11941_v39 = vmul.f32 %v11897_v46, %v1341_v9  ;;  %v837_v10 = vadd.f32 %v11829_v17, %v836_v6 }
 0x100   : > { %18766 = vst [vmem:[#allocation46_spill] sm:$0xff] %v11895_v21  ;;  %1704 = vperm.xlu1 %10641, %v11265_v31   ;;  %18774 = vst [vmem:[#allocation54_spill] sm:$0xff] %v11922_v41  ;;  %v842_v6 = vadd.f32 %v10323_v23, %v11829_v17 }
 0x101   : > { %v10326_v4 = vpop.f32.mrb[10].mxu0  ;;  %2097 = vrot.lane.b32.xlu0 %v11859_v19, %s11114_s9  ;;  %v11902_v29 = vpop.f32.mrb[10].mxu1  ;;  %18770 = vst [vmem:[#allocation50_spill] sm:$0xff] %v11907_v5  ;;  %v1342_v2 = vmax.f32 %v832_v43, 0.0  ;;  %18779 = vst [vmem:[#allocation59_spill] sm:$0xff] %v11941_v39  ;;  %v1343_v9 = vmax.f32 %v837_v10, 0.0 }
 0x102   : > { %18768 = vst [vmem:[#allocation48_spill] sm:$0xff] %v11902_v29  ;;  %v846_v51 = vpop.f32.mrb[11].mxu0  ;;  %v11904_v59 = vpop.f32.mrb[11].mxu1 }
 0x103   : > { %18769 = vst [vmem:[#allocation49_spill] sm:$0xff] %v11904_v59  ;;  %v11910_v27 = vpop.permute.xlu1 %1580  ;;  %v11927_v59 = vpop.permute.xlu0 %1476  ;;  %v11958_v43 = vmul.f32 %v11627_v44, %v1342_v2  ;;  %v1344_v44 = vmax.f32 %v842_v6, 0.0  ;;  %v847_v10 = vadd.f32 %v11829_v17, %v846_v51  ;;  %v852_v51 = vadd.f32 %v10326_v4, %v11829_v17 }
 0x104   : > { %18771 = vst [vmem:[#allocation51_spill] sm:$0xff] %v11910_v27  ;;  %1708 = vperm.xlu1 %10641, %v11269_v33   ;;  %18776 = vst [vmem:[#allocation56_spill] sm:$0xff] %v11927_v59  ;;  %v11977_v23 = vmul.f32 %v11927_v59, %v1343_v9 }
 0x105   : > { %v11913_v31 = vpop.f32.mrb[12].mxu0  ;;  %2099 = vrot.lane.b32.xlu0 %v11907_v5, %s11114_s9  ;;  %v11917_v61 = vpop.f32.mrb[12].mxu1  ;;  %18783 = vst [vmem:[#allocation63_spill] sm:$0xff] %v11958_v43  ;;  %v11994_v6 = vmul.f32 %v11636_v8, %v1344_v44  ;;  %v1345_v9 = vmax.f32 %v847_v10, 0.0  ;;  %v1346_v8 = vmax.f32 %v852_v51, 0.0 }
 0x106   : > { %18772 = vst [vmem:[#allocation52_spill] sm:$0xff] %v11917_v61  ;;  %v856_v29 = vpop.f32.mrb[13].mxu0  ;;  %v11919_v7 = vpop.f32.mrb[13].mxu1  ;;  %18788 = vst [vmem:[#allocation68_spill] sm:$0xff] %v11977_v23 }
 0x107   : > { %18773 = vst [vmem:[#allocation53_spill] sm:$0xff] %v11919_v7  ;;  %v11925_v25 = vpop.permute.xlu1 %1584  ;;  %18792 = vst [vmem:[#allocation72_spill] sm:$0xff] %v11994_v6  ;;  %v857_v10 = vadd.f32 %v11829_v17, %v856_v29  ;;  %v12030_v51 = vmul.f32 %v11640_v53, %v1346_v8  ;;  %v862_v29 = vadd.f32 %v11913_v31, %v11829_v17 }
 0x108   : > { %18775 = vst [vmem:[#allocation55_spill] sm:$0xff] %v11925_v25  ;;  %1712 = vperm.xlu1 %10641, %v11279_v35  }
 0x109   : > { %v11930_v33 = vpop.f32.mrb[14].mxu0  ;;  %2101 = vrot.lane.b32.xlu0 %v11922_v41, %s11114_s9  ;;  %v11934_v61 = vpop.f32.mrb[14].mxu1  ;;  %18801 = vst [vmem:[#allocation81_spill] sm:$0xff] %v12030_v51  ;;  %v1348_v53 = vmax.f32 %v862_v29, 0.0 }
 0x10a   : > { %18777 = vst [vmem:[#allocation57_spill] sm:$0xff] %v11934_v61  ;;  %v11936_v7 = vpop.f32.mrb[15].mxu0  ;;  %v11938_v55 = vpop.f32.mrb[15].mxu1 }
 0x10b   : > { %18778 = vst [vmem:[#allocation58_spill] sm:$0xff] %v11938_v55  ;;  %v11944_v19 = vpop.permute.xlu1 %1588 }
 0x10c   : > { %18780 = vst [vmem:[#allocation60_spill] sm:$0xff] %v11944_v19  ;;  %1716 = vperm.xlu1 %10641, %v11283_v37   ;;  %v11963_v37 = vpop.permute.xlu0 %1484 }
 0x10d   : > { %v11947_v35 = vpop.f32.mrb[16].mxu0  ;;  %2103 = vrot.lane.b32.xlu0 %v11941_v39, %s11114_s9  ;;  %v11951_v61 = vpop.f32.mrb[16].mxu1  ;;  %18785 = vst [vmem:[#allocation65_spill] sm:$0xff] %v11963_v37  ;;  %v12013_v4 = vmul.f32 %v11963_v37, %v1345_v9  ;;  %v1347_v9 = vmax.f32 %v857_v10, 0.0  ;;  %v867_v10 = vadd.f32 %v11829_v17, %v11936_v7  ;;  %v872_v7 = vadd.f32 %v11930_v33, %v11829_v17 }
 0x10e   : > { %18781 = vst [vmem:[#allocation61_spill] sm:$0xff] %v11951_v61  ;;  %v11953_v25 = vpop.f32.mrb[17].mxu0  ;;  %v11955_v55 = vpop.f32.mrb[17].mxu1 }
 0x10f   : > { %18782 = vst [vmem:[#allocation62_spill] sm:$0xff] %v11955_v55  ;;  %v11961_v46 = vpop.permute.xlu1 %1592  ;;  %18797 = vst [vmem:[#allocation77_spill] sm:$0xff] %v12013_v4 }
 0x110   : > { %18784 = vst [vmem:[#allocation64_spill] sm:$0xff] %v11961_v46  ;;  %1720 = vperm.xlu1 %10641, %v11296_v40  }
 0x111   : > { %v11966_v19 = vpop.f32.mrb[18].mxu0  ;;  %2105 = vrot.lane.b32.xlu0 %v11958_v43, %s11114_s9  ;;  %v11970_v61 = vpop.f32.mrb[18].mxu1 }
 0x112   : > { %18786 = vst [vmem:[#allocation66_spill] sm:$0xff] %v11970_v61  ;;  %v11972_v55 = vpop.f32.mrb[19].mxu0  ;;  %v11974_v2 = vpop.f32.mrb[19].mxu1 }
 0x113   : > { %18787 = vst [vmem:[#allocation67_spill] sm:$0xff] %v11974_v2  ;;  %v11980_v46 = vpop.permute.xlu1 %1596 }
 0x114   : > { %18789 = vst [vmem:[#allocation69_spill] sm:$0xff] %v11980_v46  ;;  %1724 = vperm.xlu1 %10641, %v11301_v42   ;;  %v11999_v42 = vpop.permute.xlu0 %1492 }
 0x115   : > { %v11983_v40 = vpop.f32.mrb[20].mxu0  ;;  %2107 = vrot.lane.b32.xlu0 %v11977_v23, %s11114_s9  ;;  %v11987_v61 = vpop.f32.mrb[20].mxu1  ;;  %18794 = vst [vmem:[#allocation74_spill] sm:$0xff] %v11999_v42  ;;  %v12050_v31 = vmul.f32 %v11999_v42, %v1347_v9  ;;  %v12068_v9 = vmul.f32 %v11643_v57, %v1348_v53  ;;  %v1349_v42 = vmax.f32 %v867_v10, 0.0  ;;  %v1350_v57 = vmax.f32 %v872_v7, 0.0 }
 0x116   : > { %18790 = vst [vmem:[#allocation70_spill] sm:$0xff] %v11987_v61  ;;  %v11989_v22 = vpop.f32.mrb[21].mxu0  ;;  %v11991_v2 = vpop.f32.mrb[21].mxu1  ;;  %v877_v10 = vadd.f32 %v11829_v17, %v11953_v25  ;;  %v882_v25 = vadd.f32 %v11947_v35, %v11829_v17 }
 0x117   : > { %18791 = vst [vmem:[#allocation71_spill] sm:$0xff] %v11991_v2  ;;  %v11997_v59 = vpop.permute.xlu1 %1600  ;;  %18806 = vst [vmem:[#allocation86_spill] sm:$0xff] %v12050_v31 }
 0x118   : > { %18793 = vst [vmem:[#allocation73_spill] sm:$0xff] %v11997_v59  ;;  %1728 = vperm.xlu1 %10641, %v11314_v45   ;;  %18810 = vst [vmem:[#allocation90_spill] sm:$0xff] %v12068_v9 }
 0x119   : > { %v12002_v46 = vpop.f32.mrb[22].mxu0  ;;  %2109 = vrot.lane.b32.xlu0 %v11994_v6, %s11114_s9  ;;  %v12006_v61 = vpop.f32.mrb[22].mxu1 }
 0x11a   : > { %18795 = vst [vmem:[#allocation75_spill] sm:$0xff] %v12006_v61  ;;  %v12008_v2 = vpop.f32.mrb[23].mxu0  ;;  %v12010_v44 = vpop.f32.mrb[23].mxu1 }
 0x11b   : > { %18796 = vst [vmem:[#allocation76_spill] sm:$0xff] %v12010_v44  ;;  %v12016_v59 = vpop.permute.xlu1 %1604 }
 0x11c   : > { %18798 = vst [vmem:[#allocation78_spill] sm:$0xff] %v12016_v59  ;;  %1732 = vperm.xlu1 %10641, %v11319_v47   ;;  %v12036_v47 = vpop.permute.xlu0 %1500 }
 0x11d   : > { %v12019_v45 = vpop.f32.mrb[24].mxu0  ;;  %2111 = vrot.lane.b32.xlu0 %v12013_v4, %s11114_s9  ;;  %v12023_v61 = vpop.f32.mrb[24].mxu1  ;;  %18803 = vst [vmem:[#allocation83_spill] sm:$0xff] %v12036_v47  ;;  %v12088_v33 = vmul.f32 %v12036_v47, %v1349_v42  ;;  %v1351_v47 = vmax.f32 %v877_v10, 0.0  ;;  %v887_v10 = vadd.f32 %v11829_v17, %v11972_v55  ;;  %v892_v55 = vadd.f32 %v11966_v19, %v11829_v17 }
 0x11e   : > { %18799 = vst [vmem:[#allocation79_spill] sm:$0xff] %v12023_v61  ;;  %v12025_v6 = vpop.f32.mrb[25].mxu0  ;;  %v12027_v44 = vpop.f32.mrb[25].mxu1 }
 0x11f   : > { %18800 = vst [vmem:[#allocation80_spill] sm:$0xff] %v12027_v44  ;;  %v12034_v37 = vpop.permute.xlu1 %1608  ;;  %18815 = vst [vmem:[#allocation95_spill] sm:$0xff] %v12088_v33 }
 0x120   : > { %18802 = vst [vmem:[#allocation82_spill] sm:$0xff] %v12034_v37  ;;  %1736 = vperm.xlu1 %10641, %v11332_v50  }
 0x121   : > { %v12039_v59 = vpop.f32.mrb[26].mxu0  ;;  %2113 = vrot.lane.b32.xlu0 %v12030_v51, %s11114_s9  ;;  %v12043_v61 = vpop.f32.mrb[26].mxu1 }
 0x122   : > { %18804 = vst [vmem:[#allocation84_spill] sm:$0xff] %v12043_v61  ;;  %v12045_v44 = vpop.f32.mrb[27].mxu0  ;;  %v12047_v8 = vpop.f32.mrb[27].mxu1 }
 0x123   : > { %18805 = vst [vmem:[#allocation85_spill] sm:$0xff] %v12047_v8  ;;  %v12054_v37 = vpop.permute.xlu1 %1612 }
 0x124   : > { %18807 = vst [vmem:[#allocation87_spill] sm:$0xff] %v12054_v37  ;;  %1740 = vperm.xlu1 %10641, %v11337_v52   ;;  %v12074_v52 = vpop.permute.xlu0 %1504 }
 0x125   : > { %v12057_v50 = vpop.f32.mrb[28].mxu0  ;;  %2115 = vrot.lane.b32.xlu0 %v12050_v31, %s11114_s9  ;;  %v12061_v61 = vpop.f32.mrb[28].mxu1  ;;  %18812 = vst [vmem:[#allocation92_spill] sm:$0xff] %v12074_v52  ;;  %v12106_v42 = vmul.f32 %v12074_v52, %v1350_v57  ;;  %v1352_v52 = vmax.f32 %v882_v25, 0.0 }
 0x126   : > { %18808 = vst [vmem:[#allocation88_spill] sm:$0xff] %v12061_v61  ;;  %v12063_v51 = vpop.f32.mrb[29].mxu0  ;;  %v12065_v29 = vpop.f32.mrb[29].mxu1 }
 0x127   : > { %18809 = vst [vmem:[#allocation89_spill] sm:$0xff] %v12065_v29  ;;  %v12072_v8 = vpop.permute.xlu1 %1616  ;;  %18819 = vst [vmem:[#allocation99_spill] sm:$0xff] %v12106_v42 }
 0x128   : > { %18811 = vst [vmem:[#allocation91_spill] sm:$0xff] %v12072_v8  ;;  %1744 = vperm.xlu1 %10641, %v11347_v54  }
 0x129   : > { %v12077_v37 = vpop.f32.mrb[30].mxu0  ;;  %2117 = vrot.lane.b32.xlu0 %v12068_v9, %s11114_s9  ;;  %v12081_v61 = vpop.f32.mrb[30].mxu1 }
 0x12a   : > { %18813 = vst [vmem:[#allocation93_spill] sm:$0xff] %v12081_v61  ;;  %v12083_v29 = vpop.f32.mrb[31].mxu0  ;;  %v12085_v53 = vpop.f32.mrb[31].mxu1 }
 0x12b   : > { %18814 = vst [vmem:[#allocation94_spill] sm:$0xff] %v12085_v53  ;;  %v12092_v8 = vpop.permute.xlu1 %1620 }
 0x12c   : > { %18816 = vst [vmem:[#allocation96_spill] sm:$0xff] %v12092_v8  ;;  %1748 = vperm.xlu1 %10641, %v11351_v56   ;;  %v12112_v56 = vpop.permute.xlu0 %1508 }
 0x12d   : > { %v12095_v54 = vpop.f32.mrb[32].mxu0  ;;  %2119 = vrot.lane.b32.xlu0 %v12088_v33, %s11114_s9  ;;  %v12099_v61 = vpop.f32.mrb[32].mxu1  ;;  %18821 = vst [vmem:[#allocation101_spill] sm:$0xff] %v12112_v56  ;;  %v12126_v35 = vmul.f32 %v12112_v56, %v1351_v47  ;;  %v12144_v47 = vmul.f32 %v11682_v26, %v1352_v52  ;;  %v1353_v56 = vmax.f32 %v887_v10, 0.0  ;;  %v1354_v26 = vmax.f32 %v892_v55, 0.0 }
 0x12e   : > { %18817 = vst [vmem:[#allocation97_spill] sm:$0xff] %v12099_v61  ;;  %v12101_v9 = vpop.f32.mrb[33].mxu0  ;;  %v12103_v7 = vpop.f32.mrb[33].mxu1  ;;  %v897_v10 = vadd.f32 %v11829_v17, %v11989_v22  ;;  %v902_v22 = vadd.f32 %v11983_v40, %v11829_v17 }
 0x12f   : > { %18818 = vst [vmem:[#allocation98_spill] sm:$0xff] %v12103_v7  ;;  %v12110_v53 = vpop.permute.xlu1 %1624  ;;  %18824 = vst [vmem:[#allocation104_spill] sm:$0xff] %v12126_v35  ;;  %v12162_v19 = vmul.f32 %v11698_v49, %v1353_v56  ;;  %v12180_v56 = vmul.f32 %v11709_v28, %v1354_v26  ;;  %v11077_v28 = vld [vmem:[%s11184_s16 + $0x290] sm:$0xff] }
 0x130   : > { %18820 = vst [vmem:[#allocation100_spill] sm:$0xff] %v12110_v53  ;;  %1752 = vperm.xlu1 %10641, %v11361_v58   ;;  %18828 = vst [vmem:[#allocation108_spill] sm:$0xff] %v12144_v47  ;;  %v1355_v49 = vmax.f32 %v897_v10, 0.0  ;;  %v1356_v26 = vmax.f32 %v902_v22, 0.0  ;;  %v907_v10 = vadd.f32 %v11829_v17, %v12008_v2  ;;  %v912_v2 = vadd.f32 %v12002_v46, %v11829_v17 }
 0x131   : > { %v12115_v8 = vpop.f32.mrb[34].mxu0  ;;  %2121 = vrot.lane.b32.xlu0 %v12106_v42, %s11114_s9  ;;  %v12119_v61 = vpop.f32.mrb[34].mxu1  ;;  %18832 = vst [vmem:[#allocation112_spill] sm:$0xff] %v12162_v19  ;;  %18836 = vst [vmem:[#allocation116_spill] sm:$0xff] %v12180_v56 }
 0x132   : > { %18822 = vst [vmem:[#allocation102_spill] sm:$0xff] %v12119_v61  ;;  %v12121_v7 = vpop.f32.mrb[35].mxu0  ;;  %v12123_v57 = vpop.f32.mrb[35].mxu1  ;;  %v12198_v40 = vmul.f32 %v11725_v13, %v1355_v49  ;;  %v12216_v49 = vmul.f32 %v11736_v11, %v1356_v26  ;;  %v1357_v13 = vmax.f32 %v907_v10, 0.0  ;;  %v1358_v26 = vmax.f32 %v912_v2, 0.0  ;;  %v11079_v11 = vld [vmem:[%s11184_s16 + $0x2a0] sm:$0xff] }
 0x133   : > { %18823 = vst [vmem:[#allocation103_spill] sm:$0xff] %v12123_v57  ;;  %v12130_v53 = vpop.permute.xlu1 %1628  ;;  %v917_v10 = vadd.f32 %v11829_v17, %v12025_v6  ;;  %v922_v6 = vadd.f32 %v12019_v45, %v11829_v17  ;;  %v927_v45 = vadd.f32 %v11829_v17, %v12045_v44  ;;  %v932_v44 = vadd.f32 %v12039_v59, %v11829_v17 }
 0x134   : > { %18825 = vst [vmem:[#allocation105_spill] sm:$0xff] %v12130_v53  ;;  %1756 = vperm.xlu1 %10641, %v11365_v60   ;;  %18840 = vst [vmem:[#allocation120_spill] sm:$0xff] %v12198_v40  ;;  %v12234_v46 = vmul.f32 %v11746_v34, %v1357_v13  ;;  %v12252_v13 = vmul.f32 %v11762_v24, %v1358_v26 }
 0x135   : > { %v12133_v58 = vpop.f32.mrb[36].mxu0  ;;  %2123 = vrot.lane.b32.xlu0 %v12126_v35, %s11114_s9  ;;  %v12137_v61 = vpop.f32.mrb[36].mxu1  ;;  %18844 = vst [vmem:[#allocation124_spill] sm:$0xff] %v12216_v49  ;;  %v1359_v34 = vmax.f32 %v917_v10, 0.0  ;;  %v1360_v26 = vmax.f32 %v922_v6, 0.0 }
 0x136   : > { %18826 = vst [vmem:[#allocation106_spill] sm:$0xff] %v12137_v61  ;;  %v12139_v42 = vpop.f32.mrb[37].mxu0  ;;  %v12141_v25 = vpop.f32.mrb[37].mxu1  ;;  %18848 = vst [vmem:[#allocation128_spill] sm:$0xff] %v12234_v46 }
 0x137   : > { %18827 = vst [vmem:[#allocation107_spill] sm:$0xff] %v12141_v25  ;;  %v12148_v57 = vpop.permute.xlu1 %1632  ;;  %18853 = vst [vmem:[#allocation133_spill] sm:$0xff] %v12252_v13  ;;  %v12268_v24 = vmul.f32 %v11773_v38, %v1359_v34  ;;  %v12282_v34 = vmul.f32 %v11789_v36, %v1360_v26  ;;  %v1361_v38 = vmax.f32 %v927_v45, 0.0  ;;  %v937_v26 = vadd.f32 %v11829_v17, %v12063_v51  ;;  %v11084_v51 = vld [vmem:[%s11184_s16 + $0x2c8] sm:$0xff] }
 0x138   : > { %18829 = vst [vmem:[#allocation109_spill] sm:$0xff] %v12148_v57  ;;  %1760 = vperm.xlu1 %10641, %v11375_v62  }
 0x139   : > { %v12151_v60 = vpop.f32.mrb[38].mxu0  ;;  %2125 = vrot.lane.b32.xlu0 %v12144_v47, %s11114_s9  ;;  %v12155_v61 = vpop.f32.mrb[38].mxu1  ;;  %18857 = vst [vmem:[#allocation137_spill] sm:$0xff] %v12268_v24  ;;  %18861 = vst [vmem:[#allocation141_spill] sm:$0xff] %v12282_v34 }
 0x13a   : > { %18830 = vst [vmem:[#allocation110_spill] sm:$0xff] %v12155_v61  ;;  %v12157_v53 = vpop.f32.mrb[39].mxu0  ;;  %v12159_v52 = vpop.f32.mrb[39].mxu1 }
 0x13b   : > { %18831 = vst [vmem:[#allocation111_spill] sm:$0xff] %v12159_v52  ;;  %v12166_v62 = vpop.permute.xlu1 %1636  ;;  %v11076_v52 = vld [vmem:[%s11184_s16 + $0x288] sm:$0xff] }
 0x13c   : > { %18833 = vst [vmem:[#allocation113_spill] sm:$0xff] %v12166_v62  ;;  %1764 = vperm.xlu1 %10641, %v11379_v0  }
 0x13d   : > { %v12169_v25 = vpop.f32.mrb[40].mxu0  ;;  %2127 = vrot.lane.b32.xlu0 %v12162_v19, %s11114_s9  ;;  %v12173_v61 = vpop.f32.mrb[40].mxu1 }
 0x13e   : > { %18834 = vst [vmem:[#allocation114_spill] sm:$0xff] %v12173_v61  ;;  %v12175_v57 = vpop.f32.mrb[41].mxu0  ;;  %v12177_v55 = vpop.f32.mrb[41].mxu1 }
 0x13f   : > { %18835 = vst [vmem:[#allocation115_spill] sm:$0xff] %v12177_v55  ;;  %v12184_v0 = vpop.permute.xlu1 %1640 }
 0x140   : > { %18837 = vst [vmem:[#allocation117_spill] sm:$0xff] %v12184_v0  ;;  %1768 = vperm.xlu1 %10641, %v11076_v52  }
 0x141   : > { %v12187_v62 = vpop.f32.mrb[42].mxu0  ;;  %2129 = vrot.lane.b32.xlu0 %v12180_v56, %s11114_s9  ;;  %v12191_v61 = vpop.f32.mrb[42].mxu1 }
 0x142   : > { %18838 = vst [vmem:[#allocation118_spill] sm:$0xff] %v12191_v61  ;;  %v12193_v55 = vpop.f32.mrb[43].mxu0  ;;  %v12195_v19 = vpop.f32.mrb[43].mxu1 }
 0x143   : > { %18839 = vst [vmem:[#allocation119_spill] sm:$0xff] %v12195_v19  ;;  %v12202_v52 = vpop.permute.xlu1 %1644 }
 0x144   : > { %18841 = vst [vmem:[#allocation121_spill] sm:$0xff] %v12202_v52  ;;  %1772 = vperm.xlu1 %10641, %v11077_v28   ;;  %v11078_v52 = vld [vmem:[%s11184_s16 + $0x298] sm:$0xff] }
 0x145   : > { %v12205_v0 = vpop.f32.mrb[44].mxu0  ;;  %2131 = vrot.lane.b32.xlu0 %v12198_v40, %s11114_s9  ;;  %v12209_v61 = vpop.f32.mrb[44].mxu1 }
 0x146   : > { %18842 = vst [vmem:[#allocation122_spill] sm:$0xff] %v12209_v61  ;;  %v12211_v19 = vpop.f32.mrb[45].mxu0  ;;  %v12213_v22 = vpop.f32.mrb[45].mxu1 }
 0x147   : > { %18843 = vst [vmem:[#allocation123_spill] sm:$0xff] %v12213_v22  ;;  %v12220_v28 = vpop.permute.xlu1 %1648 }
 0x148   : > { %18845 = vst [vmem:[#allocation125_spill] sm:$0xff] %v12220_v28  ;;  %1776 = vperm.xlu1 %10641, %v11078_v52  }
 0x149   : > { %v12223_v56 = vpop.f32.mrb[46].mxu0  ;;  %2133 = vrot.lane.b32.xlu0 %v12216_v49, %s11114_s9  ;;  %v12227_v61 = vpop.f32.mrb[46].mxu1 }
 0x14a   : > { %18846 = vst [vmem:[#allocation126_spill] sm:$0xff] %v12227_v61  ;;  %v12229_v22 = vpop.f32.mrb[47].mxu0  ;;  %v12231_v40 = vpop.f32.mrb[47].mxu1 }
 0x14b   : > { %18847 = vst [vmem:[#allocation127_spill] sm:$0xff] %v12231_v40  ;;  %v12238_v52 = vpop.permute.xlu1 %1652 }
 0x14c   : > { %18849 = vst [vmem:[#allocation129_spill] sm:$0xff] %v12238_v52  ;;  %1780 = vperm.xlu1 %10641, %v11079_v11   ;;  %v11080_v52 = vld [vmem:[%s11184_s16 + $0x2a8] sm:$0xff] }
 0x14d   : > { %v12241_v28 = vpop.f32.mrb[48].mxu0  ;;  %2135 = vrot.lane.b32.xlu0 %v12234_v46, %s11114_s9  ;;  %v12245_v61 = vpop.f32.mrb[48].mxu1 }
 0x14e   : > { %18850 = vst [vmem:[#allocation130_spill] sm:$0xff] %v12241_v28  ;;  %18851 = vst [vmem:[#allocation131_spill] sm:$0xff] %v12245_v61  ;;  %v12247_v40 = vpop.f32.mrb[49].mxu0  ;;  %v12249_v2 = vpop.f32.mrb[49].mxu1 }
 0x14f   : > { %18852 = vst [vmem:[#allocation132_spill] sm:$0xff] %v12249_v2  ;;  %v12256_v11 = vpop.permute.xlu1 %1656 }
 0x150   : > { %18854 = vst [vmem:[#allocation134_spill] sm:$0xff] %v12256_v11  ;;  %1784 = vperm.xlu1 %10641, %v11080_v52   ;;  %v11081_v52 = vld [vmem:[%s11184_s16 + $0x2b0] sm:$0xff] }
 0x151   : > { %v12259_v28 = vpop.f32.mrb[50].mxu0  ;;  %v10467_v46 = vpop.f32.mrb[50].mxu1  ;;  %2137 = vrot.lane.b32.xlu0 %v12252_v13, %s11114_s9 }
 0x152   : > { %18855 = vst [vmem:[#allocation135_spill] sm:$0xff] %v12259_v28  ;;  %v12263_v61 = vpop.f32.mrb[51].mxu0  ;;  %v12265_v2 = vpop.f32.mrb[51].mxu1  ;;  %v1322_v59 = vadd.f32 %v10467_v46, %v11829_v17 }
 0x153   : > { %18856 = vst [vmem:[#allocation136_spill] sm:$0xff] %v12265_v2  ;;  %v12272_v10 = vpop.permute.xlu1 %1660 }
 0x154   : > { %18858 = vst [vmem:[#allocation138_spill] sm:$0xff] %v12272_v10  ;;  %1788 = vperm.xlu1 %10641, %v11081_v52   ;;  %v11082_v52 = vld [vmem:[%s11184_s16 + $0x2b8] sm:$0xff] }
 0x155   : > { %v12275_v11 = vpop.f32.mrb[52].mxu0  ;;  %v10470_v28 = vpop.f32.mrb[52].mxu1  ;;  %2139 = vrot.lane.b32.xlu0 %v12268_v24, %s11114_s9  ;;  %v12292_v24 = vmul.f32 %v11806_v16, %v1361_v38  ;;  %v942_v38 = vadd.f32 %v12057_v50, %v11829_v17  ;;  %v9833_v50 = vld [vmem:[%s18265_s3 + $0x180] sm:$0xff] }
 0x156   : > { %18859 = vst [vmem:[#allocation139_spill] sm:$0xff] %v12275_v11  ;;  %v12279_v2 = vpop.f32.mrb[53].mxu0  ;;  %v1326_v6 = vpop.f32.mrb[53].mxu1  ;;  %v1362_v11 = vmax.f32 %v932_v44, 0.0  ;;  %v1363_v44 = vmax.f32 %v937_v26, 0.0  ;;  %v9834_v26 = vld [vmem:[%s18265_s3 + $0x188] sm:$0xff] }
 0x157   : > { %18860 = vst [vmem:[#allocation140_spill] sm:$0xff] %v12279_v2  ;;  %v12286_v10 = vpop.permute.xlu1 %1664  ;;  %18863 = vst [vmem:[#allocation143_spill] sm:$0xff] %v12292_v24  ;;  %v11083_v2 = vld [vmem:[%s11184_s16 + $0x2c0] sm:$0xff]  ;;  %v1327_v16 = vadd.f32 %v11829_v17, %v1326_v6 }
 0x158   : > { %18862 = vst [vmem:[#allocation142_spill] sm:$0xff] %v12286_v10  ;;  %1792 = vperm.xlu1 %10641, %v11082_v52   ;;  %v12303_v45 = vmul.f32 %v11817_v3, %v1362_v11  ;;  %v12314_v46 = vmul.f32 %v11823_v20, %v1363_v44  ;;  %v947_v11 = vadd.f32 %v11829_v17, %v12083_v29 }
 0x159   : > { %2141 = vrot.lane.b32.xlu0 %v12282_v34, %s11114_s9  ;;  %v1332_v29 = vadd.f32 %v10470_v28, %v11829_v17  ;;  %v10552_v44 = vpack.c.bf16 %v9834_v26, %v9833_v50  ;;  %v952_v20 = vadd.f32 %v12077_v37, %v11829_v17  ;;  %v957_v26 = vadd.f32 %v11829_v17, %v12101_v9  ;;  %v9837_v9 = vld [vmem:[%s18265_s3 + $0x1a0] sm:$0xff] }
 0x15a   : > { %18865 = vst [vmem:[#allocation145_spill] sm:$0xff] %v12303_v45  ;;  %18867 = vst [vmem:[#allocation147_spill] sm:$0xff] %v12314_v46 }
 0x15b   : > { %v12296_v36 = vpop.permute.xlu1 %1668  ;;  %v1442_v37 = vmax.f32 %v1332_v29, 0.0 }
 0x15c   : > { %18864 = vst [vmem:[#allocation144_spill] sm:$0xff] %v12296_v36  ;;  %1796 = vperm.xlu1 %10641, %v11083_v2   ;;  %v1440_v2 = vmax.f32 %v1322_v59, 0.0  ;;  %v1364_v36 = vmax.f32 %v942_v38, 0.0  ;;  %v11085_v59 = vld [vmem:[%s11184_s16 + $0x2d0] sm:$0xff]  ;;  %v1441_v38 = vmax.f32 %v1327_v16, 0.0 }
 0x15d   : > { %2143 = vrot.lane.b32.xlu0 %v12292_v24, %s11114_s9  ;;  %v9835_v16 = vld [vmem:[%s18265_s3 + $0x190] sm:$0xff] }
 0x15e   : > { %v12330_v6 = vmul.f32 %v11652_v32, %v1440_v2  ;;  %v11086_v2 = vld [vmem:[%s11184_s16 + $0x2d8] sm:$0xff]  ;;  %v12355_v28 = vmul.f32 %v11656_v1, %v1441_v38 }
 0x15f   : > { %v12307_v52 = vpop.permute.xlu1 %1672 }
 0x160   : > { %18866 = vst [vmem:[#allocation146_spill] sm:$0xff] %v12307_v52  ;;  %1800 = vperm.xlu1 %10641, %v11084_v51   ;;  %18869 = vst [vmem:[#allocation149_spill] sm:$0xff] %v12330_v6  ;;  %v12334_v51 = vmul.f32 %v11837_v12, %v1364_v36  ;;  %v9836_v36 = vld [vmem:[%s18265_s3 + $0x198] sm:$0xff] }
 0x161   : > { %2145 = vrot.lane.b32.xlu0 %v12303_v45, %s11114_s9  ;;  %18873 = vst [vmem:[#allocation153_spill] sm:$0xff] %v12355_v28 }
 0x162   : > { %18870 = vst [vmem:[#allocation150_spill] sm:$0xff] %v12334_v51 }
 0x163   : > { %v12318_v3 = vpop.permute.xlu1 %1676 }
 0x164   : > { %18868 = vst [vmem:[#allocation148_spill] sm:$0xff] %v12318_v3  ;;  %1804 = vperm.xlu1 %10641, %v11085_v59   ;;  %v1365_v3 = vmax.f32 %v947_v11, 0.0  ;;  %v1366_v11 = vmax.f32 %v952_v20, 0.0 }
 0x165   : > { %2147 = vrot.lane.b32.xlu0 %v12314_v46, %s11114_s9 }
 0x166   : > { %v12359_v50 = vmul.f32 %v11850_v15, %v1365_v3  ;;  %v18877_v3 = vmov 0.0|0.0  }
 0x167   : > { %v12338_v52 = vpop.permute.xlu1 %1680  ;;  %v2092_v59 = vpop.permute.xlu0 %2091 }
 0x168   : > { %18871 = vst [vmem:[#allocation151_spill] sm:$0xff] %v12338_v52  ;;  %v12342_v10 = vsel %vm2415_vm1, %v12330_v6, %v2092_v59  ;;  %1808 = vperm.xlu1 %10641, %v11086_v2   ;;  %18874 = vst [vmem:[#allocation154_spill] sm:$0xff] %v12359_v50  ;;  %v10555_v59 = vpack.c.bf16 %v9836_v36, %v9835_v16  ;;  %v11087_v2 = vld [vmem:[%s11184_s16 + $0x2e0] sm:$0xff]  ;;  %v12385_v16 = vmul.f32 %v11671_v18, %v1442_v37  ;;  %v11088_v18 = vld [vmem:[%s11184_s16 + $0x2e8] sm:$0xff] }
 0x169   : > { %18872 = vst [vmem:[#allocation152_spill] sm:$0xff] %v12342_v10  ;;  %2149 = vrot.lane.b32.xlu0 %v12334_v51, %s11114_s9  ;;  %2829 = vmatmul.mubr.f32.vlgmr.msra.gmra.mrb[54].mxu1 %v12342_v10  ;;  %v12391_v36 = vmul.f32 %v11866_v14, %v1366_v11  ;;  %v9840_v11 = vld [vmem:[%s18265_s3 + $0x1b8] sm:$0xff]  ;;  %v11089_v14 = vld [vmem:[%s11184_s16 + $0x2f0] sm:$0xff] }
 0x16a   : > { %3678 = vmatmul.mubr.f32.vlgmr.msra.gmra.mrb[54].mxu0 %v12342_v10  ;;  %10553 = vmatpush1.bf16.msra.mxu1 %v10552_v44  ;;  %v9838_v44 = vld [vmem:[%s18265_s3 + $0x1a8] sm:$0xff]  ;;  %18878 = vst [vmem:[#allocation157_spill] sm:$0xff] %v12385_v16 }
 0x16b   : > { %9594 = vmatprep.mubr.msk.f32.mxu1 %vm2415_vm1, %v11907_v5  ;;  %9726 = vmatprep.mubr.msk.f32.mxu0 %vm2415_vm1, %v11907_v5  ;;  %v12367_v29 = vpop.permute.xlu1 %1684  ;;  %v2094_v38 = vpop.permute.xlu0 %2093  ;;  %18879 = vst [vmem:[#allocation158_spill] sm:$0xff] %v12391_v36  ;;  %v10558_v37 = vpack.c.bf16 %v9838_v44, %v9837_v9  ;;  %v11096_v10 = vld [vmem:[%s11184_s16 + $0x328] sm:$0xff] }
 0x16c   : > { %18875 = vst [vmem:[#allocation155_spill] sm:$0xff] %v12367_v29  ;;  %1812 = vperm.xlu1 %10641, %v11087_v2   ;;  %v12372_v20 = vsel %vm2415_vm1, %v12355_v28, %v2094_v38  ;;  %10554 = vmatprep.subr.bf16.mxu1 %v18877_v3  ;;  %v962_v38 = vadd.f32 %v12095_v54, %v11829_v17  ;;  %v1367_v2 = vmax.f32 %v957_v26, 0.0  ;;  %v9839_v54 = vld [vmem:[%s18265_s3 + $0x1b0] sm:$0xff] }
 0x16d   : > { %18876 = vst [vmem:[#allocation156_spill] sm:$0xff] %v12372_v20  ;;  %2151 = vrot.lane.b32.xlu0 %v12359_v50, %s11114_s9  ;;  %2834 = vmatmul.mubr.f32.gmra.mrb[56].mxu1 %v12372_v20  ;;  %v967_v26 = vadd.f32 %v11829_v17, %v12121_v7  ;;  %v10561_v44 = vpack.c.bf16 %v9840_v11, %v9839_v54  ;;  %v11090_v11 = vld [vmem:[%s11184_s16 + $0x2f8] sm:$0xff] }
 0x16e   : > { %3683 = vmatmul.mubr.f32.gmra.mrb[56].mxu0 %v12372_v20  ;;  %9595 = vmatprep.mubr.msk.f32.mxu1 %vm2415_vm1, %v11922_v41 }
 0x16f   : > { %9727 = vmatprep.mubr.msk.f32.mxu0 %vm2415_vm1, %v11922_v41  ;;  %v12397_v1 = vpop.permute.xlu1 %1688  ;;  %v2096_v32 = vpop.permute.xlu0 %2095  ;;  %10556 = vmatpush1.bf16.msra.mxu1 %v10555_v59 }
 0x170   : > { %18880 = vst [vmem:[#allocation159_spill] sm:$0xff] %v12397_v1  ;;  %1816 = vperm.xlu1 %10641, %v11088_v18   ;;  %v12402_v15 = vsel %vm2415_vm1, %v12385_v16, %v2096_v32  ;;  %10557 = vmatprep.subr.bf16.mxu1 %v18877_v3  ;;  %v1368_v32 = vmax.f32 %v962_v38, 0.0  ;;  %v12418_v18 = vmul.f32 %v11885_v30, %v1367_v2  ;;  %v1369_v2 = vmax.f32 %v967_v26, 0.0 }
 0x171   : > { %18881 = vst [vmem:[#allocation160_spill] sm:$0xff] %v12402_v15  ;;  %2153 = vrot.lane.b32.xlu0 %v12391_v36, %s11114_s9  ;;  %2839 = vmatmul.mubr.f32.gmra.mrb[58].mxu1 %v12402_v15 }
 0x172   : > { %3688 = vmatmul.mubr.f32.gmra.mrb[58].mxu0 %v12402_v15  ;;  %9596 = vmatprep.mubr.msk.f32.mxu1 %vm2415_vm1, %v11941_v39  ;;  %18882 = vst [vmem:[#allocation161_spill] sm:$0xff] %v12418_v18  ;;  %v12439_v7 = vmul.f32 %v11895_v21, %v1368_v32  ;;  %v9842_v32 = vld [vmem:[%s18265_s3 + $0x1c8] sm:$0xff]  ;;  %v11093_v15 = vld [vmem:[%s11184_s16 + $0x310] sm:$0xff] }
 0x173   : > { %9728 = vmatprep.mubr.msk.f32.mxu0 %vm2415_vm1, %v11941_v39  ;;  %v12424_v59 = vpop.permute.xlu1 %1692  ;;  %v2098_v9 = vpop.permute.xlu0 %2097  ;;  %10559 = vmatpush1.bf16.msra.mxu1 %v10558_v37 }
 0x174   : > { %18883 = vst [vmem:[#allocation162_spill] sm:$0xff] %v12424_v59  ;;  %1820 = vperm.xlu1 %10641, %v11089_v14   ;;  %v12429_v38 = vsel %vm2415_vm1, %v11848_v63, %v2098_v9  ;;  %10560 = vmatprep.subr.bf16.mxu1 %v18877_v3  ;;  %18885 = vst [vmem:[#allocation164_spill] sm:$0xff] %v12439_v7  ;;  %v972_v14 = vadd.f32 %v12115_v8, %v11829_v17  ;;  %v9841_v8 = vld [vmem:[%s18265_s3 + $0x1c0] sm:$0xff] }
 0x175   : > { %18884 = vst [vmem:[#allocation163_spill] sm:$0xff] %v12429_v38  ;;  %2155 = vrot.lane.b32.xlu0 %v12418_v18, %s11114_s9  ;;  %2844 = vmatmul.mubr.f32.gmra.mrb[60].mxu1 %v12429_v38  ;;  %v10564_v26 = vpack.c.bf16 %v9842_v32, %v9841_v8  ;;  %v11091_v8 = vld [vmem:[%s11184_s16 + $0x300] sm:$0xff]  ;;  %v18890_v32 = vld [vmem:[#allocation40_spill] sm:$0xff] }
 0x176   : > { %3693 = vmatmul.mubr.f32.gmra.mrb[60].mxu0 %v12429_v38  ;;  %9597 = vmatprep.mubr.msk.f32.mxu1 %vm2415_vm1, %v11958_v43 }
 0x177   : > { %9729 = vmatprep.mubr.msk.f32.mxu0 %vm2415_vm1, %v11958_v43  ;;  %v12445_v37 = vpop.permute.xlu1 %1696  ;;  %v2100_v54 = vpop.permute.xlu0 %2099  ;;  %10562 = vmatpush1.bf16.msra.mxu1 %v10561_v44  ;;  %v1370_v44 = vmax.f32 %v972_v14, 0.0  ;;  %v18893_v14 = vld [vmem:[#allocation55_spill] sm:$0xff] }
 0x178   : > { %18886 = vst [vmem:[#allocation165_spill] sm:$0xff] %v12445_v37  ;;  %1824 = vperm.xlu1 %10641, %v11090_v11   ;;  %v12450_v9 = vsel %vm2415_vm1, %v11864_v48, %v2100_v54  ;;  %10563 = vmatprep.subr.bf16.mxu1 %v18877_v3  ;;  %v12466_v54 = vmul.f32 %v11910_v27, %v1369_v2 }
 0x179   : > { %18887 = vst [vmem:[#allocation166_spill] sm:$0xff] %v12450_v9  ;;  %2157 = vrot.lane.b32.xlu0 %v12439_v7, %s11114_s9  ;;  %2849 = vmatmul.mubr.f32.gmra.mrb[62].mxu1 %v12450_v9  ;;  %v977_v11 = vadd.f32 %v11829_v17, %v12139_v42  ;;  %v18892_v42 = vld [vmem:[#allocation72_spill] sm:$0xff]  ;;  %v12487_v2 = vmul.f32 %v18893_v14, %v1370_v44 }
 0x17a   : > { %3698 = vmatmul.mubr.f32.gmra.mrb[62].mxu0 %v12450_v9  ;;  %9598 = vmatprep.mubr.msk.f32.mxu1 %vm2415_vm1, %v11977_v23  ;;  %18888 = vst [vmem:[#allocation167_spill] sm:$0xff] %v12466_v54  ;;  %v11092_v9 = vld [vmem:[%s11184_s16 + $0x308] sm:$0xff] }
 0x17b   : > { %9730 = vmatprep.mubr.msk.f32.mxu0 %vm2415_vm1, %v11977_v23  ;;  %v12472_v21 = vpop.permute.xlu1 %1700  ;;  %v2102_v30 = vpop.permute.xlu0 %2101  ;;  %10565 = vmatpush1.bf16.msra.mxu1 %v10564_v26  ;;  %18894 = vst [vmem:[#allocation170_spill] sm:$0xff] %v12487_v2  ;;  %v982_v26 = vadd.f32 %v12133_v58, %v11829_v17  ;;  %v18898_v44 = vld [vmem:[#allocation60_spill] sm:$0xff] }
 0x17c   : > { %18889 = vst [vmem:[#allocation168_spill] sm:$0xff] %v12472_v21  ;;  %1828 = vperm.xlu1 %10641, %v11091_v8   ;;  %v12477_v12 = vsel %vm2415_vm1, %v18890_v32, %v2102_v30  ;;  %10566 = vmatprep.subr.bf16.mxu1 %v18877_v3  ;;  %v1371_v30 = vmax.f32 %v977_v11, 0.0 }
 0x17d   : > { %18891 = vst [vmem:[#allocation169_spill] sm:$0xff] %v12477_v12  ;;  %2159 = vrot.lane.b32.xlu0 %v12466_v54, %s11114_s9  ;;  %2854 = vmatmul.mubr.f32.gmra.mrb[64].mxu1 %v12477_v12  ;;  %v1372_v58 = vmax.f32 %v982_v26, 0.0  ;;  %v18903_v26 = vld [vmem:[#allocation64_spill] sm:$0xff] }
 0x17e   : > { %3703 = vmatmul.mubr.f32.gmra.mrb[64].mxu0 %v12477_v12  ;;  %9599 = vmatprep.mubr.msk.f32.mxu1 %vm2415_vm1, %v18892_v42  ;;  %v18896_v12 = vld [vmem:[#allocation35_spill] sm:$0xff]  ;;  %v12507_v11 = vmul.f32 %v18898_v44, %v1371_v30 }
 0x17f   : > { %9731 = vmatprep.mubr.msk.f32.mxu0 %vm2415_vm1, %v18892_v42  ;;  %v12493_v8 = vpop.permute.xlu1 %1704  ;;  %v2104_v27 = vpop.permute.xlu0 %2103  ;;  %v12527_v30 = vmul.f32 %v18903_v26, %v1372_v58  ;;  %v18907_v58 = vld [vmem:[#allocation69_spill] sm:$0xff] }
 0x180   : > { %18895 = vst [vmem:[#allocation171_spill] sm:$0xff] %v12493_v8  ;;  %1832 = vperm.xlu1 %10641, %v11092_v9   ;;  %v12498_v38 = vsel %vm2415_vm1, %v18896_v12, %v2104_v27  ;;  %18899 = vst [vmem:[#allocation173_spill] sm:$0xff] %v12507_v11  ;;  %v987_v9 = vadd.f32 %v11829_v17, %v12157_v53  ;;  %v18902_v53 = vld [vmem:[#allocation81_spill] sm:$0xff] }
 0x181   : > { %18897 = vst [vmem:[#allocation172_spill] sm:$0xff] %v12498_v38  ;;  %2161 = vrot.lane.b32.xlu0 %v12487_v2, %s11114_s9  ;;  %2859 = vmatmul.mubr.f32.gmra.mrb[66].mxu1 %v12498_v38  ;;  %18904 = vst [vmem:[#allocation176_spill] sm:$0xff] %v12527_v30  ;;  %v11098_v12 = vld [vmem:[%s11184_s16 + $0x338] sm:$0xff] }
 0x182   : > { %3708 = vmatmul.mubr.f32.gmra.mrb[66].mxu0 %v12498_v38  ;;  %9600 = vmatprep.mubr.msk.f32.mxu1 %vm2415_vm1, %v12013_v4  ;;  %v1373_v44 = vmax.f32 %v987_v9, 0.0 }
 0x183   : > { %9732 = vmatprep.mubr.msk.f32.mxu0 %vm2415_vm1, %v12013_v4  ;;  %v12513_v27 = vpop.permute.xlu1 %1708  ;;  %v2106_v14 = vpop.permute.xlu0 %2105 }
 0x184   : > { %18900 = vst [vmem:[#allocation174_spill] sm:$0xff] %v12513_v27  ;;  %1836 = vperm.xlu1 %10641, %v11093_v15   ;;  %v12518_v38 = vsel %vm2415_vm1, %v11907_v5, %v2106_v14  ;;  %v992_v15 = vadd.f32 %v12151_v60, %v11829_v17  ;;  %v11094_v5 = vld [vmem:[%s11184_s16 + $0x318] sm:$0xff]  ;;  %v12547_v9 = vmul.f32 %v18907_v58, %v1373_v44 }
 0x185   : > { %18901 = vst [vmem:[#allocation175_spill] sm:$0xff] %v12518_v38  ;;  %2163 = vrot.lane.b32.xlu0 %v12507_v11, %s11114_s9  ;;  %2864 = vmatmul.mubr.f32.gmra.mrb[68].mxu1 %v12518_v38  ;;  %v18912_v44 = vld [vmem:[#allocation73_spill] sm:$0xff] }
 0x186   : > { %3713 = vmatmul.mubr.f32.gmra.mrb[68].mxu0 %v12518_v38  ;;  %9601 = vmatprep.mubr.msk.f32.mxu1 %vm2415_vm1, %v18902_v53  ;;  %v1374_v60 = vmax.f32 %v992_v15, 0.0  ;;  %18908 = vst [vmem:[#allocation179_spill] sm:$0xff] %v12547_v9 }
 0x187   : > { %9733 = vmatprep.mubr.msk.f32.mxu0 %vm2415_vm1, %v18902_v53  ;;  %v12533_v14 = vpop.permute.xlu1 %1712  ;;  %v2108_v20 = vpop.permute.xlu0 %2107 }
 0x188   : > { %18905 = vst [vmem:[#allocation177_spill] sm:$0xff] %v12533_v14  ;;  %1840 = vperm.xlu1 %10641, %v11094_v5   ;;  %v12538_v38 = vsel %vm2415_vm1, %v11922_v41, %v2108_v20  ;;  %v997_v5 = vadd.f32 %v11829_v17, %v12175_v57  ;;  %v11095_v41 = vld [vmem:[%s11184_s16 + $0x320] sm:$0xff]  ;;  %v12567_v15 = vmul.f32 %v18912_v44, %v1374_v60 }
 0x189   : > { %18906 = vst [vmem:[#allocation178_spill] sm:$0xff] %v12538_v38  ;;  %2165 = vrot.lane.b32.xlu0 %v12527_v30, %s11114_s9  ;;  %2869 = vmatmul.mubr.f32.gmra.mrb[70].mxu1 %v12538_v38  ;;  %v18911_v57 = vld [vmem:[#allocation90_spill] sm:$0xff] }
 0x18a   : > { %3718 = vmatmul.mubr.f32.gmra.mrb[70].mxu0 %v12538_v38  ;;  %9602 = vmatprep.mubr.msk.f32.mxu1 %vm2415_vm1, %v12050_v31  ;;  %18913 = vst [vmem:[#allocation182_spill] sm:$0xff] %v12567_v15  ;;  %v1375_v58 = vmax.f32 %v997_v5, 0.0  ;;  %v18916_v60 = vld [vmem:[#allocation78_spill] sm:$0xff] }
 0x18b   : > { %9734 = vmatprep.mubr.msk.f32.mxu0 %vm2415_vm1, %v12050_v31  ;;  %v12553_v20 = vpop.permute.xlu1 %1716  ;;  %v2110_v26 = vpop.permute.xlu0 %2109 }
 0x18c   : > { %18909 = vst [vmem:[#allocation180_spill] sm:$0xff] %v12553_v20  ;;  %1844 = vperm.xlu1 %10641, %v11095_v41   ;;  %v12558_v38 = vsel %vm2415_vm1, %v11941_v39, %v2110_v26  ;;  %v1002_v41 = vadd.f32 %v12169_v25, %v11829_v17  ;;  %v12587_v5 = vmul.f32 %v18916_v60, %v1375_v58  ;;  %v18921_v58 = vld [vmem:[#allocation82_spill] sm:$0xff] }
 0x18d   : > { %18910 = vst [vmem:[#allocation181_spill] sm:$0xff] %v12558_v38  ;;  %2167 = vrot.lane.b32.xlu0 %v12547_v9, %s11114_s9  ;;  %2874 = vmatmul.mubr.f32.gmra.mrb[72].mxu1 %v12558_v38 }
 0x18e   : > { %3723 = vmatmul.mubr.f32.gmra.mrb[72].mxu0 %v12558_v38  ;;  %9603 = vmatprep.mubr.msk.f32.mxu1 %vm2415_vm1, %v18911_v57  ;;  %v1376_v25 = vmax.f32 %v1002_v41, 0.0  ;;  %18917 = vst [vmem:[#allocation185_spill] sm:$0xff] %v12587_v5 }
 0x18f   : > { %9735 = vmatprep.mubr.msk.f32.mxu0 %vm2415_vm1, %v18911_v57  ;;  %v12573_v26 = vpop.permute.xlu1 %1720  ;;  %v2112_v39 = vpop.permute.xlu0 %2111 }
 0x190   : > { %18914 = vst [vmem:[#allocation183_spill] sm:$0xff] %v12573_v26  ;;  %1848 = vperm.xlu1 %10641, %v11096_v10   ;;  %v12578_v38 = vsel %vm2415_vm1, %v11958_v43, %v2112_v39  ;;  %v1007_v10 = vadd.f32 %v11829_v17, %v12193_v55  ;;  %v11097_v43 = vld [vmem:[%s11184_s16 + $0x330] sm:$0xff]  ;;  %v18920_v55 = vld [vmem:[#allocation99_spill] sm:$0xff]  ;;  %v12607_v41 = vmul.f32 %v18921_v58, %v1376_v25 }
 0x191   : > { %18915 = vst [vmem:[#allocation184_spill] sm:$0xff] %v12578_v38  ;;  %2169 = vrot.lane.b32.xlu0 %v12567_v15, %s11114_s9  ;;  %2879 = vmatmul.mubr.f32.gmra.mrb[74].mxu1 %v12578_v38  ;;  %v18925_v25 = vld [vmem:[#allocation87_spill] sm:$0xff] }
 0x192   : > { %3728 = vmatmul.mubr.f32.gmra.mrb[74].mxu0 %v12578_v38  ;;  %9604 = vmatprep.mubr.msk.f32.mxu1 %vm2415_vm1, %v12088_v33  ;;  %18922 = vst [vmem:[#allocation188_spill] sm:$0xff] %v12607_v41  ;;  %v1377_v60 = vmax.f32 %v1007_v10, 0.0 }
 0x193   : > { %9736 = vmatprep.mubr.msk.f32.mxu0 %vm2415_vm1, %v12088_v33  ;;  %v12593_v39 = vpop.permute.xlu1 %1724  ;;  %v2114_v44 = vpop.permute.xlu0 %2113 }
 0x194   : > { %18918 = vst [vmem:[#allocation186_spill] sm:$0xff] %v12593_v39  ;;  %1852 = vperm.xlu1 %10641, %v11097_v43   ;;  %v12598_v38 = vsel %vm2415_vm1, %v11977_v23, %v2114_v44  ;;  %v1012_v43 = vadd.f32 %v12187_v62, %v11829_v17  ;;  %v12627_v10 = vmul.f32 %v18925_v25, %v1377_v60  ;;  %v9843_v60 = vld [vmem:[%s18265_s3 + $0x1d0] sm:$0xff] }
 0x195   : > { %18919 = vst [vmem:[#allocation187_spill] sm:$0xff] %v12598_v38  ;;  %2171 = vrot.lane.b32.xlu0 %v12587_v5, %s11114_s9  ;;  %2884 = vmatmul.mubr.f32.gmra.mrb[76].mxu1 %v12598_v38  ;;  %v1022_v25 = vadd.f32 %v12205_v0, %v11829_v17 }
 0x196   : > { %3733 = vmatmul.mubr.f32.gmra.mrb[76].mxu0 %v12598_v38  ;;  %9605 = vmatprep.mubr.msk.f32.mxu1 %vm2415_vm1, %v18920_v55  ;;  %v1378_v62 = vmax.f32 %v1012_v43, 0.0  ;;  %18926 = vst [vmem:[#allocation191_spill] sm:$0xff] %v12627_v10 }
 0x197   : > { %9737 = vmatprep.mubr.msk.f32.mxu0 %vm2415_vm1, %v18920_v55  ;;  %v12613_v44 = vpop.permute.xlu1 %1728  ;;  %v2116_v23 = vpop.permute.xlu0 %2115  ;;  %v1380_v0 = vmax.f32 %v1022_v25, 0.0 }
 0x198   : > { %18923 = vst [vmem:[#allocation189_spill] sm:$0xff] %v12613_v44  ;;  %1856 = vperm.xlu1 %10641, %v11098_v12   ;;  %v12618_v38 = vsel %vm2415_vm1, %v18892_v42, %v2116_v23  ;;  %v1017_v12 = vadd.f32 %v11829_v17, %v12211_v19  ;;  %v11099_v42 = vld [vmem:[%s11184_s16 + $0x340] sm:$0xff]  ;;  %v9844_v19 = vld [vmem:[%s18265_s3 + $0x1d8] sm:$0xff]  ;;  %v18933_v17 = vld [vmem:[#allocation112_spill] sm:$0xff] }
 0x199   : > { %18924 = vst [vmem:[#allocation190_spill] sm:$0xff] %v12618_v38  ;;  %2173 = vrot.lane.b32.xlu0 %v12607_v41, %s11114_s9  ;;  %2889 = vmatmul.mubr.f32.gmra.mrb[78].mxu1 %v12618_v38  ;;  %v10567_v43 = vpack.c.bf16 %v9844_v19, %v9843_v60 }
 0x19a   : > { %3738 = vmatmul.mubr.f32.gmra.mrb[78].mxu0 %v12618_v38  ;;  %9606 = vmatprep.mubr.msk.f32.mxu1 %vm2415_vm1, %v12126_v35 }
 0x19b   : > { %9738 = vmatprep.mubr.msk.f32.mxu0 %vm2415_vm1, %v12126_v35  ;;  %v12633_v23 = vpop.permute.xlu1 %1732  ;;  %v2118_v58 = vpop.permute.xlu0 %2117  ;;  %10568 = vmatpush1.bf16.msra.mxu1 %v10567_v43 }
 0x19c   : > { %18927 = vst [vmem:[#allocation192_spill] sm:$0xff] %v12633_v23  ;;  %1860 = vperm.xlu1 %10641, %v11099_v42   ;;  %v12638_v38 = vsel %vm2415_vm1, %v12013_v4, %v2118_v58  ;;  %v18929_v42 = vld [vmem:[#allocation91_spill] sm:$0xff]  ;;  %v1379_v4 = vmax.f32 %v1017_v12, 0.0  ;;  %10569 = vmatprep.subr.bf16.mxu1 %v18877_v3 }
 0x19d   : > { %18928 = vst [vmem:[#allocation193_spill] sm:$0xff] %v12638_v38  ;;  %2175 = vrot.lane.b32.xlu0 %v12627_v10, %s11114_s9  ;;  %2894 = vmatmul.mubr.f32.gmra.mrb[80].mxu1 %v12638_v38  ;;  %v12653_v58 = vmul.f32 %v18929_v42, %v1378_v62  ;;  %v18934_v62 = vld [vmem:[#allocation96_spill] sm:$0xff] }
 0x19e   : > { %3743 = vmatmul.mubr.f32.gmra.mrb[80].mxu0 %v12638_v38  ;;  %9607 = vmatprep.mubr.msk.f32.mxu1 %vm2415_vm1, %v12144_v47  ;;  %v12673_v12 = vmul.f32 %v18934_v62, %v1379_v4  ;;  %v18938_v4 = vld [vmem:[#allocation116_spill] sm:$0xff] }
 0x19f   : > { %18930 = vst [vmem:[#allocation194_spill] sm:$0xff] %v12653_v58  ;;  %9739 = vmatprep.mubr.msk.f32.mxu0 %vm2415_vm1, %v12144_v47  ;;  %v12659_v32 = vpop.permute.xlu1 %1736  ;;  %v2120_v48 = vpop.permute.xlu0 %2119 }
 0x1a0   : > { %18931 = vst [vmem:[#allocation195_spill] sm:$0xff] %v12659_v32  ;;  %v12663_v60 = vsel %vm2415_vm1, %v18902_v53, %v2120_v48  ;;  %18935 = vst [vmem:[#allocation197_spill] sm:$0xff] %v12673_v12  ;;  %v12678_v48 = vld [vmem:[%s18264_s2] ss:$0 sm:$0xff] }
 0x1a1   : > { %18932 = vst [vmem:[#allocation196_spill] sm:$0xff] %v12663_v60  ;;  %2177 = vrot.lane.b32.xlu0 %v12653_v58, %s11114_s9  ;;  %2899 = vmatmul.mubr.f32.gmra.mrb[82].mxu1 %v12663_v60  ;;  %v1027_v19 = vadd.f32 %v12678_v48, %v12229_v22  ;;  %v18939_v22 = vld [vmem:[#allocation100_spill] sm:$0xff] }
 0x1a2   : > { %3748 = vmatmul.mubr.f32.gmra.mrb[82].mxu0 %v12663_v60  ;;  %9608 = vmatprep.mubr.msk.f32.mxu1 %vm2415_vm1, %v18933_v17  ;;  %v12697_v62 = vmul.f32 %v18939_v22, %v1380_v0  ;;  %v1032_v60 = vadd.f32 %v12678_v48, %v12223_v56  ;;  %v18943_v0 = vld [vmem:[#allocation120_spill] sm:$0xff] }
 0x1a3   : > { %9740 = vmatprep.mubr.msk.f32.mxu0 %vm2415_vm1, %v18933_v17  ;;  %v12684_v43 = vpop.permute.xlu1 %1740  ;;  %v2122_v42 = vpop.permute.xlu0 %2121  ;;  %v1381_v38 = vmax.f32 %v1027_v19, 0.0  ;;  %v18944_v19 = vld [vmem:[#allocation105_spill] sm:$0xff] }
 0x1a4   : > { %18936 = vst [vmem:[#allocation198_spill] sm:$0xff] %v12684_v43  ;;  %v12688_v25 = vsel %vm2415_vm1, %v12050_v31, %v2122_v42  ;;  %18940 = vst [vmem:[#allocation200_spill] sm:$0xff] %v12697_v62  ;;  %v1382_v56 = vmax.f32 %v1032_v60, 0.0  ;;  %v18950_v60 = vld [vmem:[#allocation130_spill] sm:$0xff] }
 0x1a5   : > { %18937 = vst [vmem:[#allocation199_spill] sm:$0xff] %v12688_v25  ;;  %2179 = vrot.lane.b32.xlu0 %v12673_v12, %s11114_s9  ;;  %2904 = vmatmul.mubr.f32.gmra.mrb[84].mxu1 %v12688_v25  ;;  %v12716_v22 = vmul.f32 %v18944_v19, %v1381_v38  ;;  %v1042_v19 = vadd.f32 %v12678_v48, %v18950_v60  ;;  %v18954_v60 = vld [vmem:[#allocation113_spill] sm:$0xff] }
 0x1a6   : > { %3753 = vmatmul.mubr.f32.gmra.mrb[84].mxu0 %v12688_v25  ;;  %9609 = vmatprep.mubr.msk.f32.mxu1 %vm2415_vm1, %v18938_v4  ;;  %v1037_v25 = vadd.f32 %v12678_v48, %v12247_v40  ;;  %v18948_v40 = vld [vmem:[#allocation109_spill] sm:$0xff] }
 0x1a7   : > { %9741 = vmatprep.mubr.msk.f32.mxu0 %vm2415_vm1, %v18938_v4  ;;  %v12703_v42 = vpop.permute.xlu1 %1744  ;;  %v2124_v31 = vpop.permute.xlu0 %2123  ;;  %18945 = vst [vmem:[#allocation203_spill] sm:$0xff] %v12716_v22  ;;  %v12735_v38 = vmul.f32 %v18948_v40, %v1382_v56  ;;  %v18953_v56 = vld [vmem:[#allocation128_spill] sm:$0xff] }
 0x1a8   : > { %18941 = vst [vmem:[#allocation201_spill] sm:$0xff] %v12703_v42  ;;  %v12707_v53 = vsel %vm2415_vm1, %v18911_v57, %v2124_v31 }
 0x1a9   : > { %18942 = vst [vmem:[#allocation202_spill] sm:$0xff] %v12707_v53  ;;  %2181 = vrot.lane.b32.xlu0 %v12697_v62, %s11114_s9  ;;  %2909 = vmatmul.mubr.f32.gmra.mrb[86].mxu1 %v12707_v53  ;;  %18949 = vst [vmem:[#allocation206_spill] sm:$0xff] %v12735_v38 }
 0x1aa   : > { %3758 = vmatmul.mubr.f32.gmra.mrb[86].mxu0 %v12707_v53  ;;  %9610 = vmatprep.mubr.msk.f32.mxu1 %vm2415_vm1, %v18943_v0  ;;  %v1383_v53 = vmax.f32 %v1037_v25, 0.0  ;;  %v1384_v25 = vmax.f32 %v1042_v19, 0.0  ;;  %v18960_v19 = vld [vmem:[#allocation135_spill] sm:$0xff] }
 0x1ab   : > { %9742 = vmatprep.mubr.msk.f32.mxu0 %vm2415_vm1, %v18943_v0  ;;  %v12722_v31 = vpop.permute.xlu1 %1748  ;;  %v2126_v57 = vpop.permute.xlu0 %2125 }
 0x1ac   : > { %18946 = vst [vmem:[#allocation204_spill] sm:$0xff] %v12722_v31  ;;  %v12726_v63 = vsel %vm2415_vm1, %v12088_v33, %v2126_v57  ;;  %v12754_v40 = vmul.f32 %v18954_v60, %v1383_v53  ;;  %v1052_v60 = vadd.f32 %v12678_v48, %v18960_v19  ;;  %v18964_v19 = vld [vmem:[#allocation121_spill] sm:$0xff] }
 0x1ad   : > { %18947 = vst [vmem:[#allocation205_spill] sm:$0xff] %v12726_v63  ;;  %2183 = vrot.lane.b32.xlu0 %v12716_v22, %s11114_s9  ;;  %2914 = vmatmul.mubr.f32.gmra.mrb[88].mxu1 %v12726_v63 }
 0x1ae   : > { %3763 = vmatmul.mubr.f32.gmra.mrb[88].mxu0 %v12726_v63  ;;  %9611 = vmatprep.mubr.msk.f32.mxu1 %vm2415_vm1, %v12216_v49  ;;  %18955 = vst [vmem:[#allocation208_spill] sm:$0xff] %v12754_v40  ;;  %v1047_v63 = vadd.f32 %v12678_v48, %v12263_v61  ;;  %v18958_v61 = vld [vmem:[#allocation117_spill] sm:$0xff] }
 0x1af   : > { %9743 = vmatprep.mubr.msk.f32.mxu0 %vm2415_vm1, %v12216_v49  ;;  %v12741_v57 = vpop.permute.xlu1 %1752  ;;  %v2128_v33 = vpop.permute.xlu0 %2127  ;;  %v12773_v53 = vmul.f32 %v18958_v61, %v1384_v25  ;;  %v18963_v25 = vld [vmem:[#allocation137_spill] sm:$0xff] }
 0x1b0   : > { %18951 = vst [vmem:[#allocation130_spill] sm:$0xff] %v12741_v57  ;;  %v12745_v28 = vsel %vm2415_vm1, %v18920_v55, %v2128_v33 }
 0x1b1   : > { %18952 = vst [vmem:[#allocation207_spill] sm:$0xff] %v12745_v28  ;;  %2185 = vrot.lane.b32.xlu0 %v12735_v38, %s11114_s9  ;;  %2919 = vmatmul.mubr.f32.gmra.mrb[90].mxu1 %v12745_v28  ;;  %18959 = vst [vmem:[#allocation211_spill] sm:$0xff] %v12773_v53 }
 0x1b2   : > { %3768 = vmatmul.mubr.f32.gmra.mrb[90].mxu0 %v12745_v28  ;;  %9612 = vmatprep.mubr.msk.f32.mxu1 %vm2415_vm1, %v18953_v56  ;;  %v1385_v28 = vmax.f32 %v1047_v63, 0.0  ;;  %v1386_v63 = vmax.f32 %v1052_v60, 0.0  ;;  %v18971_v60 = vld [vmem:[#allocation139_spill] sm:$0xff] }
 0x1b3   : > { %9744 = vmatprep.mubr.msk.f32.mxu0 %vm2415_vm1, %v18953_v56  ;;  %v12760_v33 = vpop.permute.xlu1 %1756  ;;  %v2130_v55 = vpop.permute.xlu0 %2129 }
 0x1b4   : > { %18956 = vst [vmem:[#allocation209_spill] sm:$0xff] %v12760_v33  ;;  %v12764_v57 = vsel %vm2415_vm1, %v12126_v35, %v2130_v55  ;;  %v12792_v61 = vmul.f32 %v18964_v19, %v1385_v28  ;;  %v18969_v28 = vld [vmem:[#allocation125_spill] sm:$0xff]  ;;  %v1062_v19 = vadd.f32 %v12678_v48, %v18971_v60 }
 0x1b5   : > { %18957 = vst [vmem:[#allocation210_spill] sm:$0xff] %v12764_v57  ;;  %2187 = vrot.lane.b32.xlu0 %v12754_v40, %s11114_s9  ;;  %2924 = vmatmul.mubr.f32.gmra.mrb[92].mxu1 %v12764_v57 }
 0x1b6   : > { %3773 = vmatmul.mubr.f32.gmra.mrb[92].mxu0 %v12764_v57  ;;  %9613 = vmatprep.mubr.msk.f32.mxu1 %vm2415_vm1, %v12252_v13  ;;  %18965 = vst [vmem:[#allocation213_spill] sm:$0xff] %v12792_v61  ;;  %v18966_v57 = vld [vmem:[#allocation140_spill] sm:$0xff] }
 0x1b7   : > { %9745 = vmatprep.mubr.msk.f32.mxu0 %vm2415_vm1, %v12252_v13  ;;  %v12779_v55 = vpop.permute.xlu1 %1760  ;;  %v2132_v35 = vpop.permute.xlu0 %2131 }
 0x1b8   : > { %18961 = vst [vmem:[#allocation135_spill] sm:$0xff] %v12779_v55  ;;  %v12783_v33 = vsel %vm2415_vm1, %v12144_v47, %v2132_v35  ;;  %v1057_v55 = vadd.f32 %v12678_v48, %v18966_v57  ;;  %v12811_v57 = vmul.f32 %v18969_v28, %v1386_v63  ;;  %v18974_v63 = vld [vmem:[#allocation129_spill] sm:$0xff] }
 0x1b9   : > { %18962 = vst [vmem:[#allocation212_spill] sm:$0xff] %v12783_v33  ;;  %2189 = vrot.lane.b32.xlu0 %v12773_v53, %s11114_s9  ;;  %2929 = vmatmul.mubr.f32.gmra.mrb[94].mxu1 %v12783_v33 }
 0x1ba   : > { %3778 = vmatmul.mubr.f32.gmra.mrb[94].mxu0 %v12783_v33  ;;  %9614 = vmatprep.mubr.msk.f32.mxu1 %vm2415_vm1, %v18963_v25  ;;  %18970 = vst [vmem:[#allocation215_spill] sm:$0xff] %v12811_v57  ;;  %v1387_v33 = vmax.f32 %v1057_v55, 0.0  ;;  %v1388_v55 = vmax.f32 %v1062_v19, 0.0  ;;  %v9846_v19 = vld [vmem:[%s18265_s3 + $0x1e8] sm:$0xff] }
 0x1bb   : > { %9746 = vmatprep.mubr.msk.f32.mxu0 %vm2415_vm1, %v18963_v25  ;;  %v12798_v35 = vpop.permute.xlu1 %1764  ;;  %v2134_v47 = vpop.permute.xlu0 %2133 }
 0x1bc   : > { %18967 = vst [vmem:[#allocation140_spill] sm:$0xff] %v12798_v35  ;;  %v12802_v31 = vsel %vm2415_vm1, %v18933_v17, %v2134_v47  ;;  %v12830_v60 = vmul.f32 %v18974_v63, %v1387_v33  ;;  %v18978_v33 = vld [vmem:[#allocation27_spill] sm:$0xff] }
 0x1bd   : > { %18968 = vst [vmem:[#allocation214_spill] sm:$0xff] %v12802_v31  ;;  %2191 = vrot.lane.b32.xlu0 %v12792_v61, %s11114_s9  ;;  %2934 = vmatmul.mubr.f32.gmra.mrb[96].mxu1 %v12802_v31  ;;  %v1067_v63 = vadd.f32 %v12678_v48, %v18978_v33 }
 0x1be   : > { %3783 = vmatmul.mubr.f32.gmra.mrb[96].mxu0 %v12802_v31  ;;  %9615 = vmatprep.mubr.msk.f32.mxu1 %vm2415_vm1, %v12282_v34  ;;  %18975 = vst [vmem:[#allocation217_spill] sm:$0xff] %v12830_v60 }
 0x1bf   : > { %9747 = vmatprep.mubr.msk.f32.mxu0 %vm2415_vm1, %v12282_v34  ;;  %v12817_v47 = vpop.permute.xlu1 %1768  ;;  %v2136_v17 = vpop.permute.xlu0 %2135 }
 0x1c0   : > { %18972 = vst [vmem:[#allocation139_spill] sm:$0xff] %v12817_v47  ;;  %v12821_v35 = vsel %vm2415_vm1, %v18938_v4, %v2136_v17 }
 0x1c1   : > { %18973 = vst [vmem:[#allocation216_spill] sm:$0xff] %v12821_v35  ;;  %2193 = vrot.lane.b32.xlu0 %v12811_v57, %s11114_s9  ;;  %2939 = vmatmul.mubr.f32.gmra.mrb[98].mxu1 %v12821_v35 }
 0x1c2   : > { %3788 = vmatmul.mubr.f32.gmra.mrb[98].mxu0 %v12821_v35  ;;  %9616 = vmatprep.mubr.msk.f32.mxu1 %vm2415_vm1, %v12292_v24  ;;  %v9845_v35 = vld [vmem:[%s18265_s3 + $0x1e0] sm:$0xff] }
 0x1c3   : > { %9748 = vmatprep.mubr.msk.f32.mxu0 %vm2415_vm1, %v12292_v24  ;;  %v12834_v28 = vpop.permute.xlu1 %1772  ;;  %v2138_v17 = vpop.permute.xlu0 %2137  ;;  %v10570_v4 = vpack.c.bf16 %v9846_v19, %v9845_v35  ;;  %v18983_v35 = vld [vmem:[#allocation26_spill] sm:$0xff] }
 0x1c4   : > { %18976 = vst [vmem:[#allocation218_spill] sm:$0xff] %v12834_v28  ;;  %v12838_v31 = vsel %vm2415_vm1, %v18943_v0, %v2138_v17  ;;  %v18979_v17 = vld [vmem:[#allocation134_spill] sm:$0xff]  ;;  %v1072_v19 = vadd.f32 %v12678_v48, %v18983_v35 }
 0x1c5   : > { %18977 = vst [vmem:[#allocation219_spill] sm:$0xff] %v12838_v31  ;;  %2195 = vrot.lane.b32.xlu0 %v12830_v60, %s11114_s9  ;;  %2944 = vmatmul.mubr.f32.gmra.mrb[100].mxu1 %v12838_v31  ;;  %v12855_v0 = vmul.f32 %v18979_v17, %v1388_v55 }
 0x1c6   : > { %3793 = vmatmul.mubr.f32.gmra.mrb[100].mxu0 %v12838_v31  ;;  %9617 = vmatprep.mubr.msk.f32.mxu1 %vm2415_vm1, %v12303_v45  ;;  %v1389_v31 = vmax.f32 %v1067_v63, 0.0  ;;  %v1390_v17 = vmax.f32 %v1072_v19, 0.0 }
 0x1c7   : > { %18980 = vst [vmem:[#allocation27_spill] sm:$0xff] %v12855_v0  ;;  %9749 = vmatprep.mubr.msk.f32.mxu0 %vm2415_vm1, %v12303_v45  ;;  %v12859_v28 = vpop.permute.xlu1 %1776  ;;  %v2140_v33 = vpop.permute.xlu0 %2139  ;;  %10571 = vmatpush1.bf16.msra.mxu1 %v10570_v4  ;;  %v18984_v4 = vld [vmem:[#allocation138_spill] sm:$0xff] }
 0x1c8   : > { %18981 = vst [vmem:[#allocation220_spill] sm:$0xff] %v12859_v28  ;;  %v12863_v47 = vsel %vm2415_vm1, %v12216_v49, %v2140_v33  ;;  %10572 = vmatprep.subr.bf16.mxu1 %v18877_v3  ;;  %v12875_v55 = vmul.f32 %v18984_v4, %v1389_v31  ;;  %v18988_v49 = vld [vmem:[#allocation31_spill] sm:$0xff]  ;;  %v18989_v31 = vld [vmem:[#allocation142_spill] sm:$0xff] }
 0x1c9   : > { %18982 = vst [vmem:[#allocation221_spill] sm:$0xff] %v12863_v47  ;;  %2197 = vrot.lane.b32.xlu0 %v12855_v0, %s11114_s9  ;;  %2949 = vmatmul.mubr.f32.gmra.mrb[102].mxu1 %v12863_v47  ;;  %v12894_v4 = vmul.f32 %v18989_v31, %v1390_v17  ;;  %v18993_v17 = vld [vmem:[#allocation144_spill] sm:$0xff] }
 0x1ca   : > { %3798 = vmatmul.mubr.f32.gmra.mrb[102].mxu0 %v12863_v47  ;;  %9618 = vmatprep.mubr.msk.f32.mxu1 %vm2415_vm1, %v12314_v46  ;;  %18985 = vst [vmem:[#allocation26_spill] sm:$0xff] %v12875_v55  ;;  %v1077_v47 = vadd.f32 %v12678_v48, %v18988_v49 }
 0x1cb   : > { %9750 = vmatprep.mubr.msk.f32.mxu0 %vm2415_vm1, %v12314_v46  ;;  %v12879_v33 = vpop.permute.xlu1 %1780  ;;  %v2142_v35 = vpop.permute.xlu0 %2141 }
 0x1cc   : > { %18986 = vst [vmem:[#allocation222_spill] sm:$0xff] %v12879_v33  ;;  %v12883_v63 = vsel %vm2415_vm1, %v18953_v56, %v2142_v35  ;;  %v18992_v56 = vld [vmem:[#allocation30_spill] sm:$0xff] }
 0x1cd   : > { %18987 = vst [vmem:[#allocation223_spill] sm:$0xff] %v12883_v63  ;;  %2199 = vrot.lane.b32.xlu0 %v12875_v55, %s11114_s9  ;;  %2954 = vmatmul.mubr.f32.gmra.mrb[104].mxu1 %v12883_v63  ;;  %v1082_v33 = vadd.f32 %v12678_v48, %v18992_v56 }
 0x1ce   : > { %3803 = vmatmul.mubr.f32.gmra.mrb[104].mxu0 %v12883_v63  ;;  %9619 = vmatprep.mubr.msk.f32.mxu1 %vm2415_vm1, %v12334_v51  ;;  %v1391_v63 = vmax.f32 %v1077_v47, 0.0 }
 0x1cf   : > { %9751 = vmatprep.mubr.msk.f32.mxu0 %vm2415_vm1, %v12334_v51  ;;  %v12898_v19 = vpop.permute.xlu1 %1784  ;;  %v2144_v35 = vpop.permute.xlu0 %2143 }
 0x1d0   : > { %18990 = vst [vmem:[#allocation31_spill] sm:$0xff] %v12898_v19  ;;  %v12902_v49 = vsel %vm2415_vm1, %v12252_v13, %v2144_v35  ;;  %v12913_v31 = vmul.f32 %v18993_v17, %v1391_v63  ;;  %v1392_v13 = vmax.f32 %v1082_v33, 0.0  ;;  %v18997_v19 = vld [vmem:[#allocation36_spill] sm:$0xff]  ;;  %v18998_v63 = vld [vmem:[#allocation146_spill] sm:$0xff] }
 0x1d1   : > { %18991 = vst [vmem:[#allocation224_spill] sm:$0xff] %v12902_v49  ;;  %2201 = vrot.lane.b32.xlu0 %v12894_v4, %s11114_s9  ;;  %2959 = vmatmul.mubr.f32.gmra.mrb[106].mxu1 %v12902_v49 }
 0x1d2   : > { %3808 = vmatmul.mubr.f32.gmra.mrb[106].mxu0 %v12902_v49  ;;  %9620 = vmatprep.mubr.msk.f32.mxu1 %vm2415_vm1, %v12359_v50  ;;  %18994 = vst [vmem:[#allocation30_spill] sm:$0xff] %v12913_v31  ;;  %v1087_v49 = vadd.f32 %v12678_v48, %v18997_v19  ;;  %v12932_v17 = vmul.f32 %v18998_v63, %v1392_v13  ;;  %v19002_v13 = vld [vmem:[#allocation102_spill] sm:$0xff] }
 0x1d3   : > { %9752 = vmatprep.mubr.msk.f32.mxu0 %vm2415_vm1, %v12359_v50  ;;  %v12917_v35 = vpop.permute.xlu1 %1788  ;;  %v2146_v56 = vpop.permute.xlu0 %2145  ;;  %v1242_v63 = vadd.f32 %v12678_v48, %v19002_v13  ;;  %v19006_v13 = vld [vmem:[#allocation42_spill] sm:$0xff] }
 0x1d4   : > { %18995 = vst [vmem:[#allocation225_spill] sm:$0xff] %v12917_v35  ;;  %v12921_v47 = vsel %vm2415_vm1, %v18963_v25, %v2146_v56  ;;  %v19001_v25 = vld [vmem:[#allocation34_spill] sm:$0xff] }
 0x1d5   : > { %18996 = vst [vmem:[#allocation226_spill] sm:$0xff] %v12921_v47  ;;  %2203 = vrot.lane.b32.xlu0 %v12913_v31, %s11114_s9  ;;  %2964 = vmatmul.mubr.f32.gmra.mrb[108].mxu1 %v12921_v47  ;;  %v1092_v35 = vadd.f32 %v12678_v48, %v19001_v25 }
 0x1d6   : > { %3813 = vmatmul.mubr.f32.gmra.mrb[108].mxu0 %v12921_v47  ;;  %9621 = vmatprep.mubr.msk.f32.mxu1 %vm2415_vm1, %v12391_v36  ;;  %v1393_v47 = vmax.f32 %v1087_v49, 0.0 }
 0x1d7   : > { %9753 = vmatprep.mubr.msk.f32.mxu0 %vm2415_vm1, %v12391_v36  ;;  %v12936_v33 = vpop.permute.xlu1 %1792  ;;  %v2148_v56 = vpop.permute.xlu0 %2147  ;;  %v1394_v28 = vmax.f32 %v1092_v35, 0.0 }
 0x1d8   : > { %18999 = vst [vmem:[#allocation36_spill] sm:$0xff] %v12936_v33  ;;  %v12940_v19 = vsel %vm2415_vm1, %v12282_v34, %v2148_v56  ;;  %v19003_v33 = vld [vmem:[#allocation148_spill] sm:$0xff] }
 0x1d9   : > { %19000 = vst [vmem:[#allocation227_spill] sm:$0xff] %v12940_v19  ;;  %2205 = vrot.lane.b32.xlu0 %v12932_v17, %s11114_s9  ;;  %2969 = vmatmul.mubr.f32.gmra.mrb[110].mxu1 %v12940_v19  ;;  %v12953_v56 = vmul.f32 %v19003_v33, %v1393_v47  ;;  %v1424_v47 = vmax.f32 %v1242_v63, 0.0  ;;  %v12972_v33 = vmul.f32 %v12338_v52, %v1394_v28  ;;  %v19010_v28 = vld [vmem:[#allocation106_spill] sm:$0xff] }
 0x1da   : > { %3818 = vmatmul.mubr.f32.gmra.mrb[110].mxu0 %v12940_v19  ;;  %9622 = vmatprep.mubr.msk.f32.mxu1 %vm2415_vm1, %v12418_v18  ;;  %v1097_v19 = vadd.f32 %v12678_v48, %v19006_v13  ;;  %v1252_v52 = vadd.f32 %v12678_v48, %v19010_v28 }
 0x1db   : > { %9754 = vmatprep.mubr.msk.f32.mxu0 %vm2415_vm1, %v12418_v18  ;;  %v12957_v25 = vpop.permute.xlu1 %1796  ;;  %v2150_v49 = vpop.permute.xlu0 %2149 }
 0x1dc   : > { %19004 = vst [vmem:[#allocation34_spill] sm:$0xff] %v12957_v25  ;;  %v12961_v34 = vsel %vm2415_vm1, %v12292_v24, %v2150_v49  ;;  %v1395_v25 = vmax.f32 %v1097_v19, 0.0 }
 0x1dd   : > { %19005 = vst [vmem:[#allocation102_spill] sm:$0xff] %v12961_v34  ;;  %2207 = vrot.lane.b32.xlu0 %v12953_v56, %s11114_s9  ;;  %2974 = vmatmul.mubr.f32.gmra.mrb[112].mxu1 %v12961_v34 }
 0x1de   : > { %3823 = vmatmul.mubr.f32.gmra.mrb[112].mxu0 %v12961_v34  ;;  %9623 = vmatprep.mubr.msk.f32.mxu1 %vm2415_vm1, %v12439_v7  ;;  %v19009_v34 = vld [vmem:[#allocation41_spill] sm:$0xff] }
 0x1df   : > { %9755 = vmatprep.mubr.msk.f32.mxu0 %vm2415_vm1, %v12439_v7  ;;  %v12976_v35 = vpop.permute.xlu1 %1800  ;;  %v2152_v49 = vpop.permute.xlu0 %2151  ;;  %v1102_v24 = vadd.f32 %v12678_v48, %v19009_v34 }
 0x1e0   : > { %19007 = vst [vmem:[#allocation42_spill] sm:$0xff] %v12976_v35  ;;  %v12979_v13 = vmul.f32 %v12976_v35, %v1424_v47  ;;  %v12983_v63 = vsel %vm2415_vm1, %v12303_v45, %v2152_v49  ;;  %v12996_v47 = vmul.f32 %v12367_v29, %v1395_v25  ;;  %v19013_v35 = vld [vmem:[#allocation45_spill] sm:$0xff]  ;;  %v1426_v25 = vmax.f32 %v1252_v52, 0.0 }
 0x1e1   : > { %19008 = vst [vmem:[#allocation228_spill] sm:$0xff] %v12983_v63  ;;  %2209 = vrot.lane.b32.xlu0 %v12972_v33, %s11114_s9  ;;  %2979 = vmatmul.mubr.f32.gmra.mrb[114].mxu1 %v12983_v63  ;;  %v1396_v28 = vmax.f32 %v1102_v24, 0.0 }
 0x1e2   : > { %3828 = vmatmul.mubr.f32.gmra.mrb[114].mxu0 %v12983_v63  ;;  %2269 = vrot.lane.b32.xlu1 %v12979_v13, %s11114_s9  ;;  %v1107_v63 = vadd.f32 %v12678_v48, %v19013_v35 }
 0x1e3   : > { %9624 = vmatprep.mubr.msk.f32.mxu1 %vm2415_vm1, %v12466_v54  ;;  %9756 = vmatprep.mubr.msk.f32.mxu0 %vm2415_vm1, %v12466_v54  ;;  %v13002_v34 = vpop.permute.xlu1 %1804  ;;  %v2154_v19 = vpop.permute.xlu0 %2153  ;;  %v13017_v29 = vmul.f32 %v12397_v1, %v1396_v28  ;;  %v9848_v28 = vld [vmem:[%s18265_s3 + $0x1f8] sm:$0xff]  ;;  %v19016_v1 = vld [vmem:[#allocation44_spill] sm:$0xff] }
 0x1e4   : > { %19011 = vst [vmem:[#allocation41_spill] sm:$0xff] %v13002_v34  ;;  %v13006_v49 = vsel %vm2415_vm1, %v12314_v46, %v2154_v19  ;;  %v1112_v46 = vadd.f32 %v12678_v48, %v19016_v1  ;;  %v1397_v45 = vmax.f32 %v1107_v63, 0.0 }
 0x1e5   : > { %19012 = vst [vmem:[#allocation106_spill] sm:$0xff] %v13006_v49  ;;  %2211 = vrot.lane.b32.xlu0 %v12996_v47, %s11114_s9  ;;  %2984 = vmatmul.mubr.f32.gmra.mrb[116].mxu1 %v13006_v49 }
 0x1e6   : > { %3833 = vmatmul.mubr.f32.gmra.mrb[116].mxu0 %v13006_v49  ;;  %9625 = vmatprep.mubr.msk.f32.mxu1 %vm2415_vm1, %v12487_v2  ;;  %v9847_v49 = vld [vmem:[%s18265_s3 + $0x1f0] sm:$0xff] }
 0x1e7   : > { %9757 = vmatprep.mubr.msk.f32.mxu0 %vm2415_vm1, %v12487_v2  ;;  %v13021_v24 = vpop.permute.xlu1 %1808  ;;  %v2156_v35 = vpop.permute.xlu0 %2155 }
 0x1e8   : > { %19014 = vst [vmem:[#allocation45_spill] sm:$0xff] %v13021_v24  ;;  %v13024_v19 = vmul.f32 %v13021_v24, %v1426_v25  ;;  %v13028_v52 = vsel %vm2415_vm1, %v12334_v51, %v2156_v35  ;;  %v10573_v25 = vpack.c.bf16 %v9848_v28, %v9847_v49  ;;  %v19017_v35 = vld [vmem:[#allocation110_spill] sm:$0xff]  ;;  %v13047_v51 = vmul.f32 %v12424_v59, %v1397_v45 }
 0x1e9   : > { %19015 = vst [vmem:[#allocation229_spill] sm:$0xff] %v13028_v52  ;;  %2213 = vrot.lane.b32.xlu0 %v13017_v29, %s11114_s9  ;;  %2989 = vmatmul.mubr.f32.gmra.mrb[118].mxu1 %v13028_v52  ;;  %v1262_v24 = vadd.f32 %v12678_v48, %v19017_v35  ;;  %v1398_v28 = vmax.f32 %v1112_v46, 0.0  ;;  %v19020_v35 = vld [vmem:[#allocation49_spill] sm:$0xff] }
 0x1ea   : > { %3838 = vmatmul.mubr.f32.gmra.mrb[118].mxu0 %v13028_v52  ;;  %2273 = vrot.lane.b32.xlu1 %v13024_v19, %s11114_s9  ;;  %v1117_v52 = vadd.f32 %v12678_v48, %v19020_v35  ;;  %v19023_v35 = vld [vmem:[#allocation48_spill] sm:$0xff] }
 0x1eb   : > { %9626 = vmatprep.mubr.msk.f32.mxu1 %vm2415_vm1, %v12507_v11  ;;  %9758 = vmatprep.mubr.msk.f32.mxu0 %vm2415_vm1, %v12507_v11  ;;  %v13053_v1 = vpop.permute.xlu1 %1812  ;;  %v2158_v63 = vpop.permute.xlu0 %2157  ;;  %v1428_v45 = vmax.f32 %v1262_v24, 0.0  ;;  %v13068_v59 = vmul.f32 %v12445_v37, %v1398_v28  ;;  %v19024_v37 = vld [vmem:[#allocation114_spill] sm:$0xff] }
 0x1ec   : > { %19018 = vst [vmem:[#allocation44_spill] sm:$0xff] %v13053_v1  ;;  %v13057_v49 = vsel %vm2415_vm1, %v12359_v50, %v2158_v63  ;;  %10574 = vmatpush1.bf16.msra.mxu1 %v10573_v25  ;;  %v1399_v28 = vmax.f32 %v1117_v52, 0.0  ;;  %v1272_v50 = vadd.f32 %v12678_v48, %v19024_v37 }
 0x1ed   : > { %19019 = vst [vmem:[#allocation110_spill] sm:$0xff] %v13057_v49  ;;  %2215 = vrot.lane.b32.xlu0 %v13047_v51, %s11114_s9  ;;  %2994 = vmatmul.mubr.f32.gmra.mrb[120].mxu1 %v13057_v49 }
 0x1ee   : > { %3843 = vmatmul.mubr.f32.gmra.mrb[120].mxu0 %v13057_v49  ;;  %9627 = vmatprep.mubr.msk.f32.mxu1 %vm2415_vm1, %v12527_v30  ;;  %v1122_v49 = vadd.f32 %v12678_v48, %v19023_v35 }
 0x1ef   : > { %9759 = vmatprep.mubr.msk.f32.mxu0 %vm2415_vm1, %v12527_v30  ;;  %v13072_v46 = vpop.permute.xlu1 %1816  ;;  %v2160_v25 = vpop.permute.xlu0 %2159  ;;  %10575 = vmatprep.subr.bf16.mxu1 %v18877_v3 }
 0x1f0   : > { %19021 = vst [vmem:[#allocation49_spill] sm:$0xff] %v13072_v46  ;;  %v13076_v63 = vmul.f32 %v13072_v46, %v1428_v45  ;;  %v13080_v24 = vsel %vm2415_vm1, %v12391_v36, %v2160_v25  ;;  %v13093_v45 = vmul.f32 %v12472_v21, %v1399_v28  ;;  %v1400_v35 = vmax.f32 %v1122_v49, 0.0  ;;  %v19027_v46 = vld [vmem:[#allocation53_spill] sm:$0xff] }
 0x1f1   : > { %19022 = vst [vmem:[#allocation230_spill] sm:$0xff] %v13080_v24  ;;  %2217 = vrot.lane.b32.xlu0 %v13068_v59, %s11114_s9  ;;  %2999 = vmatmul.mubr.f32.gmra.mrb[122].mxu1 %v13080_v24  ;;  %v1430_v28 = vmax.f32 %v1272_v50, 0.0 }
 0x1f2   : > { %3848 = vmatmul.mubr.f32.gmra.mrb[122].mxu0 %v13080_v24  ;;  %2277 = vrot.lane.b32.xlu1 %v13076_v63, %s11114_s9  ;;  %v1127_v24 = vadd.f32 %v12678_v48, %v19027_v46  ;;  %v13114_v21 = vmul.f32 %v12493_v8, %v1400_v35  ;;  %v19031_v35 = vld [vmem:[#allocation118_spill] sm:$0xff] }
 0x1f3   : > { %9628 = vmatprep.mubr.msk.f32.mxu1 %vm2415_vm1, %v12547_v9  ;;  %9760 = vmatprep.mubr.msk.f32.mxu0 %vm2415_vm1, %v12547_v9  ;;  %v13099_v52 = vpop.permute.xlu1 %1820  ;;  %v2162_v25 = vpop.permute.xlu0 %2161  ;;  %v1282_v8 = vadd.f32 %v12678_v48, %v19031_v35 }
 0x1f4   : > { %19025 = vst [vmem:[#allocation48_spill] sm:$0xff] %v13099_v52  ;;  %v13103_v37 = vsel %vm2415_vm1, %v12418_v18, %v2162_v25  ;;  %v1401_v36 = vmax.f32 %v1127_v24, 0.0 }
 0x1f5   : > { %19026 = vst [vmem:[#allocation114_spill] sm:$0xff] %v13103_v37  ;;  %2219 = vrot.lane.b32.xlu0 %v13093_v45, %s11114_s9  ;;  %3004 = vmatmul.mubr.f32.gmra.mrb[124].mxu1 %v13103_v37 }
 0x1f6   : > { %3853 = vmatmul.mubr.f32.gmra.mrb[124].mxu0 %v13103_v37  ;;  %9629 = vmatprep.mubr.msk.f32.mxu1 %vm2415_vm1, %v12567_v15  ;;  %v19030_v37 = vld [vmem:[#allocation52_spill] sm:$0xff] }
 0x1f7   : > { %9761 = vmatprep.mubr.msk.f32.mxu0 %vm2415_vm1, %v12567_v15  ;;  %v13118_v49 = vpop.permute.xlu1 %1824  ;;  %v2164_v46 = vpop.permute.xlu0 %2163  ;;  %v1132_v18 = vadd.f32 %v12678_v48, %v19030_v37 }
 0x1f8   : > { %19028 = vst [vmem:[#allocation53_spill] sm:$0xff] %v13118_v49  ;;  %v13121_v25 = vmul.f32 %v13118_v49, %v1430_v28  ;;  %v13125_v50 = vsel %vm2415_vm1, %v12439_v7, %v2164_v46  ;;  %v13138_v28 = vmul.f32 %v12513_v27, %v1401_v36  ;;  %v19034_v49 = vld [vmem:[#allocation58_spill] sm:$0xff]  ;;  %v1432_v36 = vmax.f32 %v1282_v8, 0.0 }
 0x1f9   : > { %19029 = vst [vmem:[#allocation231_spill] sm:$0xff] %v13125_v50  ;;  %2221 = vrot.lane.b32.xlu0 %v13114_v21, %s11114_s9  ;;  %3009 = vmatmul.mubr.f32.gmra.mrb[126].mxu1 %v13125_v50  ;;  %v1402_v35 = vmax.f32 %v1132_v18, 0.0 }
 0x1fa   : > { %3858 = vmatmul.mubr.f32.gmra.mrb[126].mxu0 %v13125_v50  ;;  %2281 = vrot.lane.b32.xlu1 %v13121_v25, %s11114_s9  ;;  %v1137_v50 = vadd.f32 %v12678_v48, %v19034_v49 }
 0x1fb   : > { %9630 = vmatprep.mubr.msk.f32.mxu1 %vm2415_vm1, %v12587_v5  ;;  %9762 = vmatprep.mubr.msk.f32.mxu0 %vm2415_vm1, %v12587_v5  ;;  %v13144_v24 = vpop.permute.xlu1 %1828  ;;  %v2166_v37 = vpop.permute.xlu0 %2165  ;;  %v13159_v27 = vmul.f32 %v12533_v14, %v1402_v35  ;;  %v19039_v35 = vld [vmem:[#allocation122_spill] sm:$0xff] }
 0x1fc   : > { %19032 = vst [vmem:[#allocation52_spill] sm:$0xff] %v13144_v24  ;;  %v13148_v46 = vsel %vm2415_vm1, %v12466_v54, %v2166_v37  ;;  %v1403_v7 = vmax.f32 %v1137_v50, 0.0  ;;  %v1292_v14 = vadd.f32 %v12678_v48, %v19039_v35 }
 0x1fd   : > { %19033 = vst [vmem:[#allocation118_spill] sm:$0xff] %v13148_v46  ;;  %2223 = vrot.lane.b32.xlu0 %v13138_v28, %s11114_s9  ;;  %3014 = vmatmul.mubr.f32.gmra.mrb[128].mxu1 %v13148_v46 }
 0x1fe   : > { %3863 = vmatmul.mubr.f32.gmra.mrb[128].mxu0 %v13148_v46  ;;  %9631 = vmatprep.mubr.msk.f32.mxu1 %vm2415_vm1, %v12607_v41  ;;  %v19038_v46 = vld [vmem:[#allocation57_spill] sm:$0xff] }
 0x1ff   : > { %9763 = vmatprep.mubr.msk.f32.mxu0 %vm2415_vm1, %v12607_v41  ;;  %v13163_v18 = vpop.permute.xlu1 %1832  ;;  %v2168_v49 = vpop.permute.xlu0 %2167  ;;  %v1142_v54 = vadd.f32 %v12678_v48, %v19038_v46 }
 0x200   : > { %19035 = vst [vmem:[#allocation58_spill] sm:$0xff] %v13163_v18  ;;  %v13166_v37 = vmul.f32 %v13163_v18, %v1432_v36  ;;  %v13170_v8 = vsel %vm2415_vm1, %v12487_v2, %v2168_v49  ;;  %v13183_v36 = vmul.f32 %v12553_v20, %v1403_v7  ;;  %v19042_v18 = vld [vmem:[#allocation62_spill] sm:$0xff]  ;;  %v1434_v7 = vmax.f32 %v1292_v14, 0.0 }
 0x201   : > { %19037 = vst [vmem:[#allocation233_spill] sm:$0xff] %v13170_v8  ;;  %2225 = vrot.lane.b32.xlu0 %v13159_v27, %s11114_s9  ;;  %3019 = vmatmul.mubr.f32.gmra.mrb[130].mxu1 %v13170_v8  ;;  %v1404_v35 = vmax.f32 %v1142_v54, 0.0 }
 0x202   : > { %19036 = vst [vmem:[#allocation232_spill] sm:$0xff] %v13166_v37  ;;  %3868 = vmatmul.mubr.f32.gmra.mrb[130].mxu0 %v13170_v8  ;;  %2285 = vrot.lane.b32.xlu1 %v13166_v37, %s11114_s9  ;;  %v1147_v8 = vadd.f32 %v12678_v48, %v19042_v18 }
 0x203   : > { %9632 = vmatprep.mubr.msk.f32.mxu1 %vm2415_vm1, %v12627_v10  ;;  %9764 = vmatprep.mubr.msk.f32.mxu0 %vm2415_vm1, %v12627_v10  ;;  %v13189_v50 = vpop.permute.xlu1 %1836  ;;  %v2170_v46 = vpop.permute.xlu0 %2169  ;;  %v13204_v20 = vmul.f32 %v12573_v26, %v1404_v35  ;;  %v19047_v35 = vld [vmem:[#allocation126_spill] sm:$0xff] }
 0x204   : > { %19040 = vst [vmem:[#allocation57_spill] sm:$0xff] %v13189_v50  ;;  %v13193_v49 = vsel %vm2415_vm1, %v12507_v11, %v2170_v46  ;;  %v1405_v2 = vmax.f32 %v1147_v8, 0.0  ;;  %v1302_v26 = vadd.f32 %v12678_v48, %v19047_v35  ;;  %v9849_v35 = vld [vmem:[%s18265_s3 + $0x200] sm:$0xff] }
 0x205   : > { %19041 = vst [vmem:[#allocation122_spill] sm:$0xff] %v13193_v49  ;;  %2227 = vrot.lane.b32.xlu0 %v13183_v36, %s11114_s9  ;;  %3024 = vmatmul.mubr.f32.gmra.mrb[132].mxu1 %v13193_v49 }
 0x206   : > { %3873 = vmatmul.mubr.f32.gmra.mrb[132].mxu0 %v13193_v49  ;;  %9633 = vmatprep.mubr.msk.f32.mxu1 %vm2415_vm1, %v12653_v58  ;;  %v19046_v49 = vld [vmem:[#allocation61_spill] sm:$0xff] }
 0x207   : > { %9765 = vmatprep.mubr.msk.f32.mxu0 %vm2415_vm1, %v12653_v58  ;;  %v13208_v54 = vpop.permute.xlu1 %1840  ;;  %v2172_v18 = vpop.permute.xlu0 %2171  ;;  %v1152_v11 = vadd.f32 %v12678_v48, %v19046_v49 }
 0x208   : > { %19043 = vst [vmem:[#allocation62_spill] sm:$0xff] %v13208_v54  ;;  %v13211_v46 = vmul.f32 %v13208_v54, %v1434_v7  ;;  %v13215_v14 = vsel %vm2415_vm1, %v12527_v30, %v2172_v18  ;;  %v13228_v7 = vmul.f32 %v12593_v39, %v1405_v2  ;;  %v9850_v2 = vld [vmem:[%s18265_s3 + $0x208] sm:$0xff] }
 0x209   : > { %19045 = vst [vmem:[#allocation235_spill] sm:$0xff] %v13215_v14  ;;  %2229 = vrot.lane.b32.xlu0 %v13204_v20, %s11114_s9  ;;  %3029 = vmatmul.mubr.f32.gmra.mrb[134].mxu1 %v13215_v14  ;;  %v1406_v54 = vmax.f32 %v1152_v11, 0.0  ;;  %v19050_v39 = vld [vmem:[#allocation67_spill] sm:$0xff]  ;;  %v10576_v30 = vpack.c.bf16 %v9850_v2, %v9849_v35  ;;  %v19053_v35 = vld [vmem:[#allocation66_spill] sm:$0xff] }
 0x20a   : > { %19044 = vst [vmem:[#allocation234_spill] sm:$0xff] %v13211_v46  ;;  %3878 = vmatmul.mubr.f32.gmra.mrb[134].mxu0 %v13215_v14  ;;  %2289 = vrot.lane.b32.xlu1 %v13211_v46, %s11114_s9  ;;  %v1157_v14 = vadd.f32 %v12678_v48, %v19050_v39 }
 0x20b   : > { %9634 = vmatprep.mubr.msk.f32.mxu1 %vm2415_vm1, %v12673_v12  ;;  %9766 = vmatprep.mubr.msk.f32.mxu0 %vm2415_vm1, %v12673_v12  ;;  %v13234_v8 = vpop.permute.xlu1 %1844  ;;  %v2174_v49 = vpop.permute.xlu0 %2173 }
 0x20c   : > { %19048 = vst [vmem:[#allocation61_spill] sm:$0xff] %v13234_v8  ;;  %v13238_v18 = vsel %vm2415_vm1, %v12547_v9, %v2174_v49  ;;  %v1436_v49 = vmax.f32 %v1302_v26, 0.0  ;;  %v13255_v9 = vmul.f32 %v12613_v44, %v1406_v54  ;;  %10577 = vmatpush1.bf16.msra.mxu1 %v10576_v30  ;;  %v1162_v54 = vadd.f32 %v12678_v48, %v19053_v35  ;;  %v19054_v44 = vld [vmem:[#allocation131_spill] sm:$0xff] }
 0x20d   : > { %19049 = vst [vmem:[#allocation126_spill] sm:$0xff] %v13238_v18  ;;  %2231 = vrot.lane.b32.xlu0 %v13228_v7, %s11114_s9  ;;  %3034 = vmatmul.mubr.f32.gmra.mrb[136].mxu1 %v13238_v18  ;;  %v1407_v2 = vmax.f32 %v1157_v14, 0.0  ;;  %v1312_v30 = vadd.f32 %v12678_v48, %v19054_v44 }
 0x20e   : > { %3883 = vmatmul.mubr.f32.gmra.mrb[136].mxu0 %v13238_v18  ;;  %9635 = vmatprep.mubr.msk.f32.mxu1 %vm2415_vm1, %v12697_v62  ;;  %v1408_v35 = vmax.f32 %v1162_v54, 0.0 }
 0x20f   : > { %9767 = vmatprep.mubr.msk.f32.mxu0 %vm2415_vm1, %v12697_v62  ;;  %v13259_v11 = vpop.permute.xlu1 %1848  ;;  %v2176_v39 = vpop.permute.xlu0 %2175  ;;  %10578 = vmatprep.subr.bf16.mxu1 %v18877_v3 }
 0x210   : > { %19051 = vst [vmem:[#allocation67_spill] sm:$0xff] %v13259_v11  ;;  %v13262_v46 = vmul.f32 %v13259_v11, %v1436_v49  ;;  %v13266_v26 = vsel %vm2415_vm1, %v12567_v15, %v2176_v39  ;;  %v13280_v49 = vmul.f32 %v12633_v23, %v1407_v2  ;;  %v19057_v11 = vld [vmem:[#allocation71_spill] sm:$0xff]  ;;  %v1438_v2 = vmax.f32 %v1312_v30, 0.0 }
 0x211   : > { %19052 = vst [vmem:[#allocation236_spill] sm:$0xff] %v13266_v26  ;;  %2233 = vrot.lane.b32.xlu0 %v13255_v9, %s11114_s9  ;;  %3039 = vmatmul.mubr.f32.gmra.mrb[138].mxu1 %v13266_v26  ;;  %v13301_v23 = vmul.f32 %v12659_v32, %v1408_v35 }
 0x212   : > { %3888 = vmatmul.mubr.f32.gmra.mrb[138].mxu0 %v13266_v26  ;;  %2293 = vrot.lane.b32.xlu1 %v13262_v46, %s11114_s9  ;;  %v1167_v26 = vadd.f32 %v12678_v48, %v19057_v11 }
 0x213   : > { %9636 = vmatprep.mubr.msk.f32.mxu1 %vm2415_vm1, %v12716_v22  ;;  %9768 = vmatprep.mubr.msk.f32.mxu0 %vm2415_vm1, %v12716_v22  ;;  %v13286_v14 = vpop.permute.xlu1 %1852  ;;  %v2178_v39 = vpop.permute.xlu0 %2177 }
 0x214   : > { %19055 = vst [vmem:[#allocation66_spill] sm:$0xff] %v13286_v14  ;;  %v13290_v44 = vsel %vm2415_vm1, %v12587_v5, %v2178_v39  ;;  %v1409_v5 = vmax.f32 %v1167_v26, 0.0 }
 0x215   : > { %19056 = vst [vmem:[#allocation131_spill] sm:$0xff] %v13290_v44  ;;  %2235 = vrot.lane.b32.xlu0 %v13280_v49, %s11114_s9  ;;  %3044 = vmatmul.mubr.f32.gmra.mrb[140].mxu1 %v13290_v44 }
 0x216   : > { %3893 = vmatmul.mubr.f32.gmra.mrb[140].mxu0 %v13290_v44  ;;  %9637 = vmatprep.mubr.msk.f32.mxu1 %vm2415_vm1, %v12735_v38  ;;  %v19061_v44 = vld [vmem:[#allocation70_spill] sm:$0xff]  ;;  %v13323_v35 = vmul.f32 %v12684_v43, %v1409_v5 }
 0x217   : > { %9769 = vmatprep.mubr.msk.f32.mxu0 %vm2415_vm1, %v12735_v38  ;;  %v13305_v54 = vpop.permute.xlu1 %1856  ;;  %v2180_v11 = vpop.permute.xlu0 %2179  ;;  %v1172_v18 = vadd.f32 %v12678_v48, %v19061_v44 }
 0x218   : > { %19058 = vst [vmem:[#allocation71_spill] sm:$0xff] %v13305_v54  ;;  %v13308_v39 = vmul.f32 %v13305_v54, %v1438_v2  ;;  %v13312_v30 = vsel %vm2415_vm1, %v12607_v41, %v2180_v11  ;;  %v19063_v11 = vld [vmem:[#allocation76_spill] sm:$0xff] }
 0x219   : > { %19060 = vst [vmem:[#allocation238_spill] sm:$0xff] %v13312_v30  ;;  %2237 = vrot.lane.b32.xlu0 %v13301_v23, %s11114_s9  ;;  %3049 = vmatmul.mubr.f32.gmra.mrb[142].mxu1 %v13312_v30  ;;  %v1410_v2 = vmax.f32 %v1172_v18, 0.0  ;;  %v1177_v54 = vadd.f32 %v12678_v48, %v19063_v11  ;;  %v19065_v11 = vld [vmem:[#allocation75_spill] sm:$0xff] }
 0x21a   : > { %19059 = vst [vmem:[#allocation237_spill] sm:$0xff] %v13308_v39  ;;  %3898 = vmatmul.mubr.f32.gmra.mrb[142].mxu0 %v13312_v30  ;;  %2297 = vrot.lane.b32.xlu1 %v13308_v39, %s11114_s9  ;;  %v1182_v43 = vadd.f32 %v12678_v48, %v19065_v11 }
 0x21b   : > { %9638 = vmatprep.mubr.msk.f32.mxu1 %vm2415_vm1, %v12754_v40  ;;  %9770 = vmatprep.mubr.msk.f32.mxu0 %vm2415_vm1, %v12754_v40  ;;  %v2182_v26 = vpop.permute.xlu0 %2181  ;;  %v13342_v5 = vmul.f32 %v12703_v42, %v1410_v2  ;;  %v1411_v32 = vmax.f32 %v1177_v54, 0.0  ;;  %v19066_v2 = vld [vmem:[#allocation204_spill] sm:$0xff] }
 0x21c   : > { %v13331_v44 = vsel %vm2415_vm1, %v12627_v10, %v2182_v26  ;;  %v1412_v11 = vmax.f32 %v1182_v43, 0.0 }
 0x21d   : > { %19062 = vst [vmem:[#allocation70_spill] sm:$0xff] %v13331_v44  ;;  %2239 = vrot.lane.b32.xlu0 %v13323_v35, %s11114_s9  ;;  %3054 = vmatmul.mubr.f32.gmra.mrb[144].mxu1 %v13331_v44  ;;  %v13361_v42 = vmul.f32 %v19066_v2, %v1411_v32  ;;  %v19069_v32 = vld [vmem:[#allocation130_spill] sm:$0xff] }
 0x21e   : > { %3903 = vmatmul.mubr.f32.gmra.mrb[144].mxu0 %v13331_v44  ;;  %2301 = vrot.lane.b32.xlu1 %v12330_v6, %s11114_s9  ;;  %v19068_v44 = vld [vmem:[#allocation80_spill] sm:$0xff]  ;;  %v13380_v2 = vmul.f32 %v19069_v32, %v1412_v11  ;;  %v19072_v11 = vld [vmem:[#allocation209_spill] sm:$0xff]  ;;  %v19098_v6 = vld [vmem:[#allocation98_spill] sm:$0xff] }
 0x21f   : > { %9639 = vmatprep.mubr.msk.f32.mxu1 %vm2415_vm1, %v12773_v53  ;;  %9771 = vmatprep.mubr.msk.f32.mxu0 %vm2415_vm1, %v12773_v53  ;;  %v2184_v18 = vpop.permute.xlu0 %2183 }
 0x220   : > { %v13350_v26 = vsel %vm2415_vm1, %v12653_v58, %v2184_v18 }
 0x221   : > { %19064 = vst [vmem:[#allocation76_spill] sm:$0xff] %v13350_v26  ;;  %2241 = vrot.lane.b32.xlu0 %v13342_v5, %s11114_s9  ;;  %3059 = vmatmul.mubr.f32.gmra.mrb[146].mxu1 %v13350_v26 }
 0x222   : > { %3908 = vmatmul.mubr.f32.gmra.mrb[146].mxu0 %v13350_v26  ;;  %2305 = vrot.lane.b32.xlu1 %v12385_v16, %s11114_s9  ;;  %v1187_v26 = vadd.f32 %v12678_v48, %v19068_v44 }
 0x223   : > { %9640 = vmatprep.mubr.msk.f32.mxu1 %vm2415_vm1, %v12792_v61  ;;  %9772 = vmatprep.mubr.msk.f32.mxu0 %vm2415_vm1, %v12792_v61  ;;  %v2186_v54 = vpop.permute.xlu0 %2185 }
 0x224   : > { %v13369_v18 = vsel %vm2415_vm1, %v12673_v12, %v2186_v54  ;;  %v19071_v54 = vld [vmem:[#allocation79_spill] sm:$0xff]  ;;  %v1413_v12 = vmax.f32 %v1187_v26, 0.0 }
 0x225   : > { %19067 = vst [vmem:[#allocation75_spill] sm:$0xff] %v13369_v18  ;;  %2243 = vrot.lane.b32.xlu0 %v13361_v42, %s11114_s9  ;;  %3064 = vmatmul.mubr.f32.gmra.mrb[148].mxu1 %v13369_v18  ;;  %v1192_v30 = vadd.f32 %v12678_v48, %v19071_v54 }
 0x226   : > { %3913 = vmatmul.mubr.f32.gmra.mrb[148].mxu0 %v13369_v18  ;;  %9641 = vmatprep.mubr.msk.f32.mxu1 %vm2415_vm1, %v12811_v57  ;;  %v13397_v32 = vmul.f32 %v19072_v11, %v1413_v12  ;;  %v19074_v18 = vld [vmem:[#allocation85_spill] sm:$0xff]  ;;  %v19075_v12 = vld [vmem:[#allocation135_spill] sm:$0xff] }
 0x227   : > { %9773 = vmatprep.mubr.msk.f32.mxu0 %vm2415_vm1, %v12811_v57  ;;  %v2188_v43 = vpop.permute.xlu0 %2187  ;;  %v1414_v54 = vmax.f32 %v1192_v30, 0.0 }
 0x228   : > { %v13386_v44 = vsel %vm2415_vm1, %v12697_v62, %v2188_v43  ;;  %v1197_v62 = vadd.f32 %v12678_v48, %v19074_v18 }
 0x229   : > { %19070 = vst [vmem:[#allocation80_spill] sm:$0xff] %v13386_v44  ;;  %2245 = vrot.lane.b32.xlu0 %v13380_v2, %s11114_s9  ;;  %3069 = vmatmul.mubr.f32.gmra.mrb[150].mxu1 %v13386_v44  ;;  %v13414_v11 = vmul.f32 %v19075_v12, %v1414_v54 }
 0x22a   : > { %3918 = vmatmul.mubr.f32.gmra.mrb[150].mxu0 %v13386_v44  ;;  %9642 = vmatprep.mubr.msk.f32.mxu1 %vm2415_vm1, %v12830_v60  ;;  %v19077_v44 = vld [vmem:[#allocation84_spill] sm:$0xff]  ;;  %v1415_v12 = vmax.f32 %v1197_v62, 0.0 }
 0x22b   : > { %9774 = vmatprep.mubr.msk.f32.mxu0 %vm2415_vm1, %v12830_v60  ;;  %v2190_v43 = vpop.permute.xlu0 %2189  ;;  %v1202_v54 = vadd.f32 %v12678_v48, %v19077_v44 }
 0x22c   : > { %v13403_v26 = vsel %vm2415_vm1, %v12716_v22, %v2190_v43  ;;  %v9851_v43 = vld [vmem:[%s18265_s3 + $0x210] sm:$0xff] }
 0x22d   : > { %19073 = vst [vmem:[#allocation79_spill] sm:$0xff] %v13403_v26  ;;  %2247 = vrot.lane.b32.xlu0 %v13397_v32, %s11114_s9  ;;  %3074 = vmatmul.mubr.f32.gmra.mrb[152].mxu1 %v13403_v26  ;;  %v1416_v44 = vmax.f32 %v1202_v54, 0.0 }
 0x22e   : > { %3923 = vmatmul.mubr.f32.gmra.mrb[152].mxu0 %v13403_v26  ;;  %9643 = vmatprep.mubr.msk.f32.mxu1 %vm2415_vm1, %v12855_v0  ;;  %v9852_v26 = vld [vmem:[%s18265_s3 + $0x218] sm:$0xff] }
 0x22f   : > { %9775 = vmatprep.mubr.msk.f32.mxu0 %vm2415_vm1, %v12855_v0  ;;  %v2192_v30 = vpop.permute.xlu0 %2191  ;;  %v10579_v22 = vpack.c.bf16 %v9852_v26, %v9851_v43  ;;  %v19080_v26 = vld [vmem:[#allocation89_spill] sm:$0xff] }
 0x230   : > { %v13420_v18 = vsel %vm2415_vm1, %v12735_v38, %v2192_v30  ;;  %v19078_v30 = vld [vmem:[#allocation140_spill] sm:$0xff]  ;;  %v1207_v43 = vadd.f32 %v12678_v48, %v19080_v26 }
 0x231   : > { %19076 = vst [vmem:[#allocation85_spill] sm:$0xff] %v13420_v18  ;;  %2249 = vrot.lane.b32.xlu0 %v13414_v11, %s11114_s9  ;;  %3079 = vmatmul.mubr.f32.gmra.mrb[154].mxu1 %v13420_v18  ;;  %v13437_v38 = vmul.f32 %v19078_v30, %v1415_v12  ;;  %v19083_v30 = vld [vmem:[#allocation88_spill] sm:$0xff] }
 0x232   : > { %3928 = vmatmul.mubr.f32.gmra.mrb[154].mxu0 %v13420_v18  ;;  %9644 = vmatprep.mubr.msk.f32.mxu1 %vm2415_vm1, %v12875_v55  ;;  %v1212_v18 = vadd.f32 %v12678_v48, %v19083_v30 }
 0x233   : > { %9776 = vmatprep.mubr.msk.f32.mxu0 %vm2415_vm1, %v12875_v55  ;;  %v2194_v58 = vpop.permute.xlu0 %2193  ;;  %10580 = vmatpush1.bf16.msra.mxu1 %v10579_v22  ;;  %v19081_v22 = vld [vmem:[#allocation139_spill] sm:$0xff] }
 0x234   : > { %v13443_v62 = vsel %vm2415_vm1, %v12754_v40, %v2194_v58  ;;  %10581 = vmatprep.subr.bf16.mxu1 %v18877_v3  ;;  %v13455_v12 = vmul.f32 %v19081_v22, %v1416_v44  ;;  %v1417_v40 = vmax.f32 %v1207_v43, 0.0  ;;  %v19084_v44 = vld [vmem:[#allocation218_spill] sm:$0xff]  ;;  %v19087_v43 = vlaneseq }
 0x235   : > { %19079 = vst [vmem:[#allocation84_spill] sm:$0xff] %v13443_v62  ;;  %2251 = vrot.lane.b32.xlu0 %v13437_v38, %s11114_s9  ;;  %3084 = vmatmul.mubr.f32.gmra.mrb[156].mxu1 %v13443_v62 }
 0x236   : > { %3933 = vmatmul.mubr.f32.gmra.mrb[156].mxu0 %v13443_v62  ;;  %9645 = vmatprep.mubr.msk.f32.mxu1 %vm2415_vm1, %v12894_v4  ;;  %v13472_v22 = vmul.f32 %v19084_v44, %v1417_v40  ;;  %v13483_v62 = vshrl.u32 %v19087_v43, 7 }
 0x237   : > { %9777 = vmatprep.mubr.msk.f32.mxu0 %vm2415_vm1, %v12894_v4  ;;  %v2196_v58 = vpop.permute.xlu0 %2195 }
 0x238   : > { %v13461_v54 = vsel %vm2415_vm1, %v12773_v53, %v2196_v58  ;;  %19088 = vst [vmem:[#allocation240_spill] sm:$0xff] %v13483_v62  ;;  %v19089_v53 = vld [vmem:[#allocation94_spill] sm:$0xff]  ;;  %vm3479_vm2 = vcmp.lt.s32.totalorder %v13483_v62, 1  ;;  %vm5064_vm3 = vcmp.lt.s32.totalorder %v13483_v62, 7 }
 0x239   : > { %19082 = vst [vmem:[#allocation89_spill] sm:$0xff] %v13461_v54  ;;  %2253 = vrot.lane.b32.xlu0 %v13455_v12, %s11114_s9  ;;  %3089 = vmatmul.mubr.f32.gmra.mrb[158].mxu1 %v13461_v54  ;;  %v1217_v10 = vadd.f32 %v12678_v48, %v19089_v53 }
 0x23a   : > { %3938 = vmatmul.mubr.f32.gmra.mrb[158].mxu0 %v13461_v54  ;;  %9646 = vmatprep.mubr.msk.f32.mxu1 %vm2415_vm1, %v12913_v31  ;;  %v1418_v54 = vmax.f32 %v1212_v18, 0.0 }
 0x23b   : > { %9778 = vmatprep.mubr.msk.f32.mxu0 %vm2415_vm1, %v12913_v31  ;;  %v2198_v58 = vpop.permute.xlu0 %2197 }
 0x23c   : > { %v13476_v26 = vpop.f32.mrb[54].mxu1  ;;  %v13480_v30 = vsel %vm2415_vm1, %v12792_v61, %v2198_v58  ;;  %v19091_v58 = vld [vmem:[#allocation220_spill] sm:$0xff] }
 0x23d   : > { %19085 = vst [vmem:[#allocation88_spill] sm:$0xff] %v13476_v26  ;;  %19086 = vst [vmem:[#allocation239_spill] sm:$0xff] %v13480_v30  ;;  %v13487_v41 = vpop.f32.mrb[54].mxu0  ;;  %v2832_v40 = vpop.f32.mrb[55].mxu1  ;;  %2255 = vrot.lane.b32.xlu0 %v13472_v22, %s11114_s9  ;;  %3094 = vmatmul.mubr.f32.gmra.mrb[160].mxu1 %v13480_v30  ;;  %v13496_v43 = vmul.f32 %v19091_v58, %v1418_v54  ;;  %v18513_v61 = vrot.slane %v13476_v26, 7 }
 0x23e   : > { %19090 = vst [vmem:[#allocation94_spill] sm:$0xff] %v13487_v41  ;;  %v3681_v44 = vpop.f32.mrb[55].mxu0  ;;  %3943 = vmatmul.mubr.f32.gmra.mrb[160].mxu0 %v13480_v30  ;;  %9647 = vmatprep.mubr.msk.f32.mxu1 %vm2415_vm1, %v12932_v17  ;;  %v1419_v41 = vmax.f32 %v1217_v10, 0.0 }
 0x23f   : > { %9779 = vmatprep.mubr.msk.f32.mxu0 %vm2415_vm1, %v12932_v17  ;;  %v2200_v53 = vpop.permute.xlu0 %2199  ;;  %v19093_v44 = vld [vmem:[#allocation93_spill] sm:$0xff] }
 0x240   : > { %v2835_v18 = vpop.f32.mrb[56].mxu1  ;;  %v13503_v40 = vsel %vm2415_vm1, %v12811_v57, %v2200_v53  ;;  %v1222_v30 = vadd.f32 %v12678_v48, %v19093_v44  ;;  %v19094_v53 = vld [vmem:[#allocation222_spill] sm:$0xff] }
 0x241   : > { %19092 = vst [vmem:[#allocation241_spill] sm:$0xff] %v13503_v40  ;;  %v3370_v15 = vrot.slane %v2835_v18, 7  ;;  %v3684_v54 = vpop.f32.mrb[56].mxu0  ;;  %v2837_v58 = vpop.f32.mrb[57].mxu1  ;;  %2257 = vrot.lane.b32.xlu0 %v13496_v43, %s11114_s9  ;;  %3099 = vmatmul.mubr.f32.gmra.mrb[162].mxu1 %v13503_v40  ;;  %v13515_v57 = vmul.f32 %v19094_v53, %v1419_v41  ;;  %v1227_v41 = vadd.f32 %v12678_v48, %v19098_v6 }
 0x242   : > { %v3686_v16 = vpop.f32.mrb[57].mxu0  ;;  %3948 = vmatmul.mubr.f32.gmra.mrb[162].mxu0 %v13503_v40  ;;  %9648 = vmatprep.mubr.msk.f32.mxu1 %vm2415_vm1, %v12953_v56  ;;  %v1420_v40 = vmax.f32 %v1222_v30, 0.0 }
 0x243   : > { %19095 = vst [vmem:[#allocation93_spill] sm:$0xff] %v13515_v57  ;;  %v3586_v10 = vsel %vm3479_vm2, %v18513_v61, %v3370_v15  ;;  %9780 = vmatprep.mubr.msk.f32.mxu0 %vm2415_vm1, %v12953_v56  ;;  %v2202_v58 = vpop.permute.xlu0 %2201 }
 0x244   : > { %v13523_v18 = vadd.f32 %v3684_v54, %v3586_v10  ;;  %v2840_v16 = vpop.f32.mrb[58].mxu1  ;;  %v13527_v44 = vsel %vm2415_vm1, %v12830_v60, %v2202_v58  ;;  %v19099_v54 = vld [vmem:[#allocation31_spill] sm:$0xff]  ;;  %v13553_v58 = vld [vmem:[%s18264_s2] ss:$0 sm:$0xff] }
 0x245   : > { %19097 = vst [vmem:[#allocation243_spill] sm:$0xff] %v13527_v44  ;;  %v3371_v53 = vrot.slane %v2840_v16, 7  ;;  %v3689_v26 = vpop.f32.mrb[58].mxu0  ;;  %v2842_v39 = vpop.f32.mrb[59].mxu1  ;;  %2259 = vrot.lane.b32.xlu0 %v13515_v57, %s11114_s9  ;;  %3104 = vmatmul.mubr.f32.gmra.mrb[164].mxu1 %v13527_v44  ;;  %v13538_v10 = vmul.f32 %v19099_v54, %v1420_v40  ;;  %v19102_v40 = vld [vmem:[#allocation97_spill] sm:$0xff] }
 0x246   : > { %19096 = vst [vmem:[#allocation242_spill] sm:$0xff] %v13523_v18  ;;  %v3691_v61 = vpop.f32.mrb[59].mxu0  ;;  %3953 = vmatmul.mubr.f32.gmra.mrb[164].mxu0 %v13527_v44  ;;  %9649 = vmatprep.mubr.msk.f32.mxu1 %vm2415_vm1, %v12972_v33  ;;  %v1232_v16 = vadd.f32 %v13553_v58, %v19102_v40 }
 0x247   : > { %v3585_v6 = vsel %vm3479_vm2, %v3370_v15, %v3371_v53  ;;  %9781 = vmatprep.mubr.msk.f32.mxu0 %vm2415_vm1, %v12972_v33  ;;  %v2204_v48 = vpop.permute.xlu0 %2203  ;;  %v1421_v15 = vmax.f32 %v1227_v41, 0.0 }
 0x248   : > { %v13544_v39 = vadd.f32 %v3689_v26, %v3585_v6  ;;  %v2845_v30 = vpop.f32.mrb[60].mxu1  ;;  %v13548_v61 = vsel %vm2415_vm1, %v12855_v0, %v2204_v48  ;;  %v19103_v6 = vld [vmem:[#allocation225_spill] sm:$0xff] }
 0x249   : > { %19101 = vst [vmem:[#allocation244_spill] sm:$0xff] %v13548_v61  ;;  %v3372_v54 = vrot.slane %v2845_v30, 7  ;;  %v3694_v18 = vpop.f32.mrb[60].mxu0  ;;  %v2847_v44 = vpop.f32.mrb[61].mxu1  ;;  %2261 = vrot.lane.b32.xlu0 %v13538_v10, %s11114_s9  ;;  %3109 = vmatmul.mubr.f32.gmra.mrb[166].mxu1 %v13548_v61  ;;  %v13564_v48 = vmul.f32 %v19103_v6, %v1421_v15 }
 0x24a   : > { %19100 = vst [vmem:[#allocation98_spill] sm:$0xff] %v13544_v39  ;;  %v3696_v26 = vpop.f32.mrb[61].mxu0  ;;  %3958 = vmatmul.mubr.f32.gmra.mrb[166].mxu0 %v13548_v61  ;;  %9650 = vmatprep.mubr.msk.f32.mxu1 %vm2415_vm1, %v12996_v47  ;;  %v1422_v39 = vmax.f32 %v1232_v16, 0.0  ;;  %v19106_v61 = vld [vmem:[#allocation103_spill] sm:$0xff] }
 0x24b   : > { %v3584_v41 = vsel %vm3479_vm2, %v3371_v53, %v3372_v54  ;;  %9782 = vmatprep.mubr.msk.f32.mxu0 %vm2415_vm1, %v12996_v47  ;;  %v2206_v44 = vpop.permute.xlu0 %2205  ;;  %v1237_v0 = vadd.f32 %v13553_v58, %v19106_v61 }
 0x24c   : > { %v13570_v30 = vadd.f32 %v3694_v18, %v3584_v41  ;;  %v2850_v40 = vpop.f32.mrb[62].mxu1  ;;  %v13574_v26 = vsel %vm2415_vm1, %v12875_v55, %v2206_v44  ;;  %v19107_v18 = vld [vmem:[#allocation36_spill] sm:$0xff] }
 0x24d   : > { %19105 = vst [vmem:[#allocation245_spill] sm:$0xff] %v13574_v26  ;;  %v3373_v15 = vrot.slane %v2850_v40, 7  ;;  %v3699_v6 = vpop.f32.mrb[62].mxu0  ;;  %v2852_v60 = vpop.f32.mrb[63].mxu1  ;;  %2263 = vrot.lane.b32.xlu0 %v13564_v48, %s11114_s9  ;;  %3114 = vmatmul.mubr.f32.gmra.mrb[168].mxu1 %v13574_v26  ;;  %v13585_v41 = vmul.f32 %v19107_v18, %v1422_v39 }
 0x24e   : > { %19104 = vst [vmem:[#allocation97_spill] sm:$0xff] %v13570_v30  ;;  %v3701_v53 = vpop.f32.mrb[63].mxu0  ;;  %3963 = vmatmul.mubr.f32.gmra.mrb[168].mxu0 %v13574_v26  ;;  %9651 = vmatprep.mubr.msk.f32.mxu1 %vm2415_vm1, %v13017_v29  ;;  %v19110_v30 = vld [vmem:[#allocation107_spill] sm:$0xff] }
 0x24f   : > { %v3583_v61 = vsel %vm3479_vm2, %v3372_v54, %v3373_v15  ;;  %9783 = vmatprep.mubr.msk.f32.mxu0 %vm2415_vm1, %v13017_v29  ;;  %v2208_v60 = vpop.permute.xlu0 %2207  ;;  %v1423_v53 = vmax.f32 %v1237_v0, 0.0  ;;  %v1247_v26 = vadd.f32 %v13553_v58, %v19110_v30 }
 0x250   : > { %v13591_v16 = vadd.f32 %v3699_v6, %v3583_v61  ;;  %v2855_v44 = vpop.f32.mrb[64].mxu1  ;;  %v13595_v40 = vsel %vm2415_vm1, %v12894_v4, %v2208_v60  ;;  %v19111_v6 = vld [vmem:[#allocation34_spill] sm:$0xff] }
 0x251   : > { %19109 = vst [vmem:[#allocation246_spill] sm:$0xff] %v13595_v40  ;;  %v3374_v39 = vrot.slane %v2855_v44, 7  ;;  %v3704_v18 = vpop.f32.mrb[64].mxu0  ;;  %v2857_v55 = vpop.f32.mrb[65].mxu1  ;;  %2265 = vrot.lane.b32.xlu0 %v13585_v41, %s11114_s9  ;;  %3119 = vmatmul.mubr.f32.gmra.mrb[170].mxu1 %v13595_v40  ;;  %v13606_v61 = vmul.f32 %v19111_v6, %v1423_v53  ;;  %v9854_v53 = vld [vmem:[%s18265_s3 + $0x228] sm:$0xff] }
 0x252   : > { %19108 = vst [vmem:[#allocation103_spill] sm:$0xff] %v13591_v16  ;;  %v3706_v54 = vpop.f32.mrb[65].mxu0  ;;  %3968 = vmatmul.mubr.f32.gmra.mrb[170].mxu0 %v13595_v40  ;;  %9652 = vmatprep.mubr.msk.f32.mxu1 %vm2415_vm1, %v13047_v51  ;;  %v19114_v6 = vld [vmem:[#allocation111_spill] sm:$0xff] }
 0x253   : > { %v3582_v0 = vsel %vm3479_vm2, %v3373_v15, %v3374_v39  ;;  %9784 = vmatprep.mubr.msk.f32.mxu0 %vm2415_vm1, %v13047_v51  ;;  %v2210_v55 = vpop.permute.xlu0 %2209  ;;  %v9853_v54 = vld [vmem:[%s18265_s3 + $0x220] sm:$0xff]  ;;  %v1425_v15 = vmax.f32 %v1247_v26, 0.0  ;;  %v1257_v16 = vadd.f32 %v13553_v58, %v19114_v6 }
 0x254   : > { %v13612_v30 = vadd.f32 %v3704_v18, %v3582_v0  ;;  %v2860_v60 = vpop.f32.mrb[66].mxu1  ;;  %v13616_v44 = vsel %vm2415_vm1, %v12913_v31, %v2210_v55  ;;  %v10582_v55 = vpack.c.bf16 %v9854_v53, %v9853_v54 }
 0x255   : > { %19113 = vst [vmem:[#allocation247_spill] sm:$0xff] %v13616_v44  ;;  %v3375_v40 = vrot.slane %v2860_v60, 7  ;;  %v3709_v18 = vpop.f32.mrb[66].mxu0  ;;  %v2862_v0 = vpop.f32.mrb[67].mxu1  ;;  %2267 = vrot.lane.b32.xlu0 %v13606_v61, %s11114_s9  ;;  %3124 = vmatmul.mubr.f32.gmra.mrb[172].mxu1 %v13616_v44  ;;  %v13633_v26 = vmul.f32 %v13002_v34, %v1425_v15  ;;  %v1427_v53 = vmax.f32 %v1257_v16, 0.0  ;;  %v19117_v15 = vld [vmem:[#allocation115_spill] sm:$0xff] }
 0x256   : > { %19112 = vst [vmem:[#allocation107_spill] sm:$0xff] %v13612_v30  ;;  %v3711_v30 = vpop.f32.mrb[67].mxu0  ;;  %3973 = vmatmul.mubr.f32.gmra.mrb[172].mxu0 %v13616_v44  ;;  %9653 = vmatprep.mubr.msk.f32.mxu1 %vm2415_vm1, %v13068_v59  ;;  %v1267_v34 = vadd.f32 %v13553_v58, %v19117_v15 }
 0x257   : > { %v3581_v6 = vsel %vm3479_vm2, %v3374_v39, %v3375_v40  ;;  %9785 = vmatprep.mubr.msk.f32.mxu0 %vm2415_vm1, %v13068_v59  ;;  %v2212_v60 = vpop.permute.xlu0 %2211  ;;  %10583 = vmatpush1.bf16.msra.mxu1 %v10582_v55  ;;  %v13655_v55 = vmul.f32 %v13053_v1, %v1427_v53 }
 0x258   : > { %v13639_v0 = vadd.f32 %v3709_v18, %v3581_v6  ;;  %v2865_v54 = vpop.f32.mrb[68].mxu1  ;;  %v13643_v30 = vsel %vm2415_vm1, %v12932_v17, %v2212_v60  ;;  %10584 = vmatprep.subr.bf16.mxu1 %v18877_v3  ;;  %v1429_v15 = vmax.f32 %v1267_v34, 0.0 }
 0x259   : > { %19116 = vst [vmem:[#allocation248_spill] sm:$0xff] %v13643_v30  ;;  %v3376_v44 = vrot.slane %v2865_v54, 7  ;;  %v3714_v39 = vpop.f32.mrb[68].mxu0  ;;  %v2867_v31 = vpop.f32.mrb[69].mxu1  ;;  %2271 = vrot.lane.b32.xlu0 %v13633_v26, %s11114_s9  ;;  %3129 = vmatmul.mubr.f32.gmra.mrb[174].mxu1 %v13643_v30  ;;  %19118 = vst [vmem:[#allocation115_spill] sm:$0xff] %v13655_v55 }
 0x25a   : > { %19115 = vst [vmem:[#allocation111_spill] sm:$0xff] %v13639_v0  ;;  %v3716_v18 = vpop.f32.mrb[69].mxu0  ;;  %3978 = vmatmul.mubr.f32.gmra.mrb[174].mxu0 %v13643_v30  ;;  %9654 = vmatprep.mubr.msk.f32.mxu1 %vm2415_vm1, %v13093_v45 }
 0x25b   : > { %v3580_v16 = vsel %vm3479_vm2, %v3375_v40, %v3376_v44  ;;  %9786 = vmatprep.mubr.msk.f32.mxu0 %vm2415_vm1, %v13093_v45  ;;  %v2214_v31 = vpop.permute.xlu0 %2213  ;;  %v19121_v18 = vld [vmem:[#allocation119_spill] sm:$0xff] }
 0x25c   : > { %v13661_v6 = vadd.f32 %v3714_v39, %v3580_v16  ;;  %v2870_v60 = vpop.f32.mrb[70].mxu1  ;;  %v13665_v54 = vsel %vm2415_vm1, %v12953_v56, %v2214_v31  ;;  %v1277_v0 = vadd.f32 %v13553_v58, %v19121_v18  ;;  %v13676_v39 = vmul.f32 %v13099_v52, %v1429_v15 }
 0x25d   : > { %19120 = vst [vmem:[#allocation250_spill] sm:$0xff] %v13665_v54  ;;  %v3377_v53 = vrot.slane %v2870_v60, 7  ;;  %v3719_v1 = vpop.f32.mrb[70].mxu0  ;;  %v2872_v30 = vpop.f32.mrb[71].mxu1  ;;  %2275 = vrot.lane.b32.xlu0 %v13655_v55, %s11114_s9  ;;  %3134 = vmatmul.mubr.f32.gmra.mrb[176].mxu1 %v13665_v54 }
 0x25e   : > { %19119 = vst [vmem:[#allocation249_spill] sm:$0xff] %v13661_v6  ;;  %v3721_v40 = vpop.f32.mrb[71].mxu0  ;;  %3983 = vmatmul.mubr.f32.gmra.mrb[176].mxu0 %v13665_v54  ;;  %9655 = vmatprep.mubr.msk.f32.mxu1 %vm2415_vm1, %v13114_v21  ;;  %v1431_v18 = vmax.f32 %v1277_v0, 0.0 }
 0x25f   : > { %v3579_v34 = vsel %vm3479_vm2, %v3376_v44, %v3377_v53  ;;  %9787 = vmatprep.mubr.msk.f32.mxu0 %vm2415_vm1, %v13114_v21  ;;  %v2216_v30 = vpop.permute.xlu0 %2215  ;;  %v19124_v40 = vld [vmem:[#allocation123_spill] sm:$0xff] }
 0x260   : > { %v13682_v16 = vadd.f32 %v3719_v1, %v3579_v34  ;;  %v2875_v31 = vpop.f32.mrb[72].mxu1  ;;  %v13686_v60 = vsel %vm2415_vm1, %v12972_v33, %v2216_v30  ;;  %v1287_v6 = vadd.f32 %v13553_v58, %v19124_v40  ;;  %v13697_v1 = vmul.f32 %v13144_v24, %v1431_v18 }
 0x261   : > { %19123 = vst [vmem:[#allocation251_spill] sm:$0xff] %v13686_v60  ;;  %v3378_v15 = vrot.slane %v2875_v31, 7  ;;  %v3724_v52 = vpop.f32.mrb[72].mxu0  ;;  %v2877_v54 = vpop.f32.mrb[73].mxu1  ;;  %2279 = vrot.lane.b32.xlu0 %v13676_v39, %s11114_s9  ;;  %3139 = vmatmul.mubr.f32.gmra.mrb[178].mxu1 %v13686_v60 }
 0x262   : > { %19122 = vst [vmem:[#allocation119_spill] sm:$0xff] %v13682_v16  ;;  %v3726_v44 = vpop.f32.mrb[73].mxu0  ;;  %3988 = vmatmul.mubr.f32.gmra.mrb[178].mxu0 %v13686_v60  ;;  %9656 = vmatprep.mubr.msk.f32.mxu1 %vm2415_vm1, %v13138_v28  ;;  %19125 = vst [vmem:[#allocation123_spill] sm:$0xff] %v13697_v1  ;;  %v1433_v40 = vmax.f32 %v1287_v6, 0.0 }
 0x263   : > { %v3578_v0 = vsel %vm3479_vm2, %v3377_v53, %v3378_v15  ;;  %9788 = vmatprep.mubr.msk.f32.mxu0 %vm2415_vm1, %v13138_v28  ;;  %v2218_v54 = vpop.permute.xlu0 %2217  ;;  %v19128_v44 = vld [vmem:[#allocation127_spill] sm:$0xff] }
 0x264   : > { %v13703_v34 = vadd.f32 %v3724_v52, %v3578_v0  ;;  %v2880_v30 = vpop.f32.mrb[74].mxu1  ;;  %v13707_v31 = vsel %vm2415_vm1, %v12996_v47, %v2218_v54  ;;  %v1297_v16 = vadd.f32 %v13553_v58, %v19128_v44  ;;  %v13718_v52 = vmul.f32 %v13189_v50, %v1433_v40 }
 0x265   : > { %19127 = vst [vmem:[#allocation253_spill] sm:$0xff] %v13707_v31  ;;  %v3379_v18 = vrot.slane %v2880_v30, 7  ;;  %v3729_v24 = vpop.f32.mrb[74].mxu0  ;;  %v2882_v60 = vpop.f32.mrb[75].mxu1  ;;  %2283 = vrot.lane.b32.xlu0 %v13697_v1, %s11114_s9  ;;  %3144 = vmatmul.mubr.f32.gmra.mrb[180].mxu1 %v13707_v31 }
 0x266   : > { %19126 = vst [vmem:[#allocation252_spill] sm:$0xff] %v13703_v34  ;;  %v3731_v53 = vpop.f32.mrb[75].mxu0  ;;  %3993 = vmatmul.mubr.f32.gmra.mrb[180].mxu0 %v13707_v31  ;;  %9657 = vmatprep.mubr.msk.f32.mxu1 %vm2415_vm1, %v13159_v27  ;;  %v1435_v44 = vmax.f32 %v1297_v16, 0.0 }
 0x267   : > { %v3577_v6 = vsel %vm3479_vm2, %v3378_v15, %v3379_v18  ;;  %9789 = vmatprep.mubr.msk.f32.mxu0 %vm2415_vm1, %v13159_v27  ;;  %v2220_v60 = vpop.permute.xlu0 %2219  ;;  %v19131_v53 = vld [vmem:[#allocation132_spill] sm:$0xff] }
 0x268   : > { %v13724_v0 = vadd.f32 %v3729_v24, %v3577_v6  ;;  %v2885_v54 = vpop.f32.mrb[76].mxu1  ;;  %v13728_v30 = vsel %vm2415_vm1, %v13017_v29, %v2220_v60  ;;  %v1307_v34 = vadd.f32 %v13553_v58, %v19131_v53  ;;  %v13739_v24 = vmul.f32 %v13234_v8, %v1435_v44 }
 0x269   : > { %19130 = vst [vmem:[#allocation254_spill] sm:$0xff] %v13728_v30  ;;  %v3380_v40 = vrot.slane %v2885_v54, 7  ;;  %v3734_v50 = vpop.f32.mrb[76].mxu0  ;;  %v2887_v31 = vpop.f32.mrb[77].mxu1  ;;  %2287 = vrot.lane.b32.xlu0 %v13718_v52, %s11114_s9  ;;  %3149 = vmatmul.mubr.f32.gmra.mrb[182].mxu1 %v13728_v30 }
 0x26a   : > { %19129 = vst [vmem:[#allocation127_spill] sm:$0xff] %v13724_v0  ;;  %v3736_v15 = vpop.f32.mrb[77].mxu0  ;;  %3998 = vmatmul.mubr.f32.gmra.mrb[182].mxu0 %v13728_v30  ;;  %9658 = vmatprep.mubr.msk.f32.mxu1 %vm2415_vm1, %v13183_v36  ;;  %v1437_v53 = vmax.f32 %v1307_v34, 0.0 }
 0x26b   : > { %v3576_v16 = vsel %vm3479_vm2, %v3379_v18, %v3380_v40  ;;  %9790 = vmatprep.mubr.msk.f32.mxu0 %vm2415_vm1, %v13183_v36  ;;  %v2222_v31 = vpop.permute.xlu0 %2221  ;;  %v19133_v15 = vld [vmem:[#allocation136_spill] sm:$0xff] }
 0x26c   : > { %v13745_v6 = vadd.f32 %v3734_v50, %v3576_v16  ;;  %v2890_v60 = vpop.f32.mrb[78].mxu1  ;;  %v13749_v54 = vsel %vm2415_vm1, %v13047_v51, %v2222_v31  ;;  %v1317_v0 = vadd.f32 %v13553_v58, %v19133_v15  ;;  %v13760_v50 = vmul.f32 %v13286_v14, %v1437_v53 }
 0x26d   : > { %v3381_v44 = vrot.slane %v2890_v60, 7  ;;  %v3739_v8 = vpop.f32.mrb[78].mxu0  ;;  %v2892_v30 = vpop.f32.mrb[79].mxu1  ;;  %2291 = vrot.lane.b32.xlu0 %v13739_v24, %s11114_s9  ;;  %3154 = vmatmul.mubr.f32.gmra.mrb[184].mxu1 %v13749_v54 }
 0x26e   : > { %19132 = vst [vmem:[#allocation132_spill] sm:$0xff] %v13745_v6  ;;  %v3741_v18 = vpop.f32.mrb[79].mxu0  ;;  %4003 = vmatmul.mubr.f32.gmra.mrb[184].mxu0 %v13749_v54  ;;  %9659 = vmatprep.mubr.msk.f32.mxu1 %vm2415_vm1, %v13204_v20  ;;  %v13766_v30 = vpop.permute.xlu1 %1860  ;;  %v1439_v15 = vmax.f32 %v1317_v0, 0.0 }
 0x26f   : > { %v3575_v58 = vsel %vm3479_vm2, %v3380_v40, %v3381_v44  ;;  %9791 = vmatprep.mubr.msk.f32.mxu0 %vm2415_vm1, %v13204_v20  ;;  %v2224_v34 = vpop.permute.xlu0 %2223  ;;  %19134 = vst [vmem:[#allocation136_spill] sm:$0xff] %v13766_v30 }
 0x270   : > { %v13768_v16 = vadd.f32 %v3739_v8, %v3575_v58  ;;  %v2895_v31 = vpop.f32.mrb[80].mxu1  ;;  %v13772_v60 = vsel %vm2415_vm1, %v13068_v59, %v2224_v34  ;;  %v13781_v8 = vmul.f32 %v13766_v30, %v1439_v15 }
 0x271   : > { %19136 = vst [vmem:[#allocation256_spill] sm:$0xff] %v13772_v60  ;;  %v3382_v18 = vrot.slane %v2895_v31, 7  ;;  %v3744_v53 = vpop.f32.mrb[80].mxu0  ;;  %v2897_v14 = vpop.f32.mrb[81].mxu1  ;;  %2295 = vrot.lane.b32.xlu0 %v13760_v50, %s11114_s9  ;;  %3159 = vmatmul.mubr.f32.gmra.mrb[186].mxu1 %v13772_v60 }
 0x272   : > { %19135 = vst [vmem:[#allocation255_spill] sm:$0xff] %v13768_v16  ;;  %v3746_v40 = vpop.f32.mrb[81].mxu0  ;;  %4008 = vmatmul.mubr.f32.gmra.mrb[186].mxu0 %v13772_v60  ;;  %9660 = vmatprep.mubr.msk.f32.mxu1 %vm2415_vm1, %v13228_v7  ;;  %19137 = vst [vmem:[#allocation257_spill] sm:$0xff] %v13781_v8 }
 0x273   : > { %v3574_v0 = vsel %vm3479_vm2, %v3381_v44, %v3382_v18  ;;  %9792 = vmatprep.mubr.msk.f32.mxu0 %vm2415_vm1, %v13228_v7  ;;  %v2226_v14 = vpop.permute.xlu0 %2225 }
 0x274   : > { %v13787_v58 = vadd.f32 %v3744_v53, %v3574_v0  ;;  %v2900_v34 = vpop.f32.mrb[82].mxu1  ;;  %v13791_v31 = vsel %vm2415_vm1, %v13093_v45, %v2226_v14 }
 0x275   : > { %19139 = vst [vmem:[#allocation259_spill] sm:$0xff] %v13791_v31  ;;  %v3383_v40 = vrot.slane %v2900_v34, 7  ;;  %v3749_v16 = vpop.f32.mrb[82].mxu0  ;;  %v2902_v60 = vpop.f32.mrb[83].mxu1  ;;  %2299 = vrot.lane.b32.xlu0 %v13781_v8, %s11114_s9  ;;  %3164 = vmatmul.mubr.f32.gmra.mrb[188].mxu1 %v13791_v31  ;;  %v9855_v34 = vld [vmem:[%s18265_s3 + $0x230] sm:$0xff] }
 0x276   : > { %19138 = vst [vmem:[#allocation258_spill] sm:$0xff] %v13787_v58  ;;  %v3751_v44 = vpop.f32.mrb[83].mxu0  ;;  %4013 = vmatmul.mubr.f32.gmra.mrb[188].mxu0 %v13791_v31  ;;  %9661 = vmatprep.mubr.msk.f32.mxu1 %vm2415_vm1, %v13255_v9  ;;  %v19142_v31 = vld [vmem:[#allocation153_spill] sm:$0xff] }
 0x277   : > { %v3573_v15 = vsel %vm3479_vm2, %v3382_v18, %v3383_v40  ;;  %9793 = vmatprep.mubr.msk.f32.mxu0 %vm2415_vm1, %v13255_v9  ;;  %v2228_v53 = vpop.permute.xlu0 %2227  ;;  %v9856_v44 = vld [vmem:[%s18265_s3 + $0x238] sm:$0xff] }
 0x278   : > { %v13803_v0 = vadd.f32 %v3749_v16, %v3573_v15  ;;  %v2905_v60 = vpop.f32.mrb[84].mxu1  ;;  %v13807_v14 = vsel %vm2415_vm1, %v13114_v21, %v2228_v53  ;;  %v10585_v16 = vpack.c.bf16 %v9856_v44, %v9855_v34 }
 0x279   : > { %19141 = vst [vmem:[#allocation261_spill] sm:$0xff] %v13807_v14  ;;  %v3384_v18 = vrot.slane %v2905_v60, 7  ;;  %v3754_v30 = vpop.f32.mrb[84].mxu0  ;;  %v2907_v58 = vpop.f32.mrb[85].mxu1  ;;  %2303 = vrot.lane.b32.xlu0 %v19142_v31, %s11114_s9  ;;  %3169 = vmatmul.mubr.f32.gmra.mrb[190].mxu1 %v13807_v14 }
 0x27a   : > { %19140 = vst [vmem:[#allocation260_spill] sm:$0xff] %v13803_v0  ;;  %v3756_v15 = vpop.f32.mrb[85].mxu0  ;;  %4018 = vmatmul.mubr.f32.gmra.mrb[190].mxu0 %v13807_v14  ;;  %9662 = vmatprep.mubr.msk.f32.mxu1 %vm2415_vm1, %v13280_v49 }
 0x27b   : > { %v3572_v53 = vsel %vm3479_vm2, %v3383_v40, %v3384_v18  ;;  %9794 = vmatprep.mubr.msk.f32.mxu0 %vm2415_vm1, %v13280_v49  ;;  %v2230_v60 = vpop.permute.xlu0 %2229  ;;  %10586 = vmatpush1.bf16.msra.mxu1 %v10585_v16 }
 0x27c   : > { %v13825_v58 = vadd.f32 %v3754_v30, %v3572_v53  ;;  %v2910_v0 = vpop.f32.mrb[86].mxu1  ;;  %v13829_v34 = vsel %vm2415_vm1, %v13138_v28, %v2230_v60 }
 0x27d   : > { %v3385_v44 = vrot.slane %v2910_v0, 7  ;;  %v3759_v15 = vpop.f32.mrb[86].mxu0  ;;  %v2912_v14 = vpop.f32.mrb[87].mxu1  ;;  %3174 = vmatmul.mubr.f32.gmra.mrb[192].mxu1 %v13829_v34 }
 0x27e   : > { %19143 = vst [vmem:[#allocation262_spill] sm:$0xff] %v13825_v58  ;;  %v3761_v6 = vpop.f32.mrb[87].mxu0  ;;  %4023 = vmatmul.mubr.f32.gmra.mrb[192].mxu0 %v13829_v34  ;;  %9663 = vmatprep.mubr.msk.f32.mxu1 %vm2415_vm1, %v13301_v23 }
 0x27f   : > { %v3571_v30 = vsel %vm3479_vm2, %v3384_v18, %v3385_v44  ;;  %9795 = vmatprep.mubr.msk.f32.mxu0 %vm2415_vm1, %v13301_v23  ;;  %v2232_v40 = vpop.permute.xlu0 %2231 }
 0x280   : > { %v13839_v16 = vadd.f32 %v3759_v15, %v3571_v30  ;;  %v2915_v0 = vpop.f32.mrb[88].mxu1  ;;  %v13843_v14 = vsel %vm2415_vm1, %v13159_v27, %v2232_v40 }
 0x281   : > { %19145 = vst [vmem:[#allocation264_spill] sm:$0xff] %v13843_v14  ;;  %v3386_v6 = vrot.slane %v2915_v0, 7  ;;  %v3764_v53 = vpop.f32.mrb[88].mxu0  ;;  %v2917_v60 = vpop.f32.mrb[89].mxu1  ;;  %3179 = vmatmul.mubr.f32.gmra.mrb[194].mxu1 %v13843_v14 }
 0x282   : > { %19144 = vst [vmem:[#allocation263_spill] sm:$0xff] %v13839_v16  ;;  %v3766_v58 = vpop.f32.mrb[89].mxu0  ;;  %4028 = vmatmul.mubr.f32.gmra.mrb[194].mxu0 %v13843_v14  ;;  %9664 = vmatprep.mubr.msk.f32.mxu1 %vm2415_vm1, %v13323_v35 }
 0x283   : > { %v3570_v18 = vsel %vm3479_vm2, %v3385_v44, %v3386_v6  ;;  %9796 = vmatprep.mubr.msk.f32.mxu0 %vm2415_vm1, %v13323_v35  ;;  %v2234_v15 = vpop.permute.xlu0 %2233 }
 0x284   : > { %v13853_v30 = vadd.f32 %v3764_v53, %v3570_v18  ;;  %v2920_v40 = vpop.f32.mrb[90].mxu1  ;;  %v13857_v0 = vsel %vm2415_vm1, %v13183_v36, %v2234_v15 }
 0x285   : > { %19147 = vst [vmem:[#allocation266_spill] sm:$0xff] %v13857_v0  ;;  %v3387_v58 = vrot.slane %v2920_v40, 7  ;;  %v3769_v60 = vpop.f32.mrb[90].mxu0  ;;  %v2922_v16 = vpop.f32.mrb[91].mxu1  ;;  %3184 = vmatmul.mubr.f32.gmra.mrb[196].mxu1 %v13857_v0 }
 0x286   : > { %19146 = vst [vmem:[#allocation265_spill] sm:$0xff] %v13853_v30  ;;  %v3771_v14 = vpop.f32.mrb[91].mxu0  ;;  %4033 = vmatmul.mubr.f32.gmra.mrb[196].mxu0 %v13857_v0  ;;  %9665 = vmatprep.mubr.msk.f32.mxu1 %vm2415_vm1, %v13342_v5 }
 0x287   : > { %v3569_v44 = vsel %vm3479_vm2, %v3386_v6, %v3387_v58  ;;  %9797 = vmatprep.mubr.msk.f32.mxu0 %vm2415_vm1, %v13342_v5  ;;  %v2236_v53 = vpop.permute.xlu0 %2235 }
 0x288   : > { %v13867_v18 = vadd.f32 %v3769_v60, %v3569_v44  ;;  %v2925_v15 = vpop.f32.mrb[92].mxu1  ;;  %v13871_v16 = vsel %vm2415_vm1, %v13204_v20, %v2236_v53 }
 0x289   : > { %19149 = vst [vmem:[#allocation268_spill] sm:$0xff] %v13871_v16  ;;  %v3388_v14 = vrot.slane %v2925_v15, 7  ;;  %v3774_v40 = vpop.f32.mrb[92].mxu0  ;;  %v2927_v30 = vpop.f32.mrb[93].mxu1  ;;  %3189 = vmatmul.mubr.f32.gmra.mrb[198].mxu1 %v13871_v16 }
 0x28a   : > { %19148 = vst [vmem:[#allocation267_spill] sm:$0xff] %v13867_v18  ;;  %v3776_v0 = vpop.f32.mrb[93].mxu0  ;;  %4038 = vmatmul.mubr.f32.gmra.mrb[198].mxu0 %v13871_v16  ;;  %9666 = vmatprep.mubr.msk.f32.mxu1 %vm2415_vm1, %v13361_v42 }
 0x28b   : > { %v3568_v6 = vsel %vm3479_vm2, %v3387_v58, %v3388_v14  ;;  %9798 = vmatprep.mubr.msk.f32.mxu0 %vm2415_vm1, %v13361_v42  ;;  %v2238_v60 = vpop.permute.xlu0 %2237 }
 0x28c   : > { %v13881_v44 = vadd.f32 %v3774_v40, %v3568_v6  ;;  %v2930_v53 = vpop.f32.mrb[94].mxu1  ;;  %v13885_v30 = vsel %vm2415_vm1, %v13228_v7, %v2238_v60 }
 0x28d   : > { %19151 = vst [vmem:[#allocation270_spill] sm:$0xff] %v13885_v30  ;;  %v3389_v0 = vrot.slane %v2930_v53, 7  ;;  %v3779_v15 = vpop.f32.mrb[94].mxu0  ;;  %v2932_v18 = vpop.f32.mrb[95].mxu1  ;;  %3194 = vmatmul.mubr.f32.gmra.mrb[200].mxu1 %v13885_v30 }
 0x28e   : > { %19150 = vst [vmem:[#allocation269_spill] sm:$0xff] %v13881_v44  ;;  %v3781_v16 = vpop.f32.mrb[95].mxu0  ;;  %4043 = vmatmul.mubr.f32.gmra.mrb[200].mxu0 %v13885_v30  ;;  %9667 = vmatprep.mubr.msk.f32.mxu1 %vm2415_vm1, %v13380_v2 }
 0x28f   : > { %v3567_v58 = vsel %vm3479_vm2, %v3388_v14, %v3389_v0  ;;  %9799 = vmatprep.mubr.msk.f32.mxu0 %vm2415_vm1, %v13380_v2  ;;  %v2240_v40 = vpop.permute.xlu0 %2239 }
 0x290   : > { %v13895_v6 = vadd.f32 %v3779_v15, %v3567_v58  ;;  %v2935_v60 = vpop.f32.mrb[96].mxu1  ;;  %v13899_v18 = vsel %vm2415_vm1, %v13255_v9, %v2240_v40 }
 0x291   : > { %19153 = vst [vmem:[#allocation272_spill] sm:$0xff] %v13899_v18  ;;  %v3390_v16 = vrot.slane %v2935_v60, 7  ;;  %v3784_v53 = vpop.f32.mrb[96].mxu0  ;;  %v2937_v44 = vpop.f32.mrb[97].mxu1  ;;  %3199 = vmatmul.mubr.f32.gmra.mrb[202].mxu1 %v13899_v18 }
 0x292   : > { %19152 = vst [vmem:[#allocation271_spill] sm:$0xff] %v13895_v6  ;;  %v3786_v30 = vpop.f32.mrb[97].mxu0  ;;  %4048 = vmatmul.mubr.f32.gmra.mrb[202].mxu0 %v13899_v18  ;;  %9668 = vmatprep.mubr.msk.f32.mxu1 %vm2415_vm1, %v13397_v32 }
 0x293   : > { %v3566_v14 = vsel %vm3479_vm2, %v3389_v0, %v3390_v16  ;;  %9800 = vmatprep.mubr.msk.f32.mxu0 %vm2415_vm1, %v13397_v32  ;;  %v2242_v15 = vpop.permute.xlu0 %2241 }
 0x294   : > { %v13909_v58 = vadd.f32 %v3784_v53, %v3566_v14  ;;  %v2940_v40 = vpop.f32.mrb[98].mxu1  ;;  %v13913_v44 = vsel %vm2415_vm1, %v13280_v49, %v2242_v15 }
 0x295   : > { %19155 = vst [vmem:[#allocation274_spill] sm:$0xff] %v13913_v44  ;;  %v3391_v30 = vrot.slane %v2940_v40, 7  ;;  %v3789_v60 = vpop.f32.mrb[98].mxu0  ;;  %v2942_v6 = vpop.f32.mrb[99].mxu1  ;;  %3204 = vmatmul.mubr.f32.gmra.mrb[204].mxu1 %v13913_v44 }
 0x296   : > { %19154 = vst [vmem:[#allocation273_spill] sm:$0xff] %v13909_v58  ;;  %v3791_v18 = vpop.f32.mrb[99].mxu0  ;;  %4053 = vmatmul.mubr.f32.gmra.mrb[204].mxu0 %v13913_v44  ;;  %9669 = vmatprep.mubr.msk.f32.mxu1 %vm2415_vm1, %v13414_v11 }
 0x297   : > { %v3565_v0 = vsel %vm3479_vm2, %v3390_v16, %v3391_v30  ;;  %9801 = vmatprep.mubr.msk.f32.mxu0 %vm2415_vm1, %v13414_v11  ;;  %v2244_v53 = vpop.permute.xlu0 %2243 }
 0x298   : > { %v13923_v14 = vadd.f32 %v3789_v60, %v3565_v0  ;;  %v2945_v15 = vpop.f32.mrb[100].mxu1  ;;  %v13927_v6 = vsel %vm2415_vm1, %v13301_v23, %v2244_v53 }
 0x299   : > { %19157 = vst [vmem:[#allocation276_spill] sm:$0xff] %v13927_v6  ;;  %v3392_v18 = vrot.slane %v2945_v15, 7  ;;  %v3794_v40 = vpop.f32.mrb[100].mxu0  ;;  %v2947_v58 = vpop.f32.mrb[101].mxu1  ;;  %3209 = vmatmul.mubr.f32.gmra.mrb[206].mxu1 %v13927_v6 }
 0x29a   : > { %19156 = vst [vmem:[#allocation275_spill] sm:$0xff] %v13923_v14  ;;  %v3796_v44 = vpop.f32.mrb[101].mxu0  ;;  %4058 = vmatmul.mubr.f32.gmra.mrb[206].mxu0 %v13927_v6  ;;  %9670 = vmatprep.mubr.msk.f32.mxu1 %vm2415_vm1, %v13437_v38 }
 0x29b   : > { %v3564_v16 = vsel %vm3479_vm2, %v3391_v30, %v3392_v18  ;;  %9802 = vmatprep.mubr.msk.f32.mxu0 %vm2415_vm1, %v13437_v38  ;;  %v2246_v60 = vpop.permute.xlu0 %2245 }
 0x29c   : > { %v13937_v0 = vadd.f32 %v3794_v40, %v3564_v16  ;;  %v2950_v53 = vpop.f32.mrb[102].mxu1  ;;  %v13941_v58 = vsel %vm2415_vm1, %v13323_v35, %v2246_v60 }
 0x29d   : > { %19159 = vst [vmem:[#allocation278_spill] sm:$0xff] %v13941_v58  ;;  %v3393_v44 = vrot.slane %v2950_v53, 7  ;;  %v3799_v15 = vpop.f32.mrb[102].mxu0  ;;  %v2952_v14 = vpop.f32.mrb[103].mxu1  ;;  %3214 = vmatmul.mubr.f32.gmra.mrb[208].mxu1 %v13941_v58 }
 0x29e   : > { %19158 = vst [vmem:[#allocation277_spill] sm:$0xff] %v13937_v0  ;;  %v3801_v6 = vpop.f32.mrb[103].mxu0  ;;  %4063 = vmatmul.mubr.f32.gmra.mrb[208].mxu0 %v13941_v58  ;;  %9671 = vmatprep.mubr.msk.f32.mxu1 %vm2415_vm1, %v13455_v12 }
 0x29f   : > { %v3563_v30 = vsel %vm3479_vm2, %v3392_v18, %v3393_v44  ;;  %9803 = vmatprep.mubr.msk.f32.mxu0 %vm2415_vm1, %v13455_v12  ;;  %v2248_v40 = vpop.permute.xlu0 %2247 }
 0x2a0   : > { %v13951_v16 = vadd.f32 %v3799_v15, %v3563_v30  ;;  %v2955_v60 = vpop.f32.mrb[104].mxu1  ;;  %v13955_v14 = vsel %vm2415_vm1, %v13342_v5, %v2248_v40 }
 0x2a1   : > { %19161 = vst [vmem:[#allocation280_spill] sm:$0xff] %v13955_v14  ;;  %v3394_v6 = vrot.slane %v2955_v60, 7  ;;  %v3804_v53 = vpop.f32.mrb[104].mxu0  ;;  %v2957_v0 = vpop.f32.mrb[105].mxu1  ;;  %3219 = vmatmul.mubr.f32.gmra.mrb[210].mxu1 %v13955_v14 }
 0x2a2   : > { %19160 = vst [vmem:[#allocation279_spill] sm:$0xff] %v13951_v16  ;;  %v3806_v58 = vpop.f32.mrb[105].mxu0  ;;  %4068 = vmatmul.mubr.f32.gmra.mrb[210].mxu0 %v13955_v14  ;;  %9672 = vmatprep.mubr.msk.f32.mxu1 %vm2415_vm1, %v13472_v22 }
 0x2a3   : > { %v3562_v18 = vsel %vm3479_vm2, %v3393_v44, %v3394_v6  ;;  %9804 = vmatprep.mubr.msk.f32.mxu0 %vm2415_vm1, %v13472_v22  ;;  %v2250_v15 = vpop.permute.xlu0 %2249 }
 0x2a4   : > { %v13965_v30 = vadd.f32 %v3804_v53, %v3562_v18  ;;  %v2960_v40 = vpop.f32.mrb[106].mxu1  ;;  %v13969_v0 = vsel %vm2415_vm1, %v13361_v42, %v2250_v15 }
 0x2a5   : > { %19163 = vst [vmem:[#allocation282_spill] sm:$0xff] %v13969_v0  ;;  %v3395_v58 = vrot.slane %v2960_v40, 7  ;;  %v3809_v60 = vpop.f32.mrb[106].mxu0  ;;  %v2962_v16 = vpop.f32.mrb[107].mxu1  ;;  %3224 = vmatmul.mubr.f32.gmra.mrb[212].mxu1 %v13969_v0 }
 0x2a6   : > { %19162 = vst [vmem:[#allocation281_spill] sm:$0xff] %v13965_v30  ;;  %v3811_v14 = vpop.f32.mrb[107].mxu0  ;;  %4073 = vmatmul.mubr.f32.gmra.mrb[212].mxu0 %v13969_v0  ;;  %9673 = vmatprep.mubr.msk.f32.mxu1 %vm2415_vm1, %v13496_v43 }
 0x2a7   : > { %v3561_v44 = vsel %vm3479_vm2, %v3394_v6, %v3395_v58  ;;  %9805 = vmatprep.mubr.msk.f32.mxu0 %vm2415_vm1, %v13496_v43  ;;  %v2252_v53 = vpop.permute.xlu0 %2251 }
 0x2a8   : > { %v13979_v18 = vadd.f32 %v3809_v60, %v3561_v44  ;;  %v2965_v15 = vpop.f32.mrb[108].mxu1  ;;  %v13983_v16 = vsel %vm2415_vm1, %v13380_v2, %v2252_v53 }
 0x2a9   : > { %19165 = vst [vmem:[#allocation284_spill] sm:$0xff] %v13983_v16  ;;  %v3396_v14 = vrot.slane %v2965_v15, 7  ;;  %v3814_v40 = vpop.f32.mrb[108].mxu0  ;;  %v2967_v30 = vpop.f32.mrb[109].mxu1  ;;  %3229 = vmatmul.mubr.f32.gmra.mrb[214].mxu1 %v13983_v16 }
 0x2aa   : > { %19164 = vst [vmem:[#allocation283_spill] sm:$0xff] %v13979_v18  ;;  %v3816_v0 = vpop.f32.mrb[109].mxu0  ;;  %4078 = vmatmul.mubr.f32.gmra.mrb[214].mxu0 %v13983_v16  ;;  %9674 = vmatprep.mubr.msk.f32.mxu1 %vm2415_vm1, %v13515_v57 }
 0x2ab   : > { %v3560_v6 = vsel %vm3479_vm2, %v3395_v58, %v3396_v14  ;;  %9806 = vmatprep.mubr.msk.f32.mxu0 %vm2415_vm1, %v13515_v57  ;;  %v2254_v60 = vpop.permute.xlu0 %2253 }
 0x2ac   : > { %v13993_v44 = vadd.f32 %v3814_v40, %v3560_v6  ;;  %v2970_v53 = vpop.f32.mrb[110].mxu1  ;;  %v13997_v30 = vsel %vm2415_vm1, %v13397_v32, %v2254_v60 }
 0x2ad   : > { %19167 = vst [vmem:[#allocation286_spill] sm:$0xff] %v13997_v30  ;;  %v3397_v0 = vrot.slane %v2970_v53, 7  ;;  %v3819_v15 = vpop.f32.mrb[110].mxu0  ;;  %v2972_v18 = vpop.f32.mrb[111].mxu1  ;;  %3234 = vmatmul.mubr.f32.gmra.mrb[216].mxu1 %v13997_v30 }
 0x2ae   : > { %19166 = vst [vmem:[#allocation285_spill] sm:$0xff] %v13993_v44  ;;  %v3821_v16 = vpop.f32.mrb[111].mxu0  ;;  %4083 = vmatmul.mubr.f32.gmra.mrb[216].mxu0 %v13997_v30  ;;  %9675 = vmatprep.mubr.msk.f32.mxu1 %vm2415_vm1, %v13538_v10 }
 0x2af   : > { %v3559_v58 = vsel %vm3479_vm2, %v3396_v14, %v3397_v0  ;;  %9807 = vmatprep.mubr.msk.f32.mxu0 %vm2415_vm1, %v13538_v10  ;;  %v2256_v40 = vpop.permute.xlu0 %2255 }
 0x2b0   : > { %v14007_v6 = vadd.f32 %v3819_v15, %v3559_v58  ;;  %v2975_v60 = vpop.f32.mrb[112].mxu1  ;;  %v14011_v18 = vsel %vm2415_vm1, %v13414_v11, %v2256_v40 }
 0x2b1   : > { %19169 = vst [vmem:[#allocation288_spill] sm:$0xff] %v14011_v18  ;;  %v3398_v16 = vrot.slane %v2975_v60, 7  ;;  %v3824_v53 = vpop.f32.mrb[112].mxu0  ;;  %v2977_v44 = vpop.f32.mrb[113].mxu1  ;;  %3239 = vmatmul.mubr.f32.gmra.mrb[218].mxu1 %v14011_v18 }
 0x2b2   : > { %19168 = vst [vmem:[#allocation287_spill] sm:$0xff] %v14007_v6  ;;  %v3826_v30 = vpop.f32.mrb[113].mxu0  ;;  %4088 = vmatmul.mubr.f32.gmra.mrb[218].mxu0 %v14011_v18  ;;  %9676 = vmatprep.mubr.msk.f32.mxu1 %vm2415_vm1, %v13564_v48 }
 0x2b3   : > { %v3558_v14 = vsel %vm3479_vm2, %v3397_v0, %v3398_v16  ;;  %9808 = vmatprep.mubr.msk.f32.mxu0 %vm2415_vm1, %v13564_v48  ;;  %v2258_v15 = vpop.permute.xlu0 %2257 }
 0x2b4   : > { %v14021_v58 = vadd.f32 %v3824_v53, %v3558_v14  ;;  %v2980_v40 = vpop.f32.mrb[114].mxu1  ;;  %v14025_v44 = vsel %vm2415_vm1, %v13437_v38, %v2258_v15 }
 0x2b5   : > { %19171 = vst [vmem:[#allocation290_spill] sm:$0xff] %v14025_v44  ;;  %v3399_v30 = vrot.slane %v2980_v40, 7  ;;  %v3829_v60 = vpop.f32.mrb[114].mxu0  ;;  %v2982_v6 = vpop.f32.mrb[115].mxu1  ;;  %3244 = vmatmul.mubr.f32.gmra.mrb[220].mxu1 %v14025_v44 }
 0x2b6   : > { %19170 = vst [vmem:[#allocation289_spill] sm:$0xff] %v14021_v58  ;;  %v3831_v18 = vpop.f32.mrb[115].mxu0  ;;  %4093 = vmatmul.mubr.f32.gmra.mrb[220].mxu0 %v14025_v44  ;;  %9677 = vmatprep.mubr.msk.f32.mxu1 %vm2415_vm1, %v13585_v41 }
 0x2b7   : > { %v3557_v0 = vsel %vm3479_vm2, %v3398_v16, %v3399_v30  ;;  %9809 = vmatprep.mubr.msk.f32.mxu0 %vm2415_vm1, %v13585_v41  ;;  %v2260_v53 = vpop.permute.xlu0 %2259 }
 0x2b8   : > { %v14035_v14 = vadd.f32 %v3829_v60, %v3557_v0  ;;  %v2985_v15 = vpop.f32.mrb[116].mxu1  ;;  %v14039_v6 = vsel %vm2415_vm1, %v13455_v12, %v2260_v53 }
 0x2b9   : > { %19173 = vst [vmem:[#allocation292_spill] sm:$0xff] %v14039_v6  ;;  %v3400_v18 = vrot.slane %v2985_v15, 7  ;;  %v3834_v40 = vpop.f32.mrb[116].mxu0  ;;  %v2987_v58 = vpop.f32.mrb[117].mxu1  ;;  %3249 = vmatmul.mubr.f32.gmra.mrb[222].mxu1 %v14039_v6 }
 0x2ba   : > { %19172 = vst [vmem:[#allocation291_spill] sm:$0xff] %v14035_v14  ;;  %v3836_v44 = vpop.f32.mrb[117].mxu0  ;;  %4098 = vmatmul.mubr.f32.gmra.mrb[222].mxu0 %v14039_v6  ;;  %9678 = vmatprep.mubr.msk.f32.mxu1 %vm2415_vm1, %v13606_v61 }
 0x2bb   : > { %v3556_v16 = vsel %vm3479_vm2, %v3399_v30, %v3400_v18  ;;  %9810 = vmatprep.mubr.msk.f32.mxu0 %vm2415_vm1, %v13606_v61  ;;  %v2262_v60 = vpop.permute.xlu0 %2261 }
 0x2bc   : > { %v14049_v0 = vadd.f32 %v3834_v40, %v3556_v16  ;;  %v2990_v53 = vpop.f32.mrb[118].mxu1  ;;  %v14053_v58 = vsel %vm2415_vm1, %v13472_v22, %v2262_v60 }
 0x2bd   : > { %19175 = vst [vmem:[#allocation294_spill] sm:$0xff] %v14053_v58  ;;  %v3401_v44 = vrot.slane %v2990_v53, 7  ;;  %v3839_v15 = vpop.f32.mrb[118].mxu0  ;;  %v2992_v14 = vpop.f32.mrb[119].mxu1  ;;  %3254 = vmatmul.mubr.f32.gmra.mrb[224].mxu1 %v14053_v58 }
 0x2be   : > { %19174 = vst [vmem:[#allocation293_spill] sm:$0xff] %v14049_v0  ;;  %v3841_v6 = vpop.f32.mrb[119].mxu0  ;;  %4103 = vmatmul.mubr.f32.gmra.mrb[224].mxu0 %v14053_v58  ;;  %9679 = vmatprep.mubr.msk.f32.mxu1 %vm2415_vm1, %v12979_v13 }
 0x2bf   : > { %v3555_v30 = vsel %vm3479_vm2, %v3400_v18, %v3401_v44  ;;  %9811 = vmatprep.mubr.msk.f32.mxu0 %vm2415_vm1, %v12979_v13  ;;  %v2264_v40 = vpop.permute.xlu0 %2263 }
 0x2c0   : > { %v14063_v16 = vadd.f32 %v3839_v15, %v3555_v30  ;;  %v2995_v60 = vpop.f32.mrb[120].mxu1  ;;  %v14067_v14 = vsel %vm2415_vm1, %v13496_v43, %v2264_v40 }
 0x2c1   : > { %19177 = vst [vmem:[#allocation296_spill] sm:$0xff] %v14067_v14  ;;  %v3402_v6 = vrot.slane %v2995_v60, 7  ;;  %v3844_v53 = vpop.f32.mrb[120].mxu0  ;;  %v2997_v0 = vpop.f32.mrb[121].mxu1  ;;  %3259 = vmatmul.mubr.f32.gmra.mrb[226].mxu1 %v14067_v14 }
 0x2c2   : > { %19176 = vst [vmem:[#allocation295_spill] sm:$0xff] %v14063_v16  ;;  %v3846_v58 = vpop.f32.mrb[121].mxu0  ;;  %4108 = vmatmul.mubr.f32.gmra.mrb[226].mxu0 %v14067_v14  ;;  %9680 = vmatprep.mubr.msk.f32.mxu1 %vm2415_vm1, %v13633_v26 }
 0x2c3   : > { %v3554_v18 = vsel %vm3479_vm2, %v3401_v44, %v3402_v6  ;;  %9812 = vmatprep.mubr.msk.f32.mxu0 %vm2415_vm1, %v13633_v26  ;;  %v2266_v15 = vpop.permute.xlu0 %2265 }
 0x2c4   : > { %v14077_v30 = vadd.f32 %v3844_v53, %v3554_v18  ;;  %v3000_v40 = vpop.f32.mrb[122].mxu1  ;;  %v14081_v0 = vsel %vm2415_vm1, %v13515_v57, %v2266_v15  ;;  %v2270_v18 = vpop.permute.xlu1 %2269 }
 0x2c5   : > { %19179 = vst [vmem:[#allocation298_spill] sm:$0xff] %v14081_v0  ;;  %v3403_v58 = vrot.slane %v3000_v40, 7  ;;  %v3849_v60 = vpop.f32.mrb[122].mxu0  ;;  %v3002_v16 = vpop.f32.mrb[123].mxu1  ;;  %3264 = vmatmul.mubr.f32.gmra.mrb[228].mxu1 %v14081_v0 }
 0x2c6   : > { %19178 = vst [vmem:[#allocation297_spill] sm:$0xff] %v14077_v30  ;;  %v3851_v14 = vpop.f32.mrb[123].mxu0  ;;  %4113 = vmatmul.mubr.f32.gmra.mrb[228].mxu0 %v14081_v0  ;;  %9681 = vmatprep.mubr.msk.f32.mxu1 %vm2415_vm1, %v13024_v19 }
 0x2c7   : > { %v3553_v44 = vsel %vm3479_vm2, %v3402_v6, %v3403_v58  ;;  %9813 = vmatprep.mubr.msk.f32.mxu0 %vm2415_vm1, %v13024_v19  ;;  %v2268_v53 = vpop.permute.xlu0 %2267 }
 0x2c8   : > { %v14091_v15 = vadd.f32 %v3849_v60, %v3553_v44  ;;  %v3005_v40 = vpop.f32.mrb[124].mxu1  ;;  %v14095_v16 = vsel %vm2415_vm1, %v13538_v10, %v2268_v53 }
 0x2c9   : > { %19181 = vst [vmem:[#allocation300_spill] sm:$0xff] %v14095_v16  ;;  %v3404_v14 = vrot.slane %v3005_v40, 7  ;;  %v3854_v30 = vpop.f32.mrb[124].mxu0  ;;  %v3007_v0 = vpop.f32.mrb[125].mxu1  ;;  %3269 = vmatmul.mubr.f32.gmra.mrb[230].mxu1 %v14095_v16 }
 0x2ca   : > { %19180 = vst [vmem:[#allocation299_spill] sm:$0xff] %v14091_v15  ;;  %v3856_v57 = vpop.f32.mrb[125].mxu0  ;;  %4118 = vmatmul.mubr.f32.gmra.mrb[230].mxu0 %v14095_v16  ;;  %9682 = vmatprep.mubr.msk.f32.mxu1 %vm2415_vm1, %v13655_v55  ;;  %v14109_v0 = vsel %vm2415_vm1, %v13564_v48, %v2270_v18 }
 0x2cb   : > { %v3552_v6 = vsel %vm3479_vm2, %v3403_v58, %v3404_v14  ;;  %9814 = vmatprep.mubr.msk.f32.mxu0 %vm2415_vm1, %v13655_v55  ;;  %v2272_v44 = vpop.permute.xlu0 %2271  ;;  %19183 = vst [vmem:[#allocation302_spill] sm:$0xff] %v14109_v0  ;;  %v2274_v58 = vpop.permute.xlu1 %2273 }
 0x2cc   : > { %v14105_v60 = vadd.f32 %v3854_v30, %v3552_v6  ;;  %v3010_v53 = vpop.f32.mrb[126].mxu1 }
 0x2cd   : > { %v3405_v57 = vrot.slane %v3010_v53, 7  ;;  %v3859_v40 = vpop.f32.mrb[126].mxu0  ;;  %v3012_v15 = vpop.f32.mrb[127].mxu1  ;;  %3274 = vmatmul.mubr.f32.gmra.mrb[232].mxu1 %v14109_v0 }
 0x2ce   : > { %19182 = vst [vmem:[#allocation301_spill] sm:$0xff] %v14105_v60  ;;  %v3861_v16 = vpop.f32.mrb[127].mxu0  ;;  %4123 = vmatmul.mubr.f32.gmra.mrb[232].mxu0 %v14109_v0  ;;  %9683 = vmatprep.mubr.msk.f32.mxu1 %vm2415_vm1, %v13076_v63  ;;  %v14123_v15 = vsel %vm2415_vm1, %v13585_v41, %v2272_v44 }
 0x2cf   : > { %v3551_v30 = vsel %vm3479_vm2, %v3404_v14, %v3405_v57  ;;  %9815 = vmatprep.mubr.msk.f32.mxu0 %vm2415_vm1, %v13076_v63  ;;  %19185 = vst [vmem:[#allocation304_spill] sm:$0xff] %v14123_v15 }
 0x2d0   : > { %v14119_v18 = vadd.f32 %v3859_v40, %v3551_v30  ;;  %v3015_v6 = vpop.f32.mrb[128].mxu1  ;;  %v2276_v40 = vpop.permute.xlu0 %2275 }
 0x2d1   : > { %v3406_v16 = vrot.slane %v3015_v6, 7  ;;  %v3864_v53 = vpop.f32.mrb[128].mxu0  ;;  %v3017_v60 = vpop.f32.mrb[129].mxu1  ;;  %3279 = vmatmul.mubr.f32.gmra.mrb[234].mxu1 %v14123_v15 }
 0x2d2   : > { %19184 = vst [vmem:[#allocation303_spill] sm:$0xff] %v14119_v18  ;;  %v3866_v0 = vpop.f32.mrb[129].mxu0  ;;  %4128 = vmatmul.mubr.f32.gmra.mrb[234].mxu0 %v14123_v15  ;;  %9684 = vmatprep.mubr.msk.f32.mxu1 %vm2415_vm1, %v13676_v39  ;;  %v14137_v60 = vsel %vm2415_vm1, %v13606_v61, %v2274_v58 }
 0x2d3   : > { %v3550_v14 = vsel %vm3479_vm2, %v3405_v57, %v3406_v16  ;;  %9816 = vmatprep.mubr.msk.f32.mxu0 %vm2415_vm1, %v13676_v39  ;;  %19187 = vst [vmem:[#allocation306_spill] sm:$0xff] %v14137_v60 }
 0x2d4   : > { %v14133_v44 = vadd.f32 %v3864_v53, %v3550_v14  ;;  %v3020_v30 = vpop.f32.mrb[130].mxu1  ;;  %v2278_v53 = vpop.permute.xlu1 %2277 }
 0x2d5   : > { %v3407_v0 = vrot.slane %v3020_v30, 7  ;;  %v3869_v6 = vpop.f32.mrb[130].mxu0  ;;  %v3022_v18 = vpop.f32.mrb[131].mxu1  ;;  %3284 = vmatmul.mubr.f32.gmra.mrb[236].mxu1 %v14137_v60 }
 0x2d6   : > { %19186 = vst [vmem:[#allocation305_spill] sm:$0xff] %v14133_v44  ;;  %v3871_v15 = vpop.f32.mrb[131].mxu0  ;;  %4133 = vmatmul.mubr.f32.gmra.mrb[236].mxu0 %v14137_v60  ;;  %9685 = vmatprep.mubr.msk.f32.mxu1 %vm2415_vm1, %v13121_v25  ;;  %v14151_v18 = vsel %vm2415_vm1, %v12979_v13, %v2276_v40 }
 0x2d7   : > { %v3549_v57 = vsel %vm3479_vm2, %v3406_v16, %v3407_v0  ;;  %9817 = vmatprep.mubr.msk.f32.mxu0 %vm2415_vm1, %v13121_v25  ;;  %19189 = vst [vmem:[#allocation308_spill] sm:$0xff] %v14151_v18 }
 0x2d8   : > { %v14147_v58 = vadd.f32 %v3869_v6, %v3549_v57  ;;  %v3025_v14 = vpop.f32.mrb[132].mxu1  ;;  %v2280_v6 = vpop.permute.xlu0 %2279 }
 0x2d9   : > { %v3408_v15 = vrot.slane %v3025_v14, 7  ;;  %v3874_v30 = vpop.f32.mrb[132].mxu0  ;;  %v3027_v44 = vpop.f32.mrb[133].mxu1  ;;  %3289 = vmatmul.mubr.f32.gmra.mrb[238].mxu1 %v14151_v18 }
 0x2da   : > { %19188 = vst [vmem:[#allocation307_spill] sm:$0xff] %v14147_v58  ;;  %v3876_v60 = vpop.f32.mrb[133].mxu0  ;;  %4138 = vmatmul.mubr.f32.gmra.mrb[238].mxu0 %v14151_v18  ;;  %9686 = vmatprep.mubr.msk.f32.mxu1 %vm2415_vm1, %v13697_v1  ;;  %v14165_v44 = vsel %vm2415_vm1, %v13633_v26, %v2278_v53 }
 0x2db   : > { %v3548_v16 = vsel %vm3479_vm2, %v3407_v0, %v3408_v15  ;;  %9818 = vmatprep.mubr.msk.f32.mxu0 %vm2415_vm1, %v13697_v1  ;;  %19191 = vst [vmem:[#allocation310_spill] sm:$0xff] %v14165_v44 }
 0x2dc   : > { %v14161_v40 = vadd.f32 %v3874_v30, %v3548_v16  ;;  %v3030_v57 = vpop.f32.mrb[134].mxu1  ;;  %v2282_v30 = vpop.permute.xlu1 %2281 }
 0x2dd   : > { %v3409_v60 = vrot.slane %v3030_v57, 7  ;;  %v3879_v14 = vpop.f32.mrb[134].mxu0  ;;  %v3032_v58 = vpop.f32.mrb[135].mxu1  ;;  %3294 = vmatmul.mubr.f32.gmra.mrb[240].mxu1 %v14165_v44 }
 0x2de   : > { %19190 = vst [vmem:[#allocation309_spill] sm:$0xff] %v14161_v40  ;;  %v3881_v18 = vpop.f32.mrb[135].mxu0  ;;  %4143 = vmatmul.mubr.f32.gmra.mrb[240].mxu0 %v14165_v44  ;;  %9687 = vmatprep.mubr.msk.f32.mxu1 %vm2415_vm1, %v13166_v37  ;;  %v14179_v58 = vsel %vm2415_vm1, %v13024_v19, %v2280_v6 }
 0x2df   : > { %v3547_v0 = vsel %vm3479_vm2, %v3408_v15, %v3409_v60  ;;  %9819 = vmatprep.mubr.msk.f32.mxu0 %vm2415_vm1, %v13166_v37  ;;  %19193 = vst [vmem:[#allocation312_spill] sm:$0xff] %v14179_v58 }
 0x2e0   : > { %v14175_v53 = vadd.f32 %v3879_v14, %v3547_v0  ;;  %v3035_v16 = vpop.f32.mrb[136].mxu1  ;;  %v2284_v14 = vpop.permute.xlu0 %2283 }
 0x2e1   : > { %v3410_v18 = vrot.slane %v3035_v16, 7  ;;  %v3884_v57 = vpop.f32.mrb[136].mxu0  ;;  %v3037_v40 = vpop.f32.mrb[137].mxu1  ;;  %3299 = vmatmul.mubr.f32.gmra.mrb[242].mxu1 %v14179_v58 }
 0x2e2   : > { %19192 = vst [vmem:[#allocation311_spill] sm:$0xff] %v14175_v53  ;;  %v3886_v44 = vpop.f32.mrb[137].mxu0  ;;  %4148 = vmatmul.mubr.f32.gmra.mrb[242].mxu0 %v14179_v58  ;;  %9688 = vmatprep.mubr.msk.f32.mxu1 %vm2415_vm1, %v13718_v52  ;;  %v14193_v40 = vsel %vm2415_vm1, %v13655_v55, %v2282_v30 }
 0x2e3   : > { %v3546_v15 = vsel %vm3479_vm2, %v3409_v60, %v3410_v18  ;;  %9820 = vmatprep.mubr.msk.f32.mxu0 %vm2415_vm1, %v13718_v52  ;;  %19195 = vst [vmem:[#allocation314_spill] sm:$0xff] %v14193_v40  ;;  %v19196_v60 = vld [vmem:[#allocation234_spill] sm:$0xff] }
 0x2e4   : > { %v14189_v6 = vadd.f32 %v3884_v57, %v3546_v15  ;;  %v3040_v0 = vpop.f32.mrb[138].mxu1  ;;  %v2286_v15 = vpop.permute.xlu1 %2285 }
 0x2e5   : > { %v3411_v44 = vrot.slane %v3040_v0, 7  ;;  %v3889_v16 = vpop.f32.mrb[138].mxu0  ;;  %v3042_v53 = vpop.f32.mrb[139].mxu1  ;;  %3304 = vmatmul.mubr.f32.gmra.mrb[244].mxu1 %v14193_v40 }
 0x2e6   : > { %19194 = vst [vmem:[#allocation313_spill] sm:$0xff] %v14189_v6  ;;  %v3891_v58 = vpop.f32.mrb[139].mxu0  ;;  %4153 = vmatmul.mubr.f32.gmra.mrb[244].mxu0 %v14193_v40  ;;  %9689 = vmatprep.mubr.msk.f32.mxu1 %vm2415_vm1, %v19196_v60  ;;  %v14207_v53 = vsel %vm2415_vm1, %v13076_v63, %v2284_v14 }
 0x2e7   : > { %v3545_v57 = vsel %vm3479_vm2, %v3410_v18, %v3411_v44  ;;  %9821 = vmatprep.mubr.msk.f32.mxu0 %vm2415_vm1, %v19196_v60  ;;  %19198 = vst [vmem:[#allocation315_spill] sm:$0xff] %v14207_v53 }
 0x2e8   : > { %v14203_v30 = vadd.f32 %v3889_v16, %v3545_v57  ;;  %v3045_v0 = vpop.f32.mrb[140].mxu1  ;;  %v2288_v16 = vpop.permute.xlu0 %2287 }
 0x2e9   : > { %v3412_v58 = vrot.slane %v3045_v0, 7  ;;  %v3894_v6 = vpop.f32.mrb[140].mxu0  ;;  %v3047_v40 = vpop.f32.mrb[141].mxu1  ;;  %3309 = vmatmul.mubr.f32.gmra.mrb[246].mxu1 %v14207_v53 }
 0x2ea   : > { %19197 = vst [vmem:[#allocation234_spill] sm:$0xff] %v14203_v30  ;;  %v3896_v55 = vpop.f32.mrb[141].mxu0  ;;  %4158 = vmatmul.mubr.f32.gmra.mrb[246].mxu0 %v14207_v53  ;;  %9690 = vmatprep.mubr.msk.f32.mxu1 %vm2415_vm1, %v13739_v24  ;;  %v14221_v40 = vsel %vm2415_vm1, %v13676_v39, %v2286_v15 }
 0x2eb   : > { %v3544_v18 = vsel %vm3479_vm2, %v3411_v44, %v3412_v58  ;;  %9822 = vmatprep.mubr.msk.f32.mxu0 %vm2415_vm1, %v13739_v24  ;;  %19200 = vst [vmem:[#allocation317_spill] sm:$0xff] %v14221_v40  ;;  %v2290_v44 = vpop.permute.xlu1 %2289 }
 0x2ec   : > { %v14217_v14 = vadd.f32 %v3894_v6, %v3544_v18  ;;  %v3050_v57 = vpop.f32.mrb[142].mxu1 }
 0x2ed   : > { %v3413_v55 = vrot.slane %v3050_v57, 7  ;;  %v3899_v0 = vpop.f32.mrb[142].mxu0  ;;  %v3052_v30 = vpop.f32.mrb[143].mxu1  ;;  %3314 = vmatmul.mubr.f32.gmra.mrb[248].mxu1 %v14221_v40 }
 0x2ee   : > { %19199 = vst [vmem:[#allocation316_spill] sm:$0xff] %v14217_v14  ;;  %v3901_v53 = vpop.f32.mrb[143].mxu0  ;;  %4163 = vmatmul.mubr.f32.gmra.mrb[248].mxu0 %v14221_v40  ;;  %9691 = vmatprep.mubr.msk.f32.mxu1 %vm2415_vm1, %v13262_v46  ;;  %v14235_v30 = vsel %vm2415_vm1, %v13121_v25, %v2288_v16 }
 0x2ef   : > { %v3543_v6 = vsel %vm3479_vm2, %v3412_v58, %v3413_v55  ;;  %9823 = vmatprep.mubr.msk.f32.mxu0 %vm2415_vm1, %v13262_v46  ;;  %19202 = vst [vmem:[#allocation319_spill] sm:$0xff] %v14235_v30 }
 0x2f0   : > { %v14231_v15 = vadd.f32 %v3899_v0, %v3543_v6  ;;  %v3055_v18 = vpop.f32.mrb[144].mxu1  ;;  %v2292_v0 = vpop.permute.xlu0 %2291 }
 0x2f1   : > { %v3414_v53 = vrot.slane %v3055_v18, 7  ;;  %v3904_v57 = vpop.f32.mrb[144].mxu0  ;;  %v3057_v14 = vpop.f32.mrb[145].mxu1  ;;  %3319 = vmatmul.mubr.f32.gmra.mrb[250].mxu1 %v14235_v30 }
 0x2f2   : > { %19201 = vst [vmem:[#allocation318_spill] sm:$0xff] %v14231_v15  ;;  %v3906_v40 = vpop.f32.mrb[145].mxu0  ;;  %4168 = vmatmul.mubr.f32.gmra.mrb[250].mxu0 %v14235_v30  ;;  %9692 = vmatprep.mubr.msk.f32.mxu1 %vm2415_vm1, %v13760_v50  ;;  %v14249_v14 = vsel %vm2415_vm1, %v13697_v1, %v2290_v44 }
 0x2f3   : > { %v3542_v58 = vsel %vm3479_vm2, %v3413_v55, %v3414_v53  ;;  %9824 = vmatprep.mubr.msk.f32.mxu0 %vm2415_vm1, %v13760_v50  ;;  %19204 = vst [vmem:[#allocation321_spill] sm:$0xff] %v14249_v14  ;;  %v19205_v55 = vld [vmem:[#allocation237_spill] sm:$0xff] }
 0x2f4   : > { %v14245_v16 = vadd.f32 %v3904_v57, %v3542_v58  ;;  %v3060_v6 = vpop.f32.mrb[146].mxu1  ;;  %v2294_v58 = vpop.permute.xlu1 %2293 }
 0x2f5   : > { %v3415_v40 = vrot.slane %v3060_v6, 7  ;;  %v3909_v18 = vpop.f32.mrb[146].mxu0  ;;  %v3062_v15 = vpop.f32.mrb[147].mxu1  ;;  %3324 = vmatmul.mubr.f32.gmra.mrb[252].mxu1 %v14249_v14 }
 0x2f6   : > { %19203 = vst [vmem:[#allocation320_spill] sm:$0xff] %v14245_v16  ;;  %v3911_v30 = vpop.f32.mrb[147].mxu0  ;;  %4173 = vmatmul.mubr.f32.gmra.mrb[252].mxu0 %v14249_v14  ;;  %9693 = vmatprep.mubr.msk.f32.mxu1 %vm2415_vm1, %v19205_v55  ;;  %v14263_v15 = vsel %vm2415_vm1, %v13166_v37, %v2292_v0  ;;  %v14275_v0 = vsel %vm2415_vm1, %v13718_v52, %v2294_v58 }
 0x2f7   : > { %v3541_v57 = vsel %vm3479_vm2, %v3414_v53, %v3415_v40  ;;  %9825 = vmatprep.mubr.msk.f32.mxu0 %vm2415_vm1, %v19205_v55  ;;  %19207 = vst [vmem:[#allocation322_spill] sm:$0xff] %v14263_v15  ;;  %19208 = vst [vmem:[#allocation323_spill] sm:$0xff] %v14275_v0 }
 0x2f8   : > { %v14259_v44 = vadd.f32 %v3909_v18, %v3541_v57  ;;  %v3065_v6 = vpop.f32.mrb[148].mxu1  ;;  %v2296_v18 = vpop.permute.xlu0 %2295 }
 0x2f9   : > { %v3416_v30 = vrot.slane %v3065_v6, 7  ;;  %v3914_v16 = vpop.f32.mrb[148].mxu0  ;;  %v3067_v14 = vpop.f32.mrb[149].mxu1  ;;  %3329 = vmatmul.mubr.f32.gmra.mrb[254].mxu1 %v14263_v15  ;;  %v14289_v58 = vsel %vm2415_vm1, %v19196_v60, %v2296_v18 }
 0x2fa   : > { %19206 = vst [vmem:[#allocation237_spill] sm:$0xff] %v14259_v44  ;;  %v3916_v1 = vpop.f32.mrb[149].mxu0  ;;  %4178 = vmatmul.mubr.f32.gmra.mrb[254].mxu0 %v14263_v15  ;;  %9694 = vmatprep.mubr.msk.f32.mxu1 %vm2415_vm1, %v13781_v8  ;;  %19211 = vst [vmem:[#allocation325_spill] sm:$0xff] %v14289_v58 }
 0x2fb   : > { %v3540_v53 = vsel %vm3479_vm2, %v3415_v40, %v3416_v30  ;;  %9826 = vmatprep.mubr.msk.f32.mxu0 %vm2415_vm1, %v13781_v8  ;;  %v19210_v40 = vld [vmem:[#allocation149_spill] sm:$0xff] }
 0x2fc   : > { %v14277_v14 = vadd.f32 %v3914_v16, %v3540_v53  ;;  %v3070_v57 = vpop.f32.mrb[150].mxu1  ;;  %v2298_v16 = vpop.permute.xlu1 %2297 }
 0x2fd   : > { %v3417_v1 = vrot.slane %v3070_v57, 7  ;;  %v3919_v6 = vpop.f32.mrb[150].mxu0  ;;  %v3072_v44 = vpop.f32.mrb[151].mxu1  ;;  %3334 = vmatmul.mubr.f32.gmra.mrb[0].mxu1 %v14275_v0 }
 0x2fe   : > { %19209 = vst [vmem:[#allocation324_spill] sm:$0xff] %v14277_v14  ;;  %v3921_v15 = vpop.f32.mrb[151].mxu0  ;;  %4183 = vmatmul.mubr.f32.gmra.mrb[0].mxu0 %v14275_v0  ;;  %9695 = vmatprep.mubr.msk.f32.mxu1 %vm2415_vm1, %v19210_v40  ;;  %v2300_v18 = vpop.permute.xlu0 %2299 }
 0x2ff   : > { %v3539_v37 = vsel %vm3479_vm2, %v3416_v30, %v3417_v1  ;;  %9827 = vmatprep.mubr.msk.f32.mxu0 %vm2415_vm1, %v19210_v40  ;;  %v19230_v40 = vld [vmem:[#allocation50_spill] sm:$0xff] }
 0x300   : > { %v14291_v44 = vadd.f32 %v3919_v6, %v3539_v37  ;;  %v3075_v53 = vpop.f32.mrb[152].mxu1  ;;  %v14303_v37 = vsel %vm2415_vm1, %v13739_v24, %v2298_v16  ;;  %v2302_v16 = vpop.permute.xlu1 %2301 }
 0x301   : > { %v3418_v15 = vrot.slane %v3075_v53, 7  ;;  %v3924_v57 = vpop.f32.mrb[152].mxu0  ;;  %v3077_v14 = vpop.f32.mrb[153].mxu1  ;;  %3339 = vmatmul.mubr.f32.gmra.mrb[2].mxu1 %v14289_v58  ;;  %19213 = vst [vmem:[#allocation327_spill] sm:$0xff] %v14303_v37 }
 0x302   : > { %19212 = vst [vmem:[#allocation326_spill] sm:$0xff] %v14291_v44  ;;  %v3926_v0 = vpop.f32.mrb[153].mxu0  ;;  %4188 = vmatmul.mubr.f32.gmra.mrb[2].mxu0 %v14289_v58  ;;  %9696 = vmatprep.mubr.msk.f32.mxu1 %vm2415_vm1, %v19142_v31 }
 0x303   : > { %v3538_v30 = vsel %vm3479_vm2, %v3417_v1, %v3418_v15  ;;  %9828 = vmatprep.mubr.msk.f32.mxu0 %vm2415_vm1, %v19142_v31  ;;  %v19215_v1 = vld [vmem:[#allocation157_spill] sm:$0xff] }
 0x304   : > { %v14305_v14 = vadd.f32 %v3924_v57, %v3538_v30  ;;  %v3080_v6 = vpop.f32.mrb[154].mxu1  ;;  %v14317_v57 = vsel %vm2415_vm1, %v13262_v46, %v2300_v18  ;;  %v2304_v18 = vpop.permute.xlu0 %2303 }
 0x305   : > { %v3419_v0 = vrot.slane %v3080_v6, 7  ;;  %v3929_v53 = vpop.f32.mrb[154].mxu0  ;;  %v3082_v44 = vpop.f32.mrb[155].mxu1  ;;  %3344 = vmatmul.mubr.f32.gmra.mrb[4].mxu1 %v14303_v37  ;;  %19216 = vst [vmem:[#allocation329_spill] sm:$0xff] %v14317_v57 }
 0x306   : > { %19214 = vst [vmem:[#allocation328_spill] sm:$0xff] %v14305_v14  ;;  %v3931_v58 = vpop.f32.mrb[155].mxu0  ;;  %4193 = vmatmul.mubr.f32.gmra.mrb[4].mxu0 %v14303_v37  ;;  %9697 = vmatprep.mubr.msk.f32.mxu1 %vm2415_vm1, %v19215_v1 }
 0x307   : > { %v3537_v31 = vsel %vm3479_vm2, %v3418_v15, %v3419_v0  ;;  %9829 = vmatprep.mubr.msk.f32.mxu0 %vm2415_vm1, %v19215_v1  ;;  %v19218_v15 = vld [vmem:[#allocation32_spill] sm:$0xff] }
 0x308   : > { %v14319_v44 = vadd.f32 %v3929_v53, %v3537_v31  ;;  %v3085_v30 = vpop.f32.mrb[156].mxu1  ;;  %v14331_v31 = vsel %vm2415_vm1, %v13760_v50, %v2302_v16  ;;  %v14345_v16 = vsel %vm2415_vm1, %v19205_v55, %v2304_v18 }
 0x309   : > { %v3420_v58 = vrot.slane %v3085_v30, 7  ;;  %v3934_v6 = vpop.f32.mrb[156].mxu0  ;;  %v3087_v14 = vpop.f32.mrb[157].mxu1  ;;  %3349 = vmatmul.mubr.f32.gmra.mrb[6].mxu1 %v14317_v57  ;;  %19219 = vst [vmem:[#allocation331_spill] sm:$0xff] %v14331_v31  ;;  %19222 = vst [vmem:[#allocation333_spill] sm:$0xff] %v14345_v16 }
 0x30a   : > { %19217 = vst [vmem:[#allocation330_spill] sm:$0xff] %v14319_v44  ;;  %v3936_v37 = vpop.f32.mrb[157].mxu0  ;;  %4198 = vmatmul.mubr.f32.gmra.mrb[6].mxu0 %v14317_v57  ;;  %9698 = vmatprep.mubr.msk.f32.mxu1 %vm2415_vm1, %v19218_v15 }
 0x30b   : > { %v3536_v1 = vsel %vm3479_vm2, %v3419_v0, %v3420_v58  ;;  %9830 = vmatprep.mubr.msk.f32.mxu0 %vm2415_vm1, %v19218_v15  ;;  %v19221_v0 = vld [vmem:[#allocation37_spill] sm:$0xff] }
 0x30c   : > { %v14333_v14 = vadd.f32 %v3934_v6, %v3536_v1  ;;  %v3090_v53 = vpop.f32.mrb[158].mxu1  ;;  %v2306_v1 = vpop.permute.xlu1 %2305 }
 0x30d   : > { %v3421_v37 = vrot.slane %v3090_v53, 7  ;;  %v3939_v30 = vpop.f32.mrb[158].mxu0  ;;  %v3092_v44 = vpop.f32.mrb[159].mxu1  ;;  %3354 = vmatmul.mubr.f32.gmra.mrb[8].mxu1 %v14331_v31 }
 0x30e   : > { %19220 = vst [vmem:[#allocation332_spill] sm:$0xff] %v14333_v14  ;;  %v3941_v57 = vpop.f32.mrb[159].mxu0  ;;  %4203 = vmatmul.mubr.f32.gmra.mrb[8].mxu0 %v14331_v31  ;;  %9699 = vmatprep.mubr.msk.f32.mxu1 %vm2415_vm1, %v19221_v0 }
 0x30f   : > { %v3535_v15 = vsel %vm3479_vm2, %v3420_v58, %v3421_v37  ;;  %9831 = vmatprep.mubr.msk.f32.mxu0 %vm2415_vm1, %v19221_v0  ;;  %v19224_v58 = vld [vmem:[#allocation40_spill] sm:$0xff] }
 0x310   : > { %v14347_v44 = vadd.f32 %v3939_v30, %v3535_v15  ;;  %v3095_v6 = vpop.f32.mrb[160].mxu1  ;;  %v14359_v15 = vsel %vm2415_vm1, %v13781_v8, %v2306_v1 }
 0x311   : > { %v3422_v57 = vrot.slane %v3095_v6, 7  ;;  %v3944_v53 = vpop.f32.mrb[160].mxu0  ;;  %v3097_v14 = vpop.f32.mrb[161].mxu1  ;;  %3359 = vmatmul.mubr.f32.gmra.mrb[10].mxu1 %v14345_v16  ;;  %19225 = vst [vmem:[#allocation335_spill] sm:$0xff] %v14359_v15 }
 0x312   : > { %19223 = vst [vmem:[#allocation334_spill] sm:$0xff] %v14347_v44  ;;  %v3946_v31 = vpop.f32.mrb[161].mxu0  ;;  %4208 = vmatmul.mubr.f32.gmra.mrb[10].mxu0 %v14345_v16  ;;  %9700 = vmatprep.mubr.msk.f32.mxu1 %vm2415_vm1, %v19224_v58  ;;  %v19227_v16 = vld [vmem:[#allocation35_spill] sm:$0xff] }
 0x313   : > { %v3534_v0 = vsel %vm3479_vm2, %v3421_v37, %v3422_v57  ;;  %9832 = vmatprep.mubr.msk.f32.mxu0 %vm2415_vm1, %v19224_v58 }
 0x314   : > { %v14361_v18 = vadd.f32 %v3944_v53, %v3534_v0  ;;  %v3100_v14 = vpop.f32.mrb[162].mxu1 }
 0x315   : > { %v3423_v30 = vrot.slane %v3100_v14, 7  ;;  %v3949_v31 = vpop.f32.mrb[162].mxu0  ;;  %v3102_v6 = vpop.f32.mrb[163].mxu1  ;;  %3364 = vmatmul.mubr.f32.gmra.mrb[12].mxu1 %v14359_v15  ;;  %v19229_v14 = vld [vmem:[#allocation152_spill] sm:$0xff] }
 0x316   : > { %19226 = vst [vmem:[#allocation336_spill] sm:$0xff] %v14361_v18  ;;  %v3951_v44 = vpop.f32.mrb[163].mxu0  ;;  %4213 = vmatmul.mubr.f32.gmra.mrb[12].mxu0 %v14359_v15  ;;  %9857 = vmatprep.mubr.msk.f32.mxu1 %vm2415_vm1, %v19227_v16 }
 0x317   : > { %v3533_v37 = vsel %vm3479_vm2, %v3422_v57, %v3423_v30 }
 0x318   : > { %v14369_v58 = vadd.f32 %v3949_v31, %v3533_v37  ;;  %v3105_v1 = vpop.f32.mrb[164].mxu1  ;;  %v19232_v37 = vld [vmem:[#allocation156_spill] sm:$0xff] }
 0x319   : > { %v3424_v0 = vrot.slane %v3105_v1, 7  ;;  %v3954_v53 = vpop.f32.mrb[164].mxu0  ;;  %v3107_v18 = vpop.f32.mrb[165].mxu1  ;;  %4416 = vmatmul.mubr.f32.vlgmr.msra.gmra.mrb[14].mxu1 %v19229_v14 }
 0x31a   : > { %19228 = vst [vmem:[#allocation35_spill] sm:$0xff] %v14369_v58  ;;  %v3956_v6 = vpop.f32.mrb[165].mxu0  ;;  %9858 = vmatprep.mubr.msk.f32.mxu1 %vm2415_vm1, %v19230_v40  ;;  %v19233_v58 = vld [vmem:[#allocation54_spill] sm:$0xff] }
 0x31b   : > { %v3532_v44 = vsel %vm3479_vm2, %v3423_v30, %v3424_v0 }
 0x31c   : > { %v14376_v15 = vadd.f32 %v3954_v53, %v3532_v44  ;;  %v3110_v16 = vpop.f32.mrb[166].mxu1  ;;  %v19235_v44 = vld [vmem:[#allocation160_spill] sm:$0xff] }
 0x31d   : > { %v3425_v8 = vrot.slane %v3110_v16, 7  ;;  %v3959_v57 = vpop.f32.mrb[166].mxu0  ;;  %v3112_v31 = vpop.f32.mrb[167].mxu1  ;;  %4421 = vmatmul.mubr.f32.gmra.mrb[16].mxu1 %v19232_v37 }
 0x31e   : > { %19231 = vst [vmem:[#allocation152_spill] sm:$0xff] %v14376_v15  ;;  %v3961_v1 = vpop.f32.mrb[167].mxu0  ;;  %9859 = vmatprep.mubr.msk.f32.mxu1 %vm2415_vm1, %v19233_v58  ;;  %v19236_v15 = vld [vmem:[#allocation59_spill] sm:$0xff] }
 0x31f   : > { %v3531_v18 = vsel %vm3479_vm2, %v3424_v0, %v3425_v8 }
 0x320   : > { %v14383_v14 = vadd.f32 %v3959_v57, %v3531_v18  ;;  %v3115_v40 = vpop.f32.mrb[168].mxu1  ;;  %v19238_v18 = vld [vmem:[#allocation163_spill] sm:$0xff] }
 0x321   : > { %v3426_v6 = vrot.slane %v3115_v40, 7  ;;  %v3964_v30 = vpop.f32.mrb[168].mxu0  ;;  %v3117_v53 = vpop.f32.mrb[169].mxu1  ;;  %4426 = vmatmul.mubr.f32.gmra.mrb[18].mxu1 %v19235_v44 }
 0x322   : > { %19234 = vst [vmem:[#allocation50_spill] sm:$0xff] %v14383_v14  ;;  %v3966_v16 = vpop.f32.mrb[169].mxu0  ;;  %9860 = vmatprep.mubr.msk.f32.mxu1 %vm2415_vm1, %v19236_v15  ;;  %v19239_v14 = vld [vmem:[#allocation63_spill] sm:$0xff] }
 0x323   : > { %v3530_v31 = vsel %vm3479_vm2, %v3425_v8, %v3426_v6 }
 0x324   : > { %v14390_v37 = vadd.f32 %v3964_v30, %v3530_v31  ;;  %v3120_v58 = vpop.f32.mrb[170].mxu1  ;;  %v19241_v31 = vld [vmem:[#allocation166_spill] sm:$0xff] }
 0x325   : > { %v3427_v1 = vrot.slane %v3120_v58, 7  ;;  %v3969_v0 = vpop.f32.mrb[170].mxu0  ;;  %v3122_v57 = vpop.f32.mrb[171].mxu1  ;;  %4431 = vmatmul.mubr.f32.gmra.mrb[20].mxu1 %v19238_v18 }
 0x326   : > { %19237 = vst [vmem:[#allocation156_spill] sm:$0xff] %v14390_v37  ;;  %v3971_v40 = vpop.f32.mrb[171].mxu0  ;;  %9861 = vmatprep.mubr.msk.f32.mxu1 %vm2415_vm1, %v19239_v14  ;;  %v19242_v37 = vld [vmem:[#allocation68_spill] sm:$0xff] }
 0x327   : > { %v3529_v53 = vsel %vm3479_vm2, %v3426_v6, %v3427_v1 }
 0x328   : > { %v14397_v44 = vadd.f32 %v3969_v0, %v3529_v53  ;;  %v3125_v15 = vpop.f32.mrb[172].mxu1  ;;  %v19244_v53 = vld [vmem:[#allocation169_spill] sm:$0xff] }
 0x329   : > { %v3428_v16 = vrot.slane %v3125_v15, 7  ;;  %v3974_v8 = vpop.f32.mrb[172].mxu0  ;;  %v3127_v30 = vpop.f32.mrb[173].mxu1  ;;  %4436 = vmatmul.mubr.f32.gmra.mrb[22].mxu1 %v19241_v31 }
 0x32a   : > { %19240 = vst [vmem:[#allocation54_spill] sm:$0xff] %v14397_v44  ;;  %v3976_v58 = vpop.f32.mrb[173].mxu0  ;;  %9862 = vmatprep.mubr.msk.f32.mxu1 %vm2415_vm1, %v19242_v37  ;;  %v19245_v44 = vld [vmem:[#allocation72_spill] sm:$0xff] }
 0x32b   : > { %v3528_v57 = vsel %vm3479_vm2, %v3427_v1, %v3428_v16 }
 0x32c   : > { %v14404_v18 = vadd.f32 %v3974_v8, %v3528_v57  ;;  %v3130_v14 = vpop.f32.mrb[174].mxu1  ;;  %v19247_v57 = vld [vmem:[#allocation172_spill] sm:$0xff] }
 0x32d   : > { %v3429_v40 = vrot.slane %v3130_v14, 7  ;;  %v3979_v6 = vpop.f32.mrb[174].mxu0  ;;  %v3132_v0 = vpop.f32.mrb[175].mxu1  ;;  %4441 = vmatmul.mubr.f32.gmra.mrb[24].mxu1 %v19244_v53 }
 0x32e   : > { %19243 = vst [vmem:[#allocation160_spill] sm:$0xff] %v14404_v18  ;;  %v3981_v15 = vpop.f32.mrb[175].mxu0  ;;  %9863 = vmatprep.mubr.msk.f32.mxu1 %vm2415_vm1, %v19245_v44  ;;  %v19248_v18 = vld [vmem:[#allocation77_spill] sm:$0xff] }
 0x32f   : > { %v3527_v30 = vsel %vm3479_vm2, %v3428_v16, %v3429_v40 }
 0x330   : > { %v14411_v31 = vadd.f32 %v3979_v6, %v3527_v30  ;;  %v3135_v37 = vpop.f32.mrb[176].mxu1  ;;  %v19250_v30 = vld [vmem:[#allocation175_spill] sm:$0xff] }
 0x331   : > { %v3430_v58 = vrot.slane %v3135_v37, 7  ;;  %v3984_v1 = vpop.f32.mrb[176].mxu0  ;;  %v3137_v8 = vpop.f32.mrb[177].mxu1  ;;  %4446 = vmatmul.mubr.f32.gmra.mrb[26].mxu1 %v19247_v57 }
 0x332   : > { %19246 = vst [vmem:[#allocation59_spill] sm:$0xff] %v14411_v31  ;;  %v3986_v14 = vpop.f32.mrb[177].mxu0  ;;  %9864 = vmatprep.mubr.msk.f32.mxu1 %vm2415_vm1, %v19248_v18  ;;  %v19251_v31 = vld [vmem:[#allocation81_spill] sm:$0xff] }
 0x333   : > { %v3526_v0 = vsel %vm3479_vm2, %v3429_v40, %v3430_v58 }
 0x334   : > { %v14418_v53 = vadd.f32 %v3984_v1, %v3526_v0  ;;  %v3140_v44 = vpop.f32.mrb[178].mxu1  ;;  %v19253_v0 = vld [vmem:[#allocation178_spill] sm:$0xff] }
 0x335   : > { %v3431_v15 = vrot.slane %v3140_v44, 7  ;;  %v3989_v16 = vpop.f32.mrb[178].mxu0  ;;  %v3142_v6 = vpop.f32.mrb[179].mxu1  ;;  %4451 = vmatmul.mubr.f32.gmra.mrb[28].mxu1 %v19250_v30 }
 0x336   : > { %19249 = vst [vmem:[#allocation163_spill] sm:$0xff] %v14418_v53  ;;  %v3991_v37 = vpop.f32.mrb[179].mxu0  ;;  %9865 = vmatprep.mubr.msk.f32.mxu1 %vm2415_vm1, %v19251_v31  ;;  %v19254_v53 = vld [vmem:[#allocation86_spill] sm:$0xff] }
 0x337   : > { %v3525_v8 = vsel %vm3479_vm2, %v3430_v58, %v3431_v15 }
 0x338   : > { %v14425_v57 = vadd.f32 %v3989_v16, %v3525_v8  ;;  %v3145_v18 = vpop.f32.mrb[180].mxu1  ;;  %v19256_v8 = vld [vmem:[#allocation181_spill] sm:$0xff] }
 0x339   : > { %v3432_v14 = vrot.slane %v3145_v18, 7  ;;  %v3994_v40 = vpop.f32.mrb[180].mxu0  ;;  %v3147_v1 = vpop.f32.mrb[181].mxu1  ;;  %4456 = vmatmul.mubr.f32.gmra.mrb[30].mxu1 %v19253_v0 }
 0x33a   : > { %19252 = vst [vmem:[#allocation63_spill] sm:$0xff] %v14425_v57  ;;  %v3996_v44 = vpop.f32.mrb[181].mxu0  ;;  %9866 = vmatprep.mubr.msk.f32.mxu1 %vm2415_vm1, %v19254_v53  ;;  %v19257_v57 = vld [vmem:[#allocation90_spill] sm:$0xff] }
 0x33b   : > { %v3524_v6 = vsel %vm3479_vm2, %v3431_v15, %v3432_v14 }
 0x33c   : > { %v14432_v30 = vadd.f32 %v3994_v40, %v3524_v6  ;;  %v3150_v31 = vpop.f32.mrb[182].mxu1  ;;  %v19259_v6 = vld [vmem:[#allocation184_spill] sm:$0xff] }
 0x33d   : > { %v3433_v37 = vrot.slane %v3150_v31, 7  ;;  %v3999_v58 = vpop.f32.mrb[182].mxu0  ;;  %v3152_v16 = vpop.f32.mrb[183].mxu1  ;;  %4461 = vmatmul.mubr.f32.gmra.mrb[32].mxu1 %v19256_v8 }
 0x33e   : > { %19255 = vst [vmem:[#allocation166_spill] sm:$0xff] %v14432_v30  ;;  %v4001_v18 = vpop.f32.mrb[183].mxu0  ;;  %9867 = vmatprep.mubr.msk.f32.mxu1 %vm2415_vm1, %v19257_v57  ;;  %v19260_v30 = vld [vmem:[#allocation95_spill] sm:$0xff] }
 0x33f   : > { %v3523_v1 = vsel %vm3479_vm2, %v3432_v14, %v3433_v37 }
 0x340   : > { %v14439_v0 = vadd.f32 %v3999_v58, %v3523_v1  ;;  %v3155_v53 = vpop.f32.mrb[184].mxu1  ;;  %v19262_v1 = vld [vmem:[#allocation187_spill] sm:$0xff] }
 0x341   : > { %v3434_v44 = vrot.slane %v3155_v53, 7  ;;  %v4004_v15 = vpop.f32.mrb[184].mxu0  ;;  %v3157_v40 = vpop.f32.mrb[185].mxu1  ;;  %4466 = vmatmul.mubr.f32.gmra.mrb[34].mxu1 %v19259_v6 }
 0x342   : > { %19258 = vst [vmem:[#allocation68_spill] sm:$0xff] %v14439_v0  ;;  %v4006_v31 = vpop.f32.mrb[185].mxu0  ;;  %9868 = vmatprep.mubr.msk.f32.mxu1 %vm2415_vm1, %v19260_v30  ;;  %v19263_v0 = vld [vmem:[#allocation99_spill] sm:$0xff] }
 0x343   : > { %v3522_v16 = vsel %vm3479_vm2, %v3433_v37, %v3434_v44 }
 0x344   : > { %v14446_v8 = vadd.f32 %v4004_v15, %v3522_v16  ;;  %v3160_v57 = vpop.f32.mrb[186].mxu1  ;;  %v19265_v16 = vld [vmem:[#allocation190_spill] sm:$0xff] }
 0x345   : > { %v3435_v18 = vrot.slane %v3160_v57, 7  ;;  %v4009_v14 = vpop.f32.mrb[186].mxu0  ;;  %v3162_v58 = vpop.f32.mrb[187].mxu1  ;;  %4471 = vmatmul.mubr.f32.gmra.mrb[36].mxu1 %v19262_v1 }
 0x346   : > { %19261 = vst [vmem:[#allocation169_spill] sm:$0xff] %v14446_v8  ;;  %v4011_v53 = vpop.f32.mrb[187].mxu0  ;;  %9869 = vmatprep.mubr.msk.f32.mxu1 %vm2415_vm1, %v19263_v0  ;;  %v19266_v8 = vld [vmem:[#allocation104_spill] sm:$0xff] }
 0x347   : > { %v3521_v40 = vsel %vm3479_vm2, %v3434_v44, %v3435_v18 }
 0x348   : > { %v14453_v6 = vadd.f32 %v4009_v14, %v3521_v40  ;;  %v3165_v30 = vpop.f32.mrb[188].mxu1  ;;  %v19268_v40 = vld [vmem:[#allocation193_spill] sm:$0xff] }
 0x349   : > { %v3436_v31 = vrot.slane %v3165_v30, 7  ;;  %v4014_v37 = vpop.f32.mrb[188].mxu0  ;;  %v3167_v15 = vpop.f32.mrb[189].mxu1  ;;  %4476 = vmatmul.mubr.f32.gmra.mrb[38].mxu1 %v19265_v16 }
 0x34a   : > { %19264 = vst [vmem:[#allocation72_spill] sm:$0xff] %v14453_v6  ;;  %v4016_v57 = vpop.f32.mrb[189].mxu0  ;;  %9870 = vmatprep.mubr.msk.f32.mxu1 %vm2415_vm1, %v19266_v8  ;;  %v19269_v6 = vld [vmem:[#allocation108_spill] sm:$0xff] }
 0x34b   : > { %v3520_v58 = vsel %vm3479_vm2, %v3435_v18, %v3436_v31 }
 0x34c   : > { %v14460_v1 = vadd.f32 %v4014_v37, %v3520_v58  ;;  %v3170_v0 = vpop.f32.mrb[190].mxu1  ;;  %v19271_v58 = vld [vmem:[#allocation196_spill] sm:$0xff] }
 0x34d   : > { %v3437_v53 = vrot.slane %v3170_v0, 7  ;;  %v4019_v44 = vpop.f32.mrb[190].mxu0  ;;  %v3172_v14 = vpop.f32.mrb[191].mxu1  ;;  %4481 = vmatmul.mubr.f32.gmra.mrb[40].mxu1 %v19268_v40 }
 0x34e   : > { %19267 = vst [vmem:[#allocation172_spill] sm:$0xff] %v14460_v1  ;;  %v4021_v30 = vpop.f32.mrb[191].mxu0  ;;  %9871 = vmatprep.mubr.msk.f32.mxu1 %vm2415_vm1, %v19269_v6  ;;  %v19272_v1 = vld [vmem:[#allocation112_spill] sm:$0xff] }
 0x34f   : > { %v3519_v15 = vsel %vm3479_vm2, %v3436_v31, %v3437_v53 }
 0x350   : > { %v14467_v16 = vadd.f32 %v4019_v44, %v3519_v15  ;;  %v3175_v8 = vpop.f32.mrb[192].mxu1  ;;  %v19274_v15 = vld [vmem:[#allocation199_spill] sm:$0xff] }
 0x351   : > { %v3438_v57 = vrot.slane %v3175_v8, 7  ;;  %v4024_v18 = vpop.f32.mrb[192].mxu0  ;;  %v3177_v37 = vpop.f32.mrb[193].mxu1  ;;  %4486 = vmatmul.mubr.f32.gmra.mrb[42].mxu1 %v19271_v58 }
 0x352   : > { %19270 = vst [vmem:[#allocation77_spill] sm:$0xff] %v14467_v16  ;;  %v4026_v0 = vpop.f32.mrb[193].mxu0  ;;  %9872 = vmatprep.mubr.msk.f32.mxu1 %vm2415_vm1, %v19272_v1  ;;  %v19275_v16 = vld [vmem:[#allocation116_spill] sm:$0xff] }
 0x353   : > { %v3518_v14 = vsel %vm3479_vm2, %v3437_v53, %v3438_v57 }
 0x354   : > { %v14474_v40 = vadd.f32 %v4024_v18, %v3518_v14  ;;  %v3180_v6 = vpop.f32.mrb[194].mxu1  ;;  %v19277_v14 = vld [vmem:[#allocation202_spill] sm:$0xff] }
 0x355   : > { %v3439_v30 = vrot.slane %v3180_v6, 7  ;;  %v4029_v31 = vpop.f32.mrb[194].mxu0  ;;  %v3182_v44 = vpop.f32.mrb[195].mxu1  ;;  %4491 = vmatmul.mubr.f32.gmra.mrb[44].mxu1 %v19274_v15 }
 0x356   : > { %19273 = vst [vmem:[#allocation175_spill] sm:$0xff] %v14474_v40  ;;  %v4031_v8 = vpop.f32.mrb[195].mxu0  ;;  %9873 = vmatprep.mubr.msk.f32.mxu1 %vm2415_vm1, %v19275_v16  ;;  %v19278_v40 = vld [vmem:[#allocation120_spill] sm:$0xff] }
 0x357   : > { %v3517_v37 = vsel %vm3479_vm2, %v3438_v57, %v3439_v30 }
 0x358   : > { %v14481_v58 = vadd.f32 %v4029_v31, %v3517_v37  ;;  %v3185_v1 = vpop.f32.mrb[196].mxu1  ;;  %v19280_v37 = vld [vmem:[#allocation205_spill] sm:$0xff] }
 0x359   : > { %v3440_v0 = vrot.slane %v3185_v1, 7  ;;  %v4034_v53 = vpop.f32.mrb[196].mxu0  ;;  %v3187_v18 = vpop.f32.mrb[197].mxu1  ;;  %4496 = vmatmul.mubr.f32.gmra.mrb[46].mxu1 %v19277_v14 }
 0x35a   : > { %19276 = vst [vmem:[#allocation81_spill] sm:$0xff] %v14481_v58  ;;  %v4036_v6 = vpop.f32.mrb[197].mxu0  ;;  %9874 = vmatprep.mubr.msk.f32.mxu1 %vm2415_vm1, %v19278_v40  ;;  %v19281_v58 = vld [vmem:[#allocation124_spill] sm:$0xff] }
 0x35b   : > { %v3516_v44 = vsel %vm3479_vm2, %v3439_v30, %v3440_v0 }
 0x35c   : > { %v14488_v15 = vadd.f32 %v4034_v53, %v3516_v44  ;;  %v3190_v16 = vpop.f32.mrb[198].mxu1  ;;  %v19283_v44 = vld [vmem:[#allocation207_spill] sm:$0xff] }
 0x35d   : > { %v3441_v8 = vrot.slane %v3190_v16, 7  ;;  %v4039_v57 = vpop.f32.mrb[198].mxu0  ;;  %v3192_v31 = vpop.f32.mrb[199].mxu1  ;;  %4501 = vmatmul.mubr.f32.gmra.mrb[48].mxu1 %v19280_v37 }
 0x35e   : > { %19279 = vst [vmem:[#allocation178_spill] sm:$0xff] %v14488_v15  ;;  %v4041_v1 = vpop.f32.mrb[199].mxu0  ;;  %9875 = vmatprep.mubr.msk.f32.mxu1 %vm2415_vm1, %v19281_v58  ;;  %v19284_v15 = vld [vmem:[#allocation128_spill] sm:$0xff] }
 0x35f   : > { %v3515_v18 = vsel %vm3479_vm2, %v3440_v0, %v3441_v8 }
 0x360   : > { %v14495_v14 = vadd.f32 %v4039_v57, %v3515_v18  ;;  %v3195_v40 = vpop.f32.mrb[200].mxu1  ;;  %v19286_v18 = vld [vmem:[#allocation210_spill] sm:$0xff] }
 0x361   : > { %v3442_v6 = vrot.slane %v3195_v40, 7  ;;  %v4044_v30 = vpop.f32.mrb[200].mxu0  ;;  %v3197_v53 = vpop.f32.mrb[201].mxu1  ;;  %4506 = vmatmul.mubr.f32.gmra.mrb[50].mxu1 %v19283_v44 }
 0x362   : > { %19282 = vst [vmem:[#allocation86_spill] sm:$0xff] %v14495_v14  ;;  %v4046_v16 = vpop.f32.mrb[201].mxu0  ;;  %9876 = vmatprep.mubr.msk.f32.mxu1 %vm2415_vm1, %v19284_v15  ;;  %v19287_v14 = vld [vmem:[#allocation133_spill] sm:$0xff] }
 0x363   : > { %v3514_v31 = vsel %vm3479_vm2, %v3441_v8, %v3442_v6 }
 0x364   : > { %v14502_v37 = vadd.f32 %v4044_v30, %v3514_v31  ;;  %v3200_v58 = vpop.f32.mrb[202].mxu1  ;;  %v19289_v31 = vld [vmem:[#allocation212_spill] sm:$0xff] }
 0x365   : > { %v3443_v1 = vrot.slane %v3200_v58, 7  ;;  %v4049_v0 = vpop.f32.mrb[202].mxu0  ;;  %v3202_v57 = vpop.f32.mrb[203].mxu1  ;;  %4511 = vmatmul.mubr.f32.gmra.mrb[52].mxu1 %v19286_v18 }
 0x366   : > { %19285 = vst [vmem:[#allocation181_spill] sm:$0xff] %v14502_v37  ;;  %v4051_v40 = vpop.f32.mrb[203].mxu0  ;;  %9877 = vmatprep.mubr.msk.f32.mxu1 %vm2415_vm1, %v19287_v14  ;;  %v19290_v37 = vld [vmem:[#allocation137_spill] sm:$0xff] }
 0x367   : > { %v3513_v53 = vsel %vm3479_vm2, %v3442_v6, %v3443_v1 }
 0x368   : > { %v14509_v44 = vadd.f32 %v4049_v0, %v3513_v53  ;;  %v3205_v15 = vpop.f32.mrb[204].mxu1  ;;  %v19292_v53 = vld [vmem:[#allocation214_spill] sm:$0xff] }
 0x369   : > { %v3444_v16 = vrot.slane %v3205_v15, 7  ;;  %v4054_v8 = vpop.f32.mrb[204].mxu0  ;;  %v3207_v30 = vpop.f32.mrb[205].mxu1  ;;  %4516 = vmatmul.mubr.f32.gmra.mrb[54].mxu1 %v19289_v31 }
 0x36a   : > { %19288 = vst [vmem:[#allocation90_spill] sm:$0xff] %v14509_v44  ;;  %v4056_v58 = vpop.f32.mrb[205].mxu0  ;;  %9878 = vmatprep.mubr.msk.f32.mxu1 %vm2415_vm1, %v19290_v37  ;;  %v19293_v44 = vld [vmem:[#allocation141_spill] sm:$0xff] }
 0x36b   : > { %v3512_v57 = vsel %vm3479_vm2, %v3443_v1, %v3444_v16 }
 0x36c   : > { %v14516_v18 = vadd.f32 %v4054_v8, %v3512_v57  ;;  %v3210_v14 = vpop.f32.mrb[206].mxu1  ;;  %v19295_v57 = vld [vmem:[#allocation216_spill] sm:$0xff] }
 0x36d   : > { %v3445_v40 = vrot.slane %v3210_v14, 7  ;;  %v4059_v6 = vpop.f32.mrb[206].mxu0  ;;  %v3212_v0 = vpop.f32.mrb[207].mxu1  ;;  %4521 = vmatmul.mubr.f32.gmra.mrb[56].mxu1 %v19292_v53 }
 0x36e   : > { %19291 = vst [vmem:[#allocation184_spill] sm:$0xff] %v14516_v18  ;;  %v4061_v15 = vpop.f32.mrb[207].mxu0  ;;  %9879 = vmatprep.mubr.msk.f32.mxu1 %vm2415_vm1, %v19293_v44  ;;  %v19296_v18 = vld [vmem:[#allocation143_spill] sm:$0xff] }
 0x36f   : > { %v3511_v30 = vsel %vm3479_vm2, %v3444_v16, %v3445_v40 }
 0x370   : > { %v14523_v31 = vadd.f32 %v4059_v6, %v3511_v30  ;;  %v3215_v37 = vpop.f32.mrb[208].mxu1  ;;  %v19298_v30 = vld [vmem:[#allocation219_spill] sm:$0xff] }
 0x371   : > { %v3446_v58 = vrot.slane %v3215_v37, 7  ;;  %v4064_v1 = vpop.f32.mrb[208].mxu0  ;;  %v3217_v8 = vpop.f32.mrb[209].mxu1  ;;  %4526 = vmatmul.mubr.f32.gmra.mrb[58].mxu1 %v19295_v57 }
 0x372   : > { %19294 = vst [vmem:[#allocation95_spill] sm:$0xff] %v14523_v31  ;;  %v4066_v14 = vpop.f32.mrb[209].mxu0  ;;  %9880 = vmatprep.mubr.msk.f32.mxu1 %vm2415_vm1, %v19296_v18  ;;  %v19299_v31 = vld [vmem:[#allocation145_spill] sm:$0xff] }
 0x373   : > { %v3510_v0 = vsel %vm3479_vm2, %v3445_v40, %v3446_v58  ;;  %v6152_v40 = vld [vmem:[%s18267_s5] sm:$0xff] }
 0x374   : > { %v14530_v53 = vadd.f32 %v4064_v1, %v3510_v0  ;;  %v3220_v44 = vpop.f32.mrb[210].mxu1  ;;  %v6153_v1 = vld [vmem:[%s18267_s5 + $0x8] sm:$0xff] }
 0x375   : > { %v3447_v15 = vrot.slane %v3220_v44, 7  ;;  %v4069_v16 = vpop.f32.mrb[210].mxu0  ;;  %v3222_v6 = vpop.f32.mrb[211].mxu1  ;;  %4531 = vmatmul.mubr.f32.gmra.mrb[60].mxu1 %v19298_v30 }
 0x376   : > { %19297 = vst [vmem:[#allocation187_spill] sm:$0xff] %v14530_v53  ;;  %v4071_v37 = vpop.f32.mrb[211].mxu0  ;;  %9881 = vmatprep.mubr.msk.f32.mxu1 %vm2415_vm1, %v19299_v31  ;;  %v19301_v6 = vld [vmem:[#allocation221_spill] sm:$0xff]  ;;  %v10588_v31 = vpack.c.bf16 %v6153_v1, %v6152_v40  ;;  %v19305_v40 = vld [vmem:[#allocation150_spill] sm:$0xff] }
 0x377   : > { %v3509_v8 = vsel %vm3479_vm2, %v3446_v58, %v3447_v15  ;;  %v19302_v37 = vld [vmem:[#allocation147_spill] sm:$0xff] }
 0x378   : > { %v14537_v57 = vadd.f32 %v4069_v16, %v3509_v8  ;;  %v3225_v18 = vpop.f32.mrb[212].mxu1  ;;  %10589 = vmatpush1.bf16.msra.mxu0 %v10588_v31 }
 0x379   : > { %v3448_v14 = vrot.slane %v3225_v18, 7  ;;  %v4074_v0 = vpop.f32.mrb[212].mxu0  ;;  %v3227_v44 = vpop.f32.mrb[213].mxu1  ;;  %4536 = vmatmul.mubr.f32.gmra.mrb[62].mxu1 %v19301_v6  ;;  %10590 = vmatprep.subr.bf16.mxu0 %v18877_v3 }
 0x37a   : > { %19300 = vst [vmem:[#allocation99_spill] sm:$0xff] %v14537_v57  ;;  %v4076_v30 = vpop.f32.mrb[213].mxu0  ;;  %9882 = vmatprep.mubr.msk.f32.mxu1 %vm2415_vm1, %v19302_v37  ;;  %v19304_v44 = vld [vmem:[#allocation223_spill] sm:$0xff] }
 0x37b   : > { %v3508_v58 = vsel %vm3479_vm2, %v3447_v15, %v3448_v14 }
 0x37c   : > { %v14550_v16 = vadd.f32 %v4074_v0, %v3508_v58  ;;  %v3230_v8 = vpop.f32.mrb[214].mxu1  ;;  %v19307_v58 = vld [vmem:[#allocation224_spill] sm:$0xff] }
 0x37d   : > { %v3449_v57 = vrot.slane %v3230_v8, 7  ;;  %v4079_v18 = vpop.f32.mrb[214].mxu0  ;;  %v3232_v53 = vpop.f32.mrb[215].mxu1  ;;  %4541 = vmatmul.mubr.f32.gmra.mrb[64].mxu1 %v19304_v44 }
 0x37e   : > { %19303 = vst [vmem:[#allocation190_spill] sm:$0xff] %v14550_v16  ;;  %v4081_v6 = vpop.f32.mrb[215].mxu0  ;;  %9883 = vmatprep.mubr.msk.f32.mxu1 %vm2415_vm1, %v19305_v40  ;;  %v19308_v16 = vld [vmem:[#allocation154_spill] sm:$0xff] }
 0x37f   : > { %v3507_v1 = vsel %vm3479_vm2, %v3448_v14, %v3449_v57 }
 0x380   : > { %v14558_v30 = vadd.f32 %v4079_v18, %v3507_v1  ;;  %v3235_v15 = vpop.f32.mrb[216].mxu1  ;;  %v19310_v1 = vld [vmem:[#allocation226_spill] sm:$0xff] }
 0x381   : > { %v3450_v0 = vrot.slane %v3235_v15, 7  ;;  %v4084_v31 = vpop.f32.mrb[216].mxu0  ;;  %v3237_v37 = vpop.f32.mrb[217].mxu1  ;;  %4546 = vmatmul.mubr.f32.gmra.mrb[66].mxu1 %v19307_v58 }
 0x382   : > { %19306 = vst [vmem:[#allocation104_spill] sm:$0xff] %v14558_v30  ;;  %v4086_v8 = vpop.f32.mrb[217].mxu0  ;;  %9884 = vmatprep.mubr.msk.f32.mxu1 %vm2415_vm1, %v19308_v16  ;;  %v19311_v30 = vld [vmem:[#allocation158_spill] sm:$0xff] }
 0x383   : > { %v3506_v53 = vsel %vm3479_vm2, %v3449_v57, %v3450_v0 }
 0x384   : > { %v14565_v44 = vadd.f32 %v4084_v31, %v3506_v53  ;;  %v3240_v6 = vpop.f32.mrb[218].mxu1  ;;  %v19313_v53 = vld [vmem:[#allocation227_spill] sm:$0xff] }
 0x385   : > { %v3451_v40 = vrot.slane %v3240_v6, 7  ;;  %v4089_v14 = vpop.f32.mrb[218].mxu0  ;;  %v3242_v18 = vpop.f32.mrb[219].mxu1  ;;  %4551 = vmatmul.mubr.f32.gmra.mrb[68].mxu1 %v19310_v1 }
 0x386   : > { %19309 = vst [vmem:[#allocation193_spill] sm:$0xff] %v14565_v44  ;;  %v4091_v15 = vpop.f32.mrb[219].mxu0  ;;  %9885 = vmatprep.mubr.msk.f32.mxu1 %vm2415_vm1, %v19311_v30  ;;  %v19314_v44 = vld [vmem:[#allocation161_spill] sm:$0xff] }
 0x387   : > { %v3505_v37 = vsel %vm3479_vm2, %v3450_v0, %v3451_v40 }
 0x388   : > { %v14572_v58 = vadd.f32 %v4089_v14, %v3505_v37  ;;  %v3245_v16 = vpop.f32.mrb[220].mxu1  ;;  %v19316_v37 = vld [vmem:[#allocation102_spill] sm:$0xff] }
 0x389   : > { %v3452_v8 = vrot.slane %v3245_v16, 7  ;;  %v4094_v57 = vpop.f32.mrb[220].mxu0  ;;  %v3247_v31 = vpop.f32.mrb[221].mxu1  ;;  %4556 = vmatmul.mubr.f32.gmra.mrb[70].mxu1 %v19313_v53 }
 0x38a   : > { %19312 = vst [vmem:[#allocation108_spill] sm:$0xff] %v14572_v58  ;;  %v4096_v6 = vpop.f32.mrb[221].mxu0  ;;  %9886 = vmatprep.mubr.msk.f32.mxu1 %vm2415_vm1, %v19314_v44  ;;  %v19317_v58 = vld [vmem:[#allocation164_spill] sm:$0xff] }
 0x38b   : > { %v3504_v18 = vsel %vm3479_vm2, %v3451_v40, %v3452_v8 }
 0x38c   : > { %v14579_v1 = vadd.f32 %v4094_v57, %v3504_v18  ;;  %v3250_v30 = vpop.f32.mrb[222].mxu1  ;;  %v19319_v18 = vld [vmem:[#allocation228_spill] sm:$0xff] }
 0x38d   : > { %v3453_v15 = vrot.slane %v3250_v30, 7  ;;  %v4099_v0 = vpop.f32.mrb[222].mxu0  ;;  %v3252_v14 = vpop.f32.mrb[223].mxu1  ;;  %4561 = vmatmul.mubr.f32.gmra.mrb[72].mxu1 %v19316_v37 }
 0x38e   : > { %19315 = vst [vmem:[#allocation196_spill] sm:$0xff] %v14579_v1  ;;  %v4101_v16 = vpop.f32.mrb[223].mxu0  ;;  %9887 = vmatprep.mubr.msk.f32.mxu1 %vm2415_vm1, %v19317_v58  ;;  %v19320_v1 = vld [vmem:[#allocation167_spill] sm:$0xff] }
 0x38f   : > { %v3503_v31 = vsel %vm3479_vm2, %v3452_v8, %v3453_v15 }
 0x390   : > { %v14586_v53 = vadd.f32 %v4099_v0, %v3503_v31  ;;  %v3255_v44 = vpop.f32.mrb[224].mxu1  ;;  %v19322_v31 = vld [vmem:[#allocation106_spill] sm:$0xff] }
 0x391   : > { %v3454_v6 = vrot.slane %v3255_v44, 7  ;;  %v4104_v40 = vpop.f32.mrb[224].mxu0  ;;  %v3257_v57 = vpop.f32.mrb[225].mxu1  ;;  %4566 = vmatmul.mubr.f32.gmra.mrb[74].mxu1 %v19319_v18 }
 0x392   : > { %19318 = vst [vmem:[#allocation112_spill] sm:$0xff] %v14586_v53  ;;  %v4106_v30 = vpop.f32.mrb[225].mxu0  ;;  %9888 = vmatprep.mubr.msk.f32.mxu1 %vm2415_vm1, %v19320_v1  ;;  %v19323_v53 = vld [vmem:[#allocation170_spill] sm:$0xff] }
 0x393   : > { %v3502_v14 = vsel %vm3479_vm2, %v3453_v15, %v3454_v6 }
 0x394   : > { %v14593_v37 = vadd.f32 %v4104_v40, %v3502_v14  ;;  %v3260_v58 = vpop.f32.mrb[226].mxu1  ;;  %v19325_v14 = vld [vmem:[#allocation229_spill] sm:$0xff] }
 0x395   : > { %v3455_v16 = vrot.slane %v3260_v58, 7  ;;  %v4109_v8 = vpop.f32.mrb[226].mxu0  ;;  %v3262_v0 = vpop.f32.mrb[227].mxu1  ;;  %4571 = vmatmul.mubr.f32.gmra.mrb[76].mxu1 %v19322_v31 }
 0x396   : > { %19321 = vst [vmem:[#allocation199_spill] sm:$0xff] %v14593_v37  ;;  %v4111_v44 = vpop.f32.mrb[227].mxu0  ;;  %9889 = vmatprep.mubr.msk.f32.mxu1 %vm2415_vm1, %v19323_v53  ;;  %v19326_v37 = vld [vmem:[#allocation173_spill] sm:$0xff] }
 0x397   : > { %v3501_v57 = vsel %vm3479_vm2, %v3454_v6, %v3455_v16  ;;  %v6154_v6 = vld [vmem:[%s18267_s5 + $0x10] sm:$0xff] }
 0x398   : > { %v14600_v18 = vadd.f32 %v4109_v8, %v3501_v57  ;;  %v3265_v1 = vpop.f32.mrb[228].mxu1  ;;  %v6155_v8 = vld [vmem:[%s18267_s5 + $0x18] sm:$0xff] }
 0x399   : > { %v3456_v30 = vrot.slane %v3265_v1, 7  ;;  %v4114_v15 = vpop.f32.mrb[228].mxu0  ;;  %v3267_v40 = vpop.f32.mrb[229].mxu1  ;;  %4576 = vmatmul.mubr.f32.gmra.mrb[78].mxu1 %v19325_v14 }
 0x39a   : > { %19324 = vst [vmem:[#allocation116_spill] sm:$0xff] %v14600_v18  ;;  %v4116_v58 = vpop.f32.mrb[229].mxu0  ;;  %9890 = vmatprep.mubr.msk.f32.mxu1 %vm2415_vm1, %v19326_v37  ;;  %v19328_v40 = vld [vmem:[#allocation110_spill] sm:$0xff]  ;;  %v10591_v37 = vpack.c.bf16 %v6155_v8, %v6154_v6  ;;  %v19332_v6 = vld [vmem:[#allocation179_spill] sm:$0xff] }
 0x39b   : > { %v3500_v0 = vsel %vm3479_vm2, %v3455_v16, %v3456_v30  ;;  %v19329_v58 = vld [vmem:[#allocation176_spill] sm:$0xff] }
 0x39c   : > { %v14607_v31 = vadd.f32 %v4114_v15, %v3500_v0  ;;  %v3270_v53 = vpop.f32.mrb[230].mxu1  ;;  %10592 = vmatpush1.bf16.msra.mxu0 %v10591_v37 }
 0x39d   : > { %v3457_v44 = vrot.slane %v3270_v53, 7  ;;  %v4119_v57 = vpop.f32.mrb[230].mxu0  ;;  %v3272_v1 = vpop.f32.mrb[231].mxu1  ;;  %4581 = vmatmul.mubr.f32.gmra.mrb[80].mxu1 %v19328_v40  ;;  %10593 = vmatprep.subr.bf16.mxu0 %v18877_v3 }
 0x39e   : > { %19327 = vst [vmem:[#allocation202_spill] sm:$0xff] %v14607_v31  ;;  %v4121_v14 = vpop.f32.mrb[231].mxu0  ;;  %9891 = vmatprep.mubr.msk.f32.mxu1 %vm2415_vm1, %v19329_v58  ;;  %v19331_v1 = vld [vmem:[#allocation230_spill] sm:$0xff] }
 0x39f   : > { %v3499_v16 = vsel %vm3479_vm2, %v3456_v30, %v3457_v44 }
 0x3a0   : > { %v14620_v15 = vadd.f32 %v4119_v57, %v3499_v16  ;;  %v3275_v0 = vpop.f32.mrb[232].mxu1  ;;  %v19334_v16 = vld [vmem:[#allocation114_spill] sm:$0xff] }
 0x3a1   : > { %v3458_v31 = vrot.slane %v3275_v0, 7  ;;  %v4124_v53 = vpop.f32.mrb[232].mxu0  ;;  %v3277_v18 = vpop.f32.mrb[233].mxu1  ;;  %4586 = vmatmul.mubr.f32.gmra.mrb[82].mxu1 %v19331_v1 }
 0x3a2   : > { %19330 = vst [vmem:[#allocation120_spill] sm:$0xff] %v14620_v15  ;;  %v4126_v40 = vpop.f32.mrb[233].mxu0  ;;  %9892 = vmatprep.mubr.msk.f32.mxu1 %vm2415_vm1, %v19332_v6  ;;  %v19335_v15 = vld [vmem:[#allocation182_spill] sm:$0xff] }
 0x3a3   : > { %v3498_v8 = vsel %vm3479_vm2, %v3457_v44, %v3458_v31 }
 0x3a4   : > { %v14628_v14 = vadd.f32 %v4124_v53, %v3498_v8  ;;  %v3280_v30 = vpop.f32.mrb[234].mxu1  ;;  %v19337_v8 = vld [vmem:[#allocation231_spill] sm:$0xff] }
 0x3a5   : > { %v3459_v57 = vrot.slane %v3280_v30, 7  ;;  %v4129_v37 = vpop.f32.mrb[234].mxu0  ;;  %v3282_v58 = vpop.f32.mrb[235].mxu1  ;;  %4591 = vmatmul.mubr.f32.gmra.mrb[84].mxu1 %v19334_v16 }
 0x3a6   : > { %19333 = vst [vmem:[#allocation205_spill] sm:$0xff] %v14628_v14  ;;  %v4131_v0 = vpop.f32.mrb[235].mxu0  ;;  %9893 = vmatprep.mubr.msk.f32.mxu1 %vm2415_vm1, %v19335_v15  ;;  %v19338_v14 = vld [vmem:[#allocation185_spill] sm:$0xff] }
 0x3a7   : > { %v3497_v18 = vsel %vm3479_vm2, %v3458_v31, %v3459_v57 }
 0x3a8   : > { %v14635_v1 = vadd.f32 %v4129_v37, %v3497_v18  ;;  %v3285_v40 = vpop.f32.mrb[236].mxu1  ;;  %v19340_v18 = vld [vmem:[#allocation118_spill] sm:$0xff] }
 0x3a9   : > { %v3460_v6 = vrot.slane %v3285_v40, 7  ;;  %v4134_v44 = vpop.f32.mrb[236].mxu0  ;;  %v3287_v53 = vpop.f32.mrb[237].mxu1  ;;  %4596 = vmatmul.mubr.f32.gmra.mrb[86].mxu1 %v19337_v8 }
 0x3aa   : > { %19336 = vst [vmem:[#allocation124_spill] sm:$0xff] %v14635_v1  ;;  %v4136_v30 = vpop.f32.mrb[237].mxu0  ;;  %9894 = vmatprep.mubr.msk.f32.mxu1 %vm2415_vm1, %v19338_v14  ;;  %v19341_v1 = vld [vmem:[#allocation188_spill] sm:$0xff] }
 0x3ab   : > { %v3496_v58 = vsel %vm3479_vm2, %v3459_v57, %v3460_v6 }
 0x3ac   : > { %v14642_v16 = vadd.f32 %v4134_v44, %v3496_v58  ;;  %v3290_v15 = vpop.f32.mrb[238].mxu1  ;;  %v19343_v58 = vld [vmem:[#allocation233_spill] sm:$0xff] }
 0x3ad   : > { %v3461_v0 = vrot.slane %v3290_v15, 7  ;;  %v4139_v31 = vpop.f32.mrb[238].mxu0  ;;  %v3292_v37 = vpop.f32.mrb[239].mxu1  ;;  %4601 = vmatmul.mubr.f32.gmra.mrb[88].mxu1 %v19340_v18 }
 0x3ae   : > { %19339 = vst [vmem:[#allocation207_spill] sm:$0xff] %v14642_v16  ;;  %v4141_v40 = vpop.f32.mrb[239].mxu0  ;;  %9895 = vmatprep.mubr.msk.f32.mxu1 %vm2415_vm1, %v19341_v1  ;;  %v19344_v16 = vld [vmem:[#allocation191_spill] sm:$0xff] }
 0x3af   : > { %v3495_v53 = vsel %vm3479_vm2, %v3460_v6, %v3461_v0 }
 0x3b0   : > { %v14649_v8 = vadd.f32 %v4139_v31, %v3495_v53  ;;  %v3295_v14 = vpop.f32.mrb[240].mxu1  ;;  %v19346_v53 = vld [vmem:[#allocation122_spill] sm:$0xff] }
 0x3b1   : > { %v3462_v30 = vrot.slane %v3295_v14, 7  ;;  %v4144_v57 = vpop.f32.mrb[240].mxu0  ;;  %v3297_v44 = vpop.f32.mrb[241].mxu1  ;;  %4606 = vmatmul.mubr.f32.gmra.mrb[90].mxu1 %v19343_v58 }
 0x3b2   : > { %19342 = vst [vmem:[#allocation128_spill] sm:$0xff] %v14649_v8  ;;  %v4146_v15 = vpop.f32.mrb[241].mxu0  ;;  %9896 = vmatprep.mubr.msk.f32.mxu1 %vm2415_vm1, %v19344_v16  ;;  %v19347_v8 = vld [vmem:[#allocation194_spill] sm:$0xff] }
 0x3b3   : > { %v3494_v37 = vsel %vm3479_vm2, %v3461_v0, %v3462_v30 }
 0x3b4   : > { %v14656_v18 = vadd.f32 %v4144_v57, %v3494_v37  ;;  %v3300_v1 = vpop.f32.mrb[242].mxu1  ;;  %v19349_v37 = vld [vmem:[#allocation235_spill] sm:$0xff] }
 0x3b5   : > { %v3463_v40 = vrot.slane %v3300_v1, 7  ;;  %v4149_v6 = vpop.f32.mrb[242].mxu0  ;;  %v3302_v31 = vpop.f32.mrb[243].mxu1  ;;  %4611 = vmatmul.mubr.f32.gmra.mrb[92].mxu1 %v19346_v53 }
 0x3b6   : > { %19345 = vst [vmem:[#allocation210_spill] sm:$0xff] %v14656_v18  ;;  %v4151_v14 = vpop.f32.mrb[243].mxu0  ;;  %9897 = vmatprep.mubr.msk.f32.mxu1 %vm2415_vm1, %v19347_v8  ;;  %v19350_v18 = vld [vmem:[#allocation197_spill] sm:$0xff] }
 0x3b7   : > { %v3493_v44 = vsel %vm3479_vm2, %v3462_v30, %v3463_v40 }
 0x3b8   : > { %v14663_v58 = vadd.f32 %v4149_v6, %v3493_v44  ;;  %v3305_v16 = vpop.f32.mrb[244].mxu1  ;;  %v19352_v44 = vld [vmem:[#allocation126_spill] sm:$0xff] }
 0x3b9   : > { %v3464_v15 = vrot.slane %v3305_v16, 7  ;;  %v4154_v0 = vpop.f32.mrb[244].mxu0  ;;  %v3307_v57 = vpop.f32.mrb[245].mxu1  ;;  %4616 = vmatmul.mubr.f32.gmra.mrb[94].mxu1 %v19349_v37 }
 0x3ba   : > { %19348 = vst [vmem:[#allocation133_spill] sm:$0xff] %v14663_v58  ;;  %v4156_v1 = vpop.f32.mrb[245].mxu0  ;;  %9898 = vmatprep.mubr.msk.f32.mxu1 %vm2415_vm1, %v19350_v18  ;;  %v19353_v58 = vld [vmem:[#allocation200_spill] sm:$0xff] }
 0x3bb   : > { %v3492_v31 = vsel %vm3479_vm2, %v3463_v40, %v3464_v15  ;;  %v6156_v40 = vld [vmem:[%s18267_s5 + $0x20] sm:$0xff] }
 0x3bc   : > { %v14670_v53 = vadd.f32 %v4154_v0, %v3492_v31  ;;  %v3310_v8 = vpop.f32.mrb[246].mxu1  ;;  %v6157_v0 = vld [vmem:[%s18267_s5 + $0x28] sm:$0xff] }
 0x3bd   : > { %v3465_v14 = vrot.slane %v3310_v8, 7  ;;  %v4159_v30 = vpop.f32.mrb[246].mxu0  ;;  %v3312_v6 = vpop.f32.mrb[247].mxu1  ;;  %4621 = vmatmul.mubr.f32.gmra.mrb[96].mxu1 %v19352_v44 }
 0x3be   : > { %19351 = vst [vmem:[#allocation212_spill] sm:$0xff] %v14670_v53  ;;  %v4161_v16 = vpop.f32.mrb[247].mxu0  ;;  %9899 = vmatprep.mubr.msk.f32.mxu1 %vm2415_vm1, %v19353_v58  ;;  %v19355_v6 = vld [vmem:[#allocation236_spill] sm:$0xff]  ;;  %v10594_v58 = vpack.c.bf16 %v6157_v0, %v6156_v40  ;;  %v19359_v40 = vld [vmem:[#allocation206_spill] sm:$0xff] }
 0x3bf   : > { %v3491_v57 = vsel %vm3479_vm2, %v3464_v15, %v3465_v14  ;;  %v19356_v16 = vld [vmem:[#allocation203_spill] sm:$0xff] }
 0x3c0   : > { %v14677_v37 = vadd.f32 %v4159_v30, %v3491_v57  ;;  %v3315_v18 = vpop.f32.mrb[248].mxu1  ;;  %10595 = vmatpush1.bf16.msra.mxu0 %v10594_v58 }
 0x3c1   : > { %v3466_v1 = vrot.slane %v3315_v18, 7  ;;  %v4164_v31 = vpop.f32.mrb[248].mxu0  ;;  %v3317_v8 = vpop.f32.mrb[249].mxu1  ;;  %4626 = vmatmul.mubr.f32.gmra.mrb[98].mxu1 %v19355_v6  ;;  %10596 = vmatprep.subr.bf16.mxu0 %v18877_v3 }
 0x3c2   : > { %19354 = vst [vmem:[#allocation137_spill] sm:$0xff] %v14677_v37  ;;  %v4166_v44 = vpop.f32.mrb[249].mxu0  ;;  %9900 = vmatprep.mubr.msk.f32.mxu1 %vm2415_vm1, %v19356_v16  ;;  %v19358_v8 = vld [vmem:[#allocation131_spill] sm:$0xff] }
 0x3c3   : > { %v3490_v15 = vsel %vm3479_vm2, %v3465_v14, %v3466_v1 }
 0x3c4   : > { %v14690_v30 = vadd.f32 %v4164_v31, %v3490_v15  ;;  %v3320_v57 = vpop.f32.mrb[250].mxu1  ;;  %v19361_v15 = vld [vmem:[#allocation238_spill] sm:$0xff] }
 0x3c5   : > { %v3467_v37 = vrot.slane %v3320_v57, 7  ;;  %v4169_v18 = vpop.f32.mrb[250].mxu0  ;;  %v3322_v53 = vpop.f32.mrb[251].mxu1  ;;  %4631 = vmatmul.mubr.f32.gmra.mrb[100].mxu1 %v19358_v8 }
 0x3c6   : > { %19357 = vst [vmem:[#allocation214_spill] sm:$0xff] %v14690_v30  ;;  %v4171_v6 = vpop.f32.mrb[251].mxu0  ;;  %9901 = vmatprep.mubr.msk.f32.mxu1 %vm2415_vm1, %v19359_v40  ;;  %v19362_v30 = vld [vmem:[#allocation208_spill] sm:$0xff] }
 0x3c7   : > { %v3489_v0 = vsel %vm3479_vm2, %v3466_v1, %v3467_v37 }
 0x3c8   : > { %v14698_v44 = vadd.f32 %v4169_v18, %v3489_v0  ;;  %v3325_v14 = vpop.f32.mrb[252].mxu1  ;;  %v19364_v0 = vld [vmem:[#allocation70_spill] sm:$0xff] }
 0x3c9   : > { %v3468_v31 = vrot.slane %v3325_v14, 7  ;;  %v4174_v58 = vpop.f32.mrb[252].mxu0  ;;  %v3327_v16 = vpop.f32.mrb[253].mxu1  ;;  %4636 = vmatmul.mubr.f32.gmra.mrb[102].mxu1 %v19361_v15 }
 0x3ca   : > { %19360 = vst [vmem:[#allocation141_spill] sm:$0xff] %v14698_v44  ;;  %v4176_v57 = vpop.f32.mrb[253].mxu0  ;;  %9902 = vmatprep.mubr.msk.f32.mxu1 %vm2415_vm1, %v19362_v30  ;;  %v19365_v44 = vld [vmem:[#allocation211_spill] sm:$0xff] }
 0x3cb   : > { %v3488_v53 = vsel %vm3479_vm2, %v3467_v37, %v3468_v31 }
 0x3cc   : > { %v14705_v8 = vadd.f32 %v4174_v58, %v3488_v53  ;;  %v3330_v6 = vpop.f32.mrb[254].mxu1  ;;  %v19367_v53 = vld [vmem:[#allocation76_spill] sm:$0xff] }
 0x3cd   : > { %v3469_v40 = vrot.slane %v3330_v6, 7  ;;  %v4179_v1 = vpop.f32.mrb[254].mxu0  ;;  %v3332_v18 = vpop.f32.mrb[255].mxu1  ;;  %4641 = vmatmul.mubr.f32.gmra.mrb[104].mxu1 %v19364_v0 }
 0x3ce   : > { %19363 = vst [vmem:[#allocation216_spill] sm:$0xff] %v14705_v8  ;;  %v4181_v14 = vpop.f32.mrb[255].mxu0  ;;  %9903 = vmatprep.mubr.msk.f32.mxu1 %vm2415_vm1, %v19365_v44  ;;  %v19368_v8 = vld [vmem:[#allocation213_spill] sm:$0xff] }
 0x3cf   : > { %v3487_v16 = vsel %vm3479_vm2, %v3468_v31, %v3469_v40 }
 0x3d0   : > { %v14712_v15 = vadd.f32 %v4179_v1, %v3487_v16  ;;  %v3335_v30 = vpop.f32.mrb[0].mxu1  ;;  %v19370_v16 = vld [vmem:[#allocation75_spill] sm:$0xff] }
 0x3d1   : > { %v3470_v57 = vrot.slane %v3335_v30, 7  ;;  %v4184_v37 = vpop.f32.mrb[0].mxu0  ;;  %v3337_v58 = vpop.f32.mrb[1].mxu1  ;;  %4646 = vmatmul.mubr.f32.gmra.mrb[106].mxu1 %v19367_v53 }
 0x3d2   : > { %19366 = vst [vmem:[#allocation143_spill] sm:$0xff] %v14712_v15  ;;  %v4186_v6 = vpop.f32.mrb[1].mxu0  ;;  %9904 = vmatprep.mubr.msk.f32.mxu1 %vm2415_vm1, %v19368_v8  ;;  %v19371_v15 = vld [vmem:[#allocation215_spill] sm:$0xff] }
 0x3d3   : > { %v3486_v18 = vsel %vm3479_vm2, %v3469_v40, %v3470_v57 }
 0x3d4   : > { %v14719_v0 = vadd.f32 %v4184_v37, %v3486_v18  ;;  %v3340_v44 = vpop.f32.mrb[2].mxu1  ;;  %v19373_v18 = vld [vmem:[#allocation80_spill] sm:$0xff] }
 0x3d5   : > { %v3471_v14 = vrot.slane %v3340_v44, 7  ;;  %v4189_v31 = vpop.f32.mrb[2].mxu0  ;;  %v3342_v1 = vpop.f32.mrb[3].mxu1  ;;  %4651 = vmatmul.mubr.f32.gmra.mrb[108].mxu1 %v19370_v16 }
 0x3d6   : > { %19369 = vst [vmem:[#allocation219_spill] sm:$0xff] %v14719_v0  ;;  %v4191_v30 = vpop.f32.mrb[3].mxu0  ;;  %9905 = vmatprep.mubr.msk.f32.mxu1 %vm2415_vm1, %v19371_v15  ;;  %v19374_v0 = vld [vmem:[#allocation217_spill] sm:$0xff] }
 0x3d7   : > { %v3485_v58 = vsel %vm3479_vm2, %v3470_v57, %v3471_v14 }
 0x3d8   : > { %v14726_v53 = vadd.f32 %v4189_v31, %v3485_v58  ;;  %v3345_v8 = vpop.f32.mrb[4].mxu1  ;;  %v19376_v58 = vld [vmem:[#allocation79_spill] sm:$0xff] }
 0x3d9   : > { %v3472_v6 = vrot.slane %v3345_v8, 7  ;;  %v4194_v40 = vpop.f32.mrb[4].mxu0  ;;  %v3347_v37 = vpop.f32.mrb[5].mxu1  ;;  %4656 = vmatmul.mubr.f32.gmra.mrb[110].mxu1 %v19373_v18 }
 0x3da   : > { %19372 = vst [vmem:[#allocation145_spill] sm:$0xff] %v14726_v53  ;;  %v4196_v44 = vpop.f32.mrb[5].mxu0  ;;  %9906 = vmatprep.mubr.msk.f32.mxu1 %vm2415_vm1, %v19374_v0  ;;  %v19377_v53 = vld [vmem:[#allocation27_spill] sm:$0xff] }
 0x3db   : > { %v3484_v1 = vsel %vm3479_vm2, %v3471_v14, %v3472_v6 }
 0x3dc   : > { %v14733_v16 = vadd.f32 %v4194_v40, %v3484_v1  ;;  %v3350_v15 = vpop.f32.mrb[6].mxu1  ;;  %v19378_v1 = vld [vmem:[#allocation85_spill] sm:$0xff] }
 0x3dd   : > { %v3473_v30 = vrot.slane %v3350_v15, 7  ;;  %v4199_v57 = vpop.f32.mrb[6].mxu0  ;;  %v3352_v31 = vpop.f32.mrb[7].mxu1  ;;  %4661 = vmatmul.mubr.f32.gmra.mrb[112].mxu1 %v19376_v58 }
 0x3de   : > { %19375 = vst [vmem:[#allocation221_spill] sm:$0xff] %v14733_v16  ;;  %v4201_v8 = vpop.f32.mrb[7].mxu0  ;;  %9907 = vmatprep.mubr.msk.f32.mxu1 %vm2415_vm1, %v19377_v53  ;;  %v19379_v16 = vld [vmem:[#allocation26_spill] sm:$0xff] }
 0x3df   : > { %v3483_v37 = vsel %vm3479_vm2, %v3472_v6, %v3473_v30  ;;  %v6158_v6 = vld [vmem:[%s18267_s5 + $0x30] sm:$0xff] }
 0x3e0   : > { %v14740_v18 = vadd.f32 %v4199_v57, %v3483_v37  ;;  %v3355_v0 = vpop.f32.mrb[8].mxu1  ;;  %v6159_v57 = vld [vmem:[%s18267_s5 + $0x38] sm:$0xff] }
 0x3e1   : > { %v3474_v44 = vrot.slane %v3355_v0, 7  ;;  %v4204_v14 = vpop.f32.mrb[8].mxu0  ;;  %v3357_v40 = vpop.f32.mrb[9].mxu1  ;;  %4666 = vmatmul.mubr.f32.gmra.mrb[114].mxu1 %v19378_v1 }
 0x3e2   : > { %v4206_v15 = vpop.f32.mrb[9].mxu0  ;;  %9908 = vmatprep.mubr.msk.f32.mxu1 %vm2415_vm1, %v19379_v16  ;;  %v19381_v40 = vld [vmem:[#allocation84_spill] sm:$0xff]  ;;  %v10597_v16 = vpack.c.bf16 %v6159_v57, %v6158_v6  ;;  %v19384_v6 = vld [vmem:[#allocation30_spill] sm:$0xff] }
 0x3e3   : > { %v3482_v31 = vsel %vm3479_vm2, %v3473_v30, %v3474_v44  ;;  %v19385_v57 = vld [vmem:[#allocation88_spill] sm:$0xff] }
 0x3e4   : > { %v14747_v58 = vadd.f32 %v4204_v14, %v3482_v31  ;;  %v3360_v53 = vpop.f32.mrb[10].mxu1  ;;  %10598 = vmatpush1.bf16.msra.mxu0 %v10597_v16  ;;  %v19387_v16 = vld [vmem:[#allocation94_spill] sm:$0xff] }
 0x3e5   : > { %v3475_v8 = vrot.slane %v3360_v53, 7  ;;  %v4209_v37 = vpop.f32.mrb[10].mxu0  ;;  %v3362_v0 = vpop.f32.mrb[11].mxu1  ;;  %4671 = vmatmul.mubr.f32.gmra.mrb[116].mxu1 %v19381_v40  ;;  %10599 = vmatprep.subr.bf16.mxu0 %v18877_v3 }
 0x3e6   : > { %19380 = vst [vmem:[#allocation147_spill] sm:$0xff] %v14747_v58  ;;  %v4211_v1 = vpop.f32.mrb[11].mxu0  ;;  %9909 = vmatprep.mubr.msk.f32.mxu1 %vm2415_vm1, %v12894_v4  ;;  %v19383_v0 = vld [vmem:[#allocation89_spill] sm:$0xff]  ;;  %v19386_v4 = vrot.slane %v19385_v57, 7 }
 0x3e7   : > { %v3481_v30 = vsel %vm3479_vm2, %v3474_v44, %v3475_v8 }
 0x3e8   : > { %v14760_v14 = vadd.f32 %v4209_v37, %v3481_v30  ;;  %v3365_v15 = vpop.f32.mrb[12].mxu1 }
 0x3e9   : > { %v3476_v31 = vrot.slane %v3365_v15, 7  ;;  %v4214_v53 = vpop.f32.mrb[12].mxu0  ;;  %v3367_v58 = vpop.f32.mrb[13].mxu1  ;;  %4676 = vmatmul.mubr.f32.gmra.mrb[118].mxu1 %v19383_v0  ;;  %v19389_v0 = vld [vmem:[#allocation239_spill] sm:$0xff] }
 0x3ea   : > { %19382 = vst [vmem:[#allocation223_spill] sm:$0xff] %v14760_v14  ;;  %v4216_v40 = vpop.f32.mrb[13].mxu0  ;;  %9910 = vmatprep.mubr.msk.f32.mxu1 %vm2415_vm1, %v19384_v6 }
 0x3eb   : > { %v3587_v44 = vsel %vm3479_vm2, %v3476_v31, %v19386_v4  ;;  %v3480_v37 = vsel %vm3479_vm2, %v3475_v8, %v3476_v31  ;;  %v19390_v8 = vld [vmem:[#allocation241_spill] sm:$0xff] }
 0x3ec   : > { %v4218_v1 = vadd.f32 %v19387_v16, %v3587_v44  ;;  %v14773_v30 = vadd.f32 %v4214_v53, %v3480_v37  ;;  %v14775_v15 = vpop.f32.mrb[14].mxu1 }
 0x3ed   : > { %v4419_v58 = vpop.f32.mrb[15].mxu1  ;;  %4681 = vmatmul.mubr.f32.gmra.mrb[120].mxu1 %v19389_v0  ;;  %v18588_v6 = vrot.slane %v14775_v15, 1 }
 0x3ee   : > { %19388 = vst [vmem:[#allocation150_spill] sm:$0xff] %v14773_v30  ;;  %9911 = vmatprep.mubr.msk.f32.mxu1 %vm2415_vm1, %v12932_v17  ;;  %v14792_v17 = vld [vmem:[%s18266_s4] ss:$0 sm:$0xff]  ;;  %v19391_v58 = vld [vmem:[#allocation243_spill] sm:$0xff] }
 0x3f0   : > { %v4422_v40 = vpop.f32.mrb[16].mxu1 }
 0x3f1   : > { %v4957_v57 = vrot.slane %v4422_v40, 1  ;;  %v4424_v4 = vpop.f32.mrb[17].mxu1  ;;  %4686 = vmatmul.mubr.f32.gmra.mrb[122].mxu1 %v19390_v8 }
 0x3f2   : > { %9912 = vmatprep.mubr.msk.f32.mxu1 %vm2415_vm1, %v12953_v56  ;;  %v19392_v4 = vld [vmem:[#allocation242_spill] sm:$0xff] }
 0x3f3   : > { %v5171_v31 = vsel %vm5064_vm3, %v18588_v6, %v4957_v57 }
 0x3f4   : > { %v5173_v53 = vadd.f32 %v5171_v31, %v4218_v1  ;;  %v4427_v44 = vpop.f32.mrb[18].mxu1  ;;  %v19393_v1 = vld [vmem:[#allocation244_spill] sm:$0xff] }
 0x3f5   : > { %v4958_v37 = vrot.slane %v4427_v44, 1  ;;  %v4429_v16 = vpop.f32.mrb[19].mxu1  ;;  %4691 = vmatmul.mubr.f32.gmra.mrb[124].mxu1 %v19391_v58 }
 0x3f6   : > { %v5288_v0 = vadd.f32 %v14792_v17, %v5173_v53  ;;  %9913 = vmatprep.mubr.msk.f32.mxu1 %vm2415_vm1, %v12972_v33  ;;  %v19394_v53 = vld [vmem:[#allocation24_spill] sm:$0xff]  ;;  %v19395_v16 = vld [vmem:[#allocation98_spill] sm:$0xff] }
 0x3f7   : > { %v5170_v56 = vsel %vm5064_vm3, %v4957_v57, %v4958_v37 }
 0x3f8   : > { %v5396_v40 = vmax.f32 %v5288_v0, 0.0  ;;  %v5174_v8 = vadd.f32 %v5170_v56, %v19392_v4  ;;  %v4432_v6 = vpop.f32.mrb[20].mxu1  ;;  %v19396_v56 = vld [vmem:[#allocation245_spill] sm:$0xff] }
 0x3f9   : > { %v4959_v30 = vrot.slane %v4432_v6, 1  ;;  %v4434_v14 = vpop.f32.mrb[21].mxu1  ;;  %4696 = vmatmul.mubr.f32.gmra.mrb[126].mxu1 %v19393_v1  ;;  %v19398_v1 = vld [vmem:[#allocation97_spill] sm:$0xff] }
 0x3fa   : > { %v5289_v31 = vadd.f32 %v14792_v17, %v5174_v8  ;;  %9914 = vmatprep.mubr.msk.f32.mxu1 %vm2415_vm1, %v12996_v47  ;;  %v14806_v44 = vmul.f32 %v5396_v40, %v19394_v53  ;;  %v19397_v47 = vld [vmem:[#allocation29_spill] sm:$0xff] }
 0x3fb   : > { %v5169_v33 = vsel %vm5064_vm3, %v4958_v37, %v4959_v30 }
 0x3fc   : > { %v5397_v57 = vmax.f32 %v5289_v31, 0.0  ;;  %v5175_v58 = vadd.f32 %v5169_v33, %v19395_v16  ;;  %5720 = vrot.lane.b32.xlu0 %v14806_v44, %s11114_s9  ;;  %v4437_v14 = vpop.f32.mrb[22].mxu1 }
 0x3fd   : > { %v4960_v6 = vrot.slane %v4437_v14, 1  ;;  %v4439_v0 = vpop.f32.mrb[23].mxu1  ;;  %4701 = vmatmul.mubr.f32.gmra.mrb[128].mxu1 %v19396_v56  ;;  %v19399_v14 = vld [vmem:[#allocation246_spill] sm:$0xff]  ;;  %v19401_v56 = vld [vmem:[#allocation103_spill] sm:$0xff] }
 0x3fe   : > { %v5290_v4 = vadd.f32 %v14792_v17, %v5175_v58  ;;  %9915 = vmatprep.mubr.msk.f32.mxu1 %vm2415_vm1, %v13017_v29  ;;  %v14818_v40 = vmul.f32 %v5397_v57, %v19397_v47  ;;  %v19400_v29 = vld [vmem:[#allocation3_spill] sm:$0xff] }
 0x3ff   : > { %v5168_v37 = vsel %vm5064_vm3, %v4959_v30, %v4960_v6 }
 0x400   : > { %v5398_v8 = vmax.f32 %v5290_v4, 0.0  ;;  %v5176_v31 = vadd.f32 %v5168_v37, %v19398_v1  ;;  %5722 = vrot.lane.b32.xlu1 %v14818_v40, %s11114_s9  ;;  %v4442_v53 = vpop.f32.mrb[24].mxu1 }
 0x401   : > { %v4961_v33 = vrot.slane %v4442_v53, 1  ;;  %v4444_v16 = vpop.f32.mrb[25].mxu1  ;;  %4706 = vmatmul.mubr.f32.gmra.mrb[130].mxu1 %v19399_v14  ;;  %v19402_v53 = vld [vmem:[#allocation247_spill] sm:$0xff] }
 0x402   : > { %v5291_v58 = vadd.f32 %v14792_v17, %v5176_v31  ;;  %9916 = vmatprep.mubr.msk.f32.mxu1 %vm2415_vm1, %v13047_v51  ;;  %v14830_v57 = vmul.f32 %v5398_v8, %v19400_v29  ;;  %v19403_v51 = vld [vmem:[#allocation4_spill] sm:$0xff]  ;;  %v19404_v14 = vld [vmem:[#allocation107_spill] sm:$0xff] }
 0x403   : > { %v5167_v30 = vsel %vm5064_vm3, %v4960_v6, %v4961_v33 }
 0x404   : > { %v5399_v0 = vmax.f32 %v5291_v58, 0.0  ;;  %v5177_v4 = vadd.f32 %v5167_v30, %v19401_v56  ;;  %5724 = vrot.lane.b32.xlu0 %v14830_v57, %s11114_s9  ;;  %v4447_v47 = vpop.f32.mrb[26].mxu1  ;;  %v6161_v30 = vld [vmem:[%s18267_s5 + $0x48] sm:$0xff] }
 0x405   : > { %v4962_v37 = vrot.slane %v4447_v47, 1  ;;  %v4449_v1 = vpop.f32.mrb[27].mxu1  ;;  %4711 = vmatmul.mubr.f32.gmra.mrb[132].mxu1 %v19402_v53  ;;  %v19405_v56 = vld [vmem:[#allocation248_spill] sm:$0xff] }
 0x406   : > { %v5292_v31 = vadd.f32 %v14792_v17, %v5177_v4  ;;  %9917 = vmatprep.mubr.msk.f32.mxu1 %vm2415_vm1, %v13068_v59  ;;  %v14842_v8 = vmul.f32 %v5399_v0, %v19403_v51  ;;  %v6160_v59 = vld [vmem:[%s18267_s5 + $0x40] sm:$0xff] }
 0x407   : > { %v5166_v6 = vsel %vm5064_vm3, %v4961_v33, %v4962_v37  ;;  %v10600_v4 = vpack.c.bf16 %v6161_v30, %v6160_v59  ;;  %v19406_v1 = vld [vmem:[#allocation39_spill] sm:$0xff]  ;;  %v19408_v30 = vld [vmem:[#allocation250_spill] sm:$0xff] }
 0x408   : > { %v5400_v16 = vmax.f32 %v5292_v31, 0.0  ;;  %v5178_v58 = vadd.f32 %v5166_v6, %v19404_v14  ;;  %5726 = vrot.lane.b32.xlu1 %v14842_v8, %s11114_s9  ;;  %v4452_v29 = vpop.f32.mrb[28].mxu1  ;;  %9966 = vmatprep.mubr.msk.f32.mxu0 %vm2415_vm1, %v14842_v8  ;;  %v19407_v6 = vld [vmem:[#allocation111_spill] sm:$0xff] }
 0x409   : > { %v4963_v0 = vrot.slane %v4452_v29, 1  ;;  %v4454_v33 = vpop.f32.mrb[29].mxu1  ;;  %4716 = vmatmul.mubr.f32.gmra.mrb[134].mxu1 %v19405_v56  ;;  %10601 = vmatpush1.bf16.msra.mxu0 %v10600_v4  ;;  %v19410_v4 = vld [vmem:[#allocation249_spill] sm:$0xff] }
 0x40a   : > { %v5293_v47 = vadd.f32 %v14792_v17, %v5178_v58  ;;  %9918 = vmatprep.mubr.msk.f32.mxu1 %vm2415_vm1, %v13093_v45  ;;  %v14862_v53 = vmul.f32 %v5400_v16, %v19406_v1  ;;  %10602 = vmatprep.subr.bf16.mxu0 %v18877_v3 }
 0x40b   : > { %v5165_v31 = vsel %vm5064_vm3, %v4962_v37, %v4963_v0  ;;  %v19409_v37 = vld [vmem:[#allocation5_spill] sm:$0xff] }
 0x40c   : > { %v5401_v51 = vmax.f32 %v5293_v47, 0.0  ;;  %v5179_v14 = vadd.f32 %v5165_v31, %v19407_v6  ;;  %5728 = vrot.lane.b32.xlu0 %v14862_v53, %s11114_s9  ;;  %v4457_v29 = vpop.f32.mrb[30].mxu1 }
 0x40d   : > { %v4964_v58 = vrot.slane %v4457_v29, 1  ;;  %v4459_v59 = vpop.f32.mrb[31].mxu1  ;;  %4721 = vmatmul.mubr.f32.gmra.mrb[136].mxu1 %v19408_v30  ;;  %v19411_v29 = vld [vmem:[#allocation251_spill] sm:$0xff] }
 0x40e   : > { %v5294_v45 = vadd.f32 %v14792_v17, %v5179_v14  ;;  %9919 = vmatprep.mubr.msk.f32.mxu1 %vm2415_vm1, %v13114_v21  ;;  %v14875_v16 = vmul.f32 %v5401_v51, %v19409_v37  ;;  %v19412_v21 = vld [vmem:[#allocation47_spill] sm:$0xff] }
 0x40f   : > { %v5164_v33 = vsel %vm5064_vm3, %v4963_v0, %v4964_v58  ;;  %v19413_v30 = vld [vmem:[#allocation119_spill] sm:$0xff] }
 0x410   : > { %v5402_v56 = vmax.f32 %v5294_v45, 0.0  ;;  %v5180_v47 = vadd.f32 %v5164_v33, %v19410_v4  ;;  %5730 = vrot.lane.b32.xlu1 %v14875_v16, %s11114_s9  ;;  %v4462_v1 = vpop.f32.mrb[32].mxu1 }
 0x411   : > { %v4965_v31 = vrot.slane %v4462_v1, 1  ;;  %v4464_v6 = vpop.f32.mrb[33].mxu1  ;;  %4726 = vmatmul.mubr.f32.gmra.mrb[138].mxu1 %v19411_v29  ;;  %v19414_v1 = vld [vmem:[#allocation253_spill] sm:$0xff]  ;;  %v19416_v29 = vld [vmem:[#allocation252_spill] sm:$0xff] }
 0x412   : > { %v5295_v14 = vadd.f32 %v14792_v17, %v5180_v47  ;;  %9920 = vmatprep.mubr.msk.f32.mxu1 %vm2415_vm1, %v13138_v28  ;;  %v14887_v51 = vmul.f32 %v5402_v56, %v19412_v21  ;;  %v19415_v28 = vld [vmem:[#allocation6_spill] sm:$0xff] }
 0x413   : > { %v5163_v0 = vsel %vm5064_vm3, %v4964_v58, %v4965_v31 }
 0x414   : > { %v5403_v59 = vmax.f32 %v5295_v14, 0.0  ;;  %v5181_v45 = vadd.f32 %v5163_v0, %v19413_v30  ;;  %5732 = vrot.lane.b32.xlu0 %v14887_v51, %s11114_s9  ;;  %v4467_v37 = vpop.f32.mrb[34].mxu1 }
 0x415   : > { %v4966_v33 = vrot.slane %v4467_v37, 1  ;;  %v4469_v4 = vpop.f32.mrb[35].mxu1  ;;  %4731 = vmatmul.mubr.f32.gmra.mrb[140].mxu1 %v19414_v1  ;;  %v19417_v37 = vld [vmem:[#allocation254_spill] sm:$0xff]  ;;  %v19419_v1 = vld [vmem:[#allocation127_spill] sm:$0xff] }
 0x416   : > { %v5296_v47 = vadd.f32 %v14792_v17, %v5181_v45  ;;  %9921 = vmatprep.mubr.msk.f32.mxu1 %vm2415_vm1, %v13159_v27  ;;  %v14899_v56 = vmul.f32 %v5403_v59, %v19415_v28  ;;  %v19418_v27 = vld [vmem:[#allocation56_spill] sm:$0xff] }
 0x417   : > { %v5162_v58 = vsel %vm5064_vm3, %v4965_v31, %v4966_v33 }
 0x418   : > { %v5404_v6 = vmax.f32 %v5296_v47, 0.0  ;;  %v5182_v14 = vadd.f32 %v5162_v58, %v19416_v29  ;;  %5734 = vrot.lane.b32.xlu1 %v14899_v56, %s11114_s9  ;;  %v4472_v21 = vpop.f32.mrb[36].mxu1 }
 0x419   : > { %v4967_v0 = vrot.slane %v4472_v21, 1  ;;  %v4474_v30 = vpop.f32.mrb[37].mxu1  ;;  %4736 = vmatmul.mubr.f32.gmra.mrb[142].mxu1 %v19417_v37 }
 0x41a   : > { %v5297_v45 = vadd.f32 %v14792_v17, %v5182_v14  ;;  %9922 = vmatprep.mubr.msk.f32.mxu1 %vm2415_vm1, %v13183_v36  ;;  %v14911_v59 = vmul.f32 %v5404_v6, %v19418_v27  ;;  %v19420_v36 = vld [vmem:[#allocation7_spill] sm:$0xff]  ;;  %v19421_v30 = vld [vmem:[#allocation132_spill] sm:$0xff] }
 0x41b   : > { %v5161_v31 = vsel %vm5064_vm3, %v4966_v33, %v4967_v0 }
 0x41c   : > { %v5405_v4 = vmax.f32 %v5297_v45, 0.0  ;;  %v5183_v47 = vadd.f32 %v5161_v31, %v19419_v1  ;;  %5736 = vrot.lane.b32.xlu0 %v14911_v59, %s11114_s9  ;;  %v4477_v28 = vpop.f32.mrb[38].mxu1  ;;  %v19422_v31 = vld [vmem:[#allocation256_spill] sm:$0xff] }
 0x41d   : > { %v4968_v58 = vrot.slane %v4477_v28, 1  ;;  %v4479_v29 = vpop.f32.mrb[39].mxu1  ;;  %4741 = vmatmul.mubr.f32.gmra.mrb[144].mxu1 %v13749_v54  ;;  %v19424_v28 = vld [vmem:[#allocation255_spill] sm:$0xff] }
 0x41e   : > { %v5298_v14 = vadd.f32 %v14792_v17, %v5183_v47  ;;  %9923 = vmatprep.mubr.msk.f32.mxu1 %vm2415_vm1, %v13204_v20  ;;  %v14923_v6 = vmul.f32 %v5405_v4, %v19420_v36  ;;  %v19423_v20 = vld [vmem:[#allocation65_spill] sm:$0xff] }
 0x41f   : > { %v5160_v33 = vsel %vm5064_vm3, %v4967_v0, %v4968_v58 }
 0x420   : > { %v5406_v21 = vmax.f32 %v5298_v14, 0.0  ;;  %v5184_v37 = vadd.f32 %v5160_v33, %v19421_v30  ;;  %5738 = vrot.lane.b32.xlu1 %v14923_v6, %s11114_s9  ;;  %v4482_v45 = vpop.f32.mrb[40].mxu1  ;;  %v19425_v30 = vld [vmem:[#allocation259_spill] sm:$0xff] }
 0x421   : > { %v4969_v27 = vrot.slane %v4482_v45, 1  ;;  %v4484_v54 = vpop.f32.mrb[41].mxu1  ;;  %4746 = vmatmul.mubr.f32.gmra.mrb[146].mxu1 %v19422_v31 }
 0x422   : > { %v5299_v1 = vadd.f32 %v14792_v17, %v5184_v37  ;;  %9924 = vmatprep.mubr.msk.f32.mxu1 %vm2415_vm1, %v13228_v7  ;;  %v14935_v4 = vmul.f32 %v5406_v21, %v19423_v20  ;;  %v19426_v7 = vld [vmem:[#allocation8_spill] sm:$0xff]  ;;  %v19427_v54 = vld [vmem:[#allocation258_spill] sm:$0xff] }
 0x423   : > { %v5159_v0 = vsel %vm5064_vm3, %v4968_v58, %v4969_v27 }
 0x424   : > { %v5407_v47 = vmax.f32 %v5299_v1, 0.0  ;;  %v5185_v29 = vadd.f32 %v5159_v0, %v19424_v28  ;;  %5740 = vrot.lane.b32.xlu0 %v14935_v4, %s11114_s9  ;;  %v4487_v14 = vpop.f32.mrb[42].mxu1  ;;  %v19428_v28 = vld [vmem:[#allocation261_spill] sm:$0xff] }
 0x425   : > { %v4970_v36 = vrot.slane %v4487_v14, 1  ;;  %v4489_v33 = vpop.f32.mrb[43].mxu1  ;;  %4751 = vmatmul.mubr.f32.gmra.mrb[148].mxu1 %v19425_v30 }
 0x426   : > { %v5300_v37 = vadd.f32 %v14792_v17, %v5185_v29  ;;  %9925 = vmatprep.mubr.msk.f32.mxu1 %vm2415_vm1, %v13255_v9  ;;  %v14947_v21 = vmul.f32 %v5407_v47, %v19426_v7  ;;  %v19429_v9 = vld [vmem:[#allocation74_spill] sm:$0xff]  ;;  %v19430_v33 = vld [vmem:[#allocation260_spill] sm:$0xff] }
 0x427   : > { %v5158_v58 = vsel %vm5064_vm3, %v4969_v27, %v4970_v36  ;;  %v6162_v7 = vld [vmem:[%s18267_s5 + $0x50] sm:$0xff] }
 0x428   : > { %v5408_v45 = vmax.f32 %v5300_v37, 0.0  ;;  %v5186_v31 = vadd.f32 %v5158_v58, %v19427_v54  ;;  %5742 = vrot.lane.b32.xlu1 %v14947_v21, %s11114_s9  ;;  %v4492_v1 = vpop.f32.mrb[44].mxu1 }
 0x429   : > { %v4971_v20 = vrot.slane %v4492_v1, 1  ;;  %v4494_v0 = vpop.f32.mrb[45].mxu1  ;;  %4756 = vmatmul.mubr.f32.gmra.mrb[150].mxu1 %v19428_v28 }
 0x42a   : > { %v5301_v29 = vadd.f32 %v14792_v17, %v5186_v31  ;;  %9926 = vmatprep.mubr.msk.f32.mxu1 %vm2415_vm1, %v13280_v49  ;;  %v14959_v47 = vmul.f32 %v5408_v45, %v19429_v9  ;;  %v6163_v49 = vld [vmem:[%s18267_s5 + $0x58] sm:$0xff] }
 0x42b   : > { %v5157_v27 = vsel %vm5064_vm3, %v4970_v36, %v4971_v20  ;;  %v10603_v36 = vpack.c.bf16 %v6163_v49, %v6162_v7  ;;  %v19431_v31 = vld [vmem:[#allocation9_spill] sm:$0xff]  ;;  %v19435_v49 = vld [vmem:[#allocation263_spill] sm:$0xff] }
 0x42c   : > { %v5409_v14 = vmax.f32 %v5301_v29, 0.0  ;;  %v5187_v30 = vadd.f32 %v5157_v27, %v19430_v33  ;;  %5744 = vrot.lane.b32.xlu0 %v14959_v47, %s11114_s9  ;;  %v4497_v37 = vpop.f32.mrb[46].mxu1  ;;  %v19432_v29 = vld [vmem:[#allocation262_spill] sm:$0xff] }
 0x42d   : > { %v4972_v58 = vrot.slane %v4497_v37, 1  ;;  %v4499_v45 = vpop.f32.mrb[47].mxu1  ;;  %4761 = vmatmul.mubr.f32.gmra.mrb[152].mxu1 %v13829_v34  ;;  %10604 = vmatpush1.bf16.msra.mxu0 %v10603_v36 }
 0x42e   : > { %v5302_v54 = vadd.f32 %v14792_v17, %v5187_v30  ;;  %9927 = vmatprep.mubr.msk.f32.mxu1 %vm2415_vm1, %v13301_v23  ;;  %v14977_v1 = vmul.f32 %v5409_v14, %v19431_v31  ;;  %10605 = vmatprep.subr.bf16.mxu0 %v18877_v3  ;;  %v19433_v30 = vld [vmem:[#allocation264_spill] sm:$0xff] }
 0x42f   : > { %v5156_v0 = vsel %vm5064_vm3, %v4971_v20, %v4972_v58  ;;  %v19434_v20 = vld [vmem:[#allocation83_spill] sm:$0xff] }
 0x430   : > { %v5410_v28 = vmax.f32 %v5302_v54, 0.0  ;;  %v5188_v9 = vadd.f32 %v5156_v0, %v19432_v29  ;;  %5746 = vrot.lane.b32.xlu1 %v14977_v1, %s11114_s9  ;;  %v4502_v34 = vpop.f32.mrb[48].mxu1  ;;  %v19436_v0 = vld [vmem:[#allocation266_spill] sm:$0xff] }
 0x431   : > { %v4973_v27 = vrot.slane %v4502_v34, 1  ;;  %v4504_v33 = vpop.f32.mrb[49].mxu1  ;;  %4766 = vmatmul.mubr.f32.gmra.mrb[154].mxu1 %v19433_v30  ;;  %v19438_v34 = vld [vmem:[#allocation265_spill] sm:$0xff] }
 0x432   : > { %v5303_v23 = vadd.f32 %v14792_v17, %v5188_v9  ;;  %9928 = vmatprep.mubr.msk.f32.mxu1 %vm2415_vm1, %v13323_v35  ;;  %v14990_v14 = vmul.f32 %v5410_v28, %v19434_v20  ;;  %v19437_v35 = vld [vmem:[#allocation92_spill] sm:$0xff] }
 0x433   : > { %v5155_v37 = vsel %vm5064_vm3, %v4972_v58, %v4973_v27 }
 0x434   : > { %v5411_v7 = vmax.f32 %v5303_v23, 0.0  ;;  %v5189_v45 = vadd.f32 %v5155_v37, %v19435_v49  ;;  %5748 = vrot.lane.b32.xlu0 %v14990_v14, %s11114_s9  ;;  %v4507_v36 = vpop.f32.mrb[50].mxu1  ;;  %v19439_v37 = vld [vmem:[#allocation268_spill] sm:$0xff] }
 0x435   : > { %v4974_v54 = vrot.slane %v4507_v36, 1  ;;  %v4509_v31 = vpop.f32.mrb[51].mxu1  ;;  %4771 = vmatmul.mubr.f32.gmra.mrb[156].mxu1 %v19436_v0  ;;  %v19441_v36 = vld [vmem:[#allocation267_spill] sm:$0xff] }
 0x436   : > { %v5304_v29 = vadd.f32 %v14792_v17, %v5189_v45  ;;  %9929 = vmatprep.mubr.msk.f32.mxu1 %vm2415_vm1, %v13342_v5  ;;  %v15002_v28 = vmul.f32 %v5411_v7, %v19437_v35  ;;  %v19440_v5 = vld [vmem:[#allocation101_spill] sm:$0xff] }
 0x437   : > { %v5154_v58 = vsel %vm5064_vm3, %v4973_v27, %v4974_v54 }
 0x438   : > { %v5412_v9 = vmax.f32 %v5304_v29, 0.0  ;;  %v5190_v33 = vadd.f32 %v5154_v58, %v19438_v34  ;;  %5750 = vrot.lane.b32.xlu1 %v15002_v28, %s11114_s9  ;;  %v4512_v30 = vpop.f32.mrb[52].mxu1  ;;  %v19442_v58 = vld [vmem:[#allocation270_spill] sm:$0xff] }
 0x439   : > { %v4975_v23 = vrot.slane %v4512_v30, 1  ;;  %v4514_v20 = vpop.f32.mrb[53].mxu1  ;;  %4776 = vmatmul.mubr.f32.gmra.mrb[158].mxu1 %v19439_v37  ;;  %v19444_v30 = vld [vmem:[#allocation269_spill] sm:$0xff] }
 0x43a   : > { %v5305_v49 = vadd.f32 %v14792_v17, %v5190_v33  ;;  %9930 = vmatprep.mubr.msk.f32.mxu1 %vm2415_vm1, %v13361_v42  ;;  %v15014_v7 = vmul.f32 %v5412_v9, %v19440_v5  ;;  %v19443_v42 = vld [vmem:[#allocation13_spill] sm:$0xff] }
 0x43b   : > { %v5153_v27 = vsel %vm5064_vm3, %v4974_v54, %v4975_v23 }
 0x43c   : > { %v5413_v45 = vmax.f32 %v5305_v49, 0.0  ;;  %v5191_v31 = vadd.f32 %v5153_v27, %v19441_v36  ;;  %5752 = vrot.lane.b32.xlu0 %v15014_v7, %s11114_s9  ;;  %v4517_v0 = vpop.f32.mrb[54].mxu1  ;;  %v19445_v27 = vld [vmem:[#allocation272_spill] sm:$0xff] }
 0x43d   : > { %v4976_v29 = vrot.slane %v4517_v0, 1  ;;  %v4519_v35 = vpop.f32.mrb[55].mxu1  ;;  %4781 = vmatmul.mubr.f32.gmra.mrb[160].mxu1 %v19442_v58  ;;  %v19447_v0 = vld [vmem:[#allocation271_spill] sm:$0xff] }
 0x43e   : > { %v5306_v34 = vadd.f32 %v14792_v17, %v5191_v31  ;;  %9931 = vmatprep.mubr.msk.f32.mxu1 %vm2415_vm1, %v13380_v2  ;;  %v15026_v9 = vmul.f32 %v5413_v45, %v19443_v42  ;;  %v19446_v2 = vld [vmem:[#allocation14_spill] sm:$0xff] }
 0x43f   : > { %v5152_v54 = vsel %vm5064_vm3, %v4975_v23, %v4976_v29 }
 0x440   : > { %v5414_v33 = vmax.f32 %v5306_v34, 0.0  ;;  %v5192_v20 = vadd.f32 %v5152_v54, %v19444_v30  ;;  %5754 = vrot.lane.b32.xlu1 %v15026_v9, %s11114_s9  ;;  %v4522_v37 = vpop.f32.mrb[56].mxu1  ;;  %v19448_v54 = vld [vmem:[#allocation274_spill] sm:$0xff] }
 0x441   : > { %v4977_v49 = vrot.slane %v4522_v37, 1  ;;  %v4524_v5 = vpop.f32.mrb[57].mxu1  ;;  %4786 = vmatmul.mubr.f32.gmra.mrb[162].mxu1 %v19445_v27  ;;  %v19450_v37 = vld [vmem:[#allocation273_spill] sm:$0xff] }
 0x442   : > { %v5307_v36 = vadd.f32 %v14792_v17, %v5192_v20  ;;  %9932 = vmatprep.mubr.msk.f32.mxu1 %vm2415_vm1, %v13397_v32  ;;  %v15038_v45 = vmul.f32 %v5414_v33, %v19446_v2  ;;  %v19449_v32 = vld [vmem:[#allocation15_spill] sm:$0xff] }
 0x443   : > { %v5151_v23 = vsel %vm5064_vm3, %v4976_v29, %v4977_v49 }
 0x444   : > { %v5415_v31 = vmax.f32 %v5307_v36, 0.0  ;;  %v5193_v35 = vadd.f32 %v5151_v23, %v19447_v0  ;;  %5756 = vrot.lane.b32.xlu0 %v15038_v45, %s11114_s9  ;;  %v4527_v58 = vpop.f32.mrb[58].mxu1  ;;  %v19451_v23 = vld [vmem:[#allocation276_spill] sm:$0xff] }
 0x445   : > { %v4978_v34 = vrot.slane %v4527_v58, 1  ;;  %v4529_v42 = vpop.f32.mrb[59].mxu1  ;;  %4791 = vmatmul.mubr.f32.gmra.mrb[164].mxu1 %v19448_v54  ;;  %v19453_v58 = vld [vmem:[#allocation275_spill] sm:$0xff] }
 0x446   : > { %v5308_v30 = vadd.f32 %v14792_v17, %v5193_v35  ;;  %9933 = vmatprep.mubr.msk.f32.mxu1 %vm2415_vm1, %v13414_v11  ;;  %v15050_v33 = vmul.f32 %v5415_v31, %v19449_v32  ;;  %v19452_v11 = vld [vmem:[#allocation16_spill] sm:$0xff] }
 0x447   : > { %v5150_v29 = vsel %vm5064_vm3, %v4977_v49, %v4978_v34 }
 0x448   : > { %v5416_v20 = vmax.f32 %v5308_v30, 0.0  ;;  %v5194_v5 = vadd.f32 %v5150_v29, %v19450_v37  ;;  %5758 = vrot.lane.b32.xlu1 %v15050_v33, %s11114_s9  ;;  %v4532_v27 = vpop.f32.mrb[60].mxu1  ;;  %v19454_v29 = vld [vmem:[#allocation278_spill] sm:$0xff] }
 0x449   : > { %v4979_v36 = vrot.slane %v4532_v27, 1  ;;  %v4534_v2 = vpop.f32.mrb[61].mxu1  ;;  %4796 = vmatmul.mubr.f32.gmra.mrb[166].mxu1 %v19451_v23  ;;  %v19456_v27 = vld [vmem:[#allocation277_spill] sm:$0xff] }
 0x44a   : > { %v5309_v0 = vadd.f32 %v14792_v17, %v5194_v5  ;;  %9934 = vmatprep.mubr.msk.f32.mxu1 %vm2415_vm1, %v13437_v38  ;;  %v15062_v31 = vmul.f32 %v5416_v20, %v19452_v11  ;;  %v19455_v38 = vld [vmem:[#allocation17_spill] sm:$0xff] }
 0x44b   : > { %v5149_v49 = vsel %vm5064_vm3, %v4978_v34, %v4979_v36 }
 0x44c   : > { %v5417_v35 = vmax.f32 %v5309_v0, 0.0  ;;  %v5195_v42 = vadd.f32 %v5149_v49, %v19453_v58  ;;  %5760 = vrot.lane.b32.xlu0 %v15062_v31, %s11114_s9  ;;  %v4537_v54 = vpop.f32.mrb[62].mxu1  ;;  %v6164_v0 = vld [vmem:[%s18267_s5 + $0x60] sm:$0xff] }
 0x44d   : > { %v4980_v30 = vrot.slane %v4537_v54, 1  ;;  %v4539_v32 = vpop.f32.mrb[63].mxu1  ;;  %4801 = vmatmul.mubr.f32.gmra.mrb[168].mxu1 %v19454_v29 }
 0x44e   : > { %v5310_v37 = vadd.f32 %v14792_v17, %v5195_v42  ;;  %9935 = vmatprep.mubr.msk.f32.mxu1 %vm2415_vm1, %v13455_v12  ;;  %v15074_v20 = vmul.f32 %v5417_v35, %v19455_v38  ;;  %v6165_v12 = vld [vmem:[%s18267_s5 + $0x68] sm:$0xff]  ;;  %v19458_v42 = vld [vmem:[#allocation18_spill] sm:$0xff] }
 0x44f   : > { %v5148_v34 = vsel %vm5064_vm3, %v4979_v36, %v4980_v30  ;;  %v19457_v35 = vld [vmem:[#allocation280_spill] sm:$0xff]  ;;  %v10606_v36 = vpack.c.bf16 %v6165_v12, %v6164_v0 }
 0x450   : > { %v5418_v5 = vmax.f32 %v5310_v37, 0.0  ;;  %v5196_v2 = vadd.f32 %v5148_v34, %v19456_v27  ;;  %5762 = vrot.lane.b32.xlu1 %v15074_v20, %s11114_s9  ;;  %v4542_v23 = vpop.f32.mrb[64].mxu1  ;;  %v19459_v37 = vld [vmem:[#allocation279_spill] sm:$0xff] }
 0x451   : > { %v4981_v11 = vrot.slane %v4542_v23, 1  ;;  %v4544_v49 = vpop.f32.mrb[65].mxu1  ;;  %4806 = vmatmul.mubr.f32.gmra.mrb[170].mxu1 %v19457_v35  ;;  %10607 = vmatpush1.bf16.msra.mxu0 %v10606_v36  ;;  %v19460_v23 = vld [vmem:[#allocation282_spill] sm:$0xff] }
 0x452   : > { %v5311_v58 = vadd.f32 %v14792_v17, %v5196_v2  ;;  %9936 = vmatprep.mubr.msk.f32.mxu1 %vm2415_vm1, %v13472_v22  ;;  %v15092_v54 = vmul.f32 %v5418_v5, %v19458_v42  ;;  %10608 = vmatprep.subr.bf16.mxu0 %v18877_v3  ;;  %v19462_v49 = vld [vmem:[#allocation281_spill] sm:$0xff] }
 0x453   : > { %v5147_v32 = vsel %vm5064_vm3, %v4980_v30, %v4981_v11  ;;  %v19461_v30 = vld [vmem:[#allocation19_spill] sm:$0xff] }
 0x454   : > { %v5419_v29 = vmax.f32 %v5311_v58, 0.0  ;;  %v5197_v38 = vadd.f32 %v5147_v32, %v19459_v37  ;;  %5764 = vrot.lane.b32.xlu0 %v15092_v54, %s11114_s9  ;;  %v4547_v34 = vpop.f32.mrb[66].mxu1  ;;  %v19463_v32 = vld [vmem:[#allocation284_spill] sm:$0xff] }
 0x455   : > { %v4982_v27 = vrot.slane %v4547_v34, 1  ;;  %v4549_v2 = vpop.f32.mrb[67].mxu1  ;;  %4811 = vmatmul.mubr.f32.gmra.mrb[172].mxu1 %v19460_v23 }
 0x456   : > { %v5312_v22 = vadd.f32 %v14792_v17, %v5197_v38  ;;  %9937 = vmatprep.mubr.msk.f32.mxu1 %vm2415_vm1, %v13496_v43  ;;  %v15105_v5 = vmul.f32 %v5419_v29, %v19461_v30  ;;  %v19464_v43 = vld [vmem:[#allocation93_spill] sm:$0xff]  ;;  %v19465_v29 = vld [vmem:[#allocation20_spill] sm:$0xff]  ;;  %v19466_v2 = vld [vmem:[#allocation283_spill] sm:$0xff] }
 0x457   : > { %v5146_v0 = vsel %vm5064_vm3, %v4981_v11, %v4982_v27 }
 0x458   : > { %v5420_v12 = vmax.f32 %v5312_v22, 0.0  ;;  %v5198_v35 = vadd.f32 %v5146_v0, %v19462_v49  ;;  %5766 = vrot.lane.b32.xlu1 %v15105_v5, %s11114_s9  ;;  %v4552_v36 = vpop.f32.mrb[68].mxu1  ;;  %v19467_v49 = vld [vmem:[#allocation286_spill] sm:$0xff] }
 0x459   : > { %v4983_v58 = vrot.slane %v4552_v36, 1  ;;  %v4554_v42 = vpop.f32.mrb[69].mxu1  ;;  %4816 = vmatmul.mubr.f32.gmra.mrb[174].mxu1 %v19463_v32  ;;  %v19469_v32 = vld [vmem:[#allocation285_spill] sm:$0xff] }
 0x45a   : > { %v5313_v37 = vadd.f32 %v14792_v17, %v5198_v35  ;;  %9938 = vmatprep.mubr.msk.f32.mxu1 %vm2415_vm1, %v19464_v43  ;;  %v15117_v38 = vmul.f32 %v5420_v12, %v19465_v29  ;;  %v19468_v12 = vld [vmem:[#allocation21_spill] sm:$0xff] }
 0x45b   : > { %v5145_v11 = vsel %vm5064_vm3, %v4982_v27, %v4983_v58 }
 0x45c   : > { %v5421_v34 = vmax.f32 %v5313_v37, 0.0  ;;  %v5199_v23 = vadd.f32 %v5145_v11, %v19466_v2  ;;  %5768 = vrot.lane.b32.xlu0 %v15117_v38, %s11114_s9  ;;  %v4557_v22 = vpop.f32.mrb[70].mxu1  ;;  %v19470_v2 = vld [vmem:[#allocation288_spill] sm:$0xff] }
 0x45d   : > { %v4984_v30 = vrot.slane %v4557_v22, 1  ;;  %v4559_v0 = vpop.f32.mrb[71].mxu1  ;;  %4821 = vmatmul.mubr.f32.gmra.mrb[176].mxu1 %v19467_v49 }
 0x45e   : > { %v5314_v35 = vadd.f32 %v14792_v17, %v5199_v23  ;;  %9939 = vmatprep.mubr.msk.f32.mxu1 %vm2415_vm1, %v13538_v10  ;;  %v15129_v36 = vmul.f32 %v5421_v34, %v19468_v12  ;;  %v19471_v10 = vld [vmem:[#allocation22_spill] sm:$0xff]  ;;  %v19472_v0 = vld [vmem:[#allocation287_spill] sm:$0xff] }
 0x45f   : > { %v5144_v27 = vsel %vm5064_vm3, %v4983_v58, %v4984_v30 }
 0x460   : > { %v5422_v42 = vmax.f32 %v5314_v35, 0.0  ;;  %v5200_v37 = vadd.f32 %v5144_v27, %v19469_v32  ;;  %5770 = vrot.lane.b32.xlu1 %v15129_v36, %s11114_s9  ;;  %v4562_v43 = vpop.f32.mrb[72].mxu1  ;;  %v19473_v32 = vld [vmem:[#allocation290_spill] sm:$0xff] }
 0x461   : > { %v4985_v29 = vrot.slane %v4562_v43, 1  ;;  %v4564_v11 = vpop.f32.mrb[73].mxu1  ;;  %4826 = vmatmul.mubr.f32.gmra.mrb[178].mxu1 %v19470_v2 }
 0x462   : > { %v5315_v23 = vadd.f32 %v14792_v17, %v5200_v37  ;;  %9940 = vmatprep.mubr.msk.f32.mxu1 %vm2415_vm1, %v13564_v48  ;;  %v15141_v34 = vmul.f32 %v5422_v42, %v19471_v10  ;;  %v19474_v48 = vld [vmem:[#allocation23_spill] sm:$0xff]  ;;  %v19475_v11 = vld [vmem:[#allocation289_spill] sm:$0xff] }
 0x463   : > { %v5143_v58 = vsel %vm5064_vm3, %v4984_v30, %v4985_v29 }
 0x464   : > { %v5423_v22 = vmax.f32 %v5315_v23, 0.0  ;;  %v5201_v49 = vadd.f32 %v5143_v58, %v19472_v0  ;;  %5772 = vrot.lane.b32.xlu0 %v15141_v34, %s11114_s9  ;;  %v4567_v35 = vpop.f32.mrb[74].mxu1  ;;  %v19476_v0 = vld [vmem:[#allocation292_spill] sm:$0xff] }
 0x465   : > { %v4986_v12 = vrot.slane %v4567_v35, 1  ;;  %v4569_v27 = vpop.f32.mrb[75].mxu1  ;;  %4831 = vmatmul.mubr.f32.gmra.mrb[180].mxu1 %v19473_v32 }
 0x466   : > { %v5316_v37 = vadd.f32 %v14792_v17, %v5201_v49  ;;  %9941 = vmatprep.mubr.msk.f32.mxu1 %vm2415_vm1, %v13585_v41  ;;  %v15153_v42 = vmul.f32 %v5423_v22, %v19474_v48  ;;  %v19477_v41 = vld [vmem:[#allocation25_spill] sm:$0xff]  ;;  %v19478_v27 = vld [vmem:[#allocation291_spill] sm:$0xff] }
 0x467   : > { %v5142_v30 = vsel %vm5064_vm3, %v4985_v29, %v4986_v12 }
 0x468   : > { %v5424_v43 = vmax.f32 %v5316_v37, 0.0  ;;  %v5202_v2 = vadd.f32 %v5142_v30, %v19475_v11  ;;  %5774 = vrot.lane.b32.xlu1 %v15153_v42, %s11114_s9  ;;  %v4572_v23 = vpop.f32.mrb[76].mxu1  ;;  %v19479_v11 = vld [vmem:[#allocation294_spill] sm:$0xff] }
 0x469   : > { %v4987_v10 = vrot.slane %v4572_v23, 1  ;;  %v4574_v58 = vpop.f32.mrb[77].mxu1  ;;  %4836 = vmatmul.mubr.f32.gmra.mrb[182].mxu1 %v19476_v0 }
 0x46a   : > { %v5317_v49 = vadd.f32 %v14792_v17, %v5202_v2  ;;  %9942 = vmatprep.mubr.msk.f32.mxu1 %vm2415_vm1, %v13606_v61  ;;  %v15165_v22 = vmul.f32 %v5424_v43, %v19477_v41  ;;  %v19480_v61 = vld [vmem:[#allocation28_spill] sm:$0xff]  ;;  %v19481_v58 = vld [vmem:[#allocation293_spill] sm:$0xff] }
 0x46b   : > { %v5141_v29 = vsel %vm5064_vm3, %v4986_v12, %v4987_v10 }
 0x46c   : > { %v5425_v35 = vmax.f32 %v5317_v49, 0.0  ;;  %v5203_v32 = vadd.f32 %v5141_v29, %v19478_v27  ;;  %5776 = vrot.lane.b32.xlu0 %v15165_v22, %s11114_s9  ;;  %v4577_v37 = vpop.f32.mrb[78].mxu1  ;;  %v19482_v27 = vld [vmem:[#allocation296_spill] sm:$0xff] }
 0x46d   : > { %v4988_v48 = vrot.slane %v4577_v37, 1  ;;  %v4579_v30 = vpop.f32.mrb[79].mxu1  ;;  %4841 = vmatmul.mubr.f32.gmra.mrb[184].mxu1 %v19479_v11 }
 0x46e   : > { %v5318_v2 = vadd.f32 %v14792_v17, %v5203_v32  ;;  %9943 = vmatprep.mubr.msk.f32.mxu1 %vm2415_vm1, %v12979_v13  ;;  %v15177_v43 = vmul.f32 %v5425_v35, %v19480_v61  ;;  %v19483_v13 = vld [vmem:[#allocation33_spill] sm:$0xff]  ;;  %v19484_v30 = vld [vmem:[#allocation295_spill] sm:$0xff] }
 0x46f   : > { %v5140_v12 = vsel %vm5064_vm3, %v4987_v10, %v4988_v48  ;;  %v6166_v61 = vld [vmem:[%s18267_s5 + $0x70] sm:$0xff] }
 0x470   : > { %v5426_v23 = vmax.f32 %v5318_v2, 0.0  ;;  %v5204_v0 = vadd.f32 %v5140_v12, %v19481_v58  ;;  %5778 = vrot.lane.b32.xlu1 %v15177_v43, %s11114_s9  ;;  %v4582_v49 = vpop.f32.mrb[80].mxu1  ;;  %v19485_v58 = vld [vmem:[#allocation298_spill] sm:$0xff] }
 0x471   : > { %v4989_v41 = vrot.slane %v4582_v49, 1  ;;  %v4584_v29 = vpop.f32.mrb[81].mxu1  ;;  %4846 = vmatmul.mubr.f32.gmra.mrb[186].mxu1 %v19482_v27  ;;  %v19486_v49 = vld [vmem:[#allocation38_spill] sm:$0xff] }
 0x472   : > { %v5319_v32 = vadd.f32 %v14792_v17, %v5204_v0  ;;  %9944 = vmatprep.mubr.msk.f32.mxu1 %vm2415_vm1, %v13633_v26  ;;  %v15189_v35 = vmul.f32 %v5426_v23, %v19483_v13  ;;  %v6167_v26 = vld [vmem:[%s18267_s5 + $0x78] sm:$0xff] }
 0x473   : > { %v5139_v10 = vsel %vm5064_vm3, %v4988_v48, %v4989_v41  ;;  %v10609_v48 = vpack.c.bf16 %v6167_v26, %v6166_v61  ;;  %v19487_v13 = vld [vmem:[#allocation297_spill] sm:$0xff]  ;;  %v19488_v61 = vld [vmem:[#allocation300_spill] sm:$0xff] }
 0x474   : > { %v5427_v37 = vmax.f32 %v5319_v32, 0.0  ;;  %v5205_v11 = vadd.f32 %v5139_v10, %v19484_v30  ;;  %5780 = vrot.lane.b32.xlu0 %v15189_v35, %s11114_s9  ;;  %v4587_v2 = vpop.f32.mrb[82].mxu1 }
 0x475   : > { %v4990_v12 = vrot.slane %v4587_v2, 1  ;;  %v4589_v23 = vpop.f32.mrb[83].mxu1  ;;  %4851 = vmatmul.mubr.f32.gmra.mrb[188].mxu1 %v19485_v58  ;;  %10610 = vmatpush1.bf16.msra.mxu0 %v10609_v48  ;;  %v19491_v48 = vld [vmem:[#allocation299_spill] sm:$0xff] }
 0x476   : > { %v5320_v0 = vadd.f32 %v14792_v17, %v5205_v11  ;;  %9945 = vmatprep.mubr.msk.f32.mxu1 %vm2415_vm1, %v13024_v19  ;;  %v15207_v29 = vmul.f32 %v5427_v37, %v19486_v49  ;;  %10611 = vmatprep.subr.bf16.mxu0 %v18877_v3  ;;  %v19489_v37 = vld [vmem:[#allocation115_spill] sm:$0xff] }
 0x477   : > { %v5138_v27 = vsel %vm5064_vm3, %v4989_v41, %v4990_v12  ;;  %v19490_v41 = vld [vmem:[#allocation43_spill] sm:$0xff] }
 0x478   : > { %v5428_v32 = vmax.f32 %v5320_v0, 0.0  ;;  %v5206_v10 = vadd.f32 %v5138_v27, %v19487_v13  ;;  %5782 = vrot.lane.b32.xlu1 %v15207_v29, %s11114_s9  ;;  %v4592_v30 = vpop.f32.mrb[84].mxu1 }
 0x479   : > { %v4991_v11 = vrot.slane %v4592_v30, 1  ;;  %v4594_v2 = vpop.f32.mrb[85].mxu1  ;;  %4856 = vmatmul.mubr.f32.gmra.mrb[190].mxu1 %v19488_v61  ;;  %v19492_v30 = vld [vmem:[#allocation302_spill] sm:$0xff] }
 0x47a   : > { %v5321_v19 = vadd.f32 %v14792_v17, %v5206_v10  ;;  %9946 = vmatprep.mubr.msk.f32.mxu1 %vm2415_vm1, %v19489_v37  ;;  %v15220_v26 = vmul.f32 %v5428_v32, %v19490_v41  ;;  %v19493_v32 = vld [vmem:[#allocation46_spill] sm:$0xff] }
 0x47b   : > { %v5137_v23 = vsel %vm5064_vm3, %v4990_v12, %v4991_v11 }
 0x47c   : > { %v5429_v58 = vmax.f32 %v5321_v19, 0.0  ;;  %v5207_v0 = vadd.f32 %v5137_v23, %v19491_v48  ;;  %5784 = vrot.lane.b32.xlu0 %v15220_v26, %s11114_s9  ;;  %v4597_v49 = vpop.f32.mrb[86].mxu1  ;;  %v19494_v19 = vld [vmem:[#allocation301_spill] sm:$0xff] }
 0x47d   : > { %v4992_v27 = vrot.slane %v4597_v49, 1  ;;  %v4599_v13 = vpop.f32.mrb[87].mxu1  ;;  %4861 = vmatmul.mubr.f32.gmra.mrb[192].mxu1 %v19492_v30  ;;  %v19495_v49 = vld [vmem:[#allocation304_spill] sm:$0xff]  ;;  %v19497_v30 = vld [vmem:[#allocation303_spill] sm:$0xff] }
 0x47e   : > { %v5322_v10 = vadd.f32 %v14792_v17, %v5207_v0  ;;  %9947 = vmatprep.mubr.msk.f32.mxu1 %vm2415_vm1, %v13076_v63  ;;  %v15232_v2 = vmul.f32 %v5429_v58, %v19493_v32  ;;  %v19496_v63 = vld [vmem:[#allocation51_spill] sm:$0xff] }
 0x47f   : > { %v5136_v12 = vsel %vm5064_vm3, %v4991_v11, %v4992_v27 }
 0x480   : > { %v5430_v61 = vmax.f32 %v5322_v10, 0.0  ;;  %v5208_v37 = vadd.f32 %v5136_v12, %v19494_v19  ;;  %5786 = vrot.lane.b32.xlu1 %v15232_v2, %s11114_s9  ;;  %v4602_v41 = vpop.f32.mrb[88].mxu1 }
 0x481   : > { %v4993_v23 = vrot.slane %v4602_v41, 1  ;;  %v4604_v48 = vpop.f32.mrb[89].mxu1  ;;  %4866 = vmatmul.mubr.f32.gmra.mrb[194].mxu1 %v19495_v49  ;;  %v19498_v41 = vld [vmem:[#allocation306_spill] sm:$0xff]  ;;  %v19500_v49 = vld [vmem:[#allocation305_spill] sm:$0xff] }
 0x482   : > { %v5323_v0 = vadd.f32 %v14792_v17, %v5208_v37  ;;  %9948 = vmatprep.mubr.msk.f32.mxu1 %vm2415_vm1, %v13676_v39  ;;  %v15244_v58 = vmul.f32 %v5430_v61, %v19496_v63  ;;  %v19499_v39 = vld [vmem:[#allocation55_spill] sm:$0xff] }
 0x483   : > { %v5135_v11 = vsel %vm5064_vm3, %v4992_v27, %v4993_v23 }
 0x484   : > { %v5431_v13 = vmax.f32 %v5323_v0, 0.0  ;;  %v5209_v10 = vadd.f32 %v5135_v11, %v19497_v30  ;;  %5788 = vrot.lane.b32.xlu0 %v15244_v58, %s11114_s9  ;;  %v4607_v32 = vpop.f32.mrb[90].mxu1 }
 0x485   : > { %v4994_v12 = vrot.slane %v4607_v32, 1  ;;  %v4609_v19 = vpop.f32.mrb[91].mxu1  ;;  %4871 = vmatmul.mubr.f32.gmra.mrb[196].mxu1 %v19498_v41  ;;  %v19501_v32 = vld [vmem:[#allocation308_spill] sm:$0xff] }
 0x486   : > { %v5324_v37 = vadd.f32 %v14792_v17, %v5209_v10  ;;  %9949 = vmatprep.mubr.msk.f32.mxu1 %vm2415_vm1, %v13121_v25  ;;  %v15256_v61 = vmul.f32 %v5431_v13, %v19499_v39  ;;  %v19502_v25 = vld [vmem:[#allocation123_spill] sm:$0xff]  ;;  %v19503_v13 = vld [vmem:[#allocation60_spill] sm:$0xff] }
 0x487   : > { %v5134_v27 = vsel %vm5064_vm3, %v4993_v23, %v4994_v12 }
 0x488   : > { %v5432_v48 = vmax.f32 %v5324_v37, 0.0  ;;  %v5210_v0 = vadd.f32 %v5134_v27, %v19500_v49  ;;  %5790 = vrot.lane.b32.xlu1 %v15256_v61, %s11114_s9  ;;  %v4612_v63 = vpop.f32.mrb[92].mxu1  ;;  %v19504_v37 = vld [vmem:[#allocation307_spill] sm:$0xff] }
 0x489   : > { %v4995_v11 = vrot.slane %v4612_v63, 1  ;;  %v4614_v30 = vpop.f32.mrb[93].mxu1  ;;  %4876 = vmatmul.mubr.f32.gmra.mrb[198].mxu1 %v19501_v32  ;;  %v19506_v32 = vld [vmem:[#allocation232_spill] sm:$0xff] }
 0x48a   : > { %v5325_v10 = vadd.f32 %v14792_v17, %v5210_v0  ;;  %9950 = vmatprep.mubr.msk.f32.mxu1 %vm2415_vm1, %v19502_v25  ;;  %v15268_v19 = vmul.f32 %v5432_v48, %v19503_v13  ;;  %v19505_v30 = vld [vmem:[#allocation310_spill] sm:$0xff]  ;;  %v19507_v48 = vld [vmem:[#allocation64_spill] sm:$0xff]  ;;  %v19508_v13 = vld [vmem:[#allocation309_spill] sm:$0xff] }
 0x48b   : > { %v5133_v23 = vsel %vm5064_vm3, %v4994_v12, %v4995_v11 }
 0x48c   : > { %v5433_v41 = vmax.f32 %v5325_v10, 0.0  ;;  %v5211_v39 = vadd.f32 %v5133_v23, %v19504_v37  ;;  %5792 = vrot.lane.b32.xlu0 %v15268_v19, %s11114_s9  ;;  %v4617_v27 = vpop.f32.mrb[94].mxu1 }
 0x48d   : > { %v4996_v49 = vrot.slane %v4617_v27, 1  ;;  %v4619_v63 = vpop.f32.mrb[95].mxu1  ;;  %4881 = vmatmul.mubr.f32.gmra.mrb[200].mxu1 %v19505_v30  ;;  %v19509_v30 = vld [vmem:[#allocation312_spill] sm:$0xff] }
 0x48e   : > { %v5326_v0 = vadd.f32 %v14792_v17, %v5211_v39  ;;  %9951 = vmatprep.mubr.msk.f32.mxu1 %vm2415_vm1, %v19506_v32  ;;  %v15280_v25 = vmul.f32 %v5433_v41, %v19507_v48  ;;  %v19510_v41 = vld [vmem:[#allocation69_spill] sm:$0xff]  ;;  %v19512_v48 = vld [vmem:[#allocation311_spill] sm:$0xff] }
 0x48f   : > { %v5132_v12 = vsel %vm5064_vm3, %v4995_v11, %v4996_v49 }
 0x490   : > { %v5434_v10 = vmax.f32 %v5326_v0, 0.0  ;;  %v5212_v23 = vadd.f32 %v5132_v12, %v19508_v13  ;;  %5794 = vrot.lane.b32.xlu1 %v15280_v25, %s11114_s9  ;;  %v4622_v37 = vpop.f32.mrb[96].mxu1 }
 0x491   : > { %v4997_v27 = vrot.slane %v4622_v37, 1  ;;  %v4624_v63 = vpop.f32.mrb[97].mxu1  ;;  %4886 = vmatmul.mubr.f32.gmra.mrb[202].mxu1 %v19509_v30  ;;  %v19513_v30 = vld [vmem:[#allocation314_spill] sm:$0xff] }
 0x492   : > { %v5327_v39 = vadd.f32 %v14792_v17, %v5212_v23  ;;  %9952 = vmatprep.mubr.msk.f32.mxu1 %vm2415_vm1, %v13718_v52  ;;  %v15292_v32 = vmul.f32 %v5434_v10, %v19510_v41  ;;  %v19514_v52 = vld [vmem:[#allocation73_spill] sm:$0xff] }
 0x493   : > { %v5131_v11 = vsel %vm5064_vm3, %v4996_v49, %v4997_v27  ;;  %v19516_v41 = vld [vmem:[#allocation313_spill] sm:$0xff] }
 0x494   : > { %19511 = vst [vmem:[#allocation224_spill] sm:$0xff] %v15292_v32  ;;  %v5435_v0 = vmax.f32 %v5327_v39, 0.0  ;;  %v5213_v12 = vadd.f32 %v5131_v11, %v19512_v48  ;;  %5796 = vrot.lane.b32.xlu0 %v15292_v32, %s11114_s9  ;;  %v4627_v13 = vpop.f32.mrb[98].mxu1 }
 0x495   : > { %v4998_v37 = vrot.slane %v4627_v13, 1  ;;  %v4629_v63 = vpop.f32.mrb[99].mxu1  ;;  %4891 = vmatmul.mubr.f32.gmra.mrb[204].mxu1 %v19513_v30 }
 0x496   : > { %v5328_v23 = vadd.f32 %v14792_v17, %v5213_v12  ;;  %9953 = vmatprep.mubr.msk.f32.mxu1 %vm2415_vm1, %v19196_v60  ;;  %v15304_v10 = vmul.f32 %v5435_v0, %v19514_v52  ;;  %v6168_v12 = vld [vmem:[%s18267_s5 + $0x80] sm:$0xff]  ;;  %v6169_v60 = vld [vmem:[%s18267_s5 + $0x88] sm:$0xff] }
 0x497   : > { %v5130_v49 = vsel %vm5064_vm3, %v4997_v27, %v4998_v37  ;;  %v19517_v63 = vld [vmem:[#allocation315_spill] sm:$0xff]  ;;  %v10612_v27 = vpack.c.bf16 %v6169_v60, %v6168_v12  ;;  %v19521_v60 = vld [vmem:[#allocation317_spill] sm:$0xff] }
 0x498   : > { %19515 = vst [vmem:[#allocation154_spill] sm:$0xff] %v15304_v10  ;;  %v5436_v39 = vmax.f32 %v5328_v23, 0.0  ;;  %v5214_v11 = vadd.f32 %v5130_v49, %v19516_v41  ;;  %5798 = vrot.lane.b32.xlu1 %v15304_v10, %s11114_s9  ;;  %v4632_v48 = vpop.f32.mrb[100].mxu1  ;;  %v19518_v23 = vld [vmem:[#allocation78_spill] sm:$0xff] }
 0x499   : > { %v4999_v0 = vrot.slane %v4632_v48, 1  ;;  %v4634_v13 = vpop.f32.mrb[101].mxu1  ;;  %4896 = vmatmul.mubr.f32.gmra.mrb[206].mxu1 %v19517_v63  ;;  %10613 = vmatpush1.bf16.msra.mxu0 %v10612_v27  ;;  %v19520_v10 = vld [vmem:[#allocation234_spill] sm:$0xff]  ;;  %v19524_v63 = vld [vmem:[#allocation316_spill] sm:$0xff] }
 0x49a   : > { %v5329_v30 = vadd.f32 %v14792_v17, %v5214_v11  ;;  %9954 = vmatprep.mubr.msk.f32.mxu1 %vm2415_vm1, %v13739_v24  ;;  %v15322_v52 = vmul.f32 %v5436_v39, %v19518_v23  ;;  %10614 = vmatprep.subr.bf16.mxu0 %v18877_v3 }
 0x49b   : > { %v5129_v49 = vsel %vm5064_vm3, %v4998_v37, %v4999_v0  ;;  %v19522_v37 = vld [vmem:[#allocation82_spill] sm:$0xff] }
 0x49c   : > { %19519 = vst [vmem:[#allocation226_spill] sm:$0xff] %v15322_v52  ;;  %v5437_v41 = vmax.f32 %v5329_v30, 0.0  ;;  %v5215_v32 = vadd.f32 %v5129_v49, %v19520_v10  ;;  %5800 = vrot.lane.b32.xlu0 %v15322_v52, %s11114_s9  ;;  %v4637_v48 = vpop.f32.mrb[102].mxu1  ;;  %v19730_v52 = vld [vmem:[#allocation150_spill] sm:$0xff] }
 0x49d   : > { %v5000_v11 = vrot.slane %v4637_v48, 1  ;;  %v4639_v12 = vpop.f32.mrb[103].mxu1  ;;  %4901 = vmatmul.mubr.f32.gmra.mrb[208].mxu1 %v19521_v60  ;;  %v19525_v48 = vld [vmem:[#allocation319_spill] sm:$0xff]  ;;  %v19528_v60 = vld [vmem:[#allocation318_spill] sm:$0xff] }
 0x49e   : > { %v5330_v24 = vadd.f32 %v14792_v17, %v5215_v32  ;;  %9955 = vmatprep.mubr.msk.f32.mxu1 %vm2415_vm1, %v13262_v46  ;;  %v15335_v39 = vmul.f32 %v5437_v41, %v19522_v37  ;;  %v19526_v46 = vld [vmem:[#allocation87_spill] sm:$0xff] }
 0x49f   : > { %v5128_v10 = vsel %vm5064_vm3, %v4999_v0, %v5000_v11 }
 0x4a0   : > { %19523 = vst [vmem:[#allocation158_spill] sm:$0xff] %v15335_v39  ;;  %v5438_v13 = vmax.f32 %v5330_v24, 0.0  ;;  %v5216_v27 = vadd.f32 %v5128_v10, %v19524_v63  ;;  %5802 = vrot.lane.b32.xlu1 %v15335_v39, %s11114_s9  ;;  %v4642_v30 = vpop.f32.mrb[104].mxu1  ;;  %v19726_v39 = vld [vmem:[#allocation147_spill] sm:$0xff] }
 0x4a1   : > { %v5001_v23 = vrot.slane %v4642_v30, 1  ;;  %v4644_v49 = vpop.f32.mrb[105].mxu1  ;;  %4906 = vmatmul.mubr.f32.gmra.mrb[210].mxu1 %v19525_v48  ;;  %v19529_v30 = vld [vmem:[#allocation321_spill] sm:$0xff]  ;;  %v19532_v48 = vld [vmem:[#allocation320_spill] sm:$0xff] }
 0x4a2   : > { %v5331_v32 = vadd.f32 %v14792_v17, %v5216_v27  ;;  %9956 = vmatprep.mubr.msk.f32.mxu1 %vm2415_vm1, %v13760_v50  ;;  %v15347_v41 = vmul.f32 %v5438_v13, %v19526_v46  ;;  %v15358_v50 = vld [vmem:[%s18266_s4] ss:$0 sm:$0xff] }
 0x4a3   : > { %v5127_v0 = vsel %vm5064_vm3, %v5000_v11, %v5001_v23  ;;  %v19530_v11 = vld [vmem:[#allocation91_spill] sm:$0xff] }
 0x4a4   : > { %19527 = vst [vmem:[#allocation227_spill] sm:$0xff] %v15347_v41  ;;  %v5439_v12 = vmax.f32 %v5331_v32, 0.0  ;;  %v5217_v24 = vadd.f32 %v5127_v0, %v19528_v60  ;;  %5804 = vrot.lane.b32.xlu0 %v15347_v41, %s11114_s9  ;;  %v4647_v37 = vpop.f32.mrb[106].mxu1  ;;  %v19721_v41 = vld [vmem:[#allocation221_spill] sm:$0xff] }
 0x4a5   : > { %v5002_v10 = vrot.slane %v4647_v37, 1  ;;  %v4649_v63 = vpop.f32.mrb[107].mxu1  ;;  %4911 = vmatmul.mubr.f32.gmra.mrb[212].mxu1 %v19529_v30  ;;  %v19533_v37 = vld [vmem:[#allocation322_spill] sm:$0xff] }
 0x4a6   : > { %v5332_v17 = vadd.f32 %v15358_v50, %v5217_v24  ;;  %9957 = vmatprep.mubr.msk.f32.mxu1 %vm2415_vm1, %v19205_v55  ;;  %v15364_v13 = vmul.f32 %v5439_v12, %v19530_v11  ;;  %v19534_v55 = vld [vmem:[#allocation257_spill] sm:$0xff]  ;;  %v19535_v12 = vld [vmem:[#allocation96_spill] sm:$0xff] }
 0x4a7   : > { %v5126_v27 = vsel %vm5064_vm3, %v5001_v23, %v5002_v10 }
 0x4a8   : > { %19531 = vst [vmem:[#allocation161_spill] sm:$0xff] %v15364_v13  ;;  %v5440_v49 = vmax.f32 %v5332_v17, 0.0  ;;  %v5218_v32 = vadd.f32 %v5126_v27, %v19532_v48  ;;  %5806 = vrot.lane.b32.xlu1 %v15364_v13, %s11114_s9  ;;  %v4652_v46 = vpop.f32.mrb[108].mxu1  ;;  %v19537_v17 = vld [vmem:[#allocation237_spill] sm:$0xff] }
 0x4a9   : > { %v5003_v0 = vrot.slane %v4652_v46, 1  ;;  %v4654_v60 = vpop.f32.mrb[109].mxu1  ;;  %4916 = vmatmul.mubr.f32.gmra.mrb[214].mxu1 %v19533_v37  ;;  %v19539_v37 = vld [vmem:[#allocation149_spill] sm:$0xff] }
 0x4aa   : > { %v5333_v24 = vadd.f32 %v15358_v50, %v5218_v32  ;;  %9958 = vmatprep.mubr.msk.f32.mxu1 %vm2415_vm1, %v19534_v55  ;;  %v15376_v63 = vmul.f32 %v5440_v49, %v19535_v12  ;;  %v19538_v60 = vld [vmem:[#allocation323_spill] sm:$0xff]  ;;  %v19540_v49 = vld [vmem:[#allocation100_spill] sm:$0xff] }
 0x4ab   : > { %v5125_v23 = vsel %vm5064_vm3, %v5002_v10, %v5003_v0  ;;  %v19542_v12 = vld [vmem:[#allocation324_spill] sm:$0xff] }
 0x4ac   : > { %19536 = vst [vmem:[#allocation102_spill] sm:$0xff] %v15376_v63  ;;  %v5441_v30 = vmax.f32 %v5333_v24, 0.0  ;;  %v5219_v11 = vadd.f32 %v5125_v23, %v19537_v17  ;;  %5808 = vrot.lane.b32.xlu0 %v15376_v63, %s11114_s9  ;;  %v4657_v27 = vpop.f32.mrb[110].mxu1  ;;  %v19562_v63 = vld [vmem:[#allocation332_spill] sm:$0xff] }
 0x4ad   : > { %v5004_v48 = vrot.slane %v4657_v27, 1  ;;  %v4659_v46 = vpop.f32.mrb[111].mxu1  ;;  %4921 = vmatmul.mubr.f32.gmra.mrb[216].mxu1 %v19538_v60  ;;  %v19543_v60 = vld [vmem:[#allocation325_spill] sm:$0xff] }
 0x4ae   : > { %v5334_v32 = vadd.f32 %v15358_v50, %v5219_v11  ;;  %9959 = vmatprep.mubr.msk.f32.mxu1 %vm2415_vm1, %v19539_v37  ;;  %v15388_v55 = vmul.f32 %v5441_v30, %v19540_v49  ;;  %v19544_v37 = vld [vmem:[#allocation153_spill] sm:$0xff] }
 0x4af   : > { %v5124_v10 = vsel %vm5064_vm3, %v5003_v0, %v5004_v48  ;;  %v19545_v30 = vld [vmem:[#allocation105_spill] sm:$0xff] }
 0x4b0   : > { %19541 = vst [vmem:[#allocation164_spill] sm:$0xff] %v15388_v55  ;;  %v5442_v24 = vmax.f32 %v5334_v32, 0.0  ;;  %v5220_v23 = vadd.f32 %v5124_v10, %v19542_v12  ;;  %5810 = vrot.lane.b32.xlu1 %v15388_v55, %s11114_s9  ;;  %v4662_v17 = vpop.f32.mrb[112].mxu1  ;;  %v19547_v10 = vld [vmem:[#allocation326_spill] sm:$0xff]  ;;  %v19548_v55 = vld [vmem:[#allocation327_spill] sm:$0xff] }
 0x4b1   : > { %v5005_v27 = vrot.slane %v4662_v17, 1  ;;  %v4664_v46 = vpop.f32.mrb[113].mxu1  ;;  %4926 = vmatmul.mubr.f32.gmra.mrb[218].mxu1 %v19543_v60 }
 0x4b2   : > { %v5335_v11 = vadd.f32 %v15358_v50, %v5220_v23  ;;  %9960 = vmatprep.mubr.msk.f32.mxu1 %vm2415_vm1, %v19544_v37  ;;  %v15400_v49 = vmul.f32 %v5442_v24, %v19545_v30  ;;  %v19549_v37 = vld [vmem:[#allocation157_spill] sm:$0xff] }
 0x4b3   : > { %v5123_v0 = vsel %vm5064_vm3, %v5004_v48, %v5005_v27  ;;  %v19550_v24 = vld [vmem:[#allocation109_spill] sm:$0xff] }
 0x4b4   : > { %19546 = vst [vmem:[#allocation228_spill] sm:$0xff] %v15400_v49  ;;  %v5443_v32 = vmax.f32 %v5335_v11, 0.0  ;;  %v5221_v12 = vadd.f32 %v5123_v0, %v19547_v10  ;;  %5812 = vrot.lane.b32.xlu0 %v15400_v49, %s11114_s9  ;;  %v4667_v17 = vpop.f32.mrb[114].mxu1  ;;  %v19552_v0 = vld [vmem:[#allocation328_spill] sm:$0xff]  ;;  %v19553_v49 = vld [vmem:[#allocation329_spill] sm:$0xff] }
 0x4b5   : > { %v5006_v46 = vrot.slane %v4667_v17, 1  ;;  %v4669_v60 = vpop.f32.mrb[115].mxu1  ;;  %4931 = vmatmul.mubr.f32.gmra.mrb[220].mxu1 %v19548_v55 }
 0x4b6   : > { %v5336_v23 = vadd.f32 %v15358_v50, %v5221_v12  ;;  %9961 = vmatprep.mubr.msk.f32.mxu1 %vm2415_vm1, %v19549_v37  ;;  %v15412_v30 = vmul.f32 %v5443_v32, %v19550_v24  ;;  %v19554_v37 = vld [vmem:[#allocation32_spill] sm:$0xff]  ;;  %v19555_v32 = vld [vmem:[#allocation113_spill] sm:$0xff] }
 0x4b7   : > { %v5122_v48 = vsel %vm5064_vm3, %v5005_v27, %v5006_v46 }
 0x4b8   : > { %19551 = vst [vmem:[#allocation167_spill] sm:$0xff] %v15412_v30  ;;  %v5444_v11 = vmax.f32 %v5336_v23, 0.0  ;;  %v5222_v10 = vadd.f32 %v5122_v48, %v19552_v0  ;;  %5814 = vrot.lane.b32.xlu1 %v15412_v30, %s11114_s9  ;;  %v4672_v17 = vpop.f32.mrb[116].mxu1  ;;  %v19557_v48 = vld [vmem:[#allocation330_spill] sm:$0xff] }
 0x4b9   : > { %v5007_v60 = vrot.slane %v4672_v17, 1  ;;  %v4674_v55 = vpop.f32.mrb[117].mxu1  ;;  %4936 = vmatmul.mubr.f32.gmra.mrb[222].mxu1 %v19553_v49  ;;  %v6170_v49 = vld [vmem:[%s18267_s5 + $0x90] sm:$0xff] }
 0x4ba   : > { %v5337_v12 = vadd.f32 %v15358_v50, %v5222_v10  ;;  %9962 = vmatprep.mubr.msk.f32.mxu1 %vm2415_vm1, %v19554_v37  ;;  %v15424_v24 = vmul.f32 %v5444_v11, %v19555_v32  ;;  %v6171_v10 = vld [vmem:[%s18267_s5 + $0x98] sm:$0xff]  ;;  %v19558_v37 = vld [vmem:[#allocation331_spill] sm:$0xff] }
 0x4bb   : > { %v5121_v27 = vsel %vm5064_vm3, %v5006_v46, %v5007_v60  ;;  %v10615_v46 = vpack.c.bf16 %v6171_v10, %v6170_v49  ;;  %v19559_v32 = vld [vmem:[#allocation37_spill] sm:$0xff] }
 0x4bc   : > { %19556 = vst [vmem:[#allocation106_spill] sm:$0xff] %v15424_v24  ;;  %v5445_v23 = vmax.f32 %v5337_v12, 0.0  ;;  %v5223_v0 = vadd.f32 %v5121_v27, %v19557_v48  ;;  %5816 = vrot.lane.b32.xlu0 %v15424_v24, %s11114_s9  ;;  %v4677_v17 = vpop.f32.mrb[118].mxu1  ;;  %v19560_v27 = vld [vmem:[#allocation117_spill] sm:$0xff] }
 0x4bd   : > { %v5008_v11 = vrot.slane %v4677_v17, 1  ;;  %v4679_v55 = vpop.f32.mrb[119].mxu1  ;;  %4941 = vmatmul.mubr.f32.gmra.mrb[224].mxu1 %v19558_v37  ;;  %10616 = vmatpush1.bf16.msra.mxu0 %v10615_v46  ;;  %v19563_v10 = vld [vmem:[#allocation333_spill] sm:$0xff]  ;;  %v19567_v46 = vld [vmem:[#allocation334_spill] sm:$0xff] }
 0x4be   : > { %v5338_v12 = vadd.f32 %v15358_v50, %v5223_v0  ;;  %9963 = vmatprep.mubr.msk.f32.mxu1 %vm2415_vm1, %v19559_v32  ;;  %v15442_v48 = vmul.f32 %v5445_v23, %v19560_v27  ;;  %10617 = vmatprep.subr.bf16.mxu0 %v18877_v3  ;;  %v19564_v55 = vld [vmem:[#allocation40_spill] sm:$0xff] }
 0x4bf   : > { %v5120_v24 = vsel %vm5064_vm3, %v5007_v60, %v5008_v11  ;;  %v19565_v60 = vld [vmem:[#allocation121_spill] sm:$0xff] }
 0x4c0   : > { %19561 = vst [vmem:[#allocation170_spill] sm:$0xff] %v15442_v48  ;;  %v5446_v30 = vmax.f32 %v5338_v12, 0.0  ;;  %v5224_v13 = vadd.f32 %v5120_v24, %v19562_v63  ;;  %5818 = vrot.lane.b32.xlu1 %v15442_v48, %s11114_s9  ;;  %v4682_v17 = vpop.f32.mrb[120].mxu1 }
 0x4c1   : > { %v5009_v0 = vrot.slane %v4682_v17, 1  ;;  %v4684_v49 = vpop.f32.mrb[121].mxu1  ;;  %4946 = vmatmul.mubr.f32.gmra.mrb[226].mxu1 %v19563_v10  ;;  %v19569_v10 = vld [vmem:[#allocation125_spill] sm:$0xff] }
 0x4c2   : > { %v5339_v23 = vadd.f32 %v15358_v50, %v5224_v13  ;;  %9964 = vmatprep.mubr.msk.f32.mxu1 %vm2415_vm1, %v19564_v55  ;;  %v15455_v37 = vmul.f32 %v5446_v30, %v19565_v60  ;;  %v19568_v49 = vld [vmem:[#allocation335_spill] sm:$0xff] }
 0x4c3   : > { %v5119_v63 = vsel %vm5064_vm3, %v5008_v11, %v5009_v0 }
 0x4c4   : > { %19566 = vst [vmem:[#allocation229_spill] sm:$0xff] %v15455_v37  ;;  %v5447_v24 = vmax.f32 %v5339_v23, 0.0  ;;  %v5225_v12 = vadd.f32 %v5119_v63, %v19567_v46  ;;  %5820 = vrot.lane.b32.xlu0 %v15455_v37, %s11114_s9  ;;  %v4687_v32 = vpop.f32.mrb[122].mxu1  ;;  %v19571_v23 = vld [vmem:[#allocation336_spill] sm:$0xff] }
 0x4c5   : > { %v5010_v27 = vrot.slane %v4687_v32, 1  ;;  %v4689_v17 = vpop.f32.mrb[123].mxu1  ;;  %4951 = vmatmul.mubr.f32.gmra.mrb[228].mxu1 %v19568_v49  ;;  %v19572_v49 = vld [vmem:[#allocation129_spill] sm:$0xff] }
 0x4c6   : > { %v5340_v13 = vadd.f32 %v15358_v50, %v5225_v12  ;;  %v15465_v55 = vmul.f32 %v5447_v24, %v19569_v10  ;;  %v19574_v10 = vld [vmem:[#allocation35_spill] sm:$0xff] }
 0x4c7   : > { %v5118_v30 = vsel %vm5064_vm3, %v5009_v0, %v5010_v27 }
 0x4c8   : > { %19570 = vst [vmem:[#allocation173_spill] sm:$0xff] %v15465_v55  ;;  %v5448_v11 = vmax.f32 %v5340_v13, 0.0  ;;  %v5226_v60 = vadd.f32 %v5118_v30, %v19571_v23  ;;  %5822 = vrot.lane.b32.xlu1 %v15465_v55, %s11114_s9  ;;  %v4692_v63 = vpop.f32.mrb[124].mxu1 }
 0x4c9   : > { %v5011_v46 = vrot.slane %v4692_v63, 1  ;;  %v4694_v32 = vpop.f32.mrb[125].mxu1 }
 0x4ca   : > { %v5341_v17 = vadd.f32 %v15358_v50, %v5226_v60  ;;  %v15474_v37 = vmul.f32 %v5448_v11, %v19572_v49  ;;  %v19575_v32 = vld [vmem:[#allocation134_spill] sm:$0xff]  ;;  %v19577_v49 = vld [vmem:[#allocation152_spill] sm:$0xff] }
 0x4cb   : > { %v5117_v24 = vsel %vm5064_vm3, %v5010_v27, %v5011_v46 }
 0x4cc   : > { %19573 = vst [vmem:[#allocation110_spill] sm:$0xff] %v15474_v37  ;;  %v5449_v12 = vmax.f32 %v5341_v17, 0.0  ;;  %v5227_v0 = vadd.f32 %v5117_v24, %v19574_v10  ;;  %5824 = vrot.lane.b32.xlu0 %v15474_v37, %s11114_s9  ;;  %v4697_v13 = vpop.f32.mrb[126].mxu1 }
 0x4cd   : > { %v5012_v30 = vrot.slane %v4697_v13, 1  ;;  %v4699_v23 = vpop.f32.mrb[127].mxu1 }
 0x4ce   : > { %v5342_v63 = vadd.f32 %v15358_v50, %v5227_v0  ;;  %v15483_v55 = vmul.f32 %v5449_v12, %v19575_v32  ;;  %v19578_v23 = vld [vmem:[#allocation138_spill] sm:$0xff] }
 0x4cf   : > { %v5116_v11 = vsel %vm5064_vm3, %v5011_v46, %v5012_v30  ;;  %v19580_v32 = vld [vmem:[#allocation50_spill] sm:$0xff] }
 0x4d0   : > { %19576 = vst [vmem:[#allocation176_spill] sm:$0xff] %v15483_v55  ;;  %v5450_v60 = vmax.f32 %v5342_v63, 0.0  ;;  %v5228_v27 = vadd.f32 %v5116_v11, %v19577_v49  ;;  %5826 = vrot.lane.b32.xlu1 %v15483_v55, %s11114_s9  ;;  %v4702_v17 = vpop.f32.mrb[128].mxu1 }
 0x4d1   : > { %v5013_v24 = vrot.slane %v4702_v17, 1  ;;  %v4704_v10 = vpop.f32.mrb[129].mxu1 }
 0x4d2   : > { %v5343_v13 = vadd.f32 %v15358_v50, %v5228_v27  ;;  %v15492_v37 = vmul.f32 %v5450_v60, %v19578_v23  ;;  %v19581_v10 = vld [vmem:[#allocation142_spill] sm:$0xff]  ;;  %v19583_v23 = vld [vmem:[#allocation156_spill] sm:$0xff] }
 0x4d3   : > { %v5115_v12 = vsel %vm5064_vm3, %v5012_v30, %v5013_v24 }
 0x4d4   : > { %19579 = vst [vmem:[#allocation230_spill] sm:$0xff] %v15492_v37  ;;  %v5451_v0 = vmax.f32 %v5343_v13, 0.0  ;;  %v5229_v46 = vadd.f32 %v5115_v12, %v19580_v32  ;;  %5828 = vrot.lane.b32.xlu0 %v15492_v37, %s11114_s9  ;;  %v4707_v63 = vpop.f32.mrb[130].mxu1 }
 0x4d5   : > { %v5014_v11 = vrot.slane %v4707_v63, 1  ;;  %v4709_v49 = vpop.f32.mrb[131].mxu1 }
 0x4d6   : > { %v5344_v17 = vadd.f32 %v15358_v50, %v5229_v46  ;;  %v15501_v55 = vmul.f32 %v5451_v0, %v19581_v10  ;;  %v19584_v49 = vld [vmem:[#allocation144_spill] sm:$0xff]  ;;  %v19586_v10 = vld [vmem:[#allocation54_spill] sm:$0xff] }
 0x4d7   : > { %v5114_v60 = vsel %vm5064_vm3, %v5013_v24, %v5014_v11 }
 0x4d8   : > { %19582 = vst [vmem:[#allocation179_spill] sm:$0xff] %v15501_v55  ;;  %v5452_v27 = vmax.f32 %v5344_v17, 0.0  ;;  %v5230_v30 = vadd.f32 %v5114_v60, %v19583_v23  ;;  %5830 = vrot.lane.b32.xlu1 %v15501_v55, %s11114_s9  ;;  %v4712_v13 = vpop.f32.mrb[132].mxu1 }
 0x4d9   : > { %v5015_v12 = vrot.slane %v4712_v13, 1  ;;  %v4714_v32 = vpop.f32.mrb[133].mxu1 }
 0x4da   : > { %v5345_v63 = vadd.f32 %v15358_v50, %v5230_v30  ;;  %v15510_v37 = vmul.f32 %v5452_v27, %v19584_v49  ;;  %v19587_v32 = vld [vmem:[#allocation146_spill] sm:$0xff]  ;;  %v19589_v49 = vld [vmem:[#allocation160_spill] sm:$0xff] }
 0x4db   : > { %v5113_v0 = vsel %vm5064_vm3, %v5014_v11, %v5015_v12 }
 0x4dc   : > { %19585 = vst [vmem:[#allocation114_spill] sm:$0xff] %v15510_v37  ;;  %v5453_v46 = vmax.f32 %v5345_v63, 0.0  ;;  %v5231_v24 = vadd.f32 %v5113_v0, %v19586_v10  ;;  %5832 = vrot.lane.b32.xlu0 %v15510_v37, %s11114_s9  ;;  %v4717_v17 = vpop.f32.mrb[134].mxu1  ;;  %v6172_v0 = vld [vmem:[%s18267_s5 + $0xa0] sm:$0xff]  ;;  %v6173_v10 = vld [vmem:[%s18267_s5 + $0xa8] sm:$0xff] }
 0x4dd   : > { %v5016_v60 = vrot.slane %v4717_v17, 1  ;;  %v4719_v23 = vpop.f32.mrb[135].mxu1  ;;  %v10618_v17 = vpack.c.bf16 %v6173_v10, %v6172_v0  ;;  %v19593_v10 = vld [vmem:[#allocation151_spill] sm:$0xff] }
 0x4de   : > { %v5346_v13 = vadd.f32 %v15358_v50, %v5231_v24  ;;  %v15519_v55 = vmul.f32 %v5453_v46, %v19587_v32  ;;  %v19590_v23 = vld [vmem:[#allocation148_spill] sm:$0xff] }
 0x4df   : > { %v5112_v27 = vsel %vm5064_vm3, %v5015_v12, %v5016_v60  ;;  %10619 = vmatpush1.bf16.msra.mxu0 %v10618_v17  ;;  %v19595_v17 = vld [vmem:[#allocation163_spill] sm:$0xff] }
 0x4e0   : > { %19588 = vst [vmem:[#allocation182_spill] sm:$0xff] %v15519_v55  ;;  %v5454_v30 = vmax.f32 %v5346_v13, 0.0  ;;  %v5232_v11 = vadd.f32 %v5112_v27, %v19589_v49  ;;  %5834 = vrot.lane.b32.xlu1 %v15519_v55, %s11114_s9  ;;  %v4722_v63 = vpop.f32.mrb[136].mxu1  ;;  %v19592_v49 = vld [vmem:[#allocation59_spill] sm:$0xff]  ;;  %10620 = vmatprep.subr.bf16.mxu0 %v18877_v3 }
 0x4e1   : > { %v5017_v46 = vrot.slane %v4722_v63, 1  ;;  %v4724_v24 = vpop.f32.mrb[137].mxu1 }
 0x4e2   : > { %v5347_v12 = vadd.f32 %v15358_v50, %v5232_v11  ;;  %v15534_v13 = vmul.f32 %v5454_v30, %v19590_v23 }
 0x4e3   : > { %v5111_v32 = vsel %vm5064_vm3, %v5016_v60, %v5017_v46 }
 0x4e4   : > { %19591 = vst [vmem:[#allocation231_spill] sm:$0xff] %v15534_v13  ;;  %v5455_v27 = vmax.f32 %v5347_v12, 0.0  ;;  %v5233_v55 = vadd.f32 %v5111_v32, %v19592_v49  ;;  %5836 = vrot.lane.b32.xlu0 %v15534_v13, %s11114_s9  ;;  %v4727_v37 = vpop.f32.mrb[138].mxu1 }
 0x4e5   : > { %v5018_v63 = vrot.slane %v4727_v37, 1  ;;  %v4729_v0 = vpop.f32.mrb[139].mxu1  ;;  %v19596_v37 = vld [vmem:[#allocation155_spill] sm:$0xff] }
 0x4e6   : > { %v5348_v11 = vadd.f32 %v15358_v50, %v5233_v55  ;;  %v15544_v30 = vmul.f32 %v5455_v27, %v19593_v10  ;;  %v19598_v10 = vld [vmem:[#allocation63_spill] sm:$0xff] }
 0x4e7   : > { %v5110_v60 = vsel %vm5064_vm3, %v5017_v46, %v5018_v63 }
 0x4e8   : > { %19594 = vst [vmem:[#allocation185_spill] sm:$0xff] %v15544_v30  ;;  %v5456_v24 = vmax.f32 %v5348_v11, 0.0  ;;  %v5234_v12 = vadd.f32 %v5110_v60, %v19595_v17  ;;  %5838 = vrot.lane.b32.xlu1 %v15544_v30, %s11114_s9  ;;  %v4732_v23 = vpop.f32.mrb[140].mxu1 }
 0x4e9   : > { %v5019_v32 = vrot.slane %v4732_v23, 1  ;;  %v4734_v49 = vpop.f32.mrb[141].mxu1 }
 0x4ea   : > { %v5349_v3 = vadd.f32 %v15358_v50, %v5234_v12  ;;  %v15553_v0 = vmul.f32 %v5456_v24, %v19596_v37  ;;  %v19599_v49 = vld [vmem:[#allocation159_spill] sm:$0xff]  ;;  %v19601_v37 = vld [vmem:[#allocation166_spill] sm:$0xff] }
 0x4eb   : > { %v5109_v55 = vsel %vm5064_vm3, %v5018_v63, %v5019_v32 }
 0x4ec   : > { %19597 = vst [vmem:[#allocation118_spill] sm:$0xff] %v15553_v0  ;;  %v5457_v27 = vmax.f32 %v5349_v3, 0.0  ;;  %v5235_v46 = vadd.f32 %v5109_v55, %v19598_v10  ;;  %5840 = vrot.lane.b32.xlu0 %v15553_v0, %s11114_s9  ;;  %v4737_v11 = vpop.f32.mrb[142].mxu1 }
 0x4ed   : > { %v5020_v60 = vrot.slane %v4737_v11, 1  ;;  %v4739_v17 = vpop.f32.mrb[143].mxu1 }
 0x4ee   : > { %v5350_v23 = vadd.f32 %v15358_v50, %v5235_v46  ;;  %v15562_v30 = vmul.f32 %v5457_v27, %v19599_v49  ;;  %v19602_v17 = vld [vmem:[#allocation162_spill] sm:$0xff]  ;;  %v19604_v49 = vld [vmem:[#allocation68_spill] sm:$0xff] }
 0x4ef   : > { %v5108_v24 = vsel %vm5064_vm3, %v5019_v32, %v5020_v60 }
 0x4f0   : > { %19600 = vst [vmem:[#allocation188_spill] sm:$0xff] %v15562_v30  ;;  %v5458_v12 = vmax.f32 %v5350_v23, 0.0  ;;  %v5236_v63 = vadd.f32 %v5108_v24, %v19601_v37  ;;  %5842 = vrot.lane.b32.xlu1 %v15562_v30, %s11114_s9  ;;  %v4742_v3 = vpop.f32.mrb[144].mxu1 }
 0x4f1   : > { %v5021_v55 = vrot.slane %v4742_v3, 1  ;;  %v4744_v10 = vpop.f32.mrb[145].mxu1 }
 0x4f2   : > { %v5351_v11 = vadd.f32 %v15358_v50, %v5236_v63  ;;  %v15571_v0 = vmul.f32 %v5458_v12, %v19602_v17  ;;  %v19605_v10 = vld [vmem:[#allocation165_spill] sm:$0xff] }
 0x4f3   : > { %v5107_v27 = vsel %vm5064_vm3, %v5020_v60, %v5021_v55  ;;  %v19607_v17 = vld [vmem:[#allocation169_spill] sm:$0xff] }
 0x4f4   : > { %19603 = vst [vmem:[#allocation233_spill] sm:$0xff] %v15571_v0  ;;  %v5459_v46 = vmax.f32 %v5351_v11, 0.0  ;;  %v5237_v32 = vadd.f32 %v5107_v27, %v19604_v49  ;;  %5844 = vrot.lane.b32.xlu0 %v15571_v0, %s11114_s9  ;;  %v4747_v23 = vpop.f32.mrb[146].mxu1 }
 0x4f5   : > { %v5022_v24 = vrot.slane %v4747_v23, 1  ;;  %v4749_v37 = vpop.f32.mrb[147].mxu1 }
 0x4f6   : > { %v5352_v3 = vadd.f32 %v15358_v50, %v5237_v32  ;;  %v15580_v30 = vmul.f32 %v5459_v46, %v19605_v10  ;;  %v19608_v37 = vld [vmem:[#allocation168_spill] sm:$0xff] }
 0x4f7   : > { %v5106_v12 = vsel %vm5064_vm3, %v5021_v55, %v5022_v24  ;;  %v19610_v10 = vld [vmem:[#allocation72_spill] sm:$0xff] }
 0x4f8   : > { %19606 = vst [vmem:[#allocation191_spill] sm:$0xff] %v15580_v30  ;;  %v5460_v63 = vmax.f32 %v5352_v3, 0.0  ;;  %v5238_v60 = vadd.f32 %v5106_v12, %v19607_v17  ;;  %5846 = vrot.lane.b32.xlu1 %v15580_v30, %s11114_s9  ;;  %v4752_v11 = vpop.f32.mrb[148].mxu1 }
 0x4f9   : > { %v5023_v27 = vrot.slane %v4752_v11, 1  ;;  %v4754_v49 = vpop.f32.mrb[149].mxu1 }
 0x4fa   : > { %v5353_v23 = vadd.f32 %v15358_v50, %v5238_v60  ;;  %v15589_v0 = vmul.f32 %v5460_v63, %v19608_v37  ;;  %v19611_v49 = vld [vmem:[#allocation171_spill] sm:$0xff]  ;;  %v19613_v37 = vld [vmem:[#allocation172_spill] sm:$0xff] }
 0x4fb   : > { %v5105_v46 = vsel %vm5064_vm3, %v5022_v24, %v5023_v27 }
 0x4fc   : > { %19609 = vst [vmem:[#allocation122_spill] sm:$0xff] %v15589_v0  ;;  %v5461_v32 = vmax.f32 %v5353_v23, 0.0  ;;  %v5239_v55 = vadd.f32 %v5105_v46, %v19610_v10  ;;  %5848 = vrot.lane.b32.xlu0 %v15589_v0, %s11114_s9  ;;  %v4757_v3 = vpop.f32.mrb[150].mxu1 }
 0x4fd   : > { %v5024_v12 = vrot.slane %v4757_v3, 1  ;;  %v4759_v17 = vpop.f32.mrb[151].mxu1 }
 0x4fe   : > { %v5354_v11 = vadd.f32 %v15358_v50, %v5239_v55  ;;  %v15598_v30 = vmul.f32 %v5461_v32, %v19611_v49  ;;  %v19614_v17 = vld [vmem:[#allocation174_spill] sm:$0xff]  ;;  %v19616_v49 = vld [vmem:[#allocation77_spill] sm:$0xff] }
 0x4ff   : > { %v5104_v63 = vsel %vm5064_vm3, %v5023_v27, %v5024_v12 }
 0x500   : > { %19612 = vst [vmem:[#allocation194_spill] sm:$0xff] %v15598_v30  ;;  %v5462_v60 = vmax.f32 %v5354_v11, 0.0  ;;  %v5240_v24 = vadd.f32 %v5104_v63, %v19613_v37  ;;  %5850 = vrot.lane.b32.xlu1 %v15598_v30, %s11114_s9  ;;  %v4762_v23 = vpop.f32.mrb[152].mxu1  ;;  %v6174_v63 = vld [vmem:[%s18267_s5 + $0xb0] sm:$0xff]  ;;  %v6175_v37 = vld [vmem:[%s18267_s5 + $0xb8] sm:$0xff] }
 0x501   : > { %v5025_v46 = vrot.slane %v4762_v23, 1  ;;  %v4764_v10 = vpop.f32.mrb[153].mxu1  ;;  %v10621_v23 = vpack.c.bf16 %v6175_v37, %v6174_v63  ;;  %v19620_v37 = vld [vmem:[#allocation180_spill] sm:$0xff] }
 0x502   : > { %v5355_v3 = vadd.f32 %v15358_v50, %v5240_v24  ;;  %v15607_v0 = vmul.f32 %v5462_v60, %v19614_v17  ;;  %v19617_v10 = vld [vmem:[#allocation177_spill] sm:$0xff] }
 0x503   : > { %v5103_v32 = vsel %vm5064_vm3, %v5024_v12, %v5025_v46  ;;  %10622 = vmatpush1.bf16.msra.mxu0 %v10621_v23 }
 0x504   : > { %19615 = vst [vmem:[#allocation235_spill] sm:$0xff] %v15607_v0  ;;  %v5463_v55 = vmax.f32 %v5355_v3, 0.0  ;;  %v5241_v27 = vadd.f32 %v5103_v32, %v19616_v49  ;;  %5852 = vrot.lane.b32.xlu0 %v15607_v0, %s11114_s9  ;;  %v4767_v11 = vpop.f32.mrb[154].mxu1  ;;  %v19619_v49 = vld [vmem:[#allocation175_spill] sm:$0xff] }
 0x505   : > { %v5026_v60 = vrot.slane %v4767_v11, 1  ;;  %v4769_v24 = vpop.f32.mrb[155].mxu1 }
 0x506   : > { %v5356_v12 = vadd.f32 %v15358_v50, %v5241_v27  ;;  %v15622_v3 = vmul.f32 %v5463_v55, %v19617_v10 }
 0x507   : > { %v5102_v17 = vsel %vm5064_vm3, %v5025_v46, %v5026_v60  ;;  %v19622_v46 = vld [vmem:[#allocation81_spill] sm:$0xff] }
 0x508   : > { %19618 = vst [vmem:[#allocation197_spill] sm:$0xff] %v15622_v3  ;;  %v5464_v32 = vmax.f32 %v5356_v12, 0.0  ;;  %v5242_v0 = vadd.f32 %v5102_v17, %v19619_v49  ;;  %5854 = vrot.lane.b32.xlu1 %v15622_v3, %s11114_s9  ;;  %v4772_v30 = vpop.f32.mrb[156].mxu1  ;;  %v19623_v49 = vld [vmem:[#allocation183_spill] sm:$0xff] }
 0x509   : > { %v5027_v13 = vrot.slane %v4772_v30, 1  ;;  %v4774_v11 = vpop.f32.mrb[157].mxu1 }
 0x50a   : > { %v5357_v63 = vadd.f32 %v15358_v50, %v5242_v0  ;;  %v15631_v27 = vmul.f32 %v5464_v32, %v19620_v37  ;;  %v19625_v37 = vld [vmem:[#allocation178_spill] sm:$0xff] }
 0x50b   : > { %v5101_v55 = vsel %vm5064_vm3, %v5026_v60, %v5027_v13 }
 0x50c   : > { %19621 = vst [vmem:[#allocation126_spill] sm:$0xff] %v15631_v27  ;;  %v5465_v24 = vmax.f32 %v5357_v63, 0.0  ;;  %v5243_v23 = vadd.f32 %v5101_v55, %v19622_v46  ;;  %5856 = vrot.lane.b32.xlu0 %v15631_v27, %s11114_s9  ;;  %v4777_v12 = vpop.f32.mrb[158].mxu1 }
 0x50d   : > { %v5028_v10 = vrot.slane %v4777_v12, 1  ;;  %v4779_v17 = vpop.f32.mrb[159].mxu1 }
 0x50e   : > { %v5358_v30 = vadd.f32 %v15358_v50, %v5243_v23  ;;  %v15640_v11 = vmul.f32 %v5465_v24, %v19623_v49  ;;  %v19626_v17 = vld [vmem:[#allocation186_spill] sm:$0xff] }
 0x50f   : > { %v5100_v0 = vsel %vm5064_vm3, %v5027_v13, %v5028_v10  ;;  %v19628_v49 = vld [vmem:[#allocation86_spill] sm:$0xff] }
 0x510   : > { %19624 = vst [vmem:[#allocation200_spill] sm:$0xff] %v15640_v11  ;;  %v5466_v32 = vmax.f32 %v5358_v30, 0.0  ;;  %v5244_v60 = vadd.f32 %v5100_v0, %v19625_v37  ;;  %5858 = vrot.lane.b32.xlu1 %v15640_v11, %s11114_s9  ;;  %v4782_v63 = vpop.f32.mrb[160].mxu1 }
 0x511   : > { %v5029_v55 = vrot.slane %v4782_v63, 1  ;;  %v4784_v46 = vpop.f32.mrb[161].mxu1 }
 0x512   : > { %v5359_v12 = vadd.f32 %v15358_v50, %v5244_v60  ;;  %v15649_v27 = vmul.f32 %v5466_v32, %v19626_v17  ;;  %v19629_v46 = vld [vmem:[#allocation189_spill] sm:$0xff] }
 0x513   : > { %v5099_v24 = vsel %vm5064_vm3, %v5028_v10, %v5029_v55  ;;  %v19631_v17 = vld [vmem:[#allocation181_spill] sm:$0xff] }
 0x514   : > { %19627 = vst [vmem:[#allocation236_spill] sm:$0xff] %v15649_v27  ;;  %v5467_v23 = vmax.f32 %v5359_v12, 0.0  ;;  %v5245_v13 = vadd.f32 %v5099_v24, %v19628_v49  ;;  %5860 = vrot.lane.b32.xlu0 %v15649_v27, %s11114_s9  ;;  %v4787_v30 = vpop.f32.mrb[162].mxu1 }
 0x515   : > { %v5030_v0 = vrot.slane %v4787_v30, 1  ;;  %v4789_v37 = vpop.f32.mrb[163].mxu1 }
 0x516   : > { %v5360_v63 = vadd.f32 %v15358_v50, %v5245_v13  ;;  %v15658_v11 = vmul.f32 %v5467_v23, %v19629_v46  ;;  %v19632_v37 = vld [vmem:[#allocation192_spill] sm:$0xff]  ;;  %v19634_v46 = vld [vmem:[#allocation90_spill] sm:$0xff] }
 0x517   : > { %v5098_v32 = vsel %vm5064_vm3, %v5029_v55, %v5030_v0 }
 0x518   : > { %19630 = vst [vmem:[#allocation203_spill] sm:$0xff] %v15658_v11  ;;  %v5468_v60 = vmax.f32 %v5360_v63, 0.0  ;;  %v5246_v10 = vadd.f32 %v5098_v32, %v19631_v17  ;;  %5862 = vrot.lane.b32.xlu1 %v15658_v11, %s11114_s9  ;;  %v4792_v12 = vpop.f32.mrb[164].mxu1 }
 0x519   : > { %v5031_v24 = vrot.slane %v4792_v12, 1  ;;  %v4794_v49 = vpop.f32.mrb[165].mxu1 }
 0x51a   : > { %v5361_v30 = vadd.f32 %v15358_v50, %v5246_v10  ;;  %v15667_v27 = vmul.f32 %v5468_v60, %v19632_v37  ;;  %v19635_v49 = vld [vmem:[#allocation195_spill] sm:$0xff]  ;;  %v19637_v37 = vld [vmem:[#allocation184_spill] sm:$0xff] }
 0x51b   : > { %v5097_v23 = vsel %vm5064_vm3, %v5030_v0, %v5031_v24 }
 0x51c   : > { %19633 = vst [vmem:[#allocation131_spill] sm:$0xff] %v15667_v27  ;;  %v5469_v13 = vmax.f32 %v5361_v30, 0.0  ;;  %v5247_v55 = vadd.f32 %v5097_v23, %v19634_v46  ;;  %5864 = vrot.lane.b32.xlu0 %v15667_v27, %s11114_s9  ;;  %v4797_v63 = vpop.f32.mrb[166].mxu1 }
 0x51d   : > { %v5032_v32 = vrot.slane %v4797_v63, 1  ;;  %v4799_v17 = vpop.f32.mrb[167].mxu1 }
 0x51e   : > { %v5362_v12 = vadd.f32 %v15358_v50, %v5247_v55  ;;  %v15676_v11 = vmul.f32 %v5469_v13, %v19635_v49  ;;  %v19638_v17 = vld [vmem:[#allocation198_spill] sm:$0xff]  ;;  %v19640_v49 = vld [vmem:[#allocation95_spill] sm:$0xff] }
 0x51f   : > { %v5096_v60 = vsel %vm5064_vm3, %v5031_v24, %v5032_v32 }
 0x520   : > { %19636 = vst [vmem:[#allocation206_spill] sm:$0xff] %v15676_v11  ;;  %v5470_v10 = vmax.f32 %v5362_v12, 0.0  ;;  %v5248_v0 = vadd.f32 %v5096_v60, %v19637_v37  ;;  %5866 = vrot.lane.b32.xlu1 %v15676_v11, %s11114_s9  ;;  %v4802_v30 = vpop.f32.mrb[168].mxu1 }
 0x521   : > { %v5033_v23 = vrot.slane %v4802_v30, 1  ;;  %v4804_v46 = vpop.f32.mrb[169].mxu1 }
 0x522   : > { %v5363_v63 = vadd.f32 %v15358_v50, %v5248_v0  ;;  %v15685_v27 = vmul.f32 %v5470_v10, %v19638_v17  ;;  %v19641_v46 = vld [vmem:[#allocation201_spill] sm:$0xff]  ;;  %v19643_v17 = vld [vmem:[#allocation187_spill] sm:$0xff] }
 0x523   : > { %v5095_v13 = vsel %vm5064_vm3, %v5032_v32, %v5033_v23 }
 0x524   : > { %19639 = vst [vmem:[#allocation238_spill] sm:$0xff] %v15685_v27  ;;  %v5471_v55 = vmax.f32 %v5363_v63, 0.0  ;;  %v5249_v24 = vadd.f32 %v5095_v13, %v19640_v49  ;;  %5868 = vrot.lane.b32.xlu0 %v15685_v27, %s11114_s9  ;;  %v4807_v12 = vpop.f32.mrb[170].mxu1 }
 0x525   : > { %v5034_v60 = vrot.slane %v4807_v12, 1  ;;  %v4809_v37 = vpop.f32.mrb[171].mxu1 }
 0x526   : > { %v5364_v30 = vadd.f32 %v15358_v50, %v5249_v24  ;;  %v15694_v11 = vmul.f32 %v5471_v55, %v19641_v46  ;;  %v19644_v37 = vld [vmem:[#allocation204_spill] sm:$0xff]  ;;  %v19646_v46 = vld [vmem:[#allocation99_spill] sm:$0xff] }
 0x527   : > { %v5094_v10 = vsel %vm5064_vm3, %v5033_v23, %v5034_v60 }
 0x528   : > { %19642 = vst [vmem:[#allocation208_spill] sm:$0xff] %v15694_v11  ;;  %v5472_v0 = vmax.f32 %v5364_v30, 0.0  ;;  %v5250_v32 = vadd.f32 %v5094_v10, %v19643_v17  ;;  %5870 = vrot.lane.b32.xlu1 %v15694_v11, %s11114_s9  ;;  %v4812_v63 = vpop.f32.mrb[172].mxu1 }
 0x529   : > { %v5035_v13 = vrot.slane %v4812_v63, 1  ;;  %v4814_v49 = vpop.f32.mrb[173].mxu1 }
 0x52a   : > { %v5365_v12 = vadd.f32 %v15358_v50, %v5250_v32  ;;  %v15703_v27 = vmul.f32 %v5472_v0, %v19644_v37  ;;  %v19647_v49 = vld [vmem:[#allocation130_spill] sm:$0xff] }
 0x52b   : > { %v5093_v55 = vsel %vm5064_vm3, %v5034_v60, %v5035_v13  ;;  %v19649_v37 = vld [vmem:[#allocation190_spill] sm:$0xff] }
 0x52c   : > { %19645 = vst [vmem:[#allocation70_spill] sm:$0xff] %v15703_v27  ;;  %v5473_v24 = vmax.f32 %v5365_v12, 0.0  ;;  %v5251_v23 = vadd.f32 %v5093_v55, %v19646_v46  ;;  %5872 = vrot.lane.b32.xlu0 %v15703_v27, %s11114_s9  ;;  %v4817_v30 = vpop.f32.mrb[174].mxu1 }
 0x52d   : > { %v5036_v10 = vrot.slane %v4817_v30, 1  ;;  %v4819_v17 = vpop.f32.mrb[175].mxu1 }
 0x52e   : > { %v5366_v63 = vadd.f32 %v15358_v50, %v5251_v23  ;;  %v15712_v11 = vmul.f32 %v5473_v24, %v19647_v49  ;;  %v19650_v17 = vld [vmem:[#allocation209_spill] sm:$0xff]  ;;  %v19652_v49 = vld [vmem:[#allocation104_spill] sm:$0xff] }
 0x52f   : > { %v5092_v0 = vsel %vm5064_vm3, %v5035_v13, %v5036_v10 }
 0x530   : > { %19648 = vst [vmem:[#allocation211_spill] sm:$0xff] %v15712_v11  ;;  %v5474_v32 = vmax.f32 %v5366_v63, 0.0  ;;  %v5252_v60 = vadd.f32 %v5092_v0, %v19649_v37  ;;  %5874 = vrot.lane.b32.xlu1 %v15712_v11, %s11114_s9  ;;  %v4822_v12 = vpop.f32.mrb[176].mxu1 }
 0x531   : > { %v5037_v55 = vrot.slane %v4822_v12, 1  ;;  %v4824_v46 = vpop.f32.mrb[177].mxu1 }
 0x532   : > { %v5367_v30 = vadd.f32 %v15358_v50, %v5252_v60  ;;  %v15721_v27 = vmul.f32 %v5474_v32, %v19650_v17  ;;  %v19653_v46 = vld [vmem:[#allocation135_spill] sm:$0xff]  ;;  %v19655_v17 = vld [vmem:[#allocation193_spill] sm:$0xff] }
 0x533   : > { %v5091_v24 = vsel %vm5064_vm3, %v5036_v10, %v5037_v55 }
 0x534   : > { %19651 = vst [vmem:[#allocation76_spill] sm:$0xff] %v15721_v27  ;;  %v5475_v23 = vmax.f32 %v5367_v30, 0.0  ;;  %v5253_v13 = vadd.f32 %v5091_v24, %v19652_v49  ;;  %5876 = vrot.lane.b32.xlu0 %v15721_v27, %s11114_s9  ;;  %v4827_v63 = vpop.f32.mrb[178].mxu1 }
 0x535   : > { %v5038_v0 = vrot.slane %v4827_v63, 1  ;;  %v4829_v37 = vpop.f32.mrb[179].mxu1 }
 0x536   : > { %v5368_v12 = vadd.f32 %v15358_v50, %v5253_v13  ;;  %v15730_v11 = vmul.f32 %v5475_v23, %v19653_v46  ;;  %v19656_v37 = vld [vmem:[#allocation140_spill] sm:$0xff] }
 0x537   : > { %v5090_v32 = vsel %vm5064_vm3, %v5037_v55, %v5038_v0  ;;  %v19658_v46 = vld [vmem:[#allocation108_spill] sm:$0xff] }
 0x538   : > { %19654 = vst [vmem:[#allocation213_spill] sm:$0xff] %v15730_v11  ;;  %v5476_v60 = vmax.f32 %v5368_v12, 0.0  ;;  %v5254_v10 = vadd.f32 %v5090_v32, %v19655_v17  ;;  %5878 = vrot.lane.b32.xlu1 %v15730_v11, %s11114_s9  ;;  %v4832_v30 = vpop.f32.mrb[180].mxu1 }
 0x539   : > { %v5039_v24 = vrot.slane %v4832_v30, 1  ;;  %v4834_v49 = vpop.f32.mrb[181].mxu1 }
 0x53a   : > { %v5369_v63 = vadd.f32 %v15358_v50, %v5254_v10  ;;  %v15739_v27 = vmul.f32 %v5476_v60, %v19656_v37  ;;  %v19659_v49 = vld [vmem:[#allocation139_spill] sm:$0xff]  ;;  %v19661_v37 = vld [vmem:[#allocation196_spill] sm:$0xff] }
 0x53b   : > { %v5089_v23 = vsel %vm5064_vm3, %v5038_v0, %v5039_v24 }
 0x53c   : > { %19657 = vst [vmem:[#allocation75_spill] sm:$0xff] %v15739_v27  ;;  %v5477_v13 = vmax.f32 %v5369_v63, 0.0  ;;  %v5255_v55 = vadd.f32 %v5089_v23, %v19658_v46  ;;  %5880 = vrot.lane.b32.xlu0 %v15739_v27, %s11114_s9  ;;  %v4837_v12 = vpop.f32.mrb[182].mxu1 }
 0x53d   : > { %v5040_v32 = vrot.slane %v4837_v12, 1  ;;  %v4839_v17 = vpop.f32.mrb[183].mxu1 }
 0x53e   : > { %v5370_v30 = vadd.f32 %v15358_v50, %v5255_v55  ;;  %v15748_v11 = vmul.f32 %v5477_v13, %v19659_v49  ;;  %v19662_v17 = vld [vmem:[#allocation218_spill] sm:$0xff]  ;;  %v19664_v49 = vld [vmem:[#allocation112_spill] sm:$0xff] }
 0x53f   : > { %v5088_v60 = vsel %vm5064_vm3, %v5039_v24, %v5040_v32 }
 0x540   : > { %19660 = vst [vmem:[#allocation215_spill] sm:$0xff] %v15748_v11  ;;  %v5478_v10 = vmax.f32 %v5370_v30, 0.0  ;;  %v5256_v0 = vadd.f32 %v5088_v60, %v19661_v37  ;;  %5882 = vrot.lane.b32.xlu1 %v15748_v11, %s11114_s9  ;;  %v4842_v63 = vpop.f32.mrb[184].mxu1 }
 0x541   : > { %v5041_v23 = vrot.slane %v4842_v63, 1  ;;  %v4844_v46 = vpop.f32.mrb[185].mxu1 }
 0x542   : > { %v5371_v12 = vadd.f32 %v15358_v50, %v5256_v0  ;;  %v15757_v27 = vmul.f32 %v5478_v10, %v19662_v17  ;;  %v19665_v46 = vld [vmem:[#allocation220_spill] sm:$0xff]  ;;  %v19667_v17 = vld [vmem:[#allocation199_spill] sm:$0xff] }
 0x543   : > { %v5087_v13 = vsel %vm5064_vm3, %v5040_v32, %v5041_v23 }
 0x544   : > { %19663 = vst [vmem:[#allocation80_spill] sm:$0xff] %v15757_v27  ;;  %v5479_v55 = vmax.f32 %v5371_v12, 0.0  ;;  %v5257_v24 = vadd.f32 %v5087_v13, %v19664_v49  ;;  %5884 = vrot.lane.b32.xlu0 %v15757_v27, %s11114_s9  ;;  %v4847_v30 = vpop.f32.mrb[186].mxu1 }
 0x545   : > { %v5042_v60 = vrot.slane %v4847_v30, 1  ;;  %v4849_v37 = vpop.f32.mrb[187].mxu1 }
 0x546   : > { %v5372_v63 = vadd.f32 %v15358_v50, %v5257_v24  ;;  %v15766_v11 = vmul.f32 %v5479_v55, %v19665_v46  ;;  %v19668_v37 = vld [vmem:[#allocation222_spill] sm:$0xff]  ;;  %v19670_v46 = vld [vmem:[#allocation116_spill] sm:$0xff] }
 0x547   : > { %v5086_v10 = vsel %vm5064_vm3, %v5041_v23, %v5042_v60 }
 0x548   : > { %19666 = vst [vmem:[#allocation217_spill] sm:$0xff] %v15766_v11  ;;  %v5480_v0 = vmax.f32 %v5372_v63, 0.0  ;;  %v5258_v32 = vadd.f32 %v5086_v10, %v19667_v17  ;;  %5886 = vrot.lane.b32.xlu1 %v15766_v11, %s11114_s9  ;;  %v4852_v12 = vpop.f32.mrb[188].mxu1 }
 0x549   : > { %v5043_v13 = vrot.slane %v4852_v12, 1  ;;  %v4854_v49 = vpop.f32.mrb[189].mxu1 }
 0x54a   : > { %v5373_v30 = vadd.f32 %v15358_v50, %v5258_v32  ;;  %v15775_v27 = vmul.f32 %v5480_v0, %v19668_v37  ;;  %v19671_v49 = vld [vmem:[#allocation31_spill] sm:$0xff]  ;;  %v19673_v37 = vld [vmem:[#allocation202_spill] sm:$0xff] }
 0x54b   : > { %v5085_v55 = vsel %vm5064_vm3, %v5042_v60, %v5043_v13 }
 0x54c   : > { %19669 = vst [vmem:[#allocation79_spill] sm:$0xff] %v15775_v27  ;;  %v5481_v24 = vmax.f32 %v5373_v30, 0.0  ;;  %v5259_v23 = vadd.f32 %v5085_v55, %v19670_v46  ;;  %5888 = vrot.lane.b32.xlu0 %v15775_v27, %s11114_s9  ;;  %v4857_v63 = vpop.f32.mrb[190].mxu1 }
 0x54d   : > { %v5044_v10 = vrot.slane %v4857_v63, 1  ;;  %v4859_v17 = vpop.f32.mrb[191].mxu1 }
 0x54e   : > { %v5374_v12 = vadd.f32 %v15358_v50, %v5259_v23  ;;  %v15784_v11 = vmul.f32 %v5481_v24, %v19671_v49  ;;  %v19674_v17 = vld [vmem:[#allocation225_spill] sm:$0xff]  ;;  %v19676_v49 = vld [vmem:[#allocation120_spill] sm:$0xff] }
 0x54f   : > { %v5084_v0 = vsel %vm5064_vm3, %v5043_v13, %v5044_v10 }
 0x550   : > { %19672 = vst [vmem:[#allocation27_spill] sm:$0xff] %v15784_v11  ;;  %v5482_v32 = vmax.f32 %v5374_v12, 0.0  ;;  %v5260_v60 = vadd.f32 %v5084_v0, %v19673_v37  ;;  %5890 = vrot.lane.b32.xlu1 %v15784_v11, %s11114_s9  ;;  %v4862_v30 = vpop.f32.mrb[192].mxu1 }
 0x551   : > { %v5045_v55 = vrot.slane %v4862_v30, 1  ;;  %v4864_v46 = vpop.f32.mrb[193].mxu1 }
 0x552   : > { %v5375_v63 = vadd.f32 %v15358_v50, %v5260_v60  ;;  %v15793_v27 = vmul.f32 %v5482_v32, %v19674_v17  ;;  %v19677_v46 = vld [vmem:[#allocation36_spill] sm:$0xff]  ;;  %v19679_v17 = vld [vmem:[#allocation205_spill] sm:$0xff] }
 0x553   : > { %v5083_v24 = vsel %vm5064_vm3, %v5044_v10, %v5045_v55 }
 0x554   : > { %19675 = vst [vmem:[#allocation85_spill] sm:$0xff] %v15793_v27  ;;  %v5483_v23 = vmax.f32 %v5375_v63, 0.0  ;;  %v5261_v13 = vadd.f32 %v5083_v24, %v19676_v49  ;;  %5892 = vrot.lane.b32.xlu0 %v15793_v27, %s11114_s9  ;;  %v4867_v12 = vpop.f32.mrb[194].mxu1 }
 0x555   : > { %v5046_v0 = vrot.slane %v4867_v12, 1  ;;  %v4869_v37 = vpop.f32.mrb[195].mxu1 }
 0x556   : > { %v5376_v30 = vadd.f32 %v15358_v50, %v5261_v13  ;;  %v15802_v11 = vmul.f32 %v5483_v23, %v19677_v46  ;;  %v19680_v37 = vld [vmem:[#allocation34_spill] sm:$0xff]  ;;  %v19682_v46 = vld [vmem:[#allocation124_spill] sm:$0xff] }
 0x557   : > { %v5082_v32 = vsel %vm5064_vm3, %v5045_v55, %v5046_v0 }
 0x558   : > { %19678 = vst [vmem:[#allocation26_spill] sm:$0xff] %v15802_v11  ;;  %v5484_v60 = vmax.f32 %v5376_v30, 0.0  ;;  %v5262_v10 = vadd.f32 %v5082_v32, %v19679_v17  ;;  %5894 = vrot.lane.b32.xlu1 %v15802_v11, %s11114_s9  ;;  %v4872_v63 = vpop.f32.mrb[196].mxu1 }
 0x559   : > { %v5047_v24 = vrot.slane %v4872_v63, 1  ;;  %v4874_v49 = vpop.f32.mrb[197].mxu1 }
 0x55a   : > { %v5377_v12 = vadd.f32 %v15358_v50, %v5262_v10  ;;  %v15811_v27 = vmul.f32 %v5484_v60, %v19680_v37  ;;  %v19683_v49 = vld [vmem:[#allocation42_spill] sm:$0xff]  ;;  %v19685_v37 = vld [vmem:[#allocation207_spill] sm:$0xff] }
 0x55b   : > { %v5081_v23 = vsel %vm5064_vm3, %v5046_v0, %v5047_v24 }
 0x55c   : > { %19681 = vst [vmem:[#allocation84_spill] sm:$0xff] %v15811_v27  ;;  %v5485_v13 = vmax.f32 %v5377_v12, 0.0  ;;  %v5263_v55 = vadd.f32 %v5081_v23, %v19682_v46  ;;  %5896 = vrot.lane.b32.xlu0 %v15811_v27, %s11114_s9  ;;  %v4877_v30 = vpop.f32.mrb[198].mxu1 }
 0x55d   : > { %v5048_v32 = vrot.slane %v4877_v30, 1  ;;  %v4879_v17 = vpop.f32.mrb[199].mxu1 }
 0x55e   : > { %v5378_v63 = vadd.f32 %v15358_v50, %v5263_v55  ;;  %v15820_v11 = vmul.f32 %v5485_v13, %v19683_v49  ;;  %v19686_v17 = vld [vmem:[#allocation41_spill] sm:$0xff]  ;;  %v19688_v49 = vld [vmem:[#allocation128_spill] sm:$0xff] }
 0x55f   : > { %v5080_v60 = vsel %vm5064_vm3, %v5047_v24, %v5048_v32 }
 0x560   : > { %19684 = vst [vmem:[#allocation89_spill] sm:$0xff] %v15820_v11  ;;  %v5486_v10 = vmax.f32 %v5378_v63, 0.0  ;;  %v5264_v0 = vadd.f32 %v5080_v60, %v19685_v37  ;;  %5898 = vrot.lane.b32.xlu1 %v15820_v11, %s11114_s9  ;;  %v4882_v12 = vpop.f32.mrb[200].mxu1 }
 0x561   : > { %v5049_v23 = vrot.slane %v4882_v12, 1  ;;  %v4884_v46 = vpop.f32.mrb[201].mxu1 }
 0x562   : > { %v5379_v30 = vadd.f32 %v15358_v50, %v5264_v0  ;;  %v15829_v27 = vmul.f32 %v5486_v10, %v19686_v17  ;;  %v19689_v46 = vld [vmem:[#allocation45_spill] sm:$0xff]  ;;  %v19691_v17 = vld [vmem:[#allocation210_spill] sm:$0xff] }
 0x563   : > { %v5079_v13 = vsel %vm5064_vm3, %v5048_v32, %v5049_v23 }
 0x564   : > { %19687 = vst [vmem:[#allocation30_spill] sm:$0xff] %v15829_v27  ;;  %v5487_v55 = vmax.f32 %v5379_v30, 0.0  ;;  %v5265_v24 = vadd.f32 %v5079_v13, %v19688_v49  ;;  %5900 = vrot.lane.b32.xlu0 %v15829_v27, %s11114_s9  ;;  %v4887_v63 = vpop.f32.mrb[202].mxu1 }
 0x565   : > { %v5050_v60 = vrot.slane %v4887_v63, 1  ;;  %v4889_v37 = vpop.f32.mrb[203].mxu1 }
 0x566   : > { %v5380_v12 = vadd.f32 %v15358_v50, %v5265_v24  ;;  %v15838_v11 = vmul.f32 %v5487_v55, %v19689_v46  ;;  %v19692_v37 = vld [vmem:[#allocation44_spill] sm:$0xff]  ;;  %v19694_v46 = vld [vmem:[#allocation133_spill] sm:$0xff] }
 0x567   : > { %v5078_v10 = vsel %vm5064_vm3, %v5049_v23, %v5050_v60 }
 0x568   : > { %19690 = vst [vmem:[#allocation88_spill] sm:$0xff] %v15838_v11  ;;  %v5488_v0 = vmax.f32 %v5380_v12, 0.0  ;;  %v5266_v32 = vadd.f32 %v5078_v10, %v19691_v17  ;;  %5902 = vrot.lane.b32.xlu1 %v15838_v11, %s11114_s9  ;;  %v4892_v30 = vpop.f32.mrb[204].mxu1 }
 0x569   : > { %v5051_v13 = vrot.slane %v4892_v30, 1  ;;  %v4894_v49 = vpop.f32.mrb[205].mxu1 }
 0x56a   : > { %v5381_v63 = vadd.f32 %v15358_v50, %v5266_v32  ;;  %v15847_v27 = vmul.f32 %v5488_v0, %v19692_v37  ;;  %v19695_v49 = vld [vmem:[#allocation49_spill] sm:$0xff]  ;;  %v19697_v37 = vld [vmem:[#allocation212_spill] sm:$0xff] }
 0x56b   : > { %v5077_v55 = vsel %vm5064_vm3, %v5050_v60, %v5051_v13 }
 0x56c   : > { %19693 = vst [vmem:[#allocation94_spill] sm:$0xff] %v15847_v27  ;;  %v5489_v24 = vmax.f32 %v5381_v63, 0.0  ;;  %v5267_v23 = vadd.f32 %v5077_v55, %v19694_v46  ;;  %5904 = vrot.lane.b32.xlu0 %v15847_v27, %s11114_s9  ;;  %v4897_v12 = vpop.f32.mrb[206].mxu1 }
 0x56d   : > { %v5052_v10 = vrot.slane %v4897_v12, 1  ;;  %v4899_v17 = vpop.f32.mrb[207].mxu1 }
 0x56e   : > { %v5382_v30 = vadd.f32 %v15358_v50, %v5267_v23  ;;  %v15856_v11 = vmul.f32 %v5489_v24, %v19695_v49  ;;  %v19698_v17 = vld [vmem:[#allocation48_spill] sm:$0xff]  ;;  %v19700_v49 = vld [vmem:[#allocation137_spill] sm:$0xff] }
 0x56f   : > { %v5076_v0 = vsel %vm5064_vm3, %v5051_v13, %v5052_v10 }
 0x570   : > { %19696 = vst [vmem:[#allocation239_spill] sm:$0xff] %v15856_v11  ;;  %v5490_v32 = vmax.f32 %v5382_v30, 0.0  ;;  %v5268_v60 = vadd.f32 %v5076_v0, %v19697_v37  ;;  %5906 = vrot.lane.b32.xlu1 %v15856_v11, %s11114_s9  ;;  %v4902_v63 = vpop.f32.mrb[208].mxu1 }
 0x571   : > { %v5053_v55 = vrot.slane %v4902_v63, 1  ;;  %v4904_v46 = vpop.f32.mrb[209].mxu1 }
 0x572   : > { %v5383_v12 = vadd.f32 %v15358_v50, %v5268_v60  ;;  %v15865_v27 = vmul.f32 %v5490_v32, %v19698_v17  ;;  %v19701_v46 = vld [vmem:[#allocation53_spill] sm:$0xff]  ;;  %v19703_v17 = vld [vmem:[#allocation214_spill] sm:$0xff] }
 0x573   : > { %v5075_v24 = vsel %vm5064_vm3, %v5052_v10, %v5053_v55 }
 0x574   : > { %19699 = vst [vmem:[#allocation241_spill] sm:$0xff] %v15865_v27  ;;  %v5491_v23 = vmax.f32 %v5383_v12, 0.0  ;;  %v5269_v13 = vadd.f32 %v5075_v24, %v19700_v49  ;;  %5908 = vrot.lane.b32.xlu0 %v15865_v27, %s11114_s9  ;;  %v4907_v30 = vpop.f32.mrb[210].mxu1 }
 0x575   : > { %v5054_v0 = vrot.slane %v4907_v30, 1  ;;  %v4909_v37 = vpop.f32.mrb[211].mxu1 }
 0x576   : > { %v5384_v63 = vadd.f32 %v15358_v50, %v5269_v13  ;;  %v15874_v11 = vmul.f32 %v5491_v23, %v19701_v46  ;;  %v19704_v37 = vld [vmem:[#allocation52_spill] sm:$0xff]  ;;  %v19706_v46 = vld [vmem:[#allocation141_spill] sm:$0xff] }
 0x577   : > { %v5074_v32 = vsel %vm5064_vm3, %v5053_v55, %v5054_v0 }
 0x578   : > { %19702 = vst [vmem:[#allocation243_spill] sm:$0xff] %v15874_v11  ;;  %v5492_v60 = vmax.f32 %v5384_v63, 0.0  ;;  %v5270_v10 = vadd.f32 %v5074_v32, %v19703_v17  ;;  %5910 = vrot.lane.b32.xlu1 %v15874_v11, %s11114_s9  ;;  %v4912_v12 = vpop.f32.mrb[212].mxu1 }
 0x579   : > { %v5055_v24 = vrot.slane %v4912_v12, 1  ;;  %v4914_v49 = vpop.f32.mrb[213].mxu1  ;;  %v15893_v12 = vld [vmem:[%s18266_s4] ss:$0 sm:$0xff] }
 0x57a   : > { %v5385_v30 = vadd.f32 %v15358_v50, %v5270_v10  ;;  %v15883_v27 = vmul.f32 %v5492_v60, %v19704_v37  ;;  %v19707_v60 = vld [vmem:[#allocation58_spill] sm:$0xff] }
 0x57b   : > { %v5073_v23 = vsel %vm5064_vm3, %v5054_v0, %v5055_v24 }
 0x57c   : > { %19705 = vst [vmem:[#allocation242_spill] sm:$0xff] %v15883_v27  ;;  %v5493_v13 = vmax.f32 %v5385_v30, 0.0  ;;  %v5271_v55 = vadd.f32 %v5073_v23, %v19706_v46  ;;  %5912 = vrot.lane.b32.xlu0 %v15883_v27, %s11114_s9  ;;  %v4917_v63 = vpop.f32.mrb[214].mxu1  ;;  %v19709_v30 = vld [vmem:[#allocation216_spill] sm:$0xff]  ;;  %v19710_v27 = vld [vmem:[#allocation57_spill] sm:$0xff] }
 0x57d   : > { %v5056_v32 = vrot.slane %v4917_v63, 1  ;;  %v4919_v17 = vpop.f32.mrb[215].mxu1 }
 0x57e   : > { %v5386_v50 = vadd.f32 %v15893_v12, %v5271_v55  ;;  %v15897_v10 = vmul.f32 %v5493_v13, %v19707_v60  ;;  %v15910_v55 = vpop.permute.xlu0 %5720 }
 0x57f   : > { %v5072_v0 = vsel %vm5064_vm3, %v5055_v24, %v5056_v32 }
 0x580   : > { %19708 = vst [vmem:[#allocation244_spill] sm:$0xff] %v15897_v10  ;;  %v5494_v49 = vmax.f32 %v5386_v50, 0.0  ;;  %v5272_v37 = vadd.f32 %v5072_v0, %v19709_v30  ;;  %5914 = vrot.lane.b32.xlu1 %v15897_v10, %s11114_s9  ;;  %v4922_v23 = vpop.f32.mrb[216].mxu1  ;;  %v19712_v50 = vld [vmem:[#allocation143_spill] sm:$0xff] }
 0x581   : > { %v5057_v46 = vrot.slane %v4922_v23, 1  ;;  %v4924_v63 = vpop.f32.mrb[217].mxu1 }
 0x582   : > { %v5387_v17 = vadd.f32 %v15893_v12, %v5272_v37  ;;  %v15906_v11 = vmul.f32 %v5494_v49, %v19710_v27  ;;  %v19713_v37 = vld [vmem:[#allocation62_spill] sm:$0xff] }
 0x583   : > { %v5071_v13 = vsel %vm5064_vm3, %v5056_v32, %v5057_v46  ;;  %v15921_v32 = vpop.permute.xlu1 %5722 }
 0x584   : > { %19711 = vst [vmem:[#allocation24_spill] sm:$0xff] %v15906_v11  ;;  %v5495_v24 = vmax.f32 %v5387_v17, 0.0  ;;  %v5273_v60 = vadd.f32 %v5071_v13, %v19712_v50  ;;  %5916 = vrot.lane.b32.xlu0 %v15906_v11, %s11114_s9  ;;  %v4927_v0 = vpop.f32.mrb[218].mxu1  ;;  %v19715_v17 = vld [vmem:[#allocation219_spill] sm:$0xff] }
 0x585   : > { %v5058_v30 = vrot.slane %v4927_v0, 1  ;;  %v4929_v23 = vpop.f32.mrb[219].mxu1 }
 0x586   : > { %v5388_v63 = vadd.f32 %v15893_v12, %v5273_v60  ;;  %v15917_v10 = vmul.f32 %v5495_v24, %v19713_v37  ;;  %v19716_v60 = vld [vmem:[#allocation61_spill] sm:$0xff] }
 0x587   : > { %v5070_v27 = vsel %vm5064_vm3, %v5057_v46, %v5058_v30  ;;  %v15932_v46 = vpop.permute.xlu0 %5724 }
 0x588   : > { %19714 = vst [vmem:[#allocation98_spill] sm:$0xff] %v15917_v10  ;;  %v5496_v49 = vmax.f32 %v5388_v63, 0.0  ;;  %v5274_v3 = vadd.f32 %v5070_v27, %v19715_v17  ;;  %5918 = vrot.lane.b32.xlu1 %v15917_v10, %s11114_s9  ;;  %v4932_v13 = vpop.f32.mrb[220].mxu1  ;;  %v19718_v63 = vld [vmem:[#allocation145_spill] sm:$0xff] }
 0x589   : > { %v5059_v50 = vrot.slane %v4932_v13, 1  ;;  %v4934_v0 = vpop.f32.mrb[221].mxu1 }
 0x58a   : > { %v5389_v23 = vadd.f32 %v15893_v12, %v5274_v3  ;;  %v15928_v11 = vmul.f32 %v5496_v49, %v19716_v60  ;;  %v19719_v3 = vld [vmem:[#allocation67_spill] sm:$0xff] }
 0x58b   : > { %v5069_v24 = vsel %vm5064_vm3, %v5058_v30, %v5059_v50  ;;  %v5727_v30 = vpop.permute.xlu1 %5726 }
 0x58c   : > { %19717 = vst [vmem:[#allocation245_spill] sm:$0xff] %v15928_v11  ;;  %v5497_v37 = vmax.f32 %v5389_v23, 0.0  ;;  %v5275_v48 = vadd.f32 %v5069_v24, %v19718_v63  ;;  %5920 = vrot.lane.b32.xlu0 %v15928_v11, %s11114_s9  ;;  %v4937_v27 = vpop.f32.mrb[222].mxu1 }
 0x58d   : > { %v5060_v17 = vrot.slane %v4937_v27, 1  ;;  %v4939_v13 = vpop.f32.mrb[223].mxu1 }
 0x58e   : > { %v5390_v0 = vadd.f32 %v15893_v12, %v5275_v48  ;;  %v15939_v10 = vmul.f32 %v5497_v37, %v19719_v3  ;;  %v19722_v13 = vld [vmem:[#allocation66_spill] sm:$0xff]  ;;  %v5729_v3 = vpop.permute.xlu0 %5728 }
 0x58f   : > { %v5068_v49 = vsel %vm5064_vm3, %v5059_v50, %v5060_v17 }
 0x590   : > { %19720 = vst [vmem:[#allocation29_spill] sm:$0xff] %v15939_v10  ;;  %v5498_v60 = vmax.f32 %v5390_v0, 0.0  ;;  %v5276_v23 = vadd.f32 %v5068_v49, %v19721_v41  ;;  %5922 = vrot.lane.b32.xlu1 %v15939_v10, %s11114_s9  ;;  %v4942_v24 = vpop.f32.mrb[224].mxu1 }
 0x591   : > { %v5061_v63 = vrot.slane %v4942_v24, 1  ;;  %v4944_v11 = vpop.f32.mrb[225].mxu1  ;;  %v19724_v24 = vld [vmem:[#allocation71_spill] sm:$0xff] }
 0x592   : > { %v5391_v27 = vadd.f32 %v15893_v12, %v5276_v23  ;;  %v15948_v48 = vmul.f32 %v5498_v60, %v19722_v13  ;;  %v5731_v13 = vpop.permute.xlu1 %5730 }
 0x593   : > { %v5067_v37 = vsel %vm5064_vm3, %v5060_v17, %v5061_v63 }
 0x594   : > { %19723 = vst [vmem:[#allocation97_spill] sm:$0xff] %v15948_v48  ;;  %v5499_v50 = vmax.f32 %v5391_v27, 0.0  ;;  %v5277_v0 = vadd.f32 %v5067_v37, %v14740_v18  ;;  %5924 = vrot.lane.b32.xlu0 %v15948_v48, %s11114_s9  ;;  %v4947_v41 = vpop.f32.mrb[226].mxu1 }
 0x595   : > { %v5062_v49 = vrot.slane %v4947_v41, 1  ;;  %v4949_v10 = vpop.f32.mrb[227].mxu1  ;;  %v19727_v41 = vld [vmem:[#allocation136_spill] sm:$0xff] }
 0x596   : > { %v5392_v11 = vadd.f32 %v15893_v12, %v5277_v0  ;;  %v15957_v23 = vmul.f32 %v5499_v50, %v19724_v24 }
 0x597   : > { %v5066_v60 = vsel %vm5064_vm3, %v5061_v63, %v5062_v49  ;;  %v19728_v63 = vrot.slane %v14775_v15, 1  ;;  %v5735_v15 = vpop.permute.xlu1 %5734 }
 0x598   : > { %19725 = vst [vmem:[#allocation246_spill] sm:$0xff] %v15957_v23  ;;  %v5500_v17 = vmax.f32 %v5392_v11, 0.0  ;;  %v5278_v27 = vadd.f32 %v5066_v60, %v19726_v39  ;;  %5926 = vrot.lane.b32.xlu1 %v15957_v23, %s11114_s9  ;;  %v4952_v18 = vpop.f32.mrb[228].mxu1  ;;  %v5733_v39 = vpop.permute.xlu0 %5732  ;;  %v19729_v60 = vld [vmem:[#allocation223_spill] sm:$0xff] }
 0x599   : > { %v5063_v37 = vrot.slane %v4952_v18, 1  ;;  %v4954_v48 = vpop.f32.mrb[229].mxu1 }
 0x59a   : > { %v5393_v10 = vadd.f32 %v15893_v12, %v5278_v27  ;;  %v15966_v0 = vmul.f32 %v5500_v17, %v19727_v41  ;;  %v19731_v27 = vld [vmem:[#allocation10_spill] sm:$0xff] }
 0x59b   : > { %v5065_v50 = vsel %vm5064_vm3, %v5062_v49, %v5063_v37  ;;  %v5172_v11 = vsel %vm5064_vm3, %v5063_v37, %v19728_v63  ;;  %v5739_v63 = vpop.permute.xlu1 %5738 }
 0x59c   : > { %v5501_v24 = vmax.f32 %v5393_v10, 0.0  ;;  %v5279_v23 = vadd.f32 %v5065_v50, %v19729_v60  ;;  %v5280_v18 = vadd.f32 %v5172_v11, %v19730_v52  ;;  %5928 = vrot.lane.b32.xlu0 %v15966_v0, %s11114_s9  ;;  %v5737_v50 = vpop.permute.xlu0 %5736  ;;  %v6047_v11 = vsel %vm2415_vm1, %v14806_v44, %v5727_v30 }
 0x59d   : > { %v6050_v30 = vsel %vm2415_vm1, %v14842_v8, %v5733_v39  ;;  %v6053_v8 = vsel %vm2415_vm1, %v14887_v51, %v5739_v63 }
 0x59e   : > { %v5394_v48 = vadd.f32 %v15893_v12, %v5279_v23  ;;  %v5395_v17 = vadd.f32 %v15893_v12, %v5280_v18  ;;  %v15981_v49 = vmul.f32 %v5501_v24, %v19731_v27  ;;  %v19732_v23 = vld [vmem:[#allocation12_spill] sm:$0xff]  ;;  %v19733_v12 = vld [vmem:[#allocation11_spill] sm:$0xff] }
 0x59f   : > { %v5743_v24 = vpop.permute.xlu1 %5742 }
 0x5a0   : > { %v5502_v41 = vmax.f32 %v5394_v48, 0.0  ;;  %v5503_v62 = vmax.f32 %v5395_v17, 0.0  ;;  %5930 = vrot.lane.b32.xlu1 %v15981_v49, %s11114_s9  ;;  %v6044_v52 = vsel %vm2415_vm1, %v15981_v49, %v15910_v55  ;;  %v5741_v39 = vpop.permute.xlu0 %5740 }
 0x5a1   : > { %6457 = vmatmul.mubr.f32.vlgmr.msra.gmra.mrb[14].mxu0 %v6044_v52 }
 0x5a2   : > { %9967 = vmatprep.mubr.msk.f32.mxu0 %vm2415_vm1, %v14862_v53  ;;  %v15991_v37 = vmul.f32 %v5503_v62, %v19732_v23  ;;  %v15994_v10 = vmul.f32 %v5502_v41, %v19733_v12 }
 0x5a3   : > { %v5747_v18 = vpop.permute.xlu1 %5746 }
 0x5a4   : > { %5934 = vrot.lane.b32.xlu1 %v15991_v37, %s11114_s9  ;;  %5932 = vrot.lane.b32.xlu0 %v15994_v10, %s11114_s9  ;;  %v6045_v55 = vsel %vm2415_vm1, %v15994_v10, %v15921_v32  ;;  %v6046_v62 = vsel %vm2415_vm1, %v15991_v37, %v15932_v46  ;;  %v6048_v32 = vsel %vm2415_vm1, %v14818_v40, %v5729_v3  ;;  %v5745_v60 = vpop.permute.xlu0 %5744  ;;  %s17453_s9 = sshll.u32 %s9476_s27, 1 }
 0x5a5   : > { %6462 = vmatmul.mubr.f32.gmra.mrb[16].mxu0 %v6045_v55  ;;  %v6049_v46 = vsel %vm2415_vm1, %v14830_v57, %v5731_v13  ;;  %v6051_v3 = vsel %vm2415_vm1, %v14862_v53, %v5735_v15  ;;  %v6052_v13 = vsel %vm2415_vm1, %v14875_v16, %v5737_v50  ;;  %v6054_v53 = vsel %vm2415_vm1, %v14899_v56, %v5741_v39  ;;  %v10074_v15 = vld [vmem:[#allocation2] ss:$0 sm:$0xff]  ;;  %p280_p4 = scmp.lt.s32.totalorder %s17453_s9, 3 }
 0x5a6   : > { %9968 = vmatprep.mubr.msk.f32.mxu0 %vm2415_vm1, %v14875_v16  ;;  %v6055_v16 = vsel %vm2415_vm1, %v14911_v59, %v5743_v24 }
 0x5a7   : > { %v5751_v17 = vpop.permute.xlu1 %5750  ;;  %s19835_s9 = smov (!%p280_p4, %s17453_s9), 3 }
 0x5a8   : > { %v5749_v48 = vpop.permute.xlu0 %5748  ;;  %s10627_s27 = smul.u32 24, %s19835_s9 }
 0x5a9   : > { %6467 = vmatmul.mubr.f32.gmra.mrb[18].mxu0 %v6046_v62 }
 0x5aa   : > { %9969 = vmatprep.mubr.msk.f32.mxu0 %vm2415_vm1, %v14887_v51  ;;  %v6056_v51 = vsel %vm2415_vm1, %v14923_v6, %v5745_v60  ;;  %s17524_s16 = scalar_lea.vmem %s18269_s7, %s10627_s27 }
 0x5ab   : > { %v5755_v41 = vpop.permute.xlu1 %5754 }
 0x5ac   : > { %v5753_v27 = vpop.permute.xlu0 %5752 }
 0x5ad   : > { %6472 = vmatmul.mubr.f32.gmra.mrb[20].mxu0 %v6047_v11 }
 0x5ae   : > { %9970 = vmatprep.mubr.msk.f32.mxu0 %vm2415_vm1, %v14899_v56  ;;  %v6057_v56 = vsel %vm2415_vm1, %v14935_v4, %v5747_v18 }
 0x5af   : > { %v5759_v12 = vpop.permute.xlu1 %5758 }
 0x5b0   : > { %v5757_v52 = vpop.permute.xlu0 %5756 }
 0x5b1   : > { %6477 = vmatmul.mubr.f32.gmra.mrb[22].mxu0 %v6048_v32  ;;  %v6062_v23 = vsel %vm2415_vm1, %v15002_v28, %v5757_v52 }
 0x5b2   : > { %9971 = vmatprep.mubr.msk.f32.mxu0 %vm2415_vm1, %v14911_v59  ;;  %v6058_v59 = vsel %vm2415_vm1, %v14947_v21, %v5749_v48 }
 0x5b3   : > { %v5763_v63 = vpop.permute.xlu1 %5762 }
 0x5b4   : > { %v5761_v50 = vpop.permute.xlu0 %5760 }
 0x5b5   : > { %6482 = vmatmul.mubr.f32.gmra.mrb[24].mxu0 %v6049_v46 }
 0x5b6   : > { %9972 = vmatprep.mubr.msk.f32.mxu0 %vm2415_vm1, %v14923_v6  ;;  %v6059_v6 = vsel %vm2415_vm1, %v14959_v47, %v5751_v17 }
 0x5b7   : > { %v5767_v62 = vpop.permute.xlu1 %5766 }
 0x5b8   : > { %v5765_v55 = vpop.permute.xlu0 %5764 }
 0x5b9   : > { %6487 = vmatmul.mubr.f32.gmra.mrb[26].mxu0 %v6050_v30 }
 0x5ba   : > { %9973 = vmatprep.mubr.msk.f32.mxu0 %vm2415_vm1, %v14935_v4  ;;  %v11115_v4 = vmov 0  }
 0x5bb   : > { %10642 = vset.pattern.permute.xlu1 %v11115_v4  ;;  %10643 = vset.pattern.permute.xlu0 %v11115_v4  ;;  %v5771_v32 = vpop.permute.xlu1 %5770  ;;  %v19738_v4 = vld [vmem:[#allocation227_spill] sm:$0xff] }
 0x5bc   : > { %7819 = vperm.xlu1 %10642, %v10074_v15   ;;  %v5769_v11 = vpop.permute.xlu0 %5768 }
 0x5bd   : > { %6492 = vmatmul.mubr.f32.gmra.mrb[28].mxu0 %v6051_v3 }
 0x5be   : > { %9974 = vmatprep.mubr.msk.f32.mxu0 %vm2415_vm1, %v14947_v21  ;;  %v6060_v21 = vsel %vm2415_vm1, %v14977_v1, %v5753_v27 }
 0x5bf   : > { %v5775_v30 = vpop.permute.xlu1 %5774 }
 0x5c0   : > { %v5773_v46 = vpop.permute.xlu0 %5772 }
 0x5c1   : > { %6497 = vmatmul.mubr.f32.gmra.mrb[30].mxu0 %v6052_v13 }
 0x5c2   : > { %9975 = vmatprep.mubr.msk.f32.mxu0 %vm2415_vm1, %v14959_v47  ;;  %v6061_v47 = vsel %vm2415_vm1, %v14990_v14, %v5755_v41 }
 0x5c3   : > { %v5779_v13 = vpop.permute.xlu1 %5778 }
 0x5c4   : > { %v5777_v3 = vpop.permute.xlu0 %5776 }
 0x5c5   : > { %6502 = vmatmul.mubr.f32.gmra.mrb[32].mxu0 %v6053_v8 }
 0x5c6   : > { %9976 = vmatprep.mubr.msk.f32.mxu0 %vm2415_vm1, %v14977_v1  ;;  %v6063_v1 = vsel %vm2415_vm1, %v15014_v7, %v5759_v12 }
 0x5c7   : > { %v5783_v39 = vpop.permute.xlu1 %5782 }
 0x5c8   : > { %v5781_v8 = vpop.permute.xlu0 %5780 }
 0x5c9   : > { %6507 = vmatmul.mubr.f32.gmra.mrb[34].mxu0 %v6054_v53 }
 0x5ca   : > { %9977 = vmatprep.mubr.msk.f32.mxu0 %vm2415_vm1, %v14990_v14  ;;  %v6064_v14 = vsel %vm2415_vm1, %v15026_v9, %v5761_v50 }
 0x5cb   : > { %v5787_v24 = vpop.permute.xlu1 %5786 }
 0x5cc   : > { %v5785_v53 = vpop.permute.xlu0 %5784 }
 0x5cd   : > { %6512 = vmatmul.mubr.f32.gmra.mrb[36].mxu0 %v6055_v16 }
 0x5ce   : > { %9978 = vmatprep.mubr.msk.f32.mxu0 %vm2415_vm1, %v15002_v28  ;;  %v6065_v28 = vsel %vm2415_vm1, %v15038_v45, %v5763_v63 }
 0x5cf   : > { %v5791_v60 = vpop.permute.xlu1 %5790 }
 0x5d0   : > { %v5789_v16 = vpop.permute.xlu0 %5788 }
 0x5d1   : > { %6517 = vmatmul.mubr.f32.gmra.mrb[38].mxu0 %v6056_v51  ;;  %v19734_v51 = vld [vmem:[#allocation224_spill] sm:$0xff] }
 0x5d2   : > { %9979 = vmatprep.mubr.msk.f32.mxu0 %vm2415_vm1, %v15014_v7  ;;  %v6066_v7 = vsel %vm2415_vm1, %v15050_v33, %v5765_v55  ;;  %v19744_v55 = vld [vmem:[#allocation106_spill] sm:$0xff] }
 0x5d3   : > { %v5795_v48 = vpop.permute.xlu1 %5794 }
 0x5d4   : > { %v5793_v18 = vpop.permute.xlu0 %5792 }
 0x5d5   : > { %6522 = vmatmul.mubr.f32.gmra.mrb[40].mxu0 %v6057_v56  ;;  %v19735_v56 = vld [vmem:[#allocation154_spill] sm:$0xff] }
 0x5d6   : > { %9980 = vmatprep.mubr.msk.f32.mxu0 %vm2415_vm1, %v15026_v9  ;;  %v6067_v9 = vsel %vm2415_vm1, %v15062_v31, %v5767_v62 }
 0x5d7   : > { %v5799_v27 = vpop.permute.xlu1 %5798 }
 0x5d8   : > { %v5797_v17 = vpop.permute.xlu0 %5796 }
 0x5d9   : > { %6527 = vmatmul.mubr.f32.gmra.mrb[42].mxu0 %v6058_v59  ;;  %v19736_v59 = vld [vmem:[#allocation226_spill] sm:$0xff] }
 0x5da   : > { %9981 = vmatprep.mubr.msk.f32.mxu0 %vm2415_vm1, %v15038_v45  ;;  %v6068_v45 = vsel %vm2415_vm1, %v15074_v20, %v5769_v11 }
 0x5db   : > { %v5803_v41 = vpop.permute.xlu1 %5802 }
 0x5dc   : > { %v5801_v15 = vpop.permute.xlu0 %5800 }
 0x5dd   : > { %6532 = vmatmul.mubr.f32.gmra.mrb[44].mxu0 %v6059_v6  ;;  %v19737_v6 = vld [vmem:[#allocation158_spill] sm:$0xff] }
 0x5de   : > { %9982 = vmatprep.mubr.msk.f32.mxu0 %vm2415_vm1, %v15050_v33  ;;  %v6069_v33 = vsel %vm2415_vm1, %v15092_v54, %v5771_v32  ;;  %v19746_v32 = vld [vmem:[#allocation229_spill] sm:$0xff] }
 0x5df   : > { %v5807_v12 = vpop.permute.xlu1 %5806 }
 0x5e0   : > { %v5805_v52 = vpop.permute.xlu0 %5804 }
 0x5e1   : > { %6537 = vmatmul.mubr.f32.gmra.mrb[46].mxu0 %v6060_v21  ;;  %v19739_v21 = vld [vmem:[#allocation161_spill] sm:$0xff] }
 0x5e2   : > { %9983 = vmatprep.mubr.msk.f32.mxu0 %vm2415_vm1, %v15062_v31  ;;  %v6070_v31 = vsel %vm2415_vm1, %v15105_v5, %v5773_v46 }
 0x5e4   : > { %v5809_v50 = vpop.permute.xlu0 %5808 }
 0x5e5   : > { %6542 = vmatmul.mubr.f32.gmra.mrb[48].mxu0 %v6061_v47  ;;  %v19740_v47 = vld [vmem:[#allocation102_spill] sm:$0xff]  ;;  %v6088_v63 = vsel %vm2415_vm1, %v19737_v6, %v5809_v50 }
 0x5e6   : > { %9984 = vmatprep.mubr.msk.f32.mxu0 %vm2415_vm1, %v15074_v20  ;;  %v6071_v20 = vsel %vm2415_vm1, %v15117_v38, %v5775_v30 }
 0x5e8   : > { %v5813_v62 = vpop.permute.xlu0 %5812 }
 0x5e9   : > { %6547 = vmatmul.mubr.f32.gmra.mrb[50].mxu0 %v6062_v23  ;;  %v19741_v23 = vld [vmem:[#allocation164_spill] sm:$0xff]  ;;  %v6090_v11 = vsel %vm2415_vm1, %v19739_v21, %v5813_v62 }
 0x5ea   : > { %9985 = vmatprep.mubr.msk.f32.mxu0 %vm2415_vm1, %v15092_v54  ;;  %v6072_v54 = vsel %vm2415_vm1, %v15129_v36, %v5777_v3  ;;  %v19748_v3 = vld [vmem:[#allocation110_spill] sm:$0xff] }
 0x5ec   : > { %v5817_v46 = vpop.permute.xlu0 %5816 }
 0x5ed   : > { %6552 = vmatmul.mubr.f32.gmra.mrb[52].mxu0 %v6063_v1  ;;  %v19742_v1 = vld [vmem:[#allocation228_spill] sm:$0xff]  ;;  %v6092_v30 = vsel %vm2415_vm1, %v19741_v23, %v5817_v46 }
 0x5ee   : > { %9986 = vmatprep.mubr.msk.f32.mxu0 %vm2415_vm1, %v15105_v5  ;;  %v6073_v5 = vsel %vm2415_vm1, %v15141_v34, %v5779_v13 }
 0x5f0   : > { %v5821_v13 = vpop.permute.xlu0 %5820 }
 0x5f1   : > { %6557 = vmatmul.mubr.f32.gmra.mrb[54].mxu0 %v6064_v14  ;;  %v19743_v14 = vld [vmem:[#allocation167_spill] sm:$0xff] }
 0x5f2   : > { %9987 = vmatprep.mubr.msk.f32.mxu0 %vm2415_vm1, %v15117_v38  ;;  %v6074_v38 = vsel %vm2415_vm1, %v15153_v42, %v5781_v8  ;;  %v6094_v8 = vsel %vm2415_vm1, %v19743_v14, %v5821_v13 }
 0x5f5   : > { %6562 = vmatmul.mubr.f32.gmra.mrb[56].mxu0 %v6065_v28  ;;  %v5811_v28 = vpop.permute.xlu1 %5810 }
 0x5f6   : > { %9988 = vmatprep.mubr.msk.f32.mxu0 %vm2415_vm1, %v15129_v36  ;;  %v6075_v36 = vsel %vm2415_vm1, %v15165_v22, %v5783_v39  ;;  %v19750_v39 = vld [vmem:[#allocation230_spill] sm:$0xff] }
 0x5f9   : > { %6567 = vmatmul.mubr.f32.gmra.mrb[58].mxu0 %v6066_v7  ;;  %v6089_v7 = vsel %vm2415_vm1, %v19738_v4, %v5811_v28 }
 0x5fa   : > { %9989 = vmatprep.mubr.msk.f32.mxu0 %vm2415_vm1, %v15141_v34  ;;  %v6076_v34 = vsel %vm2415_vm1, %v15177_v43, %v5785_v53  ;;  %v5825_v53 = vpop.permute.xlu0 %5824 }
 0x5fd   : > { %6572 = vmatmul.mubr.f32.gmra.mrb[60].mxu0 %v6067_v9  ;;  %v19745_v9 = vld [vmem:[#allocation170_spill] sm:$0xff] }
 0x5fe   : > { %9990 = vmatprep.mubr.msk.f32.mxu0 %vm2415_vm1, %v15153_v42  ;;  %v6077_v42 = vsel %vm2415_vm1, %v15189_v35, %v5787_v24  ;;  %v6096_v24 = vsel %vm2415_vm1, %v19745_v9, %v5825_v53 }
 0x601   : > { %6577 = vmatmul.mubr.f32.gmra.mrb[62].mxu0 %v6068_v45  ;;  %v5815_v45 = vpop.permute.xlu1 %5814 }
 0x602   : > { %9991 = vmatprep.mubr.msk.f32.mxu0 %vm2415_vm1, %v15165_v22  ;;  %v6078_v22 = vsel %vm2415_vm1, %v15207_v29, %v5789_v16  ;;  %v19752_v16 = vld [vmem:[#allocation114_spill] sm:$0xff] }
 0x605   : > { %6582 = vmatmul.mubr.f32.gmra.mrb[64].mxu0 %v6069_v33  ;;  %v6091_v33 = vsel %vm2415_vm1, %v19740_v47, %v5815_v45  ;;  %v19758_v45 = vld [vmem:[#allocation118_spill] sm:$0xff] }
 0x606   : > { %9992 = vmatprep.mubr.msk.f32.mxu0 %vm2415_vm1, %v15177_v43  ;;  %v6079_v43 = vsel %vm2415_vm1, %v15220_v26, %v5791_v60 }
 0x609   : > { %6587 = vmatmul.mubr.f32.gmra.mrb[66].mxu0 %v6070_v31  ;;  %v19747_v31 = vld [vmem:[#allocation173_spill] sm:$0xff] }
 0x60a   : > { %9993 = vmatprep.mubr.msk.f32.mxu0 %vm2415_vm1, %v15189_v35  ;;  %v6080_v35 = vsel %vm2415_vm1, %v15232_v2, %v5793_v18  ;;  %v19753_v18 = vlaneseq }
 0x60d   : > { %6592 = vmatmul.mubr.f32.gmra.mrb[68].mxu0 %v6071_v20  ;;  %v5819_v20 = vpop.permute.xlu1 %5818 }
 0x60e   : > { %9994 = vmatprep.mubr.msk.f32.mxu0 %vm2415_vm1, %v15207_v29  ;;  %v6081_v29 = vsel %vm2415_vm1, %v15244_v58, %v5795_v48 }
 0x611   : > { %6597 = vmatmul.mubr.f32.gmra.mrb[70].mxu0 %v6072_v54  ;;  %v6093_v54 = vsel %vm2415_vm1, %v19742_v1, %v5819_v20 }
 0x612   : > { %9995 = vmatprep.mubr.msk.f32.mxu0 %vm2415_vm1, %v15220_v26  ;;  %v6082_v26 = vsel %vm2415_vm1, %v15256_v61, %v5797_v17 }
 0x615   : > { %6602 = vmatmul.mubr.f32.gmra.mrb[72].mxu0 %v6073_v5  ;;  %v19749_v5 = vld [vmem:[#allocation176_spill] sm:$0xff] }
 0x616   : > { %9996 = vmatprep.mubr.msk.f32.mxu0 %vm2415_vm1, %v15232_v2  ;;  %v6083_v2 = vsel %vm2415_vm1, %v15268_v19, %v5799_v27  ;;  %v19755_v27 = vld [vmem:[#allocation231_spill] sm:$0xff] }
 0x619   : > { %6607 = vmatmul.mubr.f32.gmra.mrb[74].mxu0 %v6074_v38  ;;  %v5823_v38 = vpop.permute.xlu1 %5822 }
 0x61a   : > { %9997 = vmatprep.mubr.msk.f32.mxu0 %vm2415_vm1, %v15244_v58  ;;  %v6084_v58 = vsel %vm2415_vm1, %v15280_v25, %v5801_v15 }
 0x61d   : > { %6612 = vmatmul.mubr.f32.gmra.mrb[76].mxu0 %v6075_v36  ;;  %v6095_v36 = vsel %vm2415_vm1, %v19744_v55, %v5823_v38  ;;  %v19759_v38 = vld [vmem:[#allocation188_spill] sm:$0xff] }
 0x61e   : > { %9998 = vmatprep.mubr.msk.f32.mxu0 %vm2415_vm1, %v15256_v61  ;;  %v6085_v61 = vsel %vm2415_vm1, %v19734_v51, %v5803_v41 }
 0x621   : > { %6617 = vmatmul.mubr.f32.gmra.mrb[78].mxu0 %v6076_v34  ;;  %v19751_v34 = vld [vmem:[#allocation179_spill] sm:$0xff] }
 0x622   : > { %9999 = vmatprep.mubr.msk.f32.mxu0 %vm2415_vm1, %v15268_v19  ;;  %v6086_v19 = vsel %vm2415_vm1, %v19735_v56, %v5805_v52 }
 0x625   : > { %6622 = vmatmul.mubr.f32.gmra.mrb[80].mxu0 %v6077_v42  ;;  %v5827_v42 = vpop.permute.xlu1 %5826 }
 0x626   : > { %10000 = vmatprep.mubr.msk.f32.mxu0 %vm2415_vm1, %v15280_v25  ;;  %v6087_v25 = vsel %vm2415_vm1, %v19736_v59, %v5807_v12  ;;  %v19757_v12 = vld [vmem:[#allocation185_spill] sm:$0xff] }
 0x629   : > { %6627 = vmatmul.mubr.f32.gmra.mrb[82].mxu0 %v6078_v22  ;;  %v6097_v22 = vsel %vm2415_vm1, %v19746_v32, %v5827_v42 }
 0x62a   : > { %10001 = vmatprep.mubr.msk.f32.mxu0 %vm2415_vm1, %v19734_v51  ;;  %v5829_v51 = vpop.permute.xlu0 %5828 }
 0x62b   : > { %v6098_v48 = vsel %vm2415_vm1, %v19747_v31, %v5829_v51 }
 0x62d   : > { %6632 = vmatmul.mubr.f32.gmra.mrb[84].mxu0 %v6079_v43 }
 0x62e   : > { %10002 = vmatprep.mubr.msk.f32.mxu0 %vm2415_vm1, %v19735_v56  ;;  %v16215_v56 = vand.u32 127, %v19753_v18 }
 0x630   : > { %vm7216_vm4 = vcmp.eq.s32.totalorder %v16215_v56, 2  ;;  %vm6999_vm5 = vcmp.eq.s32.totalorder %v16215_v56, 0 }
 0x631   : > { %6637 = vmatmul.mubr.f32.gmra.mrb[86].mxu0 %v6080_v35  ;;  %v19754_v35 = vld [vmem:[#allocation182_spill] sm:$0xff] }
 0x632   : > { %10003 = vmatprep.mubr.msk.f32.mxu0 %vm2415_vm1, %v19736_v59 }
 0x635   : > { %6642 = vmatmul.mubr.f32.gmra.mrb[88].mxu0 %v6081_v29  ;;  %v5831_v29 = vpop.permute.xlu1 %5830 }
 0x636   : > { %10004 = vmatprep.mubr.msk.f32.mxu0 %vm2415_vm1, %v19737_v6  ;;  %v6099_v15 = vsel %vm2415_vm1, %v19748_v3, %v5831_v29  ;;  %v19760_v29 = vld [vmem:[#allocation233_spill] sm:$0xff] }
 0x639   : > { %6647 = vmatmul.mubr.f32.gmra.mrb[90].mxu0 %v6082_v26 }
 0x63a   : > { %10005 = vmatprep.mubr.msk.f32.mxu0 %vm2415_vm1, %v19738_v4  ;;  %v19756_v4 = vld [vmem:[#allocation240_spill] sm:$0xff] }
 0x63d   : > { %6652 = vmatmul.mubr.f32.gmra.mrb[92].mxu0 %v6083_v2 }
 0x63e   : > { %10006 = vmatprep.mubr.msk.f32.mxu0 %vm2415_vm1, %v19739_v21 }
 0x641   : > { %6657 = vmatmul.mubr.f32.gmra.mrb[94].mxu0 %v6084_v58 }
 0x642   : > { %10007 = vmatprep.mubr.msk.f32.mxu0 %vm2415_vm1, %v19740_v47  ;;  %v5833_v47 = vpop.permute.xlu0 %5832 }
 0x643   : > { %v6100_v50 = vsel %vm2415_vm1, %v19749_v5, %v5833_v47 }
 0x645   : > { %6662 = vmatmul.mubr.f32.gmra.mrb[96].mxu0 %v6085_v61 }
 0x646   : > { %10008 = vmatprep.mubr.msk.f32.mxu0 %vm2415_vm1, %v19741_v23 }
 0x649   : > { %6667 = vmatmul.mubr.f32.gmra.mrb[98].mxu0 %v6086_v19 }
 0x64a   : > { %10009 = vmatprep.mubr.msk.f32.mxu0 %vm2415_vm1, %v19742_v1 }
 0x64d   : > { %6672 = vmatmul.mubr.f32.gmra.mrb[100].mxu0 %v6087_v25 }
 0x64e   : > { %10010 = vmatprep.mubr.msk.f32.mxu0 %vm2415_vm1, %v19743_v14 }
 0x651   : > { %6677 = vmatmul.mubr.f32.gmra.mrb[102].mxu0 %v6088_v63 }
 0x652   : > { %10011 = vmatprep.mubr.msk.f32.mxu0 %vm2415_vm1, %v19744_v55  ;;  %v5835_v55 = vpop.permute.xlu1 %5834 }
 0x655   : > { %6682 = vmatmul.mubr.f32.gmra.mrb[104].mxu0 %v6089_v7 }
 0x656   : > { %10012 = vmatprep.mubr.msk.f32.mxu0 %vm2415_vm1, %v19745_v9  ;;  %v5839_v51 = vpop.permute.xlu1 %5838 }
 0x659   : > { %6687 = vmatmul.mubr.f32.gmra.mrb[106].mxu0 %v6090_v11 }
 0x65a   : > { %10013 = vmatprep.mubr.msk.f32.mxu0 %vm2415_vm1, %v19746_v32 }
 0x65d   : > { %6692 = vmatmul.mubr.f32.gmra.mrb[108].mxu0 %v6091_v33 }
 0x65e   : > { %10014 = vmatprep.mubr.msk.f32.mxu0 %vm2415_vm1, %v19747_v31  ;;  %v6101_v31 = vsel %vm2415_vm1, %v19750_v39, %v5835_v55  ;;  %v5843_v55 = vpop.permute.xlu1 %5842 }
 0x661   : > { %6697 = vmatmul.mubr.f32.gmra.mrb[110].mxu0 %v6092_v30 }
 0x662   : > { %10015 = vmatprep.mubr.msk.f32.mxu0 %vm2415_vm1, %v19748_v3  ;;  %v5837_v3 = vpop.permute.xlu0 %5836 }
 0x665   : > { %6702 = vmatmul.mubr.f32.gmra.mrb[112].mxu0 %v6093_v54 }
 0x666   : > { %10016 = vmatprep.mubr.msk.f32.mxu0 %vm2415_vm1, %v19749_v5 }
 0x669   : > { %6707 = vmatmul.mubr.f32.gmra.mrb[114].mxu0 %v6094_v8 }
 0x66a   : > { %10017 = vmatprep.mubr.msk.f32.mxu0 %vm2415_vm1, %v19750_v39 }
 0x66d   : > { %6712 = vmatmul.mubr.f32.gmra.mrb[116].mxu0 %v6095_v36 }
 0x66e   : > { %10018 = vmatprep.mubr.msk.f32.mxu0 %vm2415_vm1, %v19751_v34 }
 0x671   : > { %6717 = vmatmul.mubr.f32.gmra.mrb[118].mxu0 %v6096_v24  ;;  %v6102_v24 = vsel %vm2415_vm1, %v19751_v34, %v5837_v3 }
 0x672   : > { %10019 = vmatprep.mubr.msk.f32.mxu0 %vm2415_vm1, %v19752_v16 }
 0x674   : > { %v16212_v60 = vpop.f32.mrb[14].mxu0 }
 0x675   : > { %v6460_v43 = vpop.f32.mrb[15].mxu0  ;;  %6722 = vmatmul.mubr.f32.gmra.mrb[120].mxu0 %v6097_v22  ;;  %v7217_v17 = vrot.slane %v16212_v60, 1  ;;  %v7000_v19 = vrot.slane %v16212_v60, 7 }
 0x676   : > { %10020 = vmatprep.mubr.msk.f32.mxu0 %vm2415_vm1, %v19754_v35 }
 0x678   : > { %v6463_v59 = vpop.f32.mrb[16].mxu0 }
 0x679   : > { %v7218_v6 = vrot.slane %v6463_v59, 1  ;;  %v6465_v26 = vpop.f32.mrb[17].mxu0  ;;  %6727 = vmatmul.mubr.f32.gmra.mrb[122].mxu0 %v6098_v48  ;;  %v7001_v21 = vrot.slane %v6463_v59, 7 }
 0x67a   : > { %10021 = vmatprep.mubr.msk.f32.mxu0 %vm2415_vm1, %v19755_v27 }
 0x67b   : > { %v7431_v2 = vsel %vm5064_vm3, %v7217_v17, %v7218_v6  ;;  %v7214_v63 = vsel %vm3479_vm2, %v7000_v19, %v7001_v21 }
 0x67c   : > { %v6468_v58 = vpop.f32.mrb[18].mxu0  ;;  %v16234_v41 = vsel %vm7216_vm4, %v7431_v2, %v16212_v60  ;;  %v6103_v2 = vsel %vm2415_vm1, %v19752_v16, %v5839_v51  ;;  %v5847_v51 = vpop.permute.xlu1 %5846 }
 0x67d   : > { %v7002_v61 = vrot.slane %v6468_v58, 7  ;;  %v7219_v52 = vrot.slane %v6468_v58, 1  ;;  %v6470_v23 = vpop.f32.mrb[19].mxu0  ;;  %6732 = vmatmul.mubr.f32.gmra.mrb[124].mxu0 %v6099_v15 }
 0x67e   : > { %10022 = vmatprep.mubr.msk.f32.mxu0 %vm2415_vm1, %v19757_v12 }
 0x67f   : > { %v7430_v1 = vsel %vm5064_vm3, %v7218_v6, %v7219_v52  ;;  %v7213_v25 = vsel %vm3479_vm2, %v7001_v21, %v7002_v61 }
 0x680   : > { %v6473_v14 = vpop.f32.mrb[20].mxu0  ;;  %v7434_v28 = vsel %vm7216_vm4, %v7430_v1, %v6463_v59  ;;  %v19761_v1 = vld [vmem:[#allocation191_spill] sm:$0xff] }
 0x681   : > { %v7003_v7 = vrot.slane %v6473_v14, 7  ;;  %v7220_v62 = vrot.slane %v6473_v14, 1  ;;  %v6475_v9 = vpop.f32.mrb[21].mxu0  ;;  %6737 = vmatmul.mubr.f32.gmra.mrb[126].mxu0 %v6100_v50  ;;  %v7542_v11 = vsel %vm6999_vm5, %v7214_v63, %v7434_v28 }
 0x682   : > { %10023 = vmatprep.mubr.msk.f32.mxu0 %vm2415_vm1, %v19758_v45  ;;  %v7653_v32 = vsel %vm7649_vm6, %v7542_v11, 0.0 }
 0x683   : > { %7654 = vadd.xlane.f32.xlu1 %v7653_v32  ;;  %v7429_v33 = vsel %vm5064_vm3, %v7219_v52, %v7220_v62  ;;  %v7212_v46 = vsel %vm3479_vm2, %v7002_v61, %v7003_v7  ;;  %v19762_v32 = vld [vmem:[#allocation122_spill] sm:$0xff] }
 0x684   : > { %v6478_v30 = vpop.f32.mrb[22].mxu0  ;;  %v7435_v20 = vsel %vm7216_vm4, %v7429_v33, %v6468_v58  ;;  %v5841_v58 = vpop.permute.xlu0 %5840 }
 0x685   : > { %v7004_v54 = vrot.slane %v6478_v30, 7  ;;  %v7221_v13 = vrot.slane %v6478_v30, 1  ;;  %v6480_v5 = vpop.f32.mrb[23].mxu0  ;;  %6742 = vmatmul.mubr.f32.gmra.mrb[128].mxu0 %v6101_v31  ;;  %v7543_v8 = vsel %vm6999_vm5, %v7213_v25, %v7435_v20  ;;  %v6105_v31 = vsel %vm2415_vm1, %v19755_v27, %v5843_v55  ;;  %v5851_v55 = vpop.permute.xlu1 %5850 }
 0x686   : > { %10024 = vmatprep.mubr.msk.f32.mxu0 %vm2415_vm1, %v19759_v38  ;;  %v7656_v36 = vsel %vm7649_vm6, %v7543_v8, 0.0 }
 0x687   : > { %7657 = vadd.xlane.f32.xlu0 %v7656_v36  ;;  %v7428_v39 = vsel %vm5064_vm3, %v7220_v62, %v7221_v13  ;;  %v7211_v53 = vsel %vm3479_vm2, %v7003_v7, %v7004_v54  ;;  %v19763_v36 = vld [vmem:[#allocation194_spill] sm:$0xff] }
 0x688   : > { %v6483_v42 = vpop.f32.mrb[24].mxu0  ;;  %v7436_v22 = vsel %vm7216_vm4, %v7428_v39, %v6473_v14  ;;  %v6104_v14 = vsel %vm2415_vm1, %v19754_v35, %v5841_v58  ;;  %v5845_v3 = vpop.permute.xlu0 %5844 }
 0x689   : > { %v7005_v43 = vrot.slane %v6483_v42, 7  ;;  %v7222_v18 = vrot.slane %v6483_v42, 1  ;;  %v6485_v48 = vpop.f32.mrb[25].mxu0  ;;  %6747 = vmatmul.mubr.f32.gmra.mrb[130].mxu0 %v6102_v24  ;;  %v7544_v59 = vsel %vm6999_vm5, %v7212_v46, %v7436_v22  ;;  %v6106_v24 = vsel %vm2415_vm1, %v19757_v12, %v5845_v3 }
 0x68a   : > { %10025 = vmatprep.mubr.msk.f32.mxu0 %vm2415_vm1, %v19760_v29  ;;  %v7659_v6 = vsel %vm7649_vm6, %v7544_v59, 0.0 }
 0x68b   : > { %7660 = vadd.xlane.f32.xlu0 %v7659_v6  ;;  %v7427_v34 = vsel %vm5064_vm3, %v7221_v13, %v7222_v18  ;;  %v7210_v26 = vsel %vm3479_vm2, %v7004_v54, %v7005_v43  ;;  %v19764_v6 = vld [vmem:[#allocation235_spill] sm:$0xff] }
 0x68c   : > { %v6488_v15 = vpop.f32.mrb[26].mxu0  ;;  %v7437_v21 = vsel %vm7216_vm4, %v7427_v34, %v6478_v30  ;;  %v5849_v58 = vpop.permute.xlu0 %5848 }
 0x68d   : > { %v7006_v47 = vrot.slane %v6488_v15, 7  ;;  %v7223_v61 = vrot.slane %v6488_v15, 1  ;;  %v6490_v52 = vpop.f32.mrb[27].mxu0  ;;  %6752 = vmatmul.mubr.f32.gmra.mrb[132].mxu0 %v6103_v2  ;;  %v7545_v23 = vsel %vm6999_vm5, %v7211_v53, %v7437_v21  ;;  %v6107_v2 = vsel %vm2415_vm1, %v19758_v45, %v5847_v51  ;;  %v5855_v51 = vpop.permute.xlu1 %5854 }
 0x68e   : > { %10026 = vmatprep.mubr.msk.f32.mxu0 %vm2415_vm1, %v19761_v1  ;;  %v7662_v25 = vsel %vm7649_vm6, %v7545_v23, 0.0 }
 0x68f   : > { %7663 = vadd.xlane.f32.xlu1 %v7662_v25  ;;  %v7426_v16 = vsel %vm5064_vm3, %v7222_v18, %v7223_v61  ;;  %v7209_v50 = vsel %vm3479_vm2, %v7005_v43, %v7006_v47  ;;  %v19765_v25 = vld [vmem:[#allocation197_spill] sm:$0xff] }
 0x690   : > { %v6493_v63 = vpop.f32.mrb[28].mxu0  ;;  %v7438_v28 = vsel %vm7216_vm4, %v7426_v16, %v6483_v42  ;;  %v5853_v3 = vpop.permute.xlu0 %5852 }
 0x691   : > { %v7007_v7 = vrot.slane %v6493_v63, 7  ;;  %v7224_v62 = vrot.slane %v6493_v63, 1  ;;  %v6495_v9 = vpop.f32.mrb[29].mxu0  ;;  %6757 = vmatmul.mubr.f32.gmra.mrb[134].mxu0 %v6104_v14  ;;  %v7546_v11 = vsel %vm6999_vm5, %v7210_v26, %v7438_v28  ;;  %v6108_v14 = vsel %vm2415_vm1, %v19759_v38, %v5849_v58 }
 0x692   : > { %10027 = vmatprep.mubr.msk.f32.mxu0 %vm2415_vm1, %v19762_v32  ;;  %v7665_v33 = vsel %vm7649_vm6, %v7546_v11, 0.0 }
 0x693   : > { %7666 = vadd.xlane.f32.xlu0 %v7665_v33  ;;  %v7425_v35 = vsel %vm5064_vm3, %v7223_v61, %v7224_v62  ;;  %v7208_v46 = vsel %vm3479_vm2, %v7006_v47, %v7007_v7  ;;  %v19766_v33 = vld [vmem:[#allocation126_spill] sm:$0xff] }
 0x694   : > { %v6498_v30 = vpop.f32.mrb[30].mxu0  ;;  %v7439_v20 = vsel %vm7216_vm4, %v7425_v35, %v6488_v15  ;;  %v5857_v58 = vpop.permute.xlu0 %5856 }
 0x695   : > { %v7008_v54 = vrot.slane %v6498_v30, 7  ;;  %v7225_v13 = vrot.slane %v6498_v30, 1  ;;  %v6500_v5 = vpop.f32.mrb[31].mxu0  ;;  %6762 = vmatmul.mubr.f32.gmra.mrb[136].mxu0 %v6105_v31  ;;  %v7547_v8 = vsel %vm6999_vm5, %v7209_v50, %v7439_v20  ;;  %v6109_v31 = vsel %vm2415_vm1, %v19760_v29, %v5851_v55  ;;  %v5859_v55 = vpop.permute.xlu1 %5858 }
 0x696   : > { %10028 = vmatprep.mubr.msk.f32.mxu0 %vm2415_vm1, %v19763_v36  ;;  %v7668_v39 = vsel %vm7649_vm6, %v7547_v8, 0.0 }
 0x697   : > { %7669 = vadd.xlane.f32.xlu1 %v7668_v39  ;;  %v7424_v27 = vsel %vm5064_vm3, %v7224_v62, %v7225_v13  ;;  %v7207_v53 = vsel %vm3479_vm2, %v7007_v7, %v7008_v54  ;;  %v19767_v39 = vld [vmem:[#allocation200_spill] sm:$0xff] }
 0x698   : > { %v6503_v42 = vpop.f32.mrb[32].mxu0  ;;  %v7440_v22 = vsel %vm7216_vm4, %v7424_v27, %v6493_v63 }
 0x699   : > { %v7009_v43 = vrot.slane %v6503_v42, 7  ;;  %v7226_v18 = vrot.slane %v6503_v42, 1  ;;  %v6505_v48 = vpop.f32.mrb[33].mxu0  ;;  %6767 = vmatmul.mubr.f32.gmra.mrb[138].mxu0 %v6106_v24  ;;  %v7548_v59 = vsel %vm6999_vm5, %v7208_v46, %v7440_v22  ;;  %v6110_v24 = vsel %vm2415_vm1, %v19761_v1, %v5853_v3  ;;  %v5861_v3 = vpop.permute.xlu0 %5860 }
 0x69a   : > { %10029 = vmatprep.mubr.msk.f32.mxu0 %vm2415_vm1, %v19764_v6  ;;  %v7671_v34 = vsel %vm7649_vm6, %v7548_v59, 0.0 }
 0x69b   : > { %7672 = vadd.xlane.f32.xlu0 %v7671_v34  ;;  %v7423_v12 = vsel %vm5064_vm3, %v7225_v13, %v7226_v18  ;;  %v7206_v26 = vsel %vm3479_vm2, %v7008_v54, %v7009_v43  ;;  %v19768_v34 = vld [vmem:[#allocation236_spill] sm:$0xff] }
 0x69c   : > { %v6508_v15 = vpop.f32.mrb[34].mxu0  ;;  %v7441_v21 = vsel %vm7216_vm4, %v7423_v12, %v6498_v30 }
 0x69d   : > { %v7010_v47 = vrot.slane %v6508_v15, 7  ;;  %v7227_v61 = vrot.slane %v6508_v15, 1  ;;  %v6510_v52 = vpop.f32.mrb[35].mxu0  ;;  %6772 = vmatmul.mubr.f32.gmra.mrb[140].mxu0 %v6107_v2  ;;  %v7549_v23 = vsel %vm6999_vm5, %v7207_v53, %v7441_v21  ;;  %v6111_v2 = vsel %vm2415_vm1, %v19762_v32, %v5855_v51  ;;  %v5863_v51 = vpop.permute.xlu1 %5862 }
 0x69e   : > { %10030 = vmatprep.mubr.msk.f32.mxu0 %vm2415_vm1, %v19765_v25  ;;  %v7674_v16 = vsel %vm7649_vm6, %v7549_v23, 0.0 }
 0x69f   : > { %7675 = vadd.xlane.f32.xlu1 %v7674_v16  ;;  %v7422_v45 = vsel %vm5064_vm3, %v7226_v18, %v7227_v61  ;;  %v7205_v50 = vsel %vm3479_vm2, %v7009_v43, %v7010_v47  ;;  %v19769_v16 = vld [vmem:[#allocation203_spill] sm:$0xff] }
 0x6a0   : > { %v6513_v63 = vpop.f32.mrb[36].mxu0  ;;  %v7442_v28 = vsel %vm7216_vm4, %v7422_v45, %v6503_v42 }
 0x6a1   : > { %v7011_v7 = vrot.slane %v6513_v63, 7  ;;  %v7228_v62 = vrot.slane %v6513_v63, 1  ;;  %v6515_v9 = vpop.f32.mrb[37].mxu0  ;;  %6777 = vmatmul.mubr.f32.gmra.mrb[142].mxu0 %v6108_v14  ;;  %v7550_v11 = vsel %vm6999_vm5, %v7206_v26, %v7442_v28  ;;  %v6112_v14 = vsel %vm2415_vm1, %v19763_v36, %v5857_v58  ;;  %v5865_v58 = vpop.permute.xlu0 %5864 }
 0x6a2   : > { %10031 = vmatprep.mubr.msk.f32.mxu0 %vm2415_vm1, %v19766_v33  ;;  %v7677_v35 = vsel %vm7649_vm6, %v7550_v11, 0.0 }
 0x6a3   : > { %7678 = vadd.xlane.f32.xlu0 %v7677_v35  ;;  %v7421_v38 = vsel %vm5064_vm3, %v7227_v61, %v7228_v62  ;;  %v7204_v46 = vsel %vm3479_vm2, %v7010_v47, %v7011_v7  ;;  %v19770_v35 = vld [vmem:[#allocation131_spill] sm:$0xff] }
 0x6a4   : > { %v6518_v30 = vpop.f32.mrb[38].mxu0  ;;  %v7443_v20 = vsel %vm7216_vm4, %v7421_v38, %v6508_v15 }
 0x6a5   : > { %v7012_v54 = vrot.slane %v6518_v30, 7  ;;  %v7229_v13 = vrot.slane %v6518_v30, 1  ;;  %v6520_v5 = vpop.f32.mrb[39].mxu0  ;;  %6782 = vmatmul.mubr.f32.gmra.mrb[144].mxu0 %v6109_v31  ;;  %v7551_v8 = vsel %vm6999_vm5, %v7205_v50, %v7443_v20  ;;  %v6113_v31 = vsel %vm2415_vm1, %v19764_v6, %v5859_v55  ;;  %v5867_v55 = vpop.permute.xlu1 %5866 }
 0x6a6   : > { %10032 = vmatprep.mubr.msk.f32.mxu0 %vm2415_vm1, %v19767_v39  ;;  %v7680_v27 = vsel %vm7649_vm6, %v7551_v8, 0.0 }
 0x6a7   : > { %7681 = vadd.xlane.f32.xlu1 %v7680_v27  ;;  %v7420_v29 = vsel %vm5064_vm3, %v7228_v62, %v7229_v13  ;;  %v7203_v53 = vsel %vm3479_vm2, %v7011_v7, %v7012_v54  ;;  %v19771_v27 = vld [vmem:[#allocation206_spill] sm:$0xff] }
 0x6a8   : > { %v6523_v42 = vpop.f32.mrb[40].mxu0  ;;  %v7444_v22 = vsel %vm7216_vm4, %v7420_v29, %v6513_v63 }
 0x6a9   : > { %v7013_v43 = vrot.slane %v6523_v42, 7  ;;  %v7230_v18 = vrot.slane %v6523_v42, 1  ;;  %v6525_v48 = vpop.f32.mrb[41].mxu0  ;;  %6787 = vmatmul.mubr.f32.gmra.mrb[146].mxu0 %v6110_v24  ;;  %v7552_v59 = vsel %vm6999_vm5, %v7204_v46, %v7444_v22  ;;  %v6114_v24 = vsel %vm2415_vm1, %v19765_v25, %v5861_v3  ;;  %v5869_v3 = vpop.permute.xlu0 %5868 }
 0x6aa   : > { %10033 = vmatprep.mubr.msk.f32.mxu0 %vm2415_vm1, %v19768_v34  ;;  %v7683_v12 = vsel %vm7649_vm6, %v7552_v59, 0.0 }
 0x6ab   : > { %7684 = vadd.xlane.f32.xlu0 %v7683_v12  ;;  %v7419_v1 = vsel %vm5064_vm3, %v7229_v13, %v7230_v18  ;;  %v7202_v26 = vsel %vm3479_vm2, %v7012_v54, %v7013_v43  ;;  %v19772_v12 = vld [vmem:[#allocation238_spill] sm:$0xff] }
 0x6ac   : > { %v6528_v15 = vpop.f32.mrb[42].mxu0  ;;  %v7445_v21 = vsel %vm7216_vm4, %v7419_v1, %v6518_v30 }
 0x6ad   : > { %v7014_v47 = vrot.slane %v6528_v15, 7  ;;  %v7231_v61 = vrot.slane %v6528_v15, 1  ;;  %v6530_v52 = vpop.f32.mrb[43].mxu0  ;;  %6792 = vmatmul.mubr.f32.gmra.mrb[148].mxu0 %v6111_v2  ;;  %v7553_v23 = vsel %vm6999_vm5, %v7203_v53, %v7445_v21  ;;  %v6115_v2 = vsel %vm2415_vm1, %v19766_v33, %v5863_v51  ;;  %v5871_v51 = vpop.permute.xlu1 %5870 }
 0x6ae   : > { %10034 = vmatprep.mubr.msk.f32.mxu0 %vm2415_vm1, %v19769_v16  ;;  %v7686_v45 = vsel %vm7649_vm6, %v7553_v23, 0.0 }
 0x6af   : > { %7687 = vadd.xlane.f32.xlu1 %v7686_v45  ;;  %v7418_v32 = vsel %vm5064_vm3, %v7230_v18, %v7231_v61  ;;  %v7201_v50 = vsel %vm3479_vm2, %v7013_v43, %v7014_v47  ;;  %v19773_v45 = vld [vmem:[#allocation208_spill] sm:$0xff] }
 0x6b0   : > { %v6533_v63 = vpop.f32.mrb[44].mxu0  ;;  %v7446_v28 = vsel %vm7216_vm4, %v7418_v32, %v6523_v42 }
 0x6b1   : > { %v7015_v7 = vrot.slane %v6533_v63, 7  ;;  %v7232_v62 = vrot.slane %v6533_v63, 1  ;;  %v6535_v9 = vpop.f32.mrb[45].mxu0  ;;  %6797 = vmatmul.mubr.f32.gmra.mrb[150].mxu0 %v6112_v14  ;;  %v7554_v11 = vsel %vm6999_vm5, %v7202_v26, %v7446_v28  ;;  %v6116_v14 = vsel %vm2415_vm1, %v19767_v39, %v5865_v58  ;;  %v5873_v58 = vpop.permute.xlu0 %5872 }
 0x6b2   : > { %10035 = vmatprep.mubr.msk.f32.mxu0 %vm2415_vm1, %v19770_v35  ;;  %v7689_v38 = vsel %vm7649_vm6, %v7554_v11, 0.0 }
 0x6b3   : > { %7690 = vadd.xlane.f32.xlu0 %v7689_v38  ;;  %v7417_v36 = vsel %vm5064_vm3, %v7231_v61, %v7232_v62  ;;  %v7200_v46 = vsel %vm3479_vm2, %v7014_v47, %v7015_v7  ;;  %v19774_v38 = vld [vmem:[#allocation70_spill] sm:$0xff] }
 0x6b4   : > { %v6538_v30 = vpop.f32.mrb[46].mxu0  ;;  %v7447_v20 = vsel %vm7216_vm4, %v7417_v36, %v6528_v15 }
 0x6b5   : > { %v7016_v54 = vrot.slane %v6538_v30, 7  ;;  %v7233_v13 = vrot.slane %v6538_v30, 1  ;;  %v6540_v5 = vpop.f32.mrb[47].mxu0  ;;  %6802 = vmatmul.mubr.f32.gmra.mrb[152].mxu0 %v6113_v31  ;;  %v7555_v8 = vsel %vm6999_vm5, %v7201_v50, %v7447_v20  ;;  %v6117_v31 = vsel %vm2415_vm1, %v19768_v34, %v5867_v55  ;;  %v5875_v55 = vpop.permute.xlu1 %5874 }
 0x6b6   : > { %10036 = vmatprep.mubr.msk.f32.mxu0 %vm2415_vm1, %v19771_v27  ;;  %v7692_v29 = vsel %vm7649_vm6, %v7555_v8, 0.0 }
 0x6b7   : > { %7693 = vadd.xlane.f32.xlu1 %v7692_v29  ;;  %v7416_v6 = vsel %vm5064_vm3, %v7232_v62, %v7233_v13  ;;  %v7199_v53 = vsel %vm3479_vm2, %v7015_v7, %v7016_v54  ;;  %v19775_v29 = vld [vmem:[#allocation211_spill] sm:$0xff] }
 0x6b8   : > { %v6543_v42 = vpop.f32.mrb[48].mxu0  ;;  %v7448_v22 = vsel %vm7216_vm4, %v7416_v6, %v6533_v63 }
 0x6b9   : > { %v7017_v43 = vrot.slane %v6543_v42, 7  ;;  %v7234_v18 = vrot.slane %v6543_v42, 1  ;;  %v6545_v48 = vpop.f32.mrb[49].mxu0  ;;  %6807 = vmatmul.mubr.f32.gmra.mrb[154].mxu0 %v6114_v24  ;;  %v7556_v59 = vsel %vm6999_vm5, %v7200_v46, %v7448_v22  ;;  %v6118_v24 = vsel %vm2415_vm1, %v19769_v16, %v5869_v3  ;;  %v5877_v3 = vpop.permute.xlu0 %5876 }
 0x6ba   : > { %10037 = vmatprep.mubr.msk.f32.mxu0 %vm2415_vm1, %v19772_v12  ;;  %v7695_v1 = vsel %vm7649_vm6, %v7556_v59, 0.0 }
 0x6bb   : > { %7696 = vadd.xlane.f32.xlu0 %v7695_v1  ;;  %v7415_v25 = vsel %vm5064_vm3, %v7233_v13, %v7234_v18  ;;  %v7198_v26 = vsel %vm3479_vm2, %v7016_v54, %v7017_v43  ;;  %v19776_v1 = vld [vmem:[#allocation76_spill] sm:$0xff] }
 0x6bc   : > { %v6548_v15 = vpop.f32.mrb[50].mxu0  ;;  %v7449_v21 = vsel %vm7216_vm4, %v7415_v25, %v6538_v30 }
 0x6bd   : > { %v7018_v47 = vrot.slane %v6548_v15, 7  ;;  %v7235_v61 = vrot.slane %v6548_v15, 1  ;;  %v6550_v52 = vpop.f32.mrb[51].mxu0  ;;  %6812 = vmatmul.mubr.f32.gmra.mrb[156].mxu0 %v6115_v2  ;;  %v7557_v23 = vsel %vm6999_vm5, %v7199_v53, %v7449_v21  ;;  %v6119_v2 = vsel %vm2415_vm1, %v19770_v35, %v5871_v51 }
 0x6be   : > { %10038 = vmatprep.mubr.msk.f32.mxu0 %vm2415_vm1, %v19773_v45  ;;  %v7698_v32 = vsel %vm7649_vm6, %v7557_v23, 0.0 }
 0x6bf   : > { %7699 = vadd.xlane.f32.xlu1 %v7698_v32  ;;  %v7414_v33 = vsel %vm5064_vm3, %v7234_v18, %v7235_v61  ;;  %v7197_v50 = vsel %vm3479_vm2, %v7017_v43, %v7018_v47  ;;  %v19777_v32 = vld [vmem:[#allocation213_spill] sm:$0xff] }
 0x6c0   : > { %v6553_v63 = vpop.f32.mrb[52].mxu0  ;;  %v7450_v28 = vsel %vm7216_vm4, %v7414_v33, %v6543_v42 }
 0x6c1   : > { %v7019_v7 = vrot.slane %v6553_v63, 7  ;;  %v7236_v62 = vrot.slane %v6553_v63, 1  ;;  %v6555_v9 = vpop.f32.mrb[53].mxu0  ;;  %6817 = vmatmul.mubr.f32.gmra.mrb[158].mxu0 %v6116_v14  ;;  %v7558_v11 = vsel %vm6999_vm5, %v7198_v26, %v7450_v28  ;;  %v6120_v14 = vsel %vm2415_vm1, %v19771_v27, %v5873_v58 }
 0x6c2   : > { %10039 = vmatprep.mubr.msk.f32.mxu0 %vm2415_vm1, %v19774_v38  ;;  %v7701_v36 = vsel %vm7649_vm6, %v7558_v11, 0.0 }
 0x6c3   : > { %7702 = vadd.xlane.f32.xlu0 %v7701_v36  ;;  %v7413_v39 = vsel %vm5064_vm3, %v7235_v61, %v7236_v62  ;;  %v7196_v46 = vsel %vm3479_vm2, %v7018_v47, %v7019_v7  ;;  %v19778_v36 = vld [vmem:[#allocation75_spill] sm:$0xff] }
 0x6c4   : > { %v6558_v30 = vpop.f32.mrb[54].mxu0  ;;  %v7451_v20 = vsel %vm7216_vm4, %v7413_v39, %v6548_v15 }
 0x6c5   : > { %v7020_v54 = vrot.slane %v6558_v30, 7  ;;  %v7237_v13 = vrot.slane %v6558_v30, 1  ;;  %v6560_v5 = vpop.f32.mrb[55].mxu0  ;;  %6822 = vmatmul.mubr.f32.gmra.mrb[160].mxu0 %v6117_v31  ;;  %v7559_v8 = vsel %vm6999_vm5, %v7197_v50, %v7451_v20  ;;  %v6121_v31 = vsel %vm2415_vm1, %v19772_v12, %v5875_v55 }
 0x6c6   : > { %10040 = vmatprep.mubr.msk.f32.mxu0 %vm2415_vm1, %v19775_v29  ;;  %v7704_v6 = vsel %vm7649_vm6, %v7559_v8, 0.0 }
 0x6c7   : > { %7705 = vadd.xlane.f32.xlu1 %v7704_v6  ;;  %v7412_v34 = vsel %vm5064_vm3, %v7236_v62, %v7237_v13  ;;  %v7195_v53 = vsel %vm3479_vm2, %v7019_v7, %v7020_v54  ;;  %v19779_v6 = vld [vmem:[#allocation215_spill] sm:$0xff] }
 0x6c8   : > { %v6563_v42 = vpop.f32.mrb[56].mxu0  ;;  %v7452_v22 = vsel %vm7216_vm4, %v7412_v34, %v6553_v63 }
 0x6c9   : > { %v7021_v43 = vrot.slane %v6563_v42, 7  ;;  %v7238_v18 = vrot.slane %v6563_v42, 1  ;;  %v6565_v48 = vpop.f32.mrb[57].mxu0  ;;  %6827 = vmatmul.mubr.f32.gmra.mrb[162].mxu0 %v6118_v24  ;;  %v7560_v59 = vsel %vm6999_vm5, %v7196_v46, %v7452_v22  ;;  %v6122_v24 = vsel %vm2415_vm1, %v19773_v45, %v5877_v3 }
 0x6ca   : > { %10041 = vmatprep.mubr.msk.f32.mxu0 %vm2415_vm1, %v19776_v1  ;;  %v7707_v25 = vsel %vm7649_vm6, %v7560_v59, 0.0 }
 0x6cb   : > { %7708 = vadd.xlane.f32.xlu0 %v7707_v25  ;;  %v7411_v16 = vsel %vm5064_vm3, %v7237_v13, %v7238_v18  ;;  %v7194_v26 = vsel %vm3479_vm2, %v7020_v54, %v7021_v43  ;;  %v19780_v25 = vld [vmem:[#allocation80_spill] sm:$0xff] }
 0x6cc   : > { %v6568_v15 = vpop.f32.mrb[58].mxu0  ;;  %v7453_v21 = vsel %vm7216_vm4, %v7411_v16, %v6558_v30 }
 0x6cd   : > { %v7022_v47 = vrot.slane %v6568_v15, 7  ;;  %v7239_v61 = vrot.slane %v6568_v15, 1  ;;  %v6570_v52 = vpop.f32.mrb[59].mxu0  ;;  %6832 = vmatmul.mubr.f32.gmra.mrb[164].mxu0 %v6119_v2  ;;  %v7561_v23 = vsel %vm6999_vm5, %v7195_v53, %v7453_v21 }
 0x6ce   : > { %10042 = vmatprep.mubr.msk.f32.mxu0 %vm2415_vm1, %v19777_v32  ;;  %v7710_v33 = vsel %vm7649_vm6, %v7561_v23, 0.0 }
 0x6cf   : > { %7711 = vadd.xlane.f32.xlu1 %v7710_v33  ;;  %v7410_v35 = vsel %vm5064_vm3, %v7238_v18, %v7239_v61  ;;  %v7193_v50 = vsel %vm3479_vm2, %v7021_v43, %v7022_v47 }
 0x6d0   : > { %v6573_v63 = vpop.f32.mrb[60].mxu0  ;;  %v7454_v28 = vsel %vm7216_vm4, %v7410_v35, %v6563_v42  ;;  %v5879_v42 = vpop.permute.xlu1 %5878  ;;  %v19781_v35 = vld [vmem:[#allocation217_spill] sm:$0xff] }
 0x6d1   : > { %v7023_v7 = vrot.slane %v6573_v63, 7  ;;  %v7240_v62 = vrot.slane %v6573_v63, 1  ;;  %v6575_v9 = vpop.f32.mrb[61].mxu0  ;;  %6837 = vmatmul.mubr.f32.gmra.mrb[166].mxu0 %v6120_v14  ;;  %v7562_v11 = vsel %vm6999_vm5, %v7194_v26, %v7454_v28  ;;  %v6123_v2 = vsel %vm2415_vm1, %v19774_v38, %v5879_v42 }
 0x6d2   : > { %10043 = vmatprep.mubr.msk.f32.mxu0 %vm2415_vm1, %v19778_v36  ;;  %v7713_v39 = vsel %vm7649_vm6, %v7562_v11, 0.0 }
 0x6d3   : > { %7714 = vadd.xlane.f32.xlu0 %v7713_v39  ;;  %v7409_v27 = vsel %vm5064_vm3, %v7239_v61, %v7240_v62  ;;  %v7192_v46 = vsel %vm3479_vm2, %v7022_v47, %v7023_v7  ;;  %v5881_v47 = vpop.permute.xlu0 %5880 }
 0x6d4   : > { %v6578_v30 = vpop.f32.mrb[62].mxu0  ;;  %v7455_v20 = vsel %vm7216_vm4, %v7409_v27, %v6568_v15  ;;  %v5883_v15 = vpop.permute.xlu1 %5882  ;;  %v19782_v27 = vld [vmem:[#allocation79_spill] sm:$0xff] }
 0x6d5   : > { %v7024_v54 = vrot.slane %v6578_v30, 7  ;;  %v7241_v13 = vrot.slane %v6578_v30, 1  ;;  %v6580_v5 = vpop.f32.mrb[63].mxu0  ;;  %6842 = vmatmul.mubr.f32.gmra.mrb[168].mxu0 %v6121_v31  ;;  %v7563_v8 = vsel %vm6999_vm5, %v7193_v50, %v7455_v20 }
 0x6d6   : > { %10044 = vmatprep.mubr.msk.f32.mxu0 %vm2415_vm1, %v19779_v6  ;;  %v7716_v34 = vsel %vm7649_vm6, %v7563_v8, 0.0 }
 0x6d7   : > { %7717 = vadd.xlane.f32.xlu1 %v7716_v34  ;;  %v7408_v12 = vsel %vm5064_vm3, %v7240_v62, %v7241_v13  ;;  %v7191_v53 = vsel %vm3479_vm2, %v7023_v7, %v7024_v54 }
 0x6d8   : > { %v6583_v22 = vpop.f32.mrb[64].mxu0  ;;  %v7456_v51 = vsel %vm7216_vm4, %v7408_v12, %v6573_v63  ;;  %v6124_v63 = vsel %vm2415_vm1, %v19775_v29, %v5881_v47  ;;  %v5887_v28 = vpop.permute.xlu1 %5886 }
 0x6d9   : > { %v7025_v43 = vrot.slane %v6583_v22, 7  ;;  %v7242_v18 = vrot.slane %v6583_v22, 1  ;;  %v6585_v48 = vpop.f32.mrb[65].mxu0  ;;  %6847 = vmatmul.mubr.f32.gmra.mrb[170].mxu0 %v6122_v24  ;;  %v7564_v59 = vsel %vm6999_vm5, %v7192_v46, %v7456_v51 }
 0x6da   : > { %10045 = vmatprep.mubr.msk.f32.mxu0 %vm2415_vm1, %v19780_v25  ;;  %v7719_v16 = vsel %vm7649_vm6, %v7564_v59, 0.0 }
 0x6db   : > { %7720 = vadd.xlane.f32.xlu0 %v7719_v16  ;;  %v7407_v45 = vsel %vm5064_vm3, %v7241_v13, %v7242_v18  ;;  %v7190_v26 = vsel %vm3479_vm2, %v7024_v54, %v7025_v43  ;;  %v5885_v13 = vpop.permute.xlu0 %5884 }
 0x6dc   : > { %v6588_v21 = vpop.f32.mrb[66].mxu0  ;;  %v7457_v58 = vsel %vm7216_vm4, %v7407_v45, %v6578_v30  ;;  %v6125_v30 = vsel %vm2415_vm1, %v19776_v1, %v5883_v15  ;;  %v5891_v20 = vpop.permute.xlu1 %5890 }
 0x6dd   : > { %v7026_v61 = vrot.slane %v6588_v21, 7  ;;  %v7243_v52 = vrot.slane %v6588_v21, 1  ;;  %v6590_v23 = vpop.f32.mrb[67].mxu0  ;;  %6852 = vmatmul.mubr.f32.gmra.mrb[172].mxu0 %v6123_v2  ;;  %v7565_v33 = vsel %vm6999_vm5, %v7191_v53, %v7457_v58  ;;  %v19783_v53 = vld [vmem:[#allocation27_spill] sm:$0xff]  ;;  %v19784_v2 = vld [vmem:[#allocation85_spill] sm:$0xff]  ;;  %v6127_v58 = vsel %vm2415_vm1, %v19778_v36, %v5887_v28 }
 0x6de   : > { %10046 = vmatprep.mubr.msk.f32.mxu0 %vm2415_vm1, %v19781_v35  ;;  %v7722_v50 = vsel %vm7649_vm6, %v7565_v33, 0.0 }
 0x6df   : > { %7723 = vadd.xlane.f32.xlu1 %v7722_v50  ;;  %v7406_v38 = vsel %vm5064_vm3, %v7242_v18, %v7243_v52  ;;  %v7189_v14 = vsel %vm3479_vm2, %v7025_v43, %v7026_v61  ;;  %v5889_v48 = vpop.permute.xlu0 %5888 }
 0x6e0   : > { %v6593_v55 = vpop.f32.mrb[68].mxu0  ;;  %v7458_v7 = vsel %vm7216_vm4, %v7406_v38, %v6583_v22  ;;  %v6126_v22 = vsel %vm2415_vm1, %v19777_v32, %v5885_v13  ;;  %v16588_v51 = vpop.permute.xlu1 %5894 }
 0x6e1   : > { %v7027_v62 = vrot.slane %v6593_v55, 7  ;;  %v7244_v9 = vrot.slane %v6593_v55, 1  ;;  %v6595_v11 = vpop.f32.mrb[69].mxu0  ;;  %6857 = vmatmul.mubr.f32.gmra.mrb[174].mxu0 %v6124_v63  ;;  %v7566_v39 = vsel %vm6999_vm5, %v7190_v26, %v7458_v7  ;;  %v19785_v63 = vld [vmem:[#allocation26_spill] sm:$0xff]  ;;  %v6128_v7 = vsel %vm2415_vm1, %v19779_v6, %v5889_v48 }
 0x6e2   : > { %10047 = vmatprep.mubr.msk.f32.mxu0 %vm2415_vm1, %v19782_v27  ;;  %v7725_v46 = vsel %vm7649_vm6, %v7566_v39, 0.0 }
 0x6e3   : > { %7726 = vadd.xlane.f32.xlu0 %v7725_v46  ;;  %v7405_v29 = vsel %vm5064_vm3, %v7243_v52, %v7244_v9  ;;  %v7188_v31 = vsel %vm3479_vm2, %v7026_v61, %v7027_v62  ;;  %v5893_v23 = vpop.permute.xlu0 %5892 }
 0x6e4   : > { %v6598_v3 = vpop.f32.mrb[70].mxu0  ;;  %v7459_v54 = vsel %vm7216_vm4, %v7405_v29, %v6588_v21  ;;  %v16603_v47 = vpop.permute.xlu1 %5898 }
 0x6e5   : > { %v7028_v5 = vrot.slane %v6598_v3, 7  ;;  %v7245_v8 = vrot.slane %v6598_v3, 1  ;;  %v6600_v34 = vpop.f32.mrb[71].mxu0  ;;  %6862 = vmatmul.mubr.f32.gmra.mrb[176].mxu0 %v6125_v30  ;;  %v7567_v12 = vsel %vm6999_vm5, %v7189_v14, %v7459_v54 }
 0x6e6   : > { %10048 = vmatprep.mubr.msk.f32.mxu0 %vm2415_vm1, %v19783_v53  ;;  %v7728_v24 = vsel %vm7649_vm6, %v7567_v12, 0.0 }
 0x6e7   : > { %7729 = vadd.xlane.f32.xlu1 %v7728_v24  ;;  %v7404_v1 = vsel %vm5064_vm3, %v7244_v9, %v7245_v8  ;;  %v7187_v42 = vsel %vm3479_vm2, %v7027_v62, %v7028_v5  ;;  %v5897_v39 = vpop.permute.xlu0 %5896 }
 0x6e8   : > { %v6603_v43 = vpop.f32.mrb[72].mxu0  ;;  %v7460_v18 = vsel %vm7216_vm4, %v7404_v1, %v6593_v55  ;;  %v16618_v62 = vpop.permute.xlu1 %5902 }
 0x6e9   : > { %v7029_v59 = vrot.slane %v6603_v43, 7  ;;  %v7246_v16 = vrot.slane %v6603_v43, 1  ;;  %v6605_v45 = vpop.f32.mrb[73].mxu0  ;;  %6867 = vmatmul.mubr.f32.gmra.mrb[178].mxu0 %v6126_v22  ;;  %v7568_v26 = vsel %vm6999_vm5, %v7188_v31, %v7460_v18  ;;  %v19787_v18 = vld [vmem:[#allocation89_spill] sm:$0xff] }
 0x6ea   : > { %10049 = vmatprep.mubr.msk.f32.mxu0 %vm2415_vm1, %v19784_v2  ;;  %v7731_v15 = vsel %vm7649_vm6, %v7568_v26, 0.0 }
 0x6eb   : > { %7732 = vadd.xlane.f32.xlu0 %v7731_v15  ;;  %v7403_v32 = vsel %vm5064_vm3, %v7245_v8, %v7246_v16  ;;  %v7186_v21 = vsel %vm3479_vm2, %v7028_v5, %v7029_v59  ;;  %v6129_v5 = vsel %vm2415_vm1, %v19780_v25, %v5891_v20  ;;  %v16637_v24 = vpop.permute.xlu0 %5900 }
 0x6ec   : > { %v6608_v61 = vpop.f32.mrb[74].mxu0  ;;  %v7461_v52 = vsel %vm7216_vm4, %v7403_v32, %v6598_v3  ;;  %v19786_v3 = vld [vmem:[#allocation84_spill] sm:$0xff]  ;;  %v16633_v8 = vpop.permute.xlu1 %5906 }
 0x6ed   : > { %v7030_v33 = vrot.slane %v6608_v61, 7  ;;  %v7247_v50 = vrot.slane %v6608_v61, 1  ;;  %v6610_v38 = vpop.f32.mrb[75].mxu0  ;;  %6872 = vmatmul.mubr.f32.gmra.mrb[180].mxu0 %v6127_v58  ;;  %v7569_v14 = vsel %vm6999_vm5, %v7187_v42, %v7461_v52  ;;  %v19788_v52 = vld [vmem:[#allocation30_spill] sm:$0xff] }
 0x6ee   : > { %10050 = vmatprep.mubr.msk.f32.mxu0 %vm2415_vm1, %v19785_v63  ;;  %v7734_v55 = vsel %vm7649_vm6, %v7569_v14, 0.0 }
 0x6ef   : > { %7735 = vadd.xlane.f32.xlu1 %v7734_v55  ;;  %v7402_v36 = vsel %vm5064_vm3, %v7246_v16, %v7247_v50  ;;  %v7185_v28 = vsel %vm3479_vm2, %v7029_v59, %v7030_v33  ;;  %v6130_v59 = vsel %vm2415_vm1, %v19781_v35, %v5893_v23  ;;  %v16654_v15 = vpop.permute.xlu0 %5904 }
 0x6f0   : > { %v6613_v9 = vpop.f32.mrb[76].mxu0  ;;  %v7462_v11 = vsel %vm7216_vm4, %v7402_v36, %v6603_v43  ;;  %v16650_v16 = vpop.permute.xlu1 %5910 }
 0x6f1   : > { %v7031_v46 = vrot.slane %v6613_v9, 7  ;;  %v7248_v29 = vrot.slane %v6613_v9, 1  ;;  %v6615_v31 = vpop.f32.mrb[77].mxu0  ;;  %6877 = vmatmul.mubr.f32.gmra.mrb[182].mxu0 %v6128_v7  ;;  %v7570_v30 = vsel %vm6999_vm5, %v7186_v21, %v7462_v11 }
 0x6f2   : > { %10051 = vmatprep.mubr.msk.f32.mxu0 %vm2415_vm1, %v19786_v3  ;;  %v7737_v54 = vsel %vm7649_vm6, %v7570_v30, 0.0  ;;  %v6132_v31 = vsel %vm2415_vm1, %v19783_v53, %v5897_v39 }
 0x6f3   : > { %7738 = vadd.xlane.f32.xlu0 %v7737_v54  ;;  %v7401_v6 = vsel %vm5064_vm3, %v7247_v50, %v7248_v29  ;;  %v7184_v13 = vsel %vm3479_vm2, %v7030_v33, %v7031_v46  ;;  %v6131_v50 = vsel %vm2415_vm1, %v19782_v27, %v16588_v51  ;;  %v16672_v36 = vpop.permute.xlu0 %5908 }
 0x6f4   : > { %v6618_v34 = vpop.f32.mrb[78].mxu0  ;;  %v7463_v12 = vsel %vm7216_vm4, %v7401_v6, %v6608_v61  ;;  %v16668_v38 = vpop.permute.xlu1 %5914 }
 0x6f5   : > { %v7032_v1 = vrot.slane %v6618_v34, 7  ;;  %v7249_v42 = vrot.slane %v6618_v34, 1  ;;  %v6620_v22 = vpop.f32.mrb[79].mxu0  ;;  %6882 = vmatmul.mubr.f32.gmra.mrb[184].mxu0 %v6129_v5  ;;  %v7571_v43 = vsel %vm6999_vm5, %v7185_v28, %v7463_v12 }
 0x6f6   : > { %10052 = vmatprep.mubr.msk.f32.mxu0 %vm2415_vm1, %v19787_v18  ;;  %v7740_v25 = vsel %vm7649_vm6, %v7571_v43, 0.0  ;;  %v6133_v43 = vsel %vm2415_vm1, %v19784_v2, %v16603_v47 }
 0x6f7   : > { %7741 = vadd.xlane.f32.xlu1 %v7740_v25  ;;  %v7400_v20 = vsel %vm5064_vm3, %v7248_v29, %v7249_v42  ;;  %v7183_v48 = vsel %vm3479_vm2, %v7031_v46, %v7032_v1  ;;  %v19789_v46 = vld [vmem:[#allocation88_spill] sm:$0xff] }
 0x6f8   : > { %v6623_v45 = vpop.f32.mrb[80].mxu0  ;;  %v7464_v26 = vsel %vm7216_vm4, %v7400_v20, %v6613_v9  ;;  %v16685_v30 = vpop.permute.xlu1 %5918 }
 0x6f9   : > { %v7033_v32 = vrot.slane %v6623_v45, 7  ;;  %v7250_v21 = vrot.slane %v6623_v45, 1  ;;  %v6625_v58 = vpop.f32.mrb[81].mxu0  ;;  %6887 = vmatmul.mubr.f32.gmra.mrb[186].mxu0 %v6130_v59  ;;  %v7572_v61 = vsel %vm6999_vm5, %v7184_v13, %v7464_v26  ;;  %v16689_v13 = vpop.permute.xlu0 %5912 }
 0x6fa   : > { %10053 = vmatprep.mubr.msk.f32.mxu0 %vm2415_vm1, %v19788_v52  ;;  %v7743_v35 = vsel %vm7649_vm6, %v7572_v61, 0.0  ;;  %v19791_v58 = vld [vmem:[#allocation239_spill] sm:$0xff] }
 0x6fb   : > { %7744 = vadd.xlane.f32.xlu0 %v7743_v35  ;;  %v7399_v23 = vsel %vm5064_vm3, %v7249_v42, %v7250_v21  ;;  %v7182_v33 = vsel %vm3479_vm2, %v7032_v1, %v7033_v32  ;;  %v19790_v42 = vld [vmem:[#allocation94_spill] sm:$0xff]  ;;  %v6134_v35 = vsel %vm2415_vm1, %v19785_v63, %v16637_v24 }
 0x6fc   : > { %v6628_v14 = vpop.f32.mrb[82].mxu0  ;;  %v7465_v55 = vsel %vm7216_vm4, %v7399_v23, %v6618_v34  ;;  %v16703_v25 = vpop.permute.xlu1 %5922 }
 0x6fd   : > { %v7034_v28 = vrot.slane %v6628_v14, 7  ;;  %v7251_v7 = vrot.slane %v6628_v14, 1  ;;  %v6630_v9 = vpop.f32.mrb[83].mxu0  ;;  %6892 = vmatmul.mubr.f32.gmra.mrb[188].mxu0 %v6131_v50  ;;  %v7573_v11 = vsel %vm6999_vm5, %v7183_v48, %v7465_v55  ;;  %v16707_v59 = vpop.permute.xlu0 %5916 }
 0x6fe   : > { %10054 = vmatprep.mubr.msk.f32.mxu0 %vm2415_vm1, %v19789_v46  ;;  %v7746_v27 = vsel %vm7649_vm6, %v7573_v11, 0.0  ;;  %v19792_v11 = vld [vmem:[#allocation241_spill] sm:$0xff] }
 0x6ff   : > { %7747 = vadd.xlane.f32.xlu1 %v7746_v27  ;;  %v7398_v51 = vsel %vm5064_vm3, %v7250_v21, %v7251_v7  ;;  %v7181_v29 = vsel %vm3479_vm2, %v7033_v32, %v7034_v28 }
 0x700   : > { %v6633_v54 = vpop.f32.mrb[84].mxu0  ;;  %v7466_v6 = vsel %vm7216_vm4, %v7398_v51, %v6623_v45  ;;  %v16721_v23 = vpop.permute.xlu1 %5926  ;;  %v6135_v51 = vsel %vm2415_vm1, %v19786_v3, %v16618_v62 }
 0x701   : > { %v7035_v5 = vrot.slane %v6633_v54, 7  ;;  %v7252_v34 = vrot.slane %v6633_v54, 1  ;;  %v6635_v12 = vpop.f32.mrb[85].mxu0  ;;  %6897 = vmatmul.mubr.f32.gmra.mrb[190].mxu0 %v6132_v31  ;;  %v7574_v1 = vsel %vm6999_vm5, %v7182_v33, %v7466_v6 }
 0x702   : > { %10055 = vmatprep.mubr.msk.f32.mxu0 %vm2415_vm1, %v19790_v42  ;;  %v7749_v53 = vsel %vm7649_vm6, %v7574_v1, 0.0 }
 0x703   : > { %7750 = vadd.xlane.f32.xlu0 %v7749_v53  ;;  %v7397_v39 = vsel %vm5064_vm3, %v7251_v7, %v7252_v34  ;;  %v7180_v22 = vsel %vm3479_vm2, %v7034_v28, %v7035_v5  ;;  %v19793_v53 = vld [vmem:[#allocation243_spill] sm:$0xff] }
 0x704   : > { %v6638_v20 = vpop.f32.mrb[86].mxu0  ;;  %v7467_v48 = vsel %vm7216_vm4, %v7397_v39, %v6628_v14  ;;  %v16725_v14 = vpop.permute.xlu0 %5920 }
 0x705   : > { %v7036_v45 = vrot.slane %v6638_v20, 7  ;;  %v7253_v26 = vrot.slane %v6638_v20, 1  ;;  %v6640_v32 = vpop.f32.mrb[87].mxu0  ;;  %6902 = vmatmul.mubr.f32.gmra.mrb[192].mxu0 %v6133_v43  ;;  %v7575_v21 = vsel %vm6999_vm5, %v7181_v29, %v7467_v48  ;;  %v16739_v29 = vpop.permute.xlu1 %5930 }
 0x706   : > { %10056 = vmatprep.mubr.msk.f32.mxu0 %vm2415_vm1, %v19791_v58  ;;  %v7752_v2 = vsel %vm7649_vm6, %v7575_v21, 0.0 }
 0x707   : > { %7753 = vadd.xlane.f32.xlu1 %v7752_v2  ;;  %v7396_v47 = vsel %vm5064_vm3, %v7252_v34, %v7253_v26  ;;  %v7179_v61 = vsel %vm3479_vm2, %v7035_v5, %v7036_v45 }
 0x708   : > { %v6643_v33 = vpop.f32.mrb[88].mxu0  ;;  %v7468_v50 = vsel %vm7216_vm4, %v7396_v47, %v6633_v54  ;;  %v16743_v6 = vpop.permute.xlu0 %5924  ;;  %v19794_v47 = vld [vmem:[#allocation242_spill] sm:$0xff] }
 0x709   : > { %v7037_v55 = vrot.slane %v6643_v33, 7  ;;  %v7254_v28 = vrot.slane %v6643_v33, 1  ;;  %v6645_v7 = vpop.f32.mrb[89].mxu0  ;;  %6907 = vmatmul.mubr.f32.gmra.mrb[194].mxu0 %v6134_v35  ;;  %v7576_v9 = vsel %vm6999_vm5, %v7180_v22, %v7468_v50  ;;  %v6136_v22 = vsel %vm2415_vm1, %v19787_v18, %v16654_v15  ;;  %v16763_v2 = vpop.permute.xlu1 %5934 }
 0x70a   : > { %10057 = vmatprep.mubr.msk.f32.mxu0 %vm2415_vm1, %v19792_v11  ;;  %v7755_v63 = vsel %vm7649_vm6, %v7576_v9, 0.0  ;;  %v6137_v35 = vsel %vm2415_vm1, %v19788_v52, %v16633_v8 }
 0x70b   : > { %7756 = vadd.xlane.f32.xlu0 %v7755_v63  ;;  %v7395_v24 = vsel %vm5064_vm3, %v7253_v26, %v7254_v28  ;;  %v7178_v27 = vsel %vm3479_vm2, %v7036_v45, %v7037_v55 }
 0x70c   : > { %v6648_v31 = vpop.f32.mrb[90].mxu0  ;;  %v7469_v54 = vsel %vm7216_vm4, %v7395_v24, %v6638_v20  ;;  %v16759_v48 = vpop.permute.xlu0 %5928  ;;  %v19795_v24 = vld [vmem:[#allocation244_spill] sm:$0xff] }
 0x70d   : > { %v7038_v5 = vrot.slane %v6648_v31, 7  ;;  %v7255_v34 = vrot.slane %v6648_v31, 1  ;;  %v6650_v12 = vpop.f32.mrb[91].mxu0  ;;  %6912 = vmatmul.mubr.f32.gmra.mrb[196].mxu0 %v6135_v51  ;;  %v7577_v1 = vsel %vm6999_vm5, %v7179_v61, %v7469_v54  ;;  %v16779_v63 = vpop.permute.xlu1 %7819 }
 0x70e   : > { %10058 = vmatprep.mubr.msk.f32.mxu0 %vm2415_vm1, %v19793_v53  ;;  %v7758_v62 = vsel %vm7649_vm6, %v7577_v1, 0.0 }
 0x70f   : > { %7759 = vadd.xlane.f32.xlu1 %v7758_v62  ;;  %v7394_v3 = vsel %vm5064_vm3, %v7254_v28, %v7255_v34  ;;  %v7177_v39 = vsel %vm3479_vm2, %v7037_v55, %v7038_v5 }
 0x710   : > { %v6653_v43 = vpop.f32.mrb[92].mxu0  ;;  %v7470_v20 = vsel %vm7216_vm4, %v7394_v3, %v6643_v33  ;;  %v16777_v55 = vpop.permute.xlu0 %5932  ;;  %v19796_v3 = vld [vmem:[#allocation24_spill] sm:$0xff] }
 0x711   : > { %v7039_v45 = vrot.slane %v6653_v43, 7  ;;  %v7256_v26 = vrot.slane %v6653_v43, 1  ;;  %v6655_v32 = vpop.f32.mrb[93].mxu0  ;;  %6917 = vmatmul.mubr.f32.gmra.mrb[198].mxu0 %v6136_v22  ;;  %v7578_v21 = vsel %vm6999_vm5, %v7178_v27, %v7470_v20  ;;  %v16809_v20 = vpop.xlane.xlu1 %7654 }
 0x712   : > { %10059 = vmatprep.mubr.msk.f32.mxu0 %vm2415_vm1, %v19794_v47  ;;  %v7761_v18 = vsel %vm7649_vm6, %v7578_v21, 0.0 }
 0x713   : > { %7762 = vadd.xlane.f32.xlu0 %v7761_v18  ;;  %v7393_v15 = vsel %vm5064_vm3, %v7255_v34, %v7256_v26  ;;  %v7176_v61 = vsel %vm3479_vm2, %v7038_v5, %v7039_v45 }
 0x714   : > { %v6658_v33 = vpop.f32.mrb[94].mxu0  ;;  %v7471_v50 = vsel %vm7216_vm4, %v7393_v15, %v6648_v31  ;;  %v6138_v31 = vsel %vm2415_vm1, %v19789_v46, %v16672_v36  ;;  %v16795_v34 = vpop.xlane.xlu0 %7657  ;;  %v19797_v15 = vld [vmem:[#allocation98_spill] sm:$0xff] }
 0x715   : > { %v7040_v28 = vrot.slane %v6658_v33, 7  ;;  %v7257_v7 = vrot.slane %v6658_v33, 1  ;;  %v6660_v9 = vpop.f32.mrb[95].mxu0  ;;  %6922 = vmatmul.mubr.f32.gmra.mrb[200].mxu0 %v6137_v35  ;;  %v7579_v27 = vsel %vm6999_vm5, %v7177_v39, %v7471_v50  ;;  %v6140_v50 = vsel %vm2415_vm1, %v19791_v58, %v16689_v13 }
 0x716   : > { %10060 = vmatprep.mubr.msk.f32.mxu0 %vm2415_vm1, %v19795_v24  ;;  %v7764_v8 = vsel %vm7649_vm6, %v7579_v27, 0.0 }
 0x717   : > { %v7392_v52 = vsel %vm5064_vm3, %v7256_v26, %v7257_v7  ;;  %v7175_v51 = vsel %vm3479_vm2, %v7039_v45, %v7040_v28  ;;  %7765 = vadd.xlane.f32.xlu1 %v7764_v8 }
 0x718   : > { %v6663_v54 = vpop.f32.mrb[96].mxu0  ;;  %v7472_v5 = vsel %vm7216_vm4, %v7392_v52, %v6653_v43  ;;  %v6139_v43 = vsel %vm2415_vm1, %v19790_v42, %v16650_v16  ;;  %v16817_v35 = vpop.xlane.xlu0 %7660 }
 0x719   : > { %v7041_v12 = vrot.slane %v6663_v54, 7  ;;  %v7258_v1 = vrot.slane %v6663_v54, 1  ;;  %v6665_v62 = vpop.f32.mrb[97].mxu0  ;;  %6927 = vmatmul.mubr.f32.gmra.mrb[202].mxu0 %v6138_v31  ;;  %v7580_v39 = vsel %vm6999_vm5, %v7176_v61, %v7472_v5 }
 0x71a   : > { %10061 = vmatprep.mubr.msk.f32.mxu0 %vm2415_vm1, %v19796_v3  ;;  %v7767_v22 = vsel %vm7649_vm6, %v7580_v39, 0.0 }
 0x71b   : > { %v7391_v36 = vsel %vm5064_vm3, %v7257_v7, %v7258_v1  ;;  %v7174_v46 = vsel %vm3479_vm2, %v7040_v28, %v7041_v12  ;;  %7768 = vadd.xlane.f32.xlu0 %v7767_v22 }
 0x71c   : > { %v6668_v45 = vpop.f32.mrb[98].mxu0  ;;  %v7473_v26 = vsel %vm7216_vm4, %v7391_v36, %v6658_v33  ;;  %v16827_v28 = vpop.xlane.xlu1 %7663 }
 0x71d   : > { %v7042_v32 = vrot.slane %v6668_v45, 7  ;;  %v7259_v21 = vrot.slane %v6668_v45, 1  ;;  %v6670_v18 = vpop.f32.mrb[99].mxu0  ;;  %6932 = vmatmul.mubr.f32.gmra.mrb[204].mxu0 %v6139_v43  ;;  %v7581_v61 = vsel %vm6999_vm5, %v7175_v51, %v7473_v26  ;;  %v19798_v51 = vld [vmem:[#allocation245_spill] sm:$0xff] }
 0x71e   : > { %10062 = vmatprep.mubr.msk.f32.mxu0 %vm2415_vm1, %v19797_v15  ;;  %v7770_v16 = vsel %vm7649_vm6, %v7581_v61, 0.0  ;;  %v19799_v26 = vld [vmem:[#allocation29_spill] sm:$0xff]  ;;  %v6142_v18 = vsel %vm2415_vm1, %v19793_v53, %v16707_v59 }
 0x71f   : > { %v7390_v42 = vsel %vm5064_vm3, %v7258_v1, %v7259_v21  ;;  %v7173_v33 = vsel %vm3479_vm2, %v7041_v12, %v7042_v32  ;;  %7771 = vadd.xlane.f32.xlu1 %v7770_v16  ;;  %v6141_v12 = vsel %vm2415_vm1, %v19792_v11, %v16668_v38 }
 0x720   : > { %v6673_v7 = vpop.f32.mrb[100].mxu0  ;;  %v7474_v9 = vsel %vm7216_vm4, %v7390_v42, %v6663_v54  ;;  %v16835_v5 = vpop.xlane.xlu0 %7666 }
 0x721   : > { %v7043_v27 = vrot.slane %v6673_v7, 7  ;;  %v7260_v8 = vrot.slane %v6673_v7, 1  ;;  %v6675_v52 = vpop.f32.mrb[101].mxu0  ;;  %6937 = vmatmul.mubr.f32.gmra.mrb[206].mxu0 %v6140_v50  ;;  %v7582_v31 = vsel %vm6999_vm5, %v7174_v46, %v7474_v9 }
 0x722   : > { %10063 = vmatprep.mubr.msk.f32.mxu0 %vm2415_vm1, %v19798_v51  ;;  %v7773_v13 = vsel %vm7649_vm6, %v7582_v31, 0.0 }
 0x723   : > { %v7389_v58 = vsel %vm5064_vm3, %v7259_v21, %v7260_v8  ;;  %v7172_v54 = vsel %vm3479_vm2, %v7042_v32, %v7043_v27  ;;  %7774 = vadd.xlane.f32.xlu0 %v7773_v13  ;;  %v6143_v13 = vsel %vm2415_vm1, %v19794_v47, %v16685_v30 }
 0x724   : > { %v7670_v1 = vpop.xlane.xlu1 %7669  ;;  %v6678_v62 = vpop.f32.mrb[102].mxu0  ;;  %v7475_v39 = vsel %vm7216_vm4, %v7389_v58, %v6668_v45 }
 0x725   : > { %v7828_v22 = vadd.f32 %v16779_v63, %v7670_v1  ;;  %v7044_v36 = vrot.slane %v6678_v62, 7  ;;  %v7261_v46 = vrot.slane %v6678_v62, 1  ;;  %v6680_v43 = vpop.f32.mrb[103].mxu0  ;;  %6942 = vmatmul.mubr.f32.gmra.mrb[208].mxu0 %v6141_v12  ;;  %v7583_v32 = vsel %vm6999_vm5, %v7173_v33, %v7475_v39 }
 0x726   : > { %10064 = vmatprep.mubr.msk.f32.mxu0 %vm2415_vm1, %v19799_v26  ;;  %v7776_v38 = vsel %vm7649_vm6, %v7583_v32, 0.0  ;;  %v19801_v43 = vld [vmem:[#allocation246_spill] sm:$0xff] }
 0x727   : > { %v10081_v21 = vmul.f32 -1.442695, %v7828_v22  ;;  %v7388_v11 = vsel %vm5064_vm3, %v7260_v8, %v7261_v46  ;;  %v7171_v45 = vsel %vm3479_vm2, %v7043_v27, %v7044_v36  ;;  %7777 = vadd.xlane.f32.xlu1 %v7776_v38  ;;  %v19800_v8 = vld [vmem:[#allocation97_spill] sm:$0xff] }
 0x728   : > { %v7673_v61 = vpop.xlane.xlu0 %7672  ;;  %v6683_v16 = vpop.f32.mrb[104].mxu0  ;;  %v7476_v42 = vsel %vm7216_vm4, %v7388_v11, %v6673_v7 }
 0x729   : > { %v7829_v33 = vadd.f32 %v16779_v63, %v7673_v61  ;;  %v7045_v50 = vrot.slane %v6683_v16, 7  ;;  %v7262_v9 = vrot.slane %v6683_v16, 1  ;;  %v6685_v52 = vpop.f32.mrb[105].mxu0  ;;  %6947 = vmatmul.mubr.f32.gmra.mrb[210].mxu0 %v6142_v18  ;;  %10644 = vpow2.f32 %v10081_v21 }
 0x72a   : > { %10065 = vmatprep.mubr.msk.f32.mxu0 %vm2415_vm1, %v19800_v8  ;;  %v7584_v27 = vsel %vm6999_vm5, %v7172_v54, %v7476_v42 }
 0x72b   : > { %v10082_v59 = vmul.f32 -1.442695, %v7829_v33  ;;  %v7779_v53 = vsel %vm7649_vm6, %v7584_v27, 0.0  ;;  %v7387_v31 = vsel %vm5064_vm3, %v7261_v46, %v7262_v9  ;;  %v7170_v7 = vsel %vm3479_vm2, %v7044_v36, %v7045_v50 }
 0x72c   : > { %7780 = vadd.xlane.f32.xlu0 %v7779_v53  ;;  %v7676_v58 = vpop.xlane.xlu1 %7675  ;;  %v6688_v12 = vpop.f32.mrb[106].mxu0  ;;  %v7477_v1 = vsel %vm7216_vm4, %v7387_v31, %v6678_v62  ;;  %v6144_v62 = vsel %vm2415_vm1, %v19795_v24, %v16725_v14  ;;  %v6145_v33 = vsel %vm2415_vm1, %v19796_v3, %v16703_v25 }
 0x72d   : > { %10646 = vpow2.f32 %v10082_v59  ;;  %v7830_v54 = vadd.f32 %v16779_v63, %v7676_v58  ;;  %v7046_v39 = vrot.slane %v6688_v12, 7  ;;  %v6690_v22 = vpop.f32.mrb[107].mxu0  ;;  %6952 = vmatmul.mubr.f32.gmra.mrb[212].mxu0 %v6143_v13  ;;  %v7263_v46 = vrot.slane %v6688_v12, 1 }
 0x72e   : > { %10066 = vmatprep.mubr.msk.f32.mxu0 %vm2415_vm1, %v19801_v43  ;;  %v7585_v36 = vsel %vm6999_vm5, %v7171_v45, %v7477_v1  ;;  %v6146_v58 = vsel %vm2415_vm1, %v19797_v15, %v16743_v6 }
 0x72f   : > { %v10083_v30 = vmul.f32 -1.442695, %v7830_v54  ;;  %v7782_v47 = vsel %vm7649_vm6, %v7585_v36, 0.0  ;;  %v7169_v32 = vsel %vm3479_vm2, %v7045_v50, %v7046_v39  ;;  %v7386_v38 = vsel %vm5064_vm3, %v7262_v9, %v7263_v46 }
 0x730   : > { %7783 = vadd.xlane.f32.xlu1 %v7782_v47  ;;  %v6693_v21 = vpop.f32.mrb[108].mxu0  ;;  %v7478_v61 = vsel %vm7216_vm4, %v7386_v38, %v6683_v16  ;;  %v16908_v25 = vpop.xlane.xlu0 %7678 }
 0x731   : > { %10648 = vpow2.f32 %v10083_v30  ;;  %v7047_v11 = vrot.slane %v6693_v21, 7  ;;  %v6695_v18 = vpop.f32.mrb[109].mxu0  ;;  %6957 = vmatmul.mubr.f32.gmra.mrb[214].mxu0 %v6144_v62  ;;  %v7264_v45 = vrot.slane %v6693_v21, 1  ;;  %v7586_v42 = vsel %vm6999_vm5, %v7170_v7, %v7478_v61 }
 0x732   : > { %10067 = vmatprep.mubr.msk.f32.mxu0 %vm2415_vm1, %v15966_v0  ;;  %v7785_v50 = vsel %vm7649_vm6, %v7586_v42, 0.0  ;;  %v6147_v62 = vsel %vm2415_vm1, %v19798_v51, %v16721_v23 }
 0x733   : > { %v7168_v14 = vsel %vm3479_vm2, %v7046_v39, %v7047_v11  ;;  %v10645_v24 = vpop.eup %10644  ;;  %v7385_v52 = vsel %vm5064_vm3, %v7263_v46, %v7264_v45  ;;  %7786 = vadd.xlane.f32.xlu0 %v7785_v50  ;;  %v6148_v50 = vsel %vm2415_vm1, %v19799_v26, %v16759_v48  ;;  %v8265_v26 = vadd.s32 4294967280, %v16215_v56 }
 0x734   : > { %v6698_v9 = vpop.f32.mrb[110].mxu0  ;;  %v7479_v53 = vsel %vm7216_vm4, %v7385_v52, %v6688_v12  ;;  %v8044_v7 = vadd.f32 1.0, %v10645_v24  ;;  %v16917_v54 = vpop.xlane.xlu1 %7681  ;;  %v8258_v52 = vadd.s32 4294967288, %v16215_v56 }
 0x735   : > { %v7048_v27 = vrot.slane %v6698_v9, 7  ;;  %v6700_v16 = vpop.f32.mrb[111].mxu0  ;;  %6962 = vmatmul.mubr.f32.gmra.mrb[216].mxu0 %v6145_v33  ;;  %v7265_v59 = vrot.slane %v6698_v9, 1  ;;  %v7587_v3 = vsel %vm6999_vm5, %v7169_v32, %v7479_v53 }
 0x736   : > { %10068 = vmatprep.mubr.msk.f32.mxu0 %vm2415_vm1, %v15981_v49  ;;  %v7788_v49 = vsel %vm7649_vm6, %v7587_v3, 0.0 }
 0x737   : > { %v10647_v31 = vpop.eup %10646  ;;  %v7167_v13 = vsel %vm3479_vm2, %v7047_v11, %v7048_v27  ;;  %v7384_v39 = vsel %vm5064_vm3, %v7264_v45, %v7265_v59  ;;  %7789 = vadd.xlane.f32.xlu1 %v7788_v49  ;;  %v6149_v49 = vsel %vm2415_vm1, %v19800_v8, %v16739_v29  ;;  %v16976_v29 = vsub.s32 %v16215_v56, %v19756_v4 }
 0x738   : > { %v8045_v1 = vadd.f32 1.0, %v10647_v31  ;;  %v6703_v12 = vpop.f32.mrb[112].mxu0  ;;  %v7480_v6 = vsel %vm7216_vm4, %v7384_v39, %v6693_v21  ;;  %v16926_v30 = vpop.xlane.xlu0 %7684  ;;  %v16968_v39 = vsub.s32 %v8258_v52, %v19756_v4 }
 0x739   : > { %v7049_v22 = vrot.slane %v6703_v12, 7  ;;  %v6705_v46 = vpop.f32.mrb[113].mxu0  ;;  %6967 = vmatmul.mubr.f32.gmra.mrb[218].mxu0 %v6146_v58  ;;  %v7266_v36 = vrot.slane %v6703_v12, 1  ;;  %v7588_v47 = vsel %vm6999_vm5, %v7168_v14, %v7480_v6 }
 0x73a   : > { %10650 = vrcp.f32 %v8045_v1  ;;  %10069 = vmatprep.mubr.msk.f32.mxu0 %vm2415_vm1, %v15994_v10  ;;  %v7791_v10 = vsel %vm7649_vm6, %v7588_v47, 0.0 }
 0x73b   : > { %v10649_v15 = vpop.eup %10648  ;;  %10652 = vrcp.f32 %v8044_v7  ;;  %v7166_v32 = vsel %vm3479_vm2, %v7048_v27, %v7049_v22  ;;  %v7383_v21 = vsel %vm5064_vm3, %v7265_v59, %v7266_v36  ;;  %7792 = vadd.xlane.f32.xlu0 %v7791_v10 }
 0x73c   : > { %v8046_v38 = vadd.f32 1.0, %v10649_v15  ;;  %v7688_v11 = vpop.xlane.xlu1 %7687  ;;  %v6708_v18 = vpop.f32.mrb[114].mxu0  ;;  %v7481_v23 = vsel %vm7216_vm4, %v7383_v21, %v6698_v9 }
 0x73d   : > { %v7834_v45 = vadd.f32 %v16779_v63, %v7688_v11  ;;  %v7050_v61 = vrot.slane %v6708_v18, 7  ;;  %v6710_v42 = vpop.f32.mrb[115].mxu0  ;;  %6972 = vmatmul.mubr.f32.gmra.mrb[220].mxu0 %v6147_v62  ;;  %v7267_v14 = vrot.slane %v6708_v18, 1  ;;  %v7589_v24 = vsel %vm6999_vm5, %v7167_v13, %v7481_v23 }
 0x73e   : > { %10654 = vrcp.f32 %v8046_v38  ;;  %10070 = vmatprep.mubr.msk.f32.mxu0 %vm2415_vm1, %v15991_v37  ;;  %v7794_v27 = vsel %vm7649_vm6, %v7589_v24, 0.0  ;;  %v16984_v38 = vsub.s32 %v8265_v26, %v19756_v4 }
 0x73f   : > { %v10087_v51 = vmul.f32 -1.442695, %v7834_v45  ;;  %v7165_v33 = vsel %vm3479_vm2, %v7049_v22, %v7050_v61  ;;  %v7382_v9 = vsel %vm5064_vm3, %v7266_v36, %v7267_v14  ;;  %7795 = vadd.xlane.f32.xlu1 %v7794_v27 }
 0x740   : > { %v7691_v16 = vpop.xlane.xlu0 %7690  ;;  %v6713_v37 = vpop.f32.mrb[116].mxu0  ;;  %v7482_v48 = vsel %vm7216_vm4, %v7382_v9, %v6703_v12  ;;  %v6151_v9 = vsel %vm2415_vm1, %v15966_v0, %v16763_v2 }
 0x741   : > { %v7835_v59 = vadd.f32 %v16779_v63, %v7691_v16  ;;  %v7051_v53 = vrot.slane %v6713_v37, 7  ;;  %v6715_v31 = vpop.f32.mrb[117].mxu0  ;;  %6977 = vmatmul.mubr.f32.gmra.mrb[222].mxu0 %v6148_v50  ;;  %10656 = vpow2.f32 %v10087_v51  ;;  %v7268_v7 = vrot.slane %v6713_v37, 1 }
 0x742   : > { %10071 = vmatprep.mubr.msk.f32.mxu0 %vm2415_vm1, %v14806_v44  ;;  %v7590_v13 = vsel %vm6999_vm5, %v7166_v32, %v7482_v48 }
 0x743   : > { %v10088_v3 = vmul.f32 -1.442695, %v7835_v59  ;;  %v7164_v58 = vsel %vm3479_vm2, %v7050_v61, %v7051_v53  ;;  %v7797_v44 = vsel %vm7649_vm6, %v7590_v13, 0.0  ;;  %v7381_v46 = vsel %vm5064_vm3, %v7267_v14, %v7268_v7 }
 0x744   : > { %v10651_v1 = vpop.eup %10650  ;;  %v7694_v12 = vpop.xlane.xlu1 %7693  ;;  %7798 = vadd.xlane.f32.xlu0 %v7797_v44  ;;  %v7483_v62 = vsel %vm7216_vm4, %v7381_v46, %v6708_v18  ;;  %v6150_v61 = vsel %vm2415_vm1, %v19801_v43, %v16777_v55 }
 0x745   : > { %v6718_v22 = vpop.f32.mrb[118].mxu0  ;;  %v10653_v36 = vpop.eup %10652  ;;  %10658 = vpow2.f32 %v10088_v3  ;;  %v7836_v6 = vadd.f32 %v16779_v63, %v7694_v12  ;;  %6982 = vmatmul.mubr.f32.gmra.mrb[224].mxu0 %v6149_v49  ;;  %v8293_v8 = vrot.slane %v10651_v1, %v16968_v39  ;;  %v7591_v11 = vsel %vm6999_vm5, %v7165_v33, %v7483_v62 }
 0x746   : > { %v7052_v15 = vrot.slane %v6718_v22, 7  ;;  %v6720_v47 = vpop.f32.mrb[119].mxu0  ;;  %v7269_v32 = vrot.slane %v6718_v22, 1  ;;  %10072 = vmatprep.mubr.msk.f32.mxu0 %vm2415_vm1, %v14818_v40  ;;  %v8289_v40 = vrot.slane %v10653_v36, %v16976_v29  ;;  %v7800_v42 = vsel %vm7649_vm6, %v7591_v11, 0.0 }
 0x747   : > { %v10089_v10 = vmul.f32 -1.442695, %v7836_v6  ;;  %7801 = vadd.xlane.f32.xlu1 %v7800_v42 }
 0x748   : > { %v7163_v21 = vsel %vm3479_vm2, %v7051_v53, %v7052_v15  ;;  %v10655_v45 = vpop.eup %10654  ;;  %v6723_v18 = vpop.f32.mrb[120].mxu0  ;;  %v7380_v14 = vsel %vm5064_vm3, %v7268_v7, %v7269_v32  ;;  %v8294_v33 = vsel %vm8263_vm7, %v8293_v8, %v8289_v40 }
 0x749   : > { %v8298_v23 = vrot.slane %v10655_v45, %v16984_v38  ;;  %10660 = vpow2.f32 %v10089_v10  ;;  %v7053_v51 = vrot.slane %v6723_v18, 7  ;;  %v6725_v24 = vpop.f32.mrb[121].mxu0  ;;  %6987 = vmatmul.mubr.f32.gmra.mrb[226].mxu0 %v6150_v61  ;;  %v7270_v55 = vrot.slane %v6723_v18, 1  ;;  %v17018_v13 = vpop.xlane.xlu0 %7696 }
 0x74a   : > { %10073 = vmatprep.mubr.msk.f32.mxu0 %vm2415_vm1, %v14830_v57  ;;  %v7484_v43 = vsel %vm7216_vm4, %v7380_v14, %v6713_v37  ;;  %vm8538_vm1 = vcmask 189440  }
 0x74b   : > { %v17004_v50 = vsel %vm8270_vm8, %v8298_v23, %v8294_v33  ;;  %v7592_v52 = vsel %vm6999_vm5, %v7164_v58, %v7484_v43  ;;  %v7162_v27 = vsel %vm3479_vm2, %v7052_v15, %v7053_v51  ;;  %v10657_v16 = vpop.eup %10656  ;;  %v7379_v37 = vsel %vm5064_vm3, %v7269_v32, %v7270_v55 }
 0x74c   : > { %v7803_v59 = vsel %vm7649_vm6, %v7592_v52, 0.0  ;;  %v6728_v57 = vpop.f32.mrb[122].mxu0  ;;  %v7485_v48 = vsel %vm7216_vm4, %v7379_v37, %v6718_v22  ;;  %v8050_v3 = vadd.f32 1.0, %v10657_v16  ;;  %v17024_v1 = vpop.xlane.xlu1 %7699 }
 0x74d   : > { %7804 = vadd.xlane.f32.xlu0 %v7803_v59  ;;  %v7054_v53 = vrot.slane %v6728_v57, 7  ;;  %v6730_v31 = vpop.f32.mrb[123].mxu0  ;;  %6992 = vmatmul.mubr.f32.gmra.mrb[228].mxu0 %v6151_v9  ;;  %v7271_v7 = vrot.slane %v6728_v57, 1  ;;  %v7593_v0 = vsel %vm6999_vm5, %v7163_v21, %v7485_v48 }
 0x74e   : > { %v7806_v49 = vsel %vm7649_vm6, %v7593_v0, 0.0 }
 0x74f   : > { %v10659_v26 = vpop.eup %10658  ;;  %v7161_v2 = vsel %vm3479_vm2, %v7053_v51, %v7054_v53  ;;  %v7378_v12 = vsel %vm5064_vm3, %v7270_v55, %v7271_v7  ;;  %7807 = vadd.xlane.f32.xlu1 %v7806_v49 }
 0x750   : > { %v8051_v58 = vadd.f32 1.0, %v10659_v26  ;;  %v6733_v44 = vpop.f32.mrb[124].mxu0  ;;  %v7486_v6 = vsel %vm7216_vm4, %v7378_v12, %v6723_v18  ;;  %v17031_v47 = vpop.xlane.xlu0 %7702 }
 0x751   : > { %v7055_v22 = vrot.slane %v6733_v44, 7  ;;  %v6735_v46 = vpop.f32.mrb[125].mxu0  ;;  %v7272_v36 = vrot.slane %v6733_v44, 1  ;;  %v7594_v8 = vsel %vm6999_vm5, %v7162_v27, %v7486_v6 }
 0x752   : > { %10662 = vrcp.f32 %v8051_v58  ;;  %v7809_v10 = vsel %vm7649_vm6, %v7594_v8, 0.0 }
 0x753   : > { %v10661_v15 = vpop.eup %10660  ;;  %10664 = vrcp.f32 %v8050_v3  ;;  %v7160_v32 = vsel %vm3479_vm2, %v7054_v53, %v7055_v22  ;;  %v7377_v45 = vsel %vm5064_vm3, %v7271_v7, %v7272_v36  ;;  %7810 = vadd.xlane.f32.xlu0 %v7809_v10 }
 0x754   : > { %v8052_v62 = vadd.f32 1.0, %v10661_v15  ;;  %v7706_v11 = vpop.xlane.xlu1 %7705  ;;  %v6738_v21 = vpop.f32.mrb[126].mxu0  ;;  %v7487_v14 = vsel %vm7216_vm4, %v7377_v45, %v6728_v57 }
 0x755   : > { %v7840_v61 = vadd.f32 %v16779_v63, %v7706_v11  ;;  %v7056_v40 = vrot.slane %v6738_v21, 7  ;;  %v6740_v42 = vpop.f32.mrb[127].mxu0  ;;  %v7273_v18 = vrot.slane %v6738_v21, 1  ;;  %v7595_v51 = vsel %vm6999_vm5, %v7161_v2, %v7487_v14 }
 0x756   : > { %10666 = vrcp.f32 %v8052_v62  ;;  %v8540_v33 = vsel %vm7649_vm6, %v7595_v51, 0.0 }
 0x757   : > { %v10093_v23 = vmul.f32 -1.442695, %v7840_v61  ;;  %v7159_v24 = vsel %vm3479_vm2, %v7055_v22, %v7056_v40  ;;  %v7376_v52 = vsel %vm5064_vm3, %v7272_v36, %v7273_v18  ;;  %8541 = vadd.xlane.f32.xlu0 %v8540_v33 }
 0x758   : > { %v7709_v55 = vpop.xlane.xlu0 %7708  ;;  %v6743_v43 = vpop.f32.mrb[128].mxu0  ;;  %v7488_v57 = vsel %vm7216_vm4, %v7376_v52, %v6733_v44 }
 0x759   : > { %v7841_v27 = vadd.f32 %v16779_v63, %v7709_v55  ;;  %v7057_v16 = vrot.slane %v6743_v43, 7  ;;  %v6745_v9 = vpop.f32.mrb[129].mxu0  ;;  %10668 = vpow2.f32 %v10093_v23  ;;  %v7274_v59 = vrot.slane %v6743_v43, 1 }
 0x75a   : > { %v7596_v53 = vsel %vm6999_vm5, %v7160_v32, %v7488_v57 }
 0x75b   : > { %v10094_v37 = vmul.f32 -1.442695, %v7841_v27  ;;  %v7158_v31 = vsel %vm3479_vm2, %v7056_v40, %v7057_v16  ;;  %v8543_v48 = vsel %vm7649_vm6, %v7596_v53, 0.0  ;;  %v7375_v0 = vsel %vm5064_vm3, %v7273_v18, %v7274_v59 }
 0x75c   : > { %v10663_v7 = vpop.eup %10662  ;;  %v7712_v26 = vpop.xlane.xlu1 %7711  ;;  %8544 = vadd.xlane.f32.xlu0 %v8543_v48  ;;  %v7489_v46 = vsel %vm7216_vm4, %v7375_v0, %v6738_v21 }
 0x75d   : > { %v6748_v3 = vpop.f32.mrb[130].mxu0  ;;  %v10665_v2 = vpop.eup %10664  ;;  %10670 = vpow2.f32 %v10094_v37  ;;  %v7842_v58 = vadd.f32 %v16779_v63, %v7712_v26  ;;  %v8321_v12 = vrot.slane %v10663_v7, %v16968_v39  ;;  %v7597_v6 = vsel %vm6999_vm5, %v7159_v24, %v7489_v46 }
 0x75e   : > { %v7058_v49 = vrot.slane %v6748_v3, 7  ;;  %v6750_v44 = vpop.f32.mrb[131].mxu0  ;;  %v7275_v22 = vrot.slane %v6748_v3, 1  ;;  %v8317_v32 = vrot.slane %v10665_v2, %v16976_v29  ;;  %v8546_v62 = vsel %vm7649_vm6, %v7597_v6, 0.0 }
 0x75f   : > { %v10095_v36 = vmul.f32 -1.442695, %v7842_v58 }
 0x760   : > { %v7157_v15 = vsel %vm3479_vm2, %v7057_v16, %v7058_v49  ;;  %v10667_v8 = vpop.eup %10666  ;;  %v6753_v10 = vpop.f32.mrb[132].mxu0  ;;  %v7374_v11 = vsel %vm5064_vm3, %v7274_v59, %v7275_v22  ;;  %8547 = vadd.xlane.f32.xlu0 %v8546_v62  ;;  %v8322_v40 = vsel %vm8263_vm7, %v8321_v12, %v8317_v32 }
 0x761   : > { %v8326_v45 = vrot.slane %v10667_v8, %v16984_v38  ;;  %10672 = vpow2.f32 %v10095_v36  ;;  %v7059_v21 = vrot.slane %v6753_v10, 7  ;;  %v6755_v61 = vpop.f32.mrb[133].mxu0  ;;  %v7276_v42 = vrot.slane %v6753_v10, 1 }
 0x762   : > { %v7490_v18 = vsel %vm7216_vm4, %v7374_v11, %v6743_v43 }
 0x763   : > { %v17077_v14 = vsel %vm8270_vm8, %v8326_v45, %v8322_v40  ;;  %v7598_v23 = vsel %vm6999_vm5, %v7158_v31, %v7490_v18  ;;  %v7156_v51 = vsel %vm3479_vm2, %v7058_v49, %v7059_v21  ;;  %v10669_v24 = vpop.eup %10668  ;;  %v7373_v52 = vsel %vm5064_vm3, %v7275_v22, %v7276_v42 }
 0x764   : > { %v8549_v33 = vsel %vm7649_vm6, %v7598_v23, 0.0  ;;  %v6758_v55 = vpop.f32.mrb[134].mxu0  ;;  %v7491_v9 = vsel %vm7216_vm4, %v7373_v52, %v6748_v3  ;;  %v8056_v57 = vadd.f32 1.0, %v10669_v24 }
 0x765   : > { %8550 = vadd.xlane.f32.xlu0 %v8549_v33  ;;  %v7060_v27 = vrot.slane %v6758_v55, 7  ;;  %v6760_v16 = vpop.f32.mrb[135].mxu0  ;;  %v7277_v43 = vrot.slane %v6758_v55, 1  ;;  %v7599_v37 = vsel %vm6999_vm5, %v7157_v15, %v7491_v9 }
 0x766   : > { %v8552_v7 = vsel %vm7649_vm6, %v7599_v37, 0.0 }
 0x767   : > { %v10671_v59 = vpop.eup %10670  ;;  %v7155_v53 = vsel %vm3479_vm2, %v7059_v21, %v7060_v27  ;;  %v7372_v26 = vsel %vm5064_vm3, %v7276_v42, %v7277_v43  ;;  %8553 = vadd.xlane.f32.xlu1 %v8552_v7 }
 0x768   : > { %v8057_v31 = vadd.f32 1.0, %v10671_v59  ;;  %v6763_v48 = vpop.f32.mrb[136].mxu0  ;;  %v7492_v58 = vsel %vm7216_vm4, %v7372_v26, %v6753_v10 }
 0x769   : > { %v7061_v0 = vrot.slane %v6763_v48, 7  ;;  %v6765_v2 = vpop.f32.mrb[137].mxu0  ;;  %v7278_v3 = vrot.slane %v6763_v48, 1  ;;  %v7600_v44 = vsel %vm6999_vm5, %v7156_v51, %v7492_v58 }
 0x76a   : > { %10674 = vrcp.f32 %v8057_v31  ;;  %v8555_v46 = vsel %vm7649_vm6, %v7600_v44, 0.0 }
 0x76b   : > { %v10673_v49 = vpop.eup %10672  ;;  %10676 = vrcp.f32 %v8056_v57  ;;  %v7154_v12 = vsel %vm3479_vm2, %v7060_v27, %v7061_v0  ;;  %v7371_v6 = vsel %vm5064_vm3, %v7277_v43, %v7278_v3  ;;  %8556 = vadd.xlane.f32.xlu0 %v8555_v46 }
 0x76c   : > { %v8058_v22 = vadd.f32 1.0, %v10673_v49  ;;  %v6768_v36 = vpop.f32.mrb[138].mxu0  ;;  %v7493_v62 = vsel %vm7216_vm4, %v7371_v6, %v6758_v55 }
 0x76d   : > { %v7062_v15 = vrot.slane %v6768_v36, 7  ;;  %v6770_v8 = vpop.f32.mrb[139].mxu0  ;;  %v7279_v32 = vrot.slane %v6768_v36, 1  ;;  %v7601_v10 = vsel %vm6999_vm5, %v7155_v53, %v7493_v62 }
 0x76e   : > { %10678 = vrcp.f32 %v8058_v22  ;;  %v8558_v45 = vsel %vm7649_vm6, %v7601_v10, 0.0 }
 0x76f   : > { %v7153_v11 = vsel %vm3479_vm2, %v7061_v0, %v7062_v15  ;;  %v7370_v61 = vsel %vm5064_vm3, %v7278_v3, %v7279_v32  ;;  %8559 = vadd.xlane.f32.xlu0 %v8558_v45  ;;  %v17149_v45 = vpop.xlane.xlu1 %7717 }
 0x770   : > { %v6773_v21 = vpop.f32.mrb[140].mxu0  ;;  %v7494_v23 = vsel %vm7216_vm4, %v7370_v61, %v6763_v48 }
 0x771   : > { %v7063_v40 = vrot.slane %v6773_v21, 7  ;;  %v6775_v42 = vpop.f32.mrb[141].mxu0  ;;  %v7280_v18 = vrot.slane %v6773_v21, 1  ;;  %v7602_v51 = vsel %vm6999_vm5, %v7154_v12, %v7494_v23  ;;  %v17135_v12 = vpop.xlane.xlu0 %7714 }
 0x772   : > { %v8561_v55 = vsel %vm7649_vm6, %v7602_v51, 0.0 }
 0x773   : > { %v7152_v24 = vsel %vm3479_vm2, %v7062_v15, %v7063_v40  ;;  %v7369_v27 = vsel %vm5064_vm3, %v7279_v32, %v7280_v18  ;;  %8562 = vadd.xlane.f32.xlu0 %v8561_v55 }
 0x774   : > { %v10675_v33 = vpop.eup %10674  ;;  %v6778_v52 = vpop.f32.mrb[142].mxu0  ;;  %v7495_v37 = vsel %vm7216_vm4, %v7369_v27, %v6768_v36 }
 0x775   : > { %v10677_v16 = vpop.eup %10676  ;;  %v7064_v43 = vrot.slane %v6778_v52, 7  ;;  %v6780_v9 = vpop.f32.mrb[143].mxu0  ;;  %v8349_v59 = vrot.slane %v10675_v33, %v16968_v39  ;;  %v7281_v57 = vrot.slane %v6778_v52, 1  ;;  %v7603_v53 = vsel %vm6999_vm5, %v7153_v11, %v7495_v37 }
 0x776   : > { %v8345_v48 = vrot.slane %v10677_v16, %v16976_v29  ;;  %v8564_v26 = vsel %vm7649_vm6, %v7603_v53, 0.0  ;;  %v7724_v27 = vpop.xlane.xlu1 %7723 }
 0x777   : > { %v7151_v31 = vsel %vm3479_vm2, %v7063_v40, %v7064_v43  ;;  %v7368_v2 = vsel %vm5064_vm3, %v7280_v18, %v7281_v57  ;;  %8565 = vadd.xlane.f32.xlu0 %v8564_v26 }
 0x778   : > { %v10679_v7 = vpop.eup %10678  ;;  %v6783_v0 = vpop.f32.mrb[144].mxu0  ;;  %v8350_v44 = vsel %vm8263_vm7, %v8349_v59, %v8345_v48  ;;  %v7496_v46 = vsel %vm7216_vm4, %v7368_v2, %v6773_v21 }
 0x779   : > { %v8354_v3 = vrot.slane %v10679_v7, %v16984_v38  ;;  %v7065_v58 = vrot.slane %v6783_v0, 7  ;;  %v6785_v49 = vpop.f32.mrb[145].mxu0  ;;  %v7282_v22 = vrot.slane %v6783_v0, 1  ;;  %v7604_v6 = vsel %vm6999_vm5, %v7152_v24, %v7496_v46  ;;  %v17151_v21 = vpop.xlane.xlu0 %7720 }
 0x77a   : > { %v8567_v8 = vsel %vm7649_vm6, %v7604_v6, 0.0  ;;  %v7730_v26 = vpop.xlane.xlu1 %7729  ;;  %v7846_v49 = vadd.f32 %v16779_v63, %v7724_v27 }
 0x77b   : > { %v17140_v36 = vsel %vm8270_vm8, %v8354_v3, %v8350_v44  ;;  %v7150_v15 = vsel %vm3479_vm2, %v7064_v43, %v7065_v58  ;;  %v7367_v62 = vsel %vm5064_vm3, %v7281_v57, %v7282_v22  ;;  %8568 = vadd.xlane.f32.xlu0 %v8567_v8  ;;  %v7848_v8 = vadd.f32 %v16779_v63, %v7730_v26 }
 0x77c   : > { %v6788_v32 = vpop.f32.mrb[146].mxu0  ;;  %v7497_v40 = vsel %vm7216_vm4, %v7367_v62, %v6778_v52 }
 0x77d   : > { %v7066_v10 = vrot.slane %v6788_v32, 7  ;;  %v6790_v11 = vpop.f32.mrb[147].mxu0  ;;  %v7283_v61 = vrot.slane %v6788_v32, 1  ;;  %v7605_v42 = vsel %vm6999_vm5, %v7151_v31, %v7497_v40  ;;  %v7727_v16 = vpop.xlane.xlu0 %7726  ;;  %v10101_v27 = vmul.f32 -1.442695, %v7848_v8 }
 0x77e   : > { %v8570_v23 = vsel %vm7649_vm6, %v7605_v42, 0.0  ;;  %v7847_v31 = vadd.f32 %v16779_v63, %v7727_v16 }
 0x77f   : > { %v7149_v18 = vsel %vm3479_vm2, %v7065_v58, %v7066_v10  ;;  %v7366_v24 = vsel %vm5064_vm3, %v7282_v22, %v7283_v61  ;;  %8571 = vadd.xlane.f32.xlu1 %v8570_v23  ;;  %v10099_v23 = vmul.f32 -1.442695, %v7846_v49 }
 0x780   : > { %v6793_v51 = vpop.f32.mrb[148].mxu0  ;;  %v7498_v52 = vsel %vm7216_vm4, %v7366_v24, %v6783_v0 }
 0x781   : > { %v7067_v33 = vrot.slane %v6793_v51, 7  ;;  %v6795_v55 = vpop.f32.mrb[149].mxu0  ;;  %v7284_v43 = vrot.slane %v6793_v51, 1  ;;  %v7606_v9 = vsel %vm6999_vm5, %v7150_v15, %v7498_v52  ;;  %v7733_v44 = vpop.xlane.xlu0 %7732  ;;  %v10100_v15 = vmul.f32 -1.442695, %v7847_v31 }
 0x782   : > { %v8573_v57 = vsel %vm7649_vm6, %v7606_v9, 0.0  ;;  %v7849_v40 = vadd.f32 %v16779_v63, %v7733_v44 }
 0x783   : > { %v7148_v59 = vsel %vm3479_vm2, %v7066_v10, %v7067_v33  ;;  %v7365_v53 = vsel %vm5064_vm3, %v7283_v61, %v7284_v43  ;;  %8574 = vadd.xlane.f32.xlu1 %v8573_v57  ;;  %v7736_v10 = vpop.xlane.xlu1 %7735  ;;  %10680 = vpow2.f32 %v10100_v15 }
 0x784   : > { %v6798_v37 = vpop.f32.mrb[150].mxu0  ;;  %v7499_v0 = vsel %vm7216_vm4, %v7365_v53, %v6788_v32  ;;  %v7850_v16 = vadd.f32 %v16779_v63, %v7736_v10  ;;  %v10102_v57 = vmul.f32 -1.442695, %v7849_v40  ;;  %10682 = vpow2.f32 %v10099_v23 }
 0x785   : > { %v7068_v7 = vrot.slane %v6798_v37, 7  ;;  %v6800_v48 = vpop.f32.mrb[151].mxu0  ;;  %v7285_v2 = vrot.slane %v6798_v37, 1  ;;  %v7607_v3 = vsel %vm6999_vm5, %v7149_v18, %v7499_v0  ;;  %v7739_v52 = vpop.xlane.xlu0 %7738  ;;  %10684 = vpow2.f32 %v10101_v27 }
 0x786   : > { %v8576_v22 = vsel %vm7649_vm6, %v7607_v3, 0.0  ;;  %v7851_v0 = vadd.f32 %v16779_v63, %v7739_v52  ;;  %10686 = vpow2.f32 %v10102_v57 }
 0x787   : > { %v7147_v58 = vsel %vm3479_vm2, %v7067_v33, %v7068_v7  ;;  %v7364_v6 = vsel %vm5064_vm3, %v7284_v43, %v7285_v2  ;;  %8577 = vadd.xlane.f32.xlu0 %v8576_v22 }
 0x788   : > { %v6803_v46 = vpop.f32.mrb[152].mxu0  ;;  %v7500_v61 = vsel %vm7216_vm4, %v7364_v6, %v6793_v51  ;;  %v7742_v6 = vpop.xlane.xlu1 %7741 }
 0x789   : > { %v7069_v32 = vrot.slane %v6803_v46, 7  ;;  %v6805_v62 = vpop.f32.mrb[153].mxu0  ;;  %v7286_v11 = vrot.slane %v6803_v46, 1  ;;  %v7608_v42 = vsel %vm6999_vm5, %v7148_v59, %v7500_v61 }
 0x78a   : > { %v8579_v24 = vsel %vm7649_vm6, %v7608_v42, 0.0  ;;  %v10104_v62 = vmul.f32 -1.442695, %v7851_v0  ;;  %v7852_v42 = vadd.f32 %v16779_v63, %v7742_v6 }
 0x78b   : > { %v7146_v18 = vsel %vm3479_vm2, %v7068_v7, %v7069_v32  ;;  %v7363_v55 = vsel %vm5064_vm3, %v7285_v2, %v7286_v11  ;;  %8580 = vadd.xlane.f32.xlu1 %v8579_v24  ;;  %v10103_v2 = vmul.f32 -1.442695, %v7850_v16  ;;  %v7745_v24 = vpop.xlane.xlu0 %7744 }
 0x78c   : > { %v6808_v33 = vpop.f32.mrb[154].mxu0  ;;  %v7501_v59 = vsel %vm7216_vm4, %v7363_v55, %v6798_v37 }
 0x78d   : > { %v7070_v51 = vrot.slane %v6808_v33, 7  ;;  %v6810_v43 = vpop.f32.mrb[155].mxu0  ;;  %v7287_v9 = vrot.slane %v6808_v33, 1  ;;  %v7609_v53 = vsel %vm6999_vm5, %v7147_v58, %v7501_v59  ;;  %10688 = vpow2.f32 %v10103_v2  ;;  %v10681_v40 = vpop.eup %10680 }
 0x78e   : > { %v8582_v7 = vsel %vm7649_vm6, %v7609_v53, 0.0  ;;  %10690 = vpow2.f32 %v10104_v62  ;;  %v10683_v43 = vpop.eup %10682  ;;  %v8063_v52 = vadd.f32 1.0, %v10681_v40 }
 0x78f   : > { %v7145_v31 = vsel %vm3479_vm2, %v7069_v32, %v7070_v51  ;;  %v7362_v26 = vsel %vm5064_vm3, %v7286_v11, %v7287_v9  ;;  %8583 = vadd.xlane.f32.xlu1 %v8582_v7  ;;  %v10685_v53 = vpop.eup %10684  ;;  %v7853_v7 = vadd.f32 %v16779_v63, %v7745_v24 }
 0x790   : > { %v6813_v48 = vpop.f32.mrb[156].mxu0  ;;  %v7502_v58 = vsel %vm7216_vm4, %v7362_v26, %v6803_v46  ;;  %10692 = vrcp.f32 %v8063_v52 }
 0x791   : > { %v7071_v37 = vrot.slane %v6813_v48, 7  ;;  %v6815_v3 = vpop.f32.mrb[157].mxu0  ;;  %v7288_v49 = vrot.slane %v6813_v48, 1  ;;  %v7610_v44 = vsel %vm6999_vm5, %v7146_v18, %v7502_v58  ;;  %v8062_v58 = vadd.f32 1.0, %v10683_v43 }
 0x792   : > { %v8585_v15 = vsel %vm7649_vm6, %v7610_v44, 0.0 }
 0x793   : > { %v7144_v22 = vsel %vm3479_vm2, %v7070_v51, %v7071_v37  ;;  %v7361_v32 = vsel %vm5064_vm3, %v7287_v9, %v7288_v49  ;;  %8586 = vadd.xlane.f32.xlu0 %v8585_v15  ;;  %v7748_v9 = vpop.xlane.xlu1 %7747  ;;  %v8064_v15 = vadd.f32 1.0, %v10685_v53 }
 0x794   : > { %v6818_v8 = vpop.f32.mrb[158].mxu0  ;;  %v7503_v61 = vsel %vm7216_vm4, %v7361_v32, %v6808_v33  ;;  %v7751_v32 = vpop.xlane.xlu0 %7750 }
 0x795   : > { %v7072_v10 = vrot.slane %v6818_v8, 7  ;;  %v6820_v11 = vpop.f32.mrb[159].mxu0  ;;  %v7289_v46 = vrot.slane %v6818_v8, 1  ;;  %v7611_v18 = vsel %vm6999_vm5, %v7145_v31, %v7503_v61  ;;  %v10105_v31 = vmul.f32 -1.442695, %v7852_v42 }
 0x796   : > { %v8588_v55 = vsel %vm7649_vm6, %v7611_v18, 0.0  ;;  %v10106_v11 = vmul.f32 -1.442695, %v7853_v7 }
 0x797   : > { %v7143_v23 = vsel %vm3479_vm2, %v7071_v37, %v7072_v10  ;;  %v7360_v16 = vsel %vm5064_vm3, %v7288_v49, %v7289_v46  ;;  %8589 = vadd.xlane.f32.xlu1 %v8588_v55  ;;  %v10687_v49 = vpop.eup %10686  ;;  %10694 = vpow2.f32 %v10105_v31  ;;  %v7754_v42 = vpop.xlane.xlu1 %7753 }
 0x798   : > { %v6823_v27 = vpop.f32.mrb[160].mxu0  ;;  %v7504_v57 = vsel %vm7216_vm4, %v7360_v16, %v6813_v48  ;;  %v7854_v48 = vadd.f32 %v16779_v63, %v7748_v9  ;;  %v8065_v40 = vadd.f32 1.0, %v10687_v49  ;;  %10696 = vrcp.f32 %v8062_v58  ;;  %v7757_v53 = vpop.xlane.xlu0 %7756 }
 0x799   : > { %v7073_v51 = vrot.slane %v6823_v27, 7  ;;  %v6825_v33 = vpop.f32.mrb[161].mxu0  ;;  %v7290_v59 = vrot.slane %v6823_v27, 1  ;;  %v7612_v26 = vsel %vm6999_vm5, %v7144_v22, %v7504_v57  ;;  %10698 = vrcp.f32 %v8064_v15 }
 0x79a   : > { %v8591_v0 = vsel %vm7649_vm6, %v7612_v26, 0.0  ;;  %v10107_v16 = vmul.f32 -1.442695, %v7854_v48  ;;  %10700 = vpow2.f32 %v10106_v11  ;;  %v7856_v57 = vadd.f32 %v16779_v63, %v7754_v42 }
 0x79b   : > { %v7142_v2 = vsel %vm3479_vm2, %v7072_v10, %v7073_v51  ;;  %v7359_v3 = vsel %vm5064_vm3, %v7289_v46, %v7290_v59  ;;  %8592 = vadd.xlane.f32.xlu1 %v8591_v0  ;;  %v10689_v10 = vpop.eup %10688  ;;  %10702 = vrcp.f32 %v8065_v40 }
 0x79c   : > { %v6828_v37 = vpop.f32.mrb[162].mxu0  ;;  %v7505_v62 = vsel %vm7216_vm4, %v7359_v3, %v6818_v8  ;;  %v7855_v8 = vadd.f32 %v16779_v63, %v7751_v32  ;;  %v10691_v9 = vpop.eup %10690  ;;  %10704 = vpow2.f32 %v10107_v16 }
 0x79d   : > { %v7074_v44 = vrot.slane %v6828_v37, 7  ;;  %v6830_v6 = vpop.f32.mrb[163].mxu0  ;;  %v7291_v22 = vrot.slane %v6828_v37, 1  ;;  %v7613_v46 = vsel %vm6999_vm5, %v7143_v23, %v7505_v62  ;;  %v8066_v23 = vadd.f32 1.0, %v10689_v10  ;;  %v10693_v10 = vpop.eup %10692 }
 0x79e   : > { %v8594_v18 = vsel %vm7649_vm6, %v7613_v46, 0.0  ;;  %v8067_v48 = vadd.f32 1.0, %v10691_v9  ;;  %v10109_v6 = vmul.f32 -1.442695, %v7856_v57  ;;  %v7760_v11 = vpop.xlane.xlu1 %7759  ;;  %v8377_v9 = vrot.slane %v10693_v10, %v16968_v39 }
 0x79f   : > { %v7141_v61 = vsel %vm3479_vm2, %v7073_v51, %v7074_v44  ;;  %v7358_v55 = vsel %vm5064_vm3, %v7290_v59, %v7291_v22  ;;  %8595 = vadd.xlane.f32.xlu0 %v8594_v18  ;;  %10706 = vrcp.f32 %v8066_v23 }
 0x7a0   : > { %v6833_v24 = vpop.f32.mrb[164].mxu0  ;;  %v7506_v51 = vsel %vm7216_vm4, %v7358_v55, %v6823_v27  ;;  %v10108_v27 = vmul.f32 -1.442695, %v7855_v8  ;;  %v7763_v15 = vpop.xlane.xlu0 %7762 }
 0x7a1   : > { %v7075_v33 = vrot.slane %v6833_v24, 7  ;;  %v6835_v43 = vpop.f32.mrb[165].mxu0  ;;  %v7292_v52 = vrot.slane %v6833_v24, 1  ;;  %v7614_v59 = vsel %vm6999_vm5, %v7142_v2, %v7506_v51  ;;  %v7857_v2 = vadd.f32 %v16779_v63, %v7757_v53 }
 0x7a2   : > { %v8597_v7 = vsel %vm7649_vm6, %v7614_v59, 0.0  ;;  %10708 = vpow2.f32 %v10108_v27 }
 0x7a3   : > { %v7140_v31 = vsel %vm3479_vm2, %v7074_v44, %v7075_v33  ;;  %v7357_v0 = vsel %vm5064_vm3, %v7291_v22, %v7292_v52  ;;  %8598 = vadd.xlane.f32.xlu1 %v8597_v7  ;;  %10710 = vrcp.f32 %v8067_v48  ;;  %v10110_v8 = vmul.f32 -1.442695, %v7857_v2 }
 0x7a4   : > { %v6838_v26 = vpop.f32.mrb[166].mxu0  ;;  %v7507_v44 = vsel %vm7216_vm4, %v7357_v0, %v6828_v37  ;;  %v10695_v37 = vpop.eup %10694  ;;  %10712 = vpow2.f32 %v10109_v6  ;;  %v7858_v0 = vadd.f32 %v16779_v63, %v7760_v11 }
 0x7a5   : > { %v7076_v3 = vrot.slane %v6838_v26, 7  ;;  %v7293_v49 = vrot.slane %v6838_v26, 1  ;;  %v6840_v58 = vpop.f32.mrb[167].mxu0  ;;  %v7615_v32 = vsel %vm6999_vm5, %v7141_v61, %v7507_v44  ;;  %v10697_v23 = vpop.eup %10696  ;;  %v8068_v57 = vadd.f32 1.0, %v10695_v37 }
 0x7a6   : > { %v8600_v46 = vsel %vm7649_vm6, %v7615_v32, 0.0  ;;  %v17274_v51 = vpop.eup %10698  ;;  %v7766_v53 = vpop.xlane.xlu1 %7765  ;;  %v8373_v2 = vrot.slane %v10697_v23, %v16976_v29  ;;  %10714 = vpow2.f32 %v10110_v8 }
 0x7a7   : > { %v7356_v22 = vsel %vm5064_vm3, %v7292_v52, %v7293_v49  ;;  %v7139_v62 = vsel %vm3479_vm2, %v7075_v33, %v7076_v3  ;;  %8601 = vadd.xlane.f32.xlu1 %v8600_v46  ;;  %v7859_v33 = vadd.f32 %v16779_v63, %v7763_v15  ;;  %v10701_v7 = vpop.eup %10700  ;;  %10716 = vrcp.f32 %v8068_v57 }
 0x7a8   : > { %v6843_v40 = vpop.f32.mrb[168].mxu0  ;;  %v7508_v42 = vsel %vm7216_vm4, %v7356_v22, %v6833_v24  ;;  %v8069_v11 = vadd.f32 1.0, %v10701_v7 }
 0x7a9   : > { %v7077_v18 = vrot.slane %v6843_v40, 7  ;;  %v7294_v55 = vrot.slane %v6843_v40, 1  ;;  %v6845_v61 = vpop.f32.mrb[169].mxu0  ;;  %v7616_v16 = vsel %vm6999_vm5, %v7140_v31, %v7508_v42  ;;  %v10112_v44 = vmul.f32 -1.442695, %v7859_v33 }
 0x7aa   : > { %v8603_v43 = vsel %vm7649_vm6, %v7616_v16, 0.0  ;;  %v10111_v61 = vmul.f32 -1.442695, %v7858_v0  ;;  %v7769_v16 = vpop.xlane.xlu0 %7768 }
 0x7ab   : > { %8604 = vadd.xlane.f32.xlu0 %v8603_v43  ;;  %v7355_v24 = vsel %vm5064_vm3, %v7293_v49, %v7294_v55  ;;  %v7138_v52 = vsel %vm3479_vm2, %v7076_v3, %v7077_v18  ;;  %v17282_v3 = vpop.eup %10702  ;;  %v8382_v43 = vrot.slane %v17274_v51, %v16984_v38  ;;  %10718 = vpow2.f32 %v10112_v44 }
 0x7ac   : > { %v6848_v59 = vpop.f32.mrb[170].mxu0  ;;  %v7509_v31 = vsel %vm7216_vm4, %v7355_v24, %v6838_v26  ;;  %v10705_v15 = vpop.eup %10704  ;;  %v7860_v26 = vadd.f32 %v16779_v63, %v7766_v53  ;;  %10720 = vrcp.f32 %v8069_v11 }
 0x7ad   : > { %v7078_v27 = vrot.slane %v6848_v59, 7  ;;  %v7295_v58 = vrot.slane %v6848_v59, 1  ;;  %v6850_v48 = vpop.f32.mrb[171].mxu0  ;;  %v7617_v49 = vsel %vm6999_vm5, %v7139_v62, %v7509_v31  ;;  %v17291_v10 = vpop.eup %10706  ;;  %v17294_v62 = vsel %vm8263_vm7, %v8377_v9, %v8373_v2 }
 0x7ae   : > { %v8606_v6 = vsel %vm7649_vm6, %v7617_v49, 0.0  ;;  %v7772_v46 = vpop.xlane.xlu1 %7771  ;;  %v8070_v23 = vadd.f32 1.0, %v10705_v15  ;;  %v10709_v9 = vpop.eup %10708  ;;  %v10113_v57 = vmul.f32 -1.442695, %v7860_v26  ;;  %v8391_v0 = vrot.slane %v17291_v10, %v16968_v39 }
 0x7af   : > { %8607 = vadd.xlane.f32.xlu1 %v8606_v6  ;;  %v7354_v32 = vsel %vm5064_vm3, %v7294_v55, %v7295_v58  ;;  %v7137_v22 = vsel %vm3479_vm2, %v7077_v18, %v7078_v27  ;;  %v7862_v53 = vadd.f32 %v16779_v63, %v7772_v46  ;;  %v17308_v7 = vpop.eup %10710  ;;  %10722 = vpow2.f32 %v10111_v61 }
 0x7b0   : > { %v6853_v42 = vpop.f32.mrb[172].mxu0  ;;  %v7510_v37 = vsel %vm7216_vm4, %v7354_v32, %v6843_v40  ;;  %v10713_v2 = vpop.eup %10712  ;;  %10724 = vrcp.f32 %v8070_v23  ;;  %v8071_v26 = vadd.f32 1.0, %v10709_v9 }
 0x7b1   : > { %v7079_v8 = vrot.slane %v6853_v42, 7  ;;  %v7296_v33 = vrot.slane %v6853_v42, 1  ;;  %v6855_v55 = vpop.f32.mrb[173].mxu0  ;;  %v7618_v18 = vsel %vm6999_vm5, %v7138_v52, %v7510_v37  ;;  %v8387_v52 = vrot.slane %v17282_v3, %v16976_v29  ;;  %v7775_v44 = vpop.xlane.xlu0 %7774 }
 0x7b2   : > { %v8609_v24 = vsel %vm7649_vm6, %v7618_v18, 0.0  ;;  %v7861_v3 = vadd.f32 %v16779_v63, %v7769_v16  ;;  %10726 = vpow2.f32 %v10113_v57  ;;  %v10115_v11 = vmul.f32 -1.442695, %v7862_v53  ;;  %v10715_v37 = vpop.eup %10714 }
 0x7b3   : > { %8610 = vadd.xlane.f32.xlu1 %v8609_v24  ;;  %v7353_v40 = vsel %vm5064_vm3, %v7295_v58, %v7296_v33  ;;  %v7136_v31 = vsel %vm3479_vm2, %v7078_v27, %v7079_v8  ;;  %v8072_v61 = vadd.f32 1.0, %v10713_v2  ;;  %v7863_v55 = vadd.f32 %v16779_v63, %v7775_v44  ;;  %v17332_v53 = vpop.eup %10716 }
 0x7b4   : > { %v6858_v48 = vpop.f32.mrb[174].mxu0  ;;  %v7511_v49 = vsel %vm7216_vm4, %v7353_v40, %v6848_v59  ;;  %v7778_v32 = vpop.xlane.xlu1 %7777  ;;  %10728 = vrcp.f32 %v8071_v26  ;;  %v10114_v40 = vmul.f32 -1.442695, %v7861_v3  ;;  %v8073_v2 = vadd.f32 1.0, %v10715_v37 }
 0x7b5   : > { %v7080_v58 = vrot.slane %v6858_v48, 7  ;;  %v7297_v6 = vrot.slane %v6858_v48, 1  ;;  %v6860_v15 = vpop.f32.mrb[175].mxu0  ;;  %v7619_v27 = vsel %vm6999_vm5, %v7137_v22, %v7511_v49  ;;  %v8396_v22 = vrot.slane %v17308_v7, %v16984_v38 }
 0x7b6   : > { %v8612_v10 = vsel %vm7649_vm6, %v7619_v27, 0.0  ;;  %v7864_v23 = vadd.f32 %v16779_v63, %v7778_v32  ;;  %10730 = vpow2.f32 %v10115_v11  ;;  %v10719_v15 = vpop.eup %10718  ;;  %v10116_v27 = vmul.f32 -1.442695, %v7863_v55 }
 0x7b7   : > { %8613 = vadd.xlane.f32.xlu0 %v8612_v10  ;;  %v7352_v59 = vsel %vm5064_vm3, %v7296_v33, %v7297_v6  ;;  %v7135_v46 = vsel %vm3479_vm2, %v7079_v8, %v7080_v58  ;;  %10732 = vrcp.f32 %v8072_v61 }
 0x7b8   : > { %v6863_v16 = vpop.f32.mrb[176].mxu0  ;;  %v7512_v18 = vsel %vm7216_vm4, %v7352_v59, %v6853_v42  ;;  %v10117_v32 = vmul.f32 -1.442695, %v7864_v23  ;;  %10734 = vpow2.f32 %v10114_v40 }
 0x7b9   : > { %v7781_v24 = vpop.xlane.xlu0 %7780  ;;  %v7081_v9 = vrot.slane %v6863_v16, 7  ;;  %v7298_v57 = vrot.slane %v6863_v16, 1  ;;  %v6865_v33 = vpop.f32.mrb[177].mxu0  ;;  %v7620_v8 = vsel %vm6999_vm5, %v7136_v31, %v7512_v18  ;;  %v8392_v31 = vsel %vm8263_vm7, %v8391_v0, %v8387_v52 }
 0x7ba   : > { %v7865_v7 = vadd.f32 %v16779_v63, %v7781_v24  ;;  %v8615_v49 = vsel %vm7649_vm6, %v7620_v8, 0.0  ;;  %v10721_v18 = vpop.eup %10720  ;;  %v8397_v55 = vsel %vm8270_vm8, %v8396_v22, %v8392_v31  ;;  %10736 = vrcp.f32 %v8073_v2 }
 0x7bb   : > { %8616 = vadd.xlane.f32.xlu0 %v8615_v49  ;;  %v7351_v42 = vsel %vm5064_vm3, %v7297_v6, %v7298_v57  ;;  %v7134_v44 = vsel %vm3479_vm2, %v7080_v58, %v7081_v9  ;;  %v10723_v61 = vpop.eup %10722  ;;  %v8075_v24 = vadd.f32 1.0, %v10719_v15  ;;  %10738 = vpow2.f32 %v10116_v27 }
 0x7bc   : > { %v6868_v26 = vpop.f32.mrb[178].mxu0  ;;  %v7513_v3 = vsel %vm7216_vm4, %v7351_v42, %v6858_v48  ;;  %v10118_v58 = vmul.f32 -1.442695, %v7865_v7  ;;  %10740 = vpow2.f32 %v10117_v32  ;;  %v8074_v31 = vadd.f32 1.0, %v10723_v61 }
 0x7bd   : > { %v7784_v10 = vpop.xlane.xlu1 %7783  ;;  %v7082_v11 = vrot.slane %v6868_v26, 7  ;;  %v7299_v59 = vrot.slane %v6868_v26, 1  ;;  %v6870_v37 = vpop.f32.mrb[179].mxu0  ;;  %v7621_v6 = vsel %vm6999_vm5, %v7135_v46, %v7513_v3  ;;  %v8401_v27 = vrot.slane %v17332_v53, %v16976_v29 }
 0x7be   : > { %v7866_v52 = vadd.f32 %v16779_v63, %v7784_v10  ;;  %v8618_v0 = vsel %vm7649_vm6, %v7621_v6, 0.0  ;;  %v10725_v46 = vpop.eup %10724  ;;  %10742 = vpow2.f32 %v10118_v58  ;;  %v8383_v58 = vsel %vm8270_vm8, %v8382_v43, %v17294_v62 }
 0x7bf   : > { %8619 = vadd.xlane.f32.xlu1 %v8618_v0  ;;  %v7350_v48 = vsel %vm5064_vm3, %v7298_v57, %v7299_v59  ;;  %v7133_v23 = vsel %vm3479_vm2, %v7081_v9, %v7082_v11  ;;  %v10727_v7 = vpop.eup %10726  ;;  %v8405_v57 = vrot.slane %v10721_v18, %v16968_v39 }
 0x7c0   : > { %v10119_v33 = vmul.f32 -1.442695, %v7866_v52  ;;  %v6873_v8 = vpop.f32.mrb[180].mxu0  ;;  %v7514_v40 = vsel %vm7216_vm4, %v7350_v48, %v6863_v16  ;;  %v7787_v9 = vpop.xlane.xlu0 %7786  ;;  %v8410_v16 = vrot.slane %v10725_v46, %v16984_v38 }
 0x7c1   : > { %v7083_v22 = vrot.slane %v6873_v8, 7  ;;  %v7300_v49 = vrot.slane %v6873_v8, 1  ;;  %v6875_v2 = vpop.f32.mrb[181].mxu0  ;;  %v7622_v42 = vsel %vm6999_vm5, %v7134_v44, %v7514_v40  ;;  %v7867_v3 = vadd.f32 %v16779_v63, %v7787_v9  ;;  %v17364_v10 = vpop.eup %10728 }
 0x7c2   : > { %v8621_v15 = vsel %vm7649_vm6, %v7622_v42, 0.0  ;;  %v8076_v44 = vadd.f32 1.0, %v10727_v7  ;;  %10744 = vpow2.f32 %v10119_v33  ;;  %v10731_v53 = vpop.eup %10730  ;;  %v8406_v48 = vsel %vm8263_vm7, %v8405_v57, %v8401_v27 }
 0x7c3   : > { %8622 = vadd.xlane.f32.xlu0 %v8621_v15  ;;  %v7349_v32 = vsel %vm5064_vm3, %v7299_v59, %v7300_v49  ;;  %v7132_v18 = vsel %vm3479_vm2, %v7082_v11, %v7083_v22  ;;  %10746 = vrcp.f32 %v8075_v24  ;;  %v10120_v59 = vmul.f32 -1.442695, %v7867_v3  ;;  %v10733_v61 = vpop.eup %10732 }
 0x7c4   : > { %v6878_v37 = vpop.f32.mrb[182].mxu0  ;;  %v7515_v6 = vsel %vm7216_vm4, %v7349_v32, %v6868_v26  ;;  %10748 = vrcp.f32 %v8074_v31  ;;  %v7790_v46 = vpop.xlane.xlu1 %7789  ;;  %v8524_v33 = vsel %vm8510_vm9, %v8397_v55, %v8383_v58  ;;  %v8411_v40 = vsel %vm8270_vm8, %v8410_v16, %v8406_v48 }
 0x7c5   : > { %v7084_v52 = vrot.slane %v6878_v37, 7  ;;  %v6880_v0 = vpop.f32.mrb[183].mxu0  ;;  %v7301_v26 = vrot.slane %v6878_v37, 1  ;;  %v7623_v11 = vsel %vm6999_vm5, %v7133_v23, %v7515_v6  ;;  %v7868_v51 = vadd.f32 %v16779_v63, %v7790_v46  ;;  %v10735_v43 = vpop.eup %10734 }
 0x7c6   : > { %v8624_v62 = vsel %vm7649_vm6, %v7623_v11, 0.0  ;;  %10750 = vrcp.f32 %v8076_v44  ;;  %v8078_v24 = vadd.f32 1.0, %v10731_v53  ;;  %v10737_v23 = vpop.eup %10736  ;;  %v17387_v27 = vsel %vm8512_vm10, %v8411_v40, %v8524_v33 }
 0x7c7   : > { %8625 = vadd.xlane.f32.xlu0 %v8624_v62  ;;  %v7348_v2 = vsel %vm5064_vm3, %v7300_v49, %v7301_v26  ;;  %v7131_v42 = vsel %vm3479_vm2, %v7083_v22, %v7084_v52  ;;  %10752 = vpow2.f32 %v10120_v59  ;;  %v10121_v55 = vmul.f32 -1.442695, %v7868_v51  ;;  %v10739_v15 = vpop.eup %10738 }
 0x7c8   : > { %v6883_v7 = vpop.f32.mrb[184].mxu0  ;;  %v8415_v16 = vrot.slane %v17364_v10, %v16976_v29  ;;  %v7793_v3 = vpop.xlane.xlu0 %7792  ;;  %v7516_v49 = vsel %vm7216_vm4, %v7348_v2, %v6873_v8  ;;  %v8419_v22 = vrot.slane %v10733_v61, %v16968_v39  ;;  %v8077_v44 = vadd.f32 1.0, %v10735_v43 }
 0x7c9   : > { %v7085_v57 = vrot.slane %v6883_v7, 7  ;;  %v7302_v31 = vrot.slane %v6883_v7, 1  ;;  %v6885_v9 = vpop.f32.mrb[185].mxu0  ;;  %v10741_v32 = vpop.eup %10740  ;;  %v7869_v6 = vadd.f32 %v16779_v63, %v7793_v3  ;;  %v7624_v53 = vsel %vm6999_vm5, %v7132_v18, %v7516_v49 }
 0x7ca   : > { %v10743_v58 = vpop.eup %10742  ;;  %10754 = vpow2.f32 %v10121_v55  ;;  %v8627_v59 = vsel %vm7649_vm6, %v7624_v53, 0.0  ;;  %v8079_v61 = vadd.f32 1.0, %v10739_v15  ;;  %v8424_v18 = vrot.slane %v10737_v23, %v16984_v38 }
 0x7cb   : > { %v7347_v10 = vsel %vm5064_vm3, %v7301_v26, %v7302_v31  ;;  %v7130_v8 = vsel %vm3479_vm2, %v7084_v52, %v7085_v57  ;;  %10756 = vrcp.f32 %v8078_v24  ;;  %v10122_v48 = vmul.f32 -1.442695, %v7869_v6  ;;  %8628 = vadd.xlane.f32.xlu0 %v8627_v59 }
 0x7cc   : > { %v6888_v0 = vpop.f32.mrb[186].mxu0  ;;  %v10745_v33 = vpop.eup %10744  ;;  %v8080_v40 = vadd.f32 1.0, %v10741_v32  ;;  %v7517_v62 = vsel %vm7216_vm4, %v7347_v10, %v6878_v37  ;;  %10758 = vrcp.f32 %v8077_v44  ;;  %v8081_v26 = vadd.f32 1.0, %v10743_v58 }
 0x7cd   : > { %v7086_v46 = vrot.slane %v6888_v0, 7  ;;  %v6890_v11 = vpop.f32.mrb[187].mxu0  ;;  %v7303_v51 = vrot.slane %v6888_v0, 1  ;;  %v10747_v43 = vpop.eup %10746  ;;  %v7625_v52 = vsel %vm6999_vm5, %v7131_v42, %v7517_v62  ;;  %v8420_v55 = vsel %vm8263_vm7, %v8419_v22, %v8415_v16 }
 0x7ce   : > { %v10749_v2 = vpop.eup %10748  ;;  %10760 = vpow2.f32 %v10122_v48  ;;  %v7796_v9 = vpop.xlane.xlu1 %7795  ;;  %v8630_v23 = vsel %vm7649_vm6, %v7625_v52, 0.0  ;;  %v8082_v3 = vadd.f32 1.0, %v10745_v33  ;;  %v8433_v6 = vrot.slane %v10747_v43, %v16968_v39 }
 0x7cf   : > { %v7129_v24 = vsel %vm3479_vm2, %v7085_v57, %v7086_v46  ;;  %v7346_v37 = vsel %vm5064_vm3, %v7302_v31, %v7303_v51  ;;  %10762 = vrcp.f32 %v8079_v61  ;;  %8631 = vadd.xlane.f32.xlu1 %v8630_v23  ;;  %v8425_v57 = vsel %vm8270_vm8, %v8424_v18, %v8420_v55 }
 0x7d0   : > { %v6893_v15 = vpop.f32.mrb[188].mxu0  ;;  %v10751_v44 = vpop.eup %10750  ;;  %10764 = vrcp.f32 %v8080_v40  ;;  %v7518_v22 = vsel %vm7216_vm4, %v7346_v37, %v6883_v7  ;;  %v8429_v58 = vrot.slane %v10749_v2, %v16976_v29  ;;  %v7870_v31 = vadd.f32 %v16779_v63, %v7796_v9 }
 0x7d1   : > { %v7087_v49 = vrot.slane %v6893_v15, 7  ;;  %v7304_v32 = vrot.slane %v6893_v15, 1  ;;  %v6895_v42 = vpop.f32.mrb[189].mxu0  ;;  %v7799_v16 = vpop.xlane.xlu0 %7798  ;;  %10766 = vrcp.f32 %v8081_v26  ;;  %v7626_v59 = vsel %vm6999_vm5, %v7130_v8, %v7518_v22 }
 0x7d2   : > { %v10753_v53 = vpop.eup %10752  ;;  %v7871_v10 = vadd.f32 %v16779_v63, %v7799_v16  ;;  %v8633_v61 = vsel %vm7649_vm6, %v7626_v59, 0.0  ;;  %v8438_v33 = vrot.slane %v10751_v44, %v16984_v38  ;;  %10768 = vrcp.f32 %v8082_v3 }
 0x7d3   : > { %v7345_v11 = vsel %vm5064_vm3, %v7303_v51, %v7304_v32  ;;  %v7128_v7 = vsel %vm3479_vm2, %v7086_v46, %v7087_v49  ;;  %8634 = vadd.xlane.f32.xlu0 %v8633_v61  ;;  %v17434_v43 = vsel %vm8514_vm11, %v8425_v57, %v17387_v27  ;;  %v8434_v26 = vsel %vm8263_vm7, %v8433_v6, %v8429_v58 }
 0x7d4   : > { %v17423_v48 = vpop.f32.mrb[190].mxu0  ;;  %v10755_v62 = vpop.eup %10754  ;;  %v8083_v51 = vadd.f32 1.0, %v10753_v53  ;;  %v7519_v46 = vsel %vm7216_vm4, %v7345_v11, %v6888_v0  ;;  %v10123_v9 = vmul.f32 -1.442695, %v7870_v31  ;;  %v10124_v3 = vmul.f32 -1.442695, %v7871_v10 }
 0x7d5   : > { %v7088_v18 = vrot.slane %v17423_v48, 7  ;;  %v7305_v8 = vrot.slane %v17423_v48, 1  ;;  %v6900_v40 = vpop.f32.mrb[191].mxu0  ;;  %v7802_v52 = vpop.xlane.xlu1 %7801  ;;  %v8084_v55 = vadd.f32 1.0, %v10755_v62  ;;  %v7627_v37 = vsel %vm6999_vm5, %v7129_v24, %v7519_v46 }
 0x7d6   : > { %v10757_v2 = vpop.eup %10756  ;;  %v7872_v23 = vadd.f32 %v16779_v63, %v7802_v52  ;;  %v8636_v27 = vsel %vm7649_vm6, %v7627_v37, 0.0  ;;  %v17448_v6 = vsel %vm8270_vm8, %v8438_v33, %v8434_v26 }
 0x7d7   : > { %v7344_v44 = vsel %vm5064_vm3, %v7304_v32, %v7305_v8  ;;  %v7127_v57 = vsel %vm3479_vm2, %v7087_v49, %v7088_v18  ;;  %v10759_v0 = vpop.eup %10758  ;;  %10770 = vrcp.f32 %v8084_v55  ;;  %8637 = vadd.xlane.f32.xlu0 %v8636_v27  ;;  %v8447_v58 = vrot.slane %v10757_v2, %v16968_v39 }
 0x7d8   : > { %v6903_v42 = vpop.f32.mrb[192].mxu0  ;;  %v10761_v53 = vpop.eup %10760  ;;  %10772 = vrcp.f32 %v8083_v51  ;;  %v10125_v32 = vmul.f32 -1.442695, %v7872_v23  ;;  %v7520_v49 = vsel %vm7216_vm4, %v7344_v44, %v6893_v15  ;;  %v8443_v52 = vrot.slane %v10759_v0, %v16976_v29 }
 0x7d9   : > { %v7089_v16 = vrot.slane %v6903_v42, 7  ;;  %v7306_v22 = vrot.slane %v6903_v42, 1  ;;  %v6905_v24 = vpop.f32.mrb[193].mxu0  ;;  %v10763_v59 = vpop.eup %10762  ;;  %v8085_v10 = vadd.f32 1.0, %v10761_v53  ;;  %10774 = vpow2.f32 %v10123_v9 }
 0x7da   : > { %v7805_v31 = vpop.xlane.xlu0 %7804  ;;  %v7628_v11 = vsel %vm6999_vm5, %v7128_v7, %v7520_v49  ;;  %v10765_v33 = vpop.eup %10764  ;;  %10776 = vpow2.f32 %v10124_v3  ;;  %v8452_v55 = vrot.slane %v10763_v59, %v16984_v38  ;;  %v8448_v37 = vsel %vm8263_vm7, %v8447_v58, %v8443_v52 }
 0x7db   : > { %v7873_v61 = vadd.f32 %v16779_v63, %v7805_v31  ;;  %v8639_v40 = vsel %vm7649_vm6, %v7628_v11, 0.0  ;;  %v7343_v26 = vsel %vm5064_vm3, %v7305_v8, %v7306_v22  ;;  %v7126_v15 = vsel %vm3479_vm2, %v7088_v18, %v7089_v16  ;;  %v10767_v51 = vpop.eup %10766 }
 0x7dc   : > { %v6908_v62 = vpop.f32.mrb[194].mxu0  ;;  %10778 = vrcp.f32 %v8085_v10  ;;  %8640 = vadd.xlane.f32.xlu1 %v8639_v40  ;;  %v7808_v9 = vpop.xlane.xlu1 %7807  ;;  %v7521_v18 = vsel %vm7216_vm4, %v7343_v26, %v17423_v48  ;;  %v8461_v0 = vrot.slane %v10767_v51, %v16968_v39  ;;  %v8453_v49 = vsel %vm8270_vm8, %v8452_v55, %v8448_v37 }
 0x7dd   : > { %v10126_v46 = vmul.f32 -1.442695, %v7873_v61  ;;  %v7090_v7 = vrot.slane %v6908_v62, 7  ;;  %v6910_v2 = vpop.f32.mrb[195].mxu0  ;;  %10780 = vpow2.f32 %v10125_v32  ;;  %v7307_v8 = vrot.slane %v6908_v62, 1  ;;  %v10769_v23 = vpop.eup %10768 }
 0x7de   : > { %v7874_v3 = vadd.f32 %v16779_v63, %v7808_v9  ;;  %v7629_v27 = vsel %vm6999_vm5, %v7127_v57, %v7521_v18  ;;  %v8457_v59 = vrot.slane %v10765_v33, %v16976_v29  ;;  %v8466_v10 = vrot.slane %v10769_v23, %v16984_v38 }
 0x7df   : > { %v7125_v44 = vsel %vm3479_vm2, %v7089_v16, %v7090_v7  ;;  %10782 = vpow2.f32 %v10126_v46  ;;  %v8642_v24 = vsel %vm7649_vm6, %v7629_v27, 0.0  ;;  %v7342_v48 = vsel %vm5064_vm3, %v7306_v22, %v7307_v8 }
 0x7e0   : > { %v6913_v53 = vpop.f32.mrb[196].mxu0  ;;  %v10127_v58 = vmul.f32 -1.442695, %v7874_v3  ;;  %8643 = vadd.xlane.f32.xlu0 %v8642_v24  ;;  %v7522_v16 = vsel %vm7216_vm4, %v7342_v48, %v6903_v42  ;;  %v7811_v61 = vpop.xlane.xlu0 %7810  ;;  %v8462_v52 = vsel %vm8263_vm7, %v8461_v0, %v8457_v59  ;;  %v8527_v27 = vsel %vm8516_vm12, %v17448_v6, %v17434_v43 }
 0x7e1   : > { %v7091_v32 = vrot.slane %v6913_v53, 7  ;;  %v7308_v57 = vrot.slane %v6913_v53, 1  ;;  %v6915_v31 = vpop.f32.mrb[197].mxu0  ;;  %v7630_v22 = vsel %vm6999_vm5, %v7126_v15, %v7522_v16  ;;  %v10771_v11 = vpop.eup %10770  ;;  %v7875_v40 = vadd.f32 %v16779_v63, %v7811_v61 }
 0x7e2   : > { %10784 = vpow2.f32 %v10127_v58  ;;  %v8645_v26 = vsel %vm7649_vm6, %v7630_v22, 0.0  ;;  %v10773_v51 = vpop.eup %10772  ;;  %v8475_v33 = vrot.slane %v10771_v11, %v16968_v39  ;;  %v8528_v31 = vsel %vm8518_vm13, %v8453_v49, %v8527_v27 }
 0x7e3   : > { %v7341_v42 = vsel %vm5064_vm3, %v7307_v8, %v7308_v57  ;;  %v7124_v15 = vsel %vm3479_vm2, %v7090_v7, %v7091_v32  ;;  %v10775_v55 = vpop.eup %10774  ;;  %v10128_v9 = vmul.f32 -1.442695, %v7875_v40  ;;  %v8471_v24 = vrot.slane %v10773_v51, %v16976_v29 }
 0x7e4   : > { %v6918_v46 = vpop.f32.mrb[198].mxu0  ;;  %v7523_v2 = vsel %vm7216_vm4, %v7341_v42, %v6908_v62  ;;  %8646 = vadd.xlane.f32.xlu0 %v8645_v26  ;;  %v10777_v3 = vpop.eup %10776  ;;  %v8467_v62 = vsel %vm8270_vm8, %v8466_v10, %v8462_v52  ;;  %v8086_v6 = vadd.f32 1.0, %v10775_v55 }
 0x7e5   : > { %v7092_v18 = vrot.slane %v6918_v46, 7  ;;  %v7309_v23 = vrot.slane %v6918_v46, 1  ;;  %v6920_v37 = vpop.f32.mrb[199].mxu0  ;;  %v7631_v8 = vsel %vm6999_vm5, %v7125_v44, %v7523_v2  ;;  %10786 = vpow2.f32 %v10128_v9 }
 0x7e6   : > { %v8648_v7 = vsel %vm7649_vm6, %v7631_v8, 0.0  ;;  %v10779_v0 = vpop.eup %10778  ;;  %v8476_v10 = vsel %vm8263_vm7, %v8475_v33, %v8471_v24  ;;  %v8529_v11 = vsel %vm8520_vm14, %v8467_v62, %v8528_v31  ;;  %10788 = vrcp.f32 %v8086_v6 }
 0x7e7   : > { %8649 = vadd.xlane.f32.xlu1 %v8648_v7  ;;  %v7340_v48 = vsel %vm5064_vm3, %v7308_v57, %v7309_v23  ;;  %v7123_v44 = vsel %vm3479_vm2, %v7091_v32, %v7092_v18  ;;  %v10781_v58 = vpop.eup %10780  ;;  %v8480_v43 = vrot.slane %v10779_v0, %v16984_v38 }
 0x7e8   : > { %v6923_v16 = vpop.f32.mrb[200].mxu0  ;;  %v7524_v59 = vsel %vm7216_vm4, %v7340_v48, %v6913_v53  ;;  %v8087_v53 = vadd.f32 1.0, %v10777_v3  ;;  %v8088_v51 = vadd.f32 1.0, %v10781_v58 }
 0x7e9   : > { %v7093_v57 = vrot.slane %v6923_v16, 7  ;;  %v7310_v32 = vrot.slane %v6923_v16, 1  ;;  %v6925_v61 = vpop.f32.mrb[201].mxu0  ;;  %v7632_v49 = vsel %vm6999_vm5, %v7124_v15, %v7524_v59  ;;  %v10783_v22 = vpop.eup %10782  ;;  %v8481_v40 = vsel %vm8270_vm8, %v8480_v43, %v8476_v10 }
 0x7ea   : > { %v8651_v26 = vsel %vm7649_vm6, %v7632_v49, 0.0  ;;  %v8530_v42 = vsel %vm8522_vm15, %v8481_v40, %v8529_v11  ;;  %v8089_v9 = vadd.f32 1.0, %v10783_v22  ;;  %10790 = vrcp.f32 %v8087_v53 }
 0x7eb   : > { %8652 = vadd.xlane.f32.xlu0 %v8651_v26  ;;  %v7339_v52 = vsel %vm5064_vm3, %v7309_v23, %v7310_v32  ;;  %v7122_v33 = vsel %vm3479_vm2, %v7092_v18, %v7093_v57  ;;  %8537 = vst.msk [vmem:[%s17524_s16 + $0x8] sm:$0xff] %vm8535_vm0, %v8530_v42  ;;  %10792 = vrcp.f32 %v8088_v51 }
 0x7ec   : > { %v6928_v2 = vpop.f32.mrb[202].mxu0  ;;  %v7525_v15 = vsel %vm7216_vm4, %v7339_v52, %v6918_v46  ;;  %v10785_v55 = vpop.eup %10784 }
 0x7ed   : > { %v7094_v37 = vrot.slane %v6928_v2, 7  ;;  %v7311_v8 = vrot.slane %v6928_v2, 1  ;;  %v6930_v3 = vpop.f32.mrb[203].mxu0  ;;  %v7633_v27 = vsel %vm6999_vm5, %v7123_v44, %v7525_v15  ;;  %v8090_v23 = vadd.f32 1.0, %v10785_v55 }
 0x7ee   : > { %v8654_v62 = vsel %vm7649_vm6, %v7633_v27, 0.0 }
 0x7ef   : > { %8655 = vadd.xlane.f32.xlu0 %v8654_v62  ;;  %v7338_v18 = vsel %vm5064_vm3, %v7310_v32, %v7311_v8  ;;  %v7121_v46 = vsel %vm3479_vm2, %v7093_v57, %v7094_v37  ;;  %10794 = vrcp.f32 %v8090_v23  ;;  %v10787_v24 = vpop.eup %10786 }
 0x7f0   : > { %v6933_v7 = vpop.f32.mrb[204].mxu0  ;;  %v7526_v0 = vsel %vm7216_vm4, %v7338_v18, %v6923_v16  ;;  %10796 = vrcp.f32 %v8089_v9  ;;  %v8091_v43 = vadd.f32 1.0, %v10787_v24  ;;  %v10789_v11 = vpop.eup %10788 }
 0x7f1   : > { %v7095_v48 = vrot.slane %v6933_v7, 7  ;;  %v7312_v44 = vrot.slane %v6933_v7, 1  ;;  %v6935_v58 = vpop.f32.mrb[205].mxu0  ;;  %v7634_v31 = vsel %vm6999_vm5, %v7122_v33, %v7526_v0  ;;  %v8485_v24 = vrot.slane %v10789_v11, %v16976_v29 }
 0x7f2   : > { %v8657_v6 = vsel %vm7649_vm6, %v7634_v31, 0.0  ;;  %10798 = vrcp.f32 %v8091_v43 }
 0x7f3   : > { %8658 = vadd.xlane.f32.xlu1 %v8657_v6  ;;  %v7337_v59 = vsel %vm5064_vm3, %v7311_v8, %v7312_v44  ;;  %v7120_v10 = vsel %vm3479_vm2, %v7094_v37, %v7095_v48 }
 0x7f4   : > { %v6938_v16 = vpop.f32.mrb[206].mxu0  ;;  %v7527_v57 = vsel %vm7216_vm4, %v7337_v59, %v6928_v2  ;;  %v10791_v42 = vpop.eup %10790 }
 0x7f5   : > { %v7096_v32 = vrot.slane %v6938_v16, 7  ;;  %v7313_v61 = vrot.slane %v6938_v16, 1  ;;  %v6940_v49 = vpop.f32.mrb[207].mxu0  ;;  %v7635_v22 = vsel %vm6999_vm5, %v7121_v46, %v7527_v57  ;;  %v10793_v33 = vpop.eup %10792  ;;  %v8489_v27 = vrot.slane %v10791_v42, %v16968_v39 }
 0x7f6   : > { %v8660_v40 = vsel %vm7649_vm6, %v7635_v22, 0.0  ;;  %v8494_v18 = vrot.slane %v10793_v33, %v16984_v38 }
 0x7f7   : > { %8661 = vadd.xlane.f32.xlu0 %v8660_v40  ;;  %v7336_v53 = vsel %vm5064_vm3, %v7312_v44, %v7313_v61  ;;  %v7119_v26 = vsel %vm3479_vm2, %v7095_v48, %v7096_v32 }
 0x7f8   : > { %v6943_v51 = vpop.f32.mrb[208].mxu0  ;;  %v7528_v52 = vsel %vm7216_vm4, %v7336_v53, %v6933_v7 }
 0x7f9   : > { %v7097_v2 = vrot.slane %v6943_v51, 7  ;;  %v7314_v15 = vrot.slane %v6943_v51, 1  ;;  %v6945_v55 = vpop.f32.mrb[209].mxu0  ;;  %v7636_v9 = vsel %vm6999_vm5, %v7120_v10, %v7528_v52  ;;  %v10795_v37 = vpop.eup %10794  ;;  %v8490_v10 = vsel %vm8263_vm7, %v8489_v27, %v8485_v24 }
 0x7fa   : > { %v8663_v8 = vsel %vm7649_vm6, %v7636_v9, 0.0  ;;  %v10797_v3 = vpop.eup %10796  ;;  %v8503_v46 = vrot.slane %v10795_v37, %v16968_v39 }
 0x7fb   : > { %8664 = vadd.xlane.f32.xlu0 %v8663_v8  ;;  %v7335_v23 = vsel %vm5064_vm3, %v7313_v61, %v7314_v15  ;;  %v7118_v62 = vsel %vm3479_vm2, %v7096_v32, %v7097_v2  ;;  %v8499_v6 = vrot.slane %v10797_v3, %v16976_v29  ;;  %v8495_v61 = vsel %vm8270_vm8, %v8494_v18, %v8490_v10 }
 0x7fc   : > { %v6948_v7 = vpop.f32.mrb[210].mxu0  ;;  %v7529_v0 = vsel %vm7216_vm4, %v7335_v23, %v6938_v16  ;;  %v10799_v43 = vpop.eup %10798 }
 0x7fd   : > { %v7098_v48 = vrot.slane %v6948_v7, 7  ;;  %v7315_v44 = vrot.slane %v6948_v7, 1  ;;  %v6950_v58 = vpop.f32.mrb[211].mxu0  ;;  %v7637_v31 = vsel %vm6999_vm5, %v7119_v26, %v7529_v0  ;;  %v8508_v57 = vrot.slane %v10799_v43, %v16984_v38 }
 0x7fe   : > { %v8666_v59 = vsel %vm7649_vm6, %v7637_v31, 0.0  ;;  %v8504_v49 = vsel %vm8263_vm7, %v8503_v46, %v8499_v6 }
 0x7ff   : > { %8667 = vadd.xlane.f32.xlu1 %v8666_v59  ;;  %v7334_v16 = vsel %vm5064_vm3, %v7314_v15, %v7315_v44  ;;  %v7117_v32 = vsel %vm3479_vm2, %v7097_v2, %v7098_v48  ;;  %v8509_v40 = vsel %vm8270_vm8, %v8508_v57, %v8504_v49 }
 0x800   : > { %v6953_v22 = vpop.f32.mrb[212].mxu0  ;;  %v7530_v11 = vsel %vm7216_vm4, %v7334_v16, %v6943_v51  ;;  %v8531_v33 = vsel %vm8510_vm9, %v8509_v40, %v8495_v61 }
 0x801   : > { %v7099_v53 = vrot.slane %v6953_v22, 7  ;;  %v7316_v26 = vrot.slane %v6953_v22, 1  ;;  %v6955_v42 = vpop.f32.mrb[213].mxu0  ;;  %v7638_v52 = vsel %vm6999_vm5, %v7118_v62, %v7530_v11  ;;  %8539 = vst.msk [vmem:[%s17524_s16 + $0x10] sm:$0x3] %vm8538_vm1, %v8531_v33 }
 0x802   : > { %v8669_v2 = vsel %vm7649_vm6, %v7638_v52, 0.0 }
 0x803   : > { %8670 = vadd.xlane.f32.xlu0 %v8669_v2  ;;  %v7333_v15 = vsel %vm5064_vm3, %v7315_v44, %v7316_v26  ;;  %v7116_v51 = vsel %vm3479_vm2, %v7098_v48, %v7099_v53 }
 0x804   : > { %v6958_v55 = vpop.f32.mrb[214].mxu0  ;;  %v7531_v9 = vsel %vm7216_vm4, %v7333_v15, %v6948_v7 }
 0x805   : > { %v7100_v37 = vrot.slane %v6958_v55, 7  ;;  %v7317_v8 = vrot.slane %v6958_v55, 1  ;;  %v6960_v3 = vpop.f32.mrb[215].mxu0  ;;  %v7639_v27 = vsel %vm6999_vm5, %v7117_v32, %v7531_v9 }
 0x806   : > { %v8672_v23 = vsel %vm7649_vm6, %v7639_v27, 0.0 }
 0x807   : > { %8673 = vadd.xlane.f32.xlu0 %v8672_v23  ;;  %v7332_v62 = vsel %vm5064_vm3, %v7316_v26, %v7317_v8  ;;  %v7115_v18 = vsel %vm3479_vm2, %v7099_v53, %v7100_v37  ;;  %v17646_v23 = vpop.xlane.xlu0 %8541 }
 0x808   : > { %v6963_v46 = vpop.f32.mrb[216].mxu0  ;;  %v7532_v0 = vsel %vm7216_vm4, %v7332_v62, %v6953_v22 }
 0x809   : > { %v7101_v7 = vrot.slane %v6963_v46, 7  ;;  %v7318_v24 = vrot.slane %v6963_v46, 1  ;;  %v6965_v48 = vpop.f32.mrb[217].mxu0  ;;  %v7640_v44 = vsel %vm6999_vm5, %v7116_v51, %v7532_v0 }
 0x80a   : > { %v8675_v58 = vsel %vm7649_vm6, %v7640_v44, 0.0 }
 0x80b   : > { %8676 = vadd.xlane.f32.xlu1 %v8675_v58  ;;  %v7331_v31 = vsel %vm5064_vm3, %v7317_v8, %v7318_v24  ;;  %v7114_v43 = vsel %vm3479_vm2, %v7100_v37, %v7101_v7 }
 0x80c   : > { %v6968_v6 = vpop.f32.mrb[218].mxu0  ;;  %v7533_v59 = vsel %vm7216_vm4, %v7331_v31, %v6958_v55 }
 0x80d   : > { %v7102_v10 = vrot.slane %v6968_v6, 7  ;;  %v7319_v57 = vrot.slane %v6968_v6, 1  ;;  %v6970_v16 = vpop.f32.mrb[219].mxu0  ;;  %v7641_v32 = vsel %vm6999_vm5, %v7115_v18, %v7533_v59 }
 0x80e   : > { %v8678_v61 = vsel %vm7649_vm6, %v7641_v32, 0.0 }
 0x80f   : > { %8679 = vadd.xlane.f32.xlu0 %v8678_v61  ;;  %v7330_v49 = vsel %vm5064_vm3, %v7318_v24, %v7319_v57  ;;  %v7113_v22 = vsel %vm3479_vm2, %v7101_v7, %v7102_v10 }
 0x810   : > { %v6973_v11 = vpop.f32.mrb[220].mxu0  ;;  %v7534_v40 = vsel %vm7216_vm4, %v7330_v49, %v6963_v46 }
 0x811   : > { %v7103_v53 = vrot.slane %v6973_v11, 7  ;;  %v7320_v26 = vrot.slane %v6973_v11, 1  ;;  %v6975_v42 = vpop.f32.mrb[221].mxu0  ;;  %v7642_v52 = vsel %vm6999_vm5, %v7114_v43, %v7534_v40 }
 0x812   : > { %v8681_v33 = vsel %vm7649_vm6, %v7642_v52, 0.0 }
 0x813   : > { %8682 = vadd.xlane.f32.xlu0 %v8681_v33  ;;  %v7329_v2 = vsel %vm5064_vm3, %v7319_v57, %v7320_v26  ;;  %v7112_v15 = vsel %vm3479_vm2, %v7102_v10, %v7103_v53  ;;  %v17663_v10 = vpop.xlane.xlu0 %8544 }
 0x814   : > { %v6978_v51 = vpop.f32.mrb[222].mxu0  ;;  %v7535_v55 = vsel %vm7216_vm4, %v7329_v2, %v6968_v6 }
 0x815   : > { %v7104_v9 = vrot.slane %v6978_v51, 7  ;;  %v7321_v37 = vrot.slane %v6978_v51, 1  ;;  %v6980_v8 = vpop.f32.mrb[223].mxu0  ;;  %v7643_v3 = vsel %vm6999_vm5, %v7113_v22, %v7535_v55 }
 0x816   : > { %v8684_v27 = vsel %vm7649_vm6, %v7643_v3, 0.0 }
 0x817   : > { %8685 = vadd.xlane.f32.xlu1 %v8684_v27  ;;  %v7328_v62 = vsel %vm5064_vm3, %v7320_v26, %v7321_v37  ;;  %v7111_v18 = vsel %vm3479_vm2, %v7103_v53, %v7104_v9 }
 0x818   : > { %v6983_v46 = vpop.f32.mrb[224].mxu0  ;;  %v7536_v0 = vsel %vm7216_vm4, %v7328_v62, %v6973_v11 }
 0x819   : > { %v7105_v7 = vrot.slane %v6983_v46, 7  ;;  %v7322_v24 = vrot.slane %v6983_v46, 1  ;;  %v6985_v48 = vpop.f32.mrb[225].mxu0  ;;  %v7644_v44 = vsel %vm6999_vm5, %v7112_v15, %v7536_v0  ;;  %v17677_v15 = vpop.xlane.xlu0 %8547 }
 0x81a   : > { %v8687_v58 = vsel %vm7649_vm6, %v7644_v44, 0.0 }
 0x81b   : > { %8688 = vadd.xlane.f32.xlu0 %v8687_v58  ;;  %v7327_v31 = vsel %vm5064_vm3, %v7321_v37, %v7322_v24  ;;  %v7110_v43 = vsel %vm3479_vm2, %v7104_v9, %v7105_v7 }
 0x81c   : > { %v6988_v6 = vpop.f32.mrb[226].mxu0  ;;  %v7537_v59 = vsel %vm7216_vm4, %v7327_v31, %v6978_v51 }
 0x81d   : > { %v7106_v57 = vrot.slane %v6988_v6, 7  ;;  %v7323_v16 = vrot.slane %v6988_v6, 1  ;;  %v6990_v32 = vpop.f32.mrb[227].mxu0  ;;  %v7645_v61 = vsel %vm6999_vm5, %v7111_v18, %v7537_v59  ;;  %v17703_v4 = vpop.xlane.xlu0 %8550 }
 0x81e   : > { %v8690_v49 = vsel %vm7649_vm6, %v7645_v61, 0.0 }
 0x81f   : > { %8691 = vadd.xlane.f32.xlu1 %v8690_v49  ;;  %v7326_v22 = vsel %vm5064_vm3, %v7322_v24, %v7323_v16  ;;  %v7109_v11 = vsel %vm3479_vm2, %v7105_v7, %v7106_v57 }
 0x820   : > { %v6993_v40 = vpop.f32.mrb[228].mxu0  ;;  %v7538_v53 = vsel %vm7216_vm4, %v7326_v22, %v6983_v46  ;;  %v10129_v46 = vld [vmem:[#allocation2] ss:$0 sm:$0xff] }
 0x821   : > { %v7107_v26 = vrot.slane %v6993_v40, 7  ;;  %v7324_v42 = vrot.slane %v6993_v40, 1  ;;  %v6995_v52 = vpop.f32.mrb[229].mxu0  ;;  %v7646_v33 = vsel %vm6999_vm5, %v7110_v43, %v7538_v53  ;;  %v17706_v18 = vpop.xlane.xlu0 %8556 }
 0x822   : > { %v8693_v2 = vsel %vm7649_vm6, %v7646_v33, 0.0  ;;  %v17725_v43 = vpop.xlane.xlu1 %8553 }
 0x823   : > { %v7432_v51 = vsel %vm5064_vm3, %v7324_v42, %v7217_v17  ;;  %8694 = vadd.xlane.f32.xlu1 %v8693_v2  ;;  %v7215_v55 = vsel %vm3479_vm2, %v7107_v26, %v7000_v19  ;;  %v7325_v9 = vsel %vm5064_vm3, %v7323_v16, %v7324_v42  ;;  %v7108_v37 = vsel %vm3479_vm2, %v7106_v57, %v7107_v26 }
 0x824   : > { %v7540_v8 = vsel %vm7216_vm4, %v7432_v51, %v6993_v40  ;;  %v7541_v3 = vsel %vm6999_vm5, %v7215_v55, %v16234_v41  ;;  %v7539_v17 = vsel %vm7216_vm4, %v7325_v9, %v6988_v6 }
 0x825   : > { %v7650_v60 = vsel %vm7649_vm6, %v7541_v3, 0.0  ;;  %v7647_v19 = vsel %vm6999_vm5, %v7109_v11, %v7539_v17  ;;  %v7648_v27 = vsel %vm6999_vm5, %v7108_v37, %v7540_v8  ;;  %v17709_v0 = vpop.xlane.xlu0 %8559 }
 0x826   : > { %7651 = vadd.xlane.f32.xlu0 %v7650_v60  ;;  %v8696_v62 = vsel %vm7649_vm6, %v7647_v19, 0.0  ;;  %v8699_v41 = vsel %vm7649_vm6, %v7648_v27, 0.0  ;;  %v17729_v59 = vpop.xlane.xlu1 %8571  ;;  %v7826_v60 = vadd.f32 %v16779_v63, %v16827_v28 }
 0x828   : > { %v10079_v27 = vmul.f32 -1.442695, %v7826_v60 }
 0x829   : > { %v17711_v7 = vpop.xlane.xlu0 %8562 }
 0x82a   : > { %8697 = vadd.xlane.f32.xlu0 %v8696_v62  ;;  %v17733_v16 = vpop.xlane.xlu1 %8574  ;;  %10800 = vpow2.f32 %v10079_v27 }
 0x82d   : > { %v17713_v24 = vpop.xlane.xlu0 %8565 }
 0x82e   : > { %8700 = vadd.xlane.f32.xlu0 %v8699_v41  ;;  %v17737_v61 = vpop.xlane.xlu1 %8580  ;;  %v7827_v41 = vadd.f32 %v16779_v63, %v16835_v5 }
 0x830   : > { %v10080_v60 = vmul.f32 -1.442695, %v7827_v41 }
 0x831   : > { %v17715_v56 = vpop.xlane.xlu0 %8568 }
 0x832   : > { %v17741_v22 = vpop.xlane.xlu1 %8583  ;;  %10802 = vpow2.f32 %v10080_v60 }
 0x834   : > { %8709 = vperm.xlu1 %10642, %v10129_v46  }
 0x835   : > { %v17717_v48 = vpop.xlane.xlu0 %8577 }
 0x836   : > { %v17745_v40 = vpop.xlane.xlu1 %8589 }
 0x839   : > { %v17719_v44 = vpop.xlane.xlu0 %8586 }
 0x83a   : > { %v17749_v26 = vpop.xlane.xlu1 %8592 }
 0x83d   : > { %v17721_v58 = vpop.xlane.xlu0 %8595 }
 0x83e   : > { %v17753_v52 = vpop.xlane.xlu1 %8598 }
 0x841   : > { %v17723_v31 = vpop.xlane.xlu0 %8604 }
 0x842   : > { %v17757_v2 = vpop.xlane.xlu1 %8601 }
 0x845   : > { %v17727_v6 = vpop.xlane.xlu0 %8613 }
 0x846   : > { %v17761_v55 = vpop.xlane.xlu1 %8607 }
 0x849   : > { %v17731_v57 = vpop.xlane.xlu0 %8616 }
 0x84a   : > { %v17765_v37 = vpop.xlane.xlu1 %8610 }
 0x84e   : > { %v17769_v3 = vpop.xlane.xlu1 %8619 }
 0x850   : > { %v17735_v32 = vpop.xlane.xlu0 %8622 }
 0x854   : > { %v17739_v49 = vpop.xlane.xlu0 %8625 }
 0x858   : > { %v17743_v11 = vpop.xlane.xlu0 %8628 }
 0x85c   : > { %v17775_v19 = vpop.xlane.xlu1 %8631 }
 0x860   : > { %v17747_v53 = vpop.xlane.xlu0 %8634 }
 0x864   : > { %v17751_v42 = vpop.xlane.xlu0 %8637 }
 0x869   : > { %v17777_v62 = vpop.xlane.xlu1 %8640 }
 0x86a   : > { %19807 = vst [vmem:[#allocation248_spill] sm:$0xff] %v17777_v62 }
 0x86d   : > { %v17755_v33 = vpop.xlane.xlu0 %8643 }
 0x86e   : > { %19802 = vst [vmem:[#allocation3_spill] sm:$0xff] %v17755_v33 }
 0x871   : > { %v17759_v51 = vpop.xlane.xlu0 %8646 }
 0x872   : > { %19803 = vst [vmem:[#allocation103_spill] sm:$0xff] %v17759_v51  ;;  %v7831_v51 = vadd.f32 %v16779_v63, %v16908_v25 }
 0x874   : > { %v17789_v28 = vpop.xlane.xlu1 %8649  ;;  %v10084_v41 = vmul.f32 -1.442695, %v7831_v51 }
 0x878   : > { %v17763_v9 = vpop.xlane.xlu0 %8652 }
 0x879   : > { %19804 = vst [vmem:[#allocation247_spill] sm:$0xff] %v17763_v9  ;;  %v7823_v9 = vadd.f32 %v16779_v63, %v16809_v20  ;;  %v7833_v20 = vadd.f32 %v16779_v63, %v16926_v30 }
 0x87c   : > { %v17767_v8 = vpop.xlane.xlu0 %8655 }
 0x87d   : > { %19805 = vst [vmem:[#allocation4_spill] sm:$0xff] %v17767_v8  ;;  %v7825_v8 = vadd.f32 %v16779_v63, %v16817_v35  ;;  %v10076_v35 = vmul.f32 -1.442695, %v7823_v9 }
 0x87f   : > { %v10078_v5 = vmul.f32 -1.442695, %v7825_v8  ;;  %v7837_v8 = vadd.f32 %v16779_v63, %v17018_v13  ;;  %v7843_v13 = vadd.f32 %v16779_v63, %v17135_v12 }
 0x880   : > { %v17801_v27 = vpop.xlane.xlu1 %8658 }
 0x881   : > { %10804 = vpow2.f32 %v10078_v5  ;;  %v10090_v51 = vmul.f32 -1.442695, %v7837_v8 }
 0x882   : > { %10806 = vpow2.f32 %v10076_v35  ;;  %v7845_v35 = vadd.f32 %v16779_v63, %v17151_v21 }
 0x884   : > { %v17771_v17 = vpop.xlane.xlu0 %8661  ;;  %v10098_v8 = vmul.f32 -1.442695, %v7845_v35 }
 0x885   : > { %19806 = vst [vmem:[#allocation107_spill] sm:$0xff] %v17771_v17  ;;  %v7824_v17 = vadd.f32 %v16779_v63, %v16795_v34  ;;  %v7838_v34 = vadd.f32 %v16779_v63, %v17024_v1  ;;  %v7839_v1 = vadd.f32 %v16779_v63, %v17031_v47 }
 0x887   : > { %v10077_v62 = vmul.f32 -1.442695, %v7824_v17  ;;  %v10091_v9 = vmul.f32 -1.442695, %v7838_v34  ;;  %v10801_v17 = vpop.eup %10800 }
 0x888   : > { %v17781_v46 = vpop.xlane.xlu0 %8664  ;;  %v8042_v5 = vadd.f32 1.0, %v10801_v17  ;;  %v10803_v34 = vpop.eup %10802 }
 0x889   : > { %19808 = vst [vmem:[#allocation39_spill] sm:$0xff] %v17781_v46  ;;  %v7832_v46 = vadd.f32 %v16779_v63, %v16917_v54  ;;  %10808 = vpow2.f32 %v10077_v62 }
 0x88a   : > { %10810 = vpow2.f32 %v10084_v41  ;;  %v10096_v41 = vmul.f32 -1.442695, %v7843_v13 }
 0x88b   : > { %v10085_v25 = vmul.f32 -1.442695, %v7832_v46  ;;  %v7844_v46 = vadd.f32 %v16779_v63, %v17149_v45 }
 0x88c   : > { %v17807_v30 = vpop.xlane.xlu1 %8667 }
 0x88d   : > { %10812 = vpow2.f32 %v10085_v25  ;;  %v10097_v47 = vmul.f32 -1.442695, %v7844_v46 }
 0x890   : > { %v17793_v33 = vpop.xlane.xlu0 %8670 }
 0x891   : > { %19809 = vst [vmem:[#allocation111_spill] sm:$0xff] %v17793_v33  ;;  %v10086_v33 = vmul.f32 -1.442695, %v7833_v20  ;;  %v10092_v20 = vmul.f32 -1.442695, %v7839_v1 }
 0x893   : > { %10814 = vpow2.f32 %v10086_v33  ;;  %v10805_v33 = vpop.eup %10804 }
 0x894   : > { %v17805_v54 = vpop.xlane.xlu0 %8673  ;;  %10816 = vpow2.f32 %v10091_v9  ;;  %v10807_v45 = vpop.eup %10806 }
 0x895   : > { %10818 = vpow2.f32 %v10090_v51  ;;  %v10809_v12 = vpop.eup %10808  ;;  %v8039_v1 = vadd.f32 1.0, %v10807_v45 }
 0x896   : > { %10820 = vrcp.f32 %v8042_v5  ;;  %v10811_v17 = vpop.eup %10810  ;;  %v8040_v13 = vadd.f32 1.0, %v10809_v12 }
 0x897   : > { %10822 = vpow2.f32 %v10092_v20  ;;  %v10813_v21 = vpop.eup %10812  ;;  %v8047_v35 = vadd.f32 1.0, %v10811_v17 }
 0x898   : > { %v17817_v62 = vpop.xlane.xlu1 %8676  ;;  %10824 = vpow2.f32 %v10097_v47 }
 0x899   : > { %19811 = vst [vmem:[#allocation5_spill] sm:$0xff] %v17817_v62  ;;  %v8041_v62 = vadd.f32 1.0, %v10805_v33  ;;  %10826 = vpow2.f32 %v10096_v41 }
 0x89a   : > { %10828 = vpow2.f32 %v10098_v8 }
 0x89c   : > { %v17813_v60 = vpop.xlane.xlu0 %8679 }
 0x89d   : > { %19810 = vst [vmem:[#allocation250_spill] sm:$0xff] %v17813_v60  ;;  %v8043_v60 = vadd.f32 1.0, %v10803_v34  ;;  %v10815_v46 = vpop.eup %10814 }
 0x89e   : > { %v10817_v5 = vpop.eup %10816  ;;  %v8049_v20 = vadd.f32 1.0, %v10815_v46 }
 0x89f   : > { %10830 = vrcp.f32 %v8043_v60  ;;  %v10819_v34 = vpop.eup %10818  ;;  %v8054_v47 = vadd.f32 1.0, %v10817_v5 }
 0x8a0   : > { %v17823_v9 = vpop.xlane.xlu0 %8682  ;;  %10832 = vrcp.f32 %v8041_v62  ;;  %v10821_v12 = vpop.eup %10820 }
 0x8a1   : > { %19813 = vst [vmem:[#allocation251_spill] sm:$0xff] %v17823_v9  ;;  %v8048_v9 = vadd.f32 1.0, %v10813_v21  ;;  %10834 = vrcp.f32 %v8039_v1  ;;  %v10823_v8 = vpop.eup %10822 }
 0x8a2   : > { %10836 = vrcp.f32 %v8040_v13  ;;  %v10825_v17 = vpop.eup %10824  ;;  %v8055_v1 = vadd.f32 1.0, %v10823_v8 }
 0x8a3   : > { %10838 = vrcp.f32 %v8047_v35  ;;  %v10827_v62 = vpop.eup %10826  ;;  %v8060_v13 = vadd.f32 1.0, %v10825_v17 }
 0x8a4   : > { %v17821_v25 = vpop.xlane.xlu1 %8685  ;;  %10840 = vrcp.f32 %v8048_v9  ;;  %v10829_v21 = vpop.eup %10828  ;;  %v8279_v9 = vrot.slane %v10821_v12, %v16968_v39 }
 0x8a5   : > { %19812 = vst [vmem:[#allocation249_spill] sm:$0xff] %v17821_v25  ;;  %10842 = vrcp.f32 %v8049_v20  ;;  %v8061_v20 = vadd.f32 1.0, %v10829_v21 }
 0x8a6   : > { %10844 = vrcp.f32 %v8054_v47 }
 0x8a8   : > { %v17827_v25 = vpop.xlane.xlu0 %8688 }
 0x8a9   : > { %19815 = vst [vmem:[#allocation119_spill] sm:$0xff] %v17827_v25  ;;  %v10831_v46 = vpop.eup %10830  ;;  %v8059_v25 = vadd.f32 1.0, %v10827_v62 }
 0x8aa   : > { %v10833_v35 = vpop.eup %10832  ;;  %v8284_v47 = vrot.slane %v10831_v46, %v16984_v38 }
 0x8ab   : > { %v8275_v8 = vrot.slane %v10833_v35, %v16976_v29 }
 0x8ac   : > { %v17825_v51 = vpop.xlane.xlu1 %8691 }
 0x8ad   : > { %19814 = vst [vmem:[#allocation47_spill] sm:$0xff] %v17825_v51  ;;  %v8053_v51 = vadd.f32 1.0, %v10819_v34 }
 0x8b0   : > { %v17829_v41 = vpop.xlane.xlu1 %8694 }
 0x8b3   : > { %v7652_v33 = vpop.xlane.xlu0 %7651 }
 0x8b4   : > { %v7822_v45 = vadd.f32 %v16779_v63, %v7652_v33  ;;  %v17832_v5 = vpop.permute.xlu1 %8709  ;;  %v17834_v63 = vpop.eup %10834 }
 0x8b5   : > { %v17837_v34 = vpop.eup %10836  ;;  %v8712_v33 = vadd.f32 %v17832_v5, %v17646_v23  ;;  %v8715_v62 = vadd.f32 %v17832_v5, %v17703_v4 }
 0x8b6   : > { %v10075_v60 = vmul.f32 -1.442695, %v7822_v45  ;;  %v10839_v45 = vpop.eup %10838 }
 0x8b7   : > { %v10841_v12 = vpop.eup %10840  ;;  %v8303_v17 = vrot.slane %v10839_v45, %v16976_v29 }
 0x8b8   : > { %10846 = vpow2.f32 %v10075_v60  ;;  %v8714_v60 = vadd.f32 %v17832_v5, %v17677_v15  ;;  %v10843_v21 = vpop.eup %10842  ;;  %v8307_v23 = vrot.slane %v10841_v12, %v16968_v39 }
 0x8b9   : > { %10848 = vrcp.f32 %v8053_v51  ;;  %v8713_v51 = vadd.f32 %v17832_v5, %v17663_v10  ;;  %v8280_v10 = vsel %vm8263_vm7, %v8279_v9, %v8275_v8  ;;  %v10845_v46 = vpop.eup %10844  ;;  %v8718_v9 = vadd.f32 %v17832_v5, %v17709_v0 }
 0x8ba   : > { %10850 = vrcp.f32 %v8055_v1  ;;  %v8716_v1 = vadd.f32 %v17832_v5, %v17725_v43  ;;  %v17857_v15 = vsel %vm8270_vm8, %v8284_v47, %v8280_v10  ;;  %v8719_v43 = vadd.f32 %v17832_v5, %v17711_v7 }
 0x8bb   : > { %10852 = vrcp.f32 %v8060_v13  ;;  %v10130_v13 = vmul.f32 -1.442695, %v8712_v33  ;;  %v10131_v35 = vmul.f32 -1.442695, %v8713_v51  ;;  %v10133_v47 = vmul.f32 -1.442695, %v8715_v62 }
 0x8bc   : > { %10854 = vrcp.f32 %v8059_v25  ;;  %v8717_v25 = vadd.f32 %v17832_v5, %v17706_v18  ;;  %v8312_v18 = vrot.slane %v10843_v21, %v16984_v38  ;;  %v8720_v33 = vadd.f32 %v17832_v5, %v17713_v24 }
 0x8bd   : > { %10856 = vrcp.f32 %v8061_v20  ;;  %v10132_v20 = vmul.f32 -1.442695, %v8714_v60  ;;  %v10134_v51 = vmul.f32 -1.442695, %v8716_v1  ;;  %v8335_v45 = vrot.slane %v10845_v46, %v16968_v39 }
 0x8be   : > { %10858 = vpow2.f32 %v10130_v13  ;;  %v8721_v0 = vadd.f32 %v17832_v5, %v17715_v56  ;;  %v10135_v60 = vmul.f32 -1.442695, %v8717_v25  ;;  %v8308_v12 = vsel %vm8263_vm7, %v8307_v23, %v8303_v17 }
 0x8bf   : > { %10860 = vpow2.f32 %v10131_v35  ;;  %v8722_v7 = vadd.f32 %v17832_v5, %v17729_v59  ;;  %v10136_v62 = vmul.f32 -1.442695, %v8718_v9  ;;  %v8723_v24 = vadd.f32 %v17832_v5, %v17733_v16 }
 0x8c0   : > { %v10137_v1 = vmul.f32 -1.442695, %v8719_v43  ;;  %v17880_v35 = vsel %vm8270_vm8, %v8312_v18, %v8308_v12  ;;  %v8724_v56 = vadd.f32 %v17832_v5, %v17717_v48  ;;  %v10138_v17 = vmul.f32 -1.442695, %v8720_v33 }
 0x8c1   : > { %v8725_v25 = vadd.f32 %v17832_v5, %v17737_v61  ;;  %v8727_v43 = vadd.f32 %v17832_v5, %v17719_v44  ;;  %v8728_v61 = vadd.f32 %v17832_v5, %v17745_v40 }
 0x8c2   : > { %v10847_v4 = vpop.eup %10846  ;;  %v10142_v18 = vmul.f32 -1.442695, %v8724_v56  ;;  %v8733_v56 = vadd.f32 %v17832_v5, %v17723_v31 }
 0x8c3   : > { %v8038_v8 = vadd.f32 1.0, %v10847_v4  ;;  %v10849_v10 = vpop.eup %10848  ;;  %v10139_v4 = vmul.f32 -1.442695, %v8721_v0 }
 0x8c4   : > { %v10851_v21 = vpop.eup %10850  ;;  %v8331_v13 = vrot.slane %v10849_v10, %v16976_v29 }
 0x8c5   : > { %10862 = vrcp.f32 %v8038_v8  ;;  %v10853_v46 = vpop.eup %10852  ;;  %v8340_v9 = vrot.slane %v10851_v21, %v16984_v38  ;;  %v10140_v8 = vmul.f32 -1.442695, %v8722_v7  ;;  %v10145_v21 = vmul.f32 -1.442695, %v8727_v43 }
 0x8c6   : > { %10864 = vpow2.f32 %v10132_v20  ;;  %v10855_v59 = vpop.eup %10854  ;;  %v8336_v23 = vsel %vm8263_vm7, %v8335_v45, %v8331_v13  ;;  %v8726_v20 = vadd.f32 %v17832_v5, %v17741_v22  ;;  %v8363_v48 = vrot.slane %v10853_v46, %v16968_v39 }
 0x8c7   : > { %10866 = vpow2.f32 %v10133_v47  ;;  %v10857_v16 = vpop.eup %10856  ;;  %v10141_v47 = vmul.f32 -1.442695, %v8723_v24  ;;  %v8359_v10 = vrot.slane %v10855_v59, %v16976_v29  ;;  %v10143_v45 = vmul.f32 -1.442695, %v8725_v25 }
 0x8c8   : > { %10868 = vpow2.f32 %v10134_v51  ;;  %v17896_v33 = vpop.eup %10858  ;;  %v8368_v22 = vrot.slane %v10857_v16, %v16984_v38  ;;  %v8729_v51 = vadd.f32 %v17832_v5, %v17749_v26  ;;  %v8341_v44 = vsel %vm8270_vm8, %v8340_v9, %v8336_v23 }
 0x8c9   : > { %10870 = vpow2.f32 %v10135_v60  ;;  %v17901_v0 = vpop.eup %10860  ;;  %v8730_v60 = vadd.f32 %v17832_v5, %v17721_v58  ;;  %v10144_v40 = vmul.f32 -1.442695, %v8726_v20  ;;  %v8364_v7 = vsel %vm8263_vm7, %v8363_v48, %v8359_v10 }
 0x8ca   : > { %10872 = vpow2.f32 %v10136_v62  ;;  %v8731_v62 = vadd.f32 %v17832_v5, %v17753_v52  ;;  %v8732_v24 = vadd.f32 %v17832_v5, %v17757_v2  ;;  %v8369_v46 = vsel %vm8270_vm8, %v8368_v22, %v8364_v7 }
 0x8cb   : > { %10874 = vpow2.f32 %v10137_v1  ;;  %v10146_v1 = vmul.f32 -1.442695, %v8728_v61  ;;  %v10147_v52 = vmul.f32 -1.442695, %v8729_v51  ;;  %v19816_v59 = vrot.slane %v17834_v63, %v16968_v39 }
 0x8cc   : > { %10876 = vpow2.f32 %v10138_v17  ;;  %v8734_v2 = vadd.f32 %v17832_v5, %v17761_v55  ;;  %v10148_v25 = vmul.f32 -1.442695, %v8730_v60  ;;  %v19817_v16 = vrot.slane %v17837_v34, %v16984_v38 }
 0x8cd   : > { %10878 = vpow2.f32 %v10139_v4  ;;  %v8735_v9 = vadd.f32 %v17832_v5, %v17765_v37  ;;  %v10149_v20 = vmul.f32 -1.442695, %v8731_v62  ;;  %v8736_v55 = vadd.f32 %v17832_v5, %v17727_v6 }
 0x8ce   : > { %10880 = vpow2.f32 %v10140_v8  ;;  %v10150_v48 = vmul.f32 -1.442695, %v8732_v24  ;;  %v8737_v37 = vadd.f32 %v17832_v5, %v17731_v57  ;;  %v8738_v6 = vadd.f32 %v17832_v5, %v17769_v3 }
 0x8cf   : > { %v10863_v12 = vpop.eup %10862  ;;  %10882 = vpow2.f32 %v10141_v47  ;;  %v10151_v47 = vmul.f32 -1.442695, %v8733_v56  ;;  %v10152_v61 = vmul.f32 -1.442695, %v8734_v2  ;;  %v8739_v57 = vadd.f32 %v17832_v5, %v17735_v32 }
 0x8d0   : > { %v17909_v26 = vpop.eup %10864  ;;  %v8257_v13 = vrot.slane %v10863_v12, %v16976_v29  ;;  %10884 = vpow2.f32 %v10142_v18  ;;  %v10153_v22 = vmul.f32 -1.442695, %v8735_v9  ;;  %v8740_v3 = vadd.f32 %v17832_v5, %v17739_v49 }
 0x8d1   : > { %v17914_v58 = vpop.eup %10866  ;;  %10886 = vpow2.f32 %v10143_v45  ;;  %v10154_v45 = vmul.f32 -1.442695, %v8736_v55  ;;  %v8741_v32 = vadd.f32 %v17832_v5, %v17743_v11  ;;  %v10156_v49 = vmul.f32 -1.442695, %v8738_v6  ;;  %v19821_v55 = vld [vmem:[#allocation247_spill] sm:$0xff] }
 0x8d2   : > { %v17919_v17 = vpop.eup %10868  ;;  %v8264_v23 = vsel %vm8263_vm7, %v19816_v59, %v8257_v13  ;;  %10888 = vpow2.f32 %v10144_v40  ;;  %v10155_v40 = vmul.f32 -1.442695, %v8737_v37  ;;  %v10157_v11 = vmul.f32 -1.442695, %v8739_v57  ;;  %v19819_v59 = vld [vmem:[#allocation3_spill] sm:$0xff] }
 0x8d3   : > { %v17927_v4 = vpop.eup %10870  ;;  %v8271_v31 = vsel %vm8270_vm8, %v19817_v16, %v8264_v23  ;;  %10890 = vpow2.f32 %v10145_v21  ;;  %v8744_v13 = vadd.f32 %v17832_v5, %v17751_v42  ;;  %v10158_v24 = vmul.f32 -1.442695, %v8740_v3 }
 0x8d4   : > { %v17935_v63 = vpop.eup %10872  ;;  %v8511_v8 = vsel %vm8510_vm9, %v17857_v15, %v8271_v31  ;;  %10892 = vpow2.f32 %v10146_v1  ;;  %v10159_v56 = vmul.f32 -1.442695, %v8741_v32  ;;  %v8748_v9 = vadd.f32 %v17832_v5, %v17789_v28 }
 0x8d5   : > { %v17941_v43 = vpop.eup %10874  ;;  %v8513_v34 = vsel %vm8512_vm10, %v17004_v50, %v8511_v8  ;;  %10894 = vpow2.f32 %v10147_v52  ;;  %v8751_v28 = vadd.f32 %v17832_v5, %v17801_v27  ;;  %v8754_v27 = vadd.f32 %v17832_v5, %v17807_v30 }
 0x8d6   : > { %v17947_v10 = vpop.eup %10876  ;;  %v8515_v15 = vsel %vm8514_vm11, %v17880_v35, %v8513_v34  ;;  %10896 = vpow2.f32 %v10148_v25  ;;  %v19820_v25 = vld [vmem:[#allocation103_spill] sm:$0xff]  ;;  %v10166_v3 = vmul.f32 -1.442695, %v8748_v9 }
 0x8d7   : > { %v17953_v18 = vpop.eup %10878  ;;  %v8517_v50 = vsel %vm8516_vm12, %v17077_v14, %v8515_v15  ;;  %10898 = vpow2.f32 %v10149_v20  ;;  %v8747_v42 = vadd.f32 %v17832_v5, %v19820_v25  ;;  %v10162_v20 = vmul.f32 -1.442695, %v8744_v13  ;;  %v19827_v25 = vld [vmem:[#allocation250_spill] sm:$0xff] }
 0x8d8   : > { %v17959_v51 = vpop.eup %10880  ;;  %v8519_v35 = vsel %vm8518_vm13, %v8341_v44, %v8517_v50  ;;  %10900 = vpow2.f32 %v10150_v48  ;;  %v8742_v44 = vadd.f32 %v17832_v5, %v17775_v19  ;;  %v19818_v19 = vld [vmem:[#allocation248_spill] sm:$0xff]  ;;  %v8749_v48 = vadd.f32 %v17832_v5, %v19821_v55 }
 0x8d9   : > { %v17964_v60 = vpop.eup %10882  ;;  %v8521_v14 = vsel %vm8520_vm14, %v17140_v36, %v8519_v35  ;;  %10902 = vpow2.f32 %v10151_v47  ;;  %v8743_v36 = vadd.f32 %v17832_v5, %v17747_v53  ;;  %v8746_v53 = vadd.f32 %v17832_v5, %v19819_v59  ;;  %v19822_v47 = vld [vmem:[#allocation4_spill] sm:$0xff]  ;;  %v19826_v59 = vld [vmem:[#allocation5_spill] sm:$0xff] }
 0x8da   : > { %v17970_v12 = vpop.eup %10884  ;;  %v8523_v7 = vsel %vm8522_vm15, %v8369_v46, %v8521_v14  ;;  %10904 = vpow2.f32 %v10152_v61  ;;  %v8745_v46 = vadd.f32 %v17832_v5, %v19818_v19  ;;  %v10160_v23 = vmul.f32 -1.442695, %v8742_v44  ;;  %v19824_v14 = vld [vmem:[#allocation39_spill] sm:$0xff] }
 0x8db   : > { %v17975_v62 = vpop.eup %10886  ;;  %8536 = vst.msk [vmem:[%s17524_s16] sm:$0xff] %vm8535_vm0, %v8523_v7  ;;  %10906 = vpow2.f32 %v10153_v22  ;;  %v10161_v16 = vmul.f32 -1.442695, %v8743_v36  ;;  %v8750_v15 = vadd.f32 %v17832_v5, %v19822_v47  ;;  %v10164_v6 = vmul.f32 -1.442695, %v8746_v53  ;;  %v19823_v22 = vld [vmem:[#allocation107_spill] sm:$0xff] }
 0x8dc   : > { %v17981_v21 = vpop.eup %10888  ;;  %10908 = vpow2.f32 %v10154_v45  ;;  %v10163_v34 = vmul.f32 -1.442695, %v8745_v46  ;;  %v10165_v50 = vmul.f32 -1.442695, %v8747_v42  ;;  %v8752_v35 = vadd.f32 %v17832_v5, %v19823_v22  ;;  %v19825_v36 = vld [vmem:[#allocation111_spill] sm:$0xff] }
 0x8dd   : > { %v17985_v1 = vpop.eup %10890  ;;  %10910 = vpow2.f32 %v10155_v40  ;;  %v8753_v32 = vadd.f32 %v17832_v5, %v19824_v14  ;;  %v10167_v40 = vmul.f32 -1.442695, %v8749_v48  ;;  %v10168_v44 = vmul.f32 -1.442695, %v8750_v15 }
 0x8de   : > { %v17989_v52 = vpop.eup %10892  ;;  %10912 = vpow2.f32 %v10156_v49  ;;  %v10169_v13 = vmul.f32 -1.442695, %v8751_v28  ;;  %v8756_v19 = vadd.f32 %v17832_v5, %v17805_v54  ;;  %v10170_v46 = vmul.f32 -1.442695, %v8752_v35 }
 0x8df   : > { %v17993_v2 = vpop.eup %10894  ;;  %10914 = vpow2.f32 %v10157_v11  ;;  %v8755_v11 = vadd.f32 %v17832_v5, %v19825_v36  ;;  %v8757_v30 = vadd.f32 %v17832_v5, %v19826_v59  ;;  %v10171_v53 = vmul.f32 -1.442695, %v8753_v32 }
 0x8e0   : > { %v17997_v31 = vpop.eup %10896  ;;  %10916 = vpow2.f32 %v10158_v24  ;;  %v8758_v42 = vadd.f32 %v17832_v5, %v19827_v25  ;;  %v8929_v32 = vadd.f32 1.0, %v17901_v0  ;;  %v8931_v36 = vadd.f32 1.0, %v17914_v58 }
 0x8e1   : > { %v18001_v8 = vpop.eup %10898  ;;  %10918 = vpow2.f32 %v10159_v56  ;;  %v10173_v55 = vmul.f32 -1.442695, %v8755_v11  ;;  %v10175_v15 = vmul.f32 -1.442695, %v8757_v30  ;;  %v8935_v59 = vadd.f32 1.0, %v17941_v43 }
 0x8e2   : > { %v18005_v37 = vpop.eup %10900  ;;  %10920 = vpow2.f32 %v10160_v23  ;;  %v10176_v28 = vmul.f32 -1.442695, %v8758_v42  ;;  %v8939_v43 = vadd.f32 1.0, %v17964_v60 }
 0x8e3   : > { %v18009_v61 = vpop.eup %10902  ;;  %10922 = vpow2.f32 %v10161_v16  ;;  %v10172_v16 = vmul.f32 -1.442695, %v8754_v27  ;;  %v8930_v27 = vadd.f32 1.0, %v17909_v26 }
 0x8e4   : > { %v18013_v57 = vpop.eup %10904  ;;  %10924 = vpow2.f32 %v10162_v20  ;;  %v19828_v20 = vld [vmem:[#allocation251_spill] sm:$0xff] }
 0x8e5   : > { %v18017_v45 = vpop.eup %10906  ;;  %10926 = vpow2.f32 %v10163_v34  ;;  %v8759_v54 = vadd.f32 %v17832_v5, %v19828_v20  ;;  %v10174_v34 = vmul.f32 -1.442695, %v8756_v19  ;;  %v8933_v19 = vadd.f32 1.0, %v17927_v4 }
 0x8e6   : > { %v18021_v7 = vpop.eup %10908  ;;  %10928 = vpow2.f32 %v10164_v6  ;;  %v8937_v4 = vadd.f32 1.0, %v17953_v18  ;;  %v8698_v18 = vpop.xlane.xlu0 %8697 }
 0x8e7   : > { %v18025_v49 = vpop.eup %10910  ;;  %10930 = vpow2.f32 %v10165_v50  ;;  %v10177_v22 = vmul.f32 -1.442695, %v8759_v54  ;;  %v8941_v54 = vadd.f32 1.0, %v17975_v62 }
 0x8e8   : > { %v18029_v24 = vpop.eup %10912  ;;  %10932 = vpow2.f32 %v10166_v3  ;;  %v8928_v3 = vadd.f32 1.0, %v17896_v33 }
 0x8e9   : > { %v18033_v56 = vpop.eup %10914  ;;  %10934 = vpow2.f32 %v10167_v40 }
 0x8ea   : > { %v18037_v23 = vpop.eup %10916  ;;  %10936 = vpow2.f32 %v10168_v44 }
 0x8eb   : > { %v18041_v9 = vpop.eup %10918  ;;  %10938 = vpow2.f32 %v10169_v13  ;;  %v8932_v13 = vadd.f32 1.0, %v17919_v17  ;;  %v8936_v17 = vadd.f32 1.0, %v17947_v10  ;;  %v8940_v10 = vadd.f32 1.0, %v17970_v12 }
 0x8ec   : > { %v18045_v48 = vpop.eup %10920  ;;  %10940 = vpow2.f32 %v10170_v46  ;;  %v8934_v46 = vadd.f32 1.0, %v17935_v63  ;;  %v8938_v63 = vadd.f32 1.0, %v17959_v51 }
 0x8ed   : > { %v18047_v47 = vpop.eup %10922  ;;  %10942 = vpow2.f32 %v10171_v53 }
 0x8ee   : > { %v18049_v6 = vpop.eup %10924  ;;  %10944 = vpow2.f32 %v10172_v16  ;;  %v8763_v16 = vadd.f32 %v17832_v5, %v17829_v41  ;;  %v8944_v41 = vadd.f32 1.0, %v17989_v52 }
 0x8ef   : > { %v18051_v50 = vpop.eup %10926  ;;  %10946 = vpow2.f32 %v10173_v55  ;;  %v8942_v55 = vadd.f32 1.0, %v17981_v21  ;;  %v8945_v21 = vadd.f32 1.0, %v17993_v2 }
 0x8f0   : > { %v18053_v35 = vpop.eup %10928  ;;  %10948 = vpow2.f32 %v10174_v34  ;;  %v8943_v34 = vadd.f32 1.0, %v17985_v1  ;;  %v18103_v62 = vmul.f32 -1.442695, %v8763_v16  ;;  %v19829_v1 = vld [vmem:[#allocation249_spill] sm:$0xff]  ;;  %v8949_v16 = vadd.f32 1.0, %v18009_v61 }
 0x8f1   : > { %v18056_v14 = vpop.eup %10930  ;;  %10950 = vpow2.f32 %v10175_v15  ;;  %v8764_v15 = vadd.f32 %v17832_v5, %v8698_v18 }
 0x8f2   : > { %v18059_v40 = vpop.eup %10932  ;;  %10952 = vpow2.f32 %v10176_v28 }
 0x8f3   : > { %v18062_v44 = vpop.eup %10934  ;;  %10954 = vpow2.f32 %v10177_v22 }
 0x8f4   : > { %v18065_v11 = vpop.eup %10936  ;;  %10956 = vrcp.f32 %v8928_v3 }
 0x8f5   : > { %v18068_v33 = vpop.eup %10938  ;;  %10958 = vrcp.f32 %v8929_v32 }
 0x8f6   : > { %v18071_v0 = vpop.eup %10940  ;;  %10960 = vrcp.f32 %v8930_v27  ;;  %v18109_v27 = vadd.f32 %v17832_v5, %v19829_v1  ;;  %v8954_v1 = vadd.f32 1.0, %v18029_v24 }
 0x8f7   : > { %v18074_v26 = vpop.eup %10942  ;;  %10962 = vrcp.f32 %v8931_v36 }
 0x8f8   : > { %v18077_v58 = vpop.eup %10944  ;;  %10964 = vrcp.f32 %v8932_v13  ;;  %v8946_v13 = vadd.f32 1.0, %v17997_v31 }
 0x8f9   : > { %v18080_v30 = vpop.eup %10946  ;;  %10966 = vrcp.f32 %v8933_v19 }
 0x8fa   : > { %v18083_v53 = vpop.eup %10948  ;;  %10968 = vrcp.f32 %v8934_v46 }
 0x8fb   : > { %v18086_v25 = vpop.eup %10950  ;;  %10970 = vrcp.f32 %v8935_v59  ;;  %v8947_v59 = vadd.f32 1.0, %v18001_v8 }
 0x8fc   : > { %v18089_v42 = vpop.eup %10952  ;;  %10972 = vrcp.f32 %v8936_v17  ;;  %v18116_v17 = vmul.f32 -1.442695, %v8764_v15 }
 0x8fd   : > { %v18094_v20 = vpop.eup %10954  ;;  %10974 = vrcp.f32 %v8937_v4 }
 0x8fe   : > { %v10957_v51 = vpop.eup %10956  ;;  %10976 = vrcp.f32 %v8938_v63  ;;  %v8948_v63 = vadd.f32 1.0, %v18005_v37 }
 0x8ff   : > { %v10959_v60 = vpop.eup %10958  ;;  %10978 = vrcp.f32 %v8939_v43  ;;  %v9147_v12 = vrot.slane %v10957_v51, %v16976_v29  ;;  %v8950_v51 = vadd.f32 1.0, %v18013_v57 }
 0x900   : > { %v10961_v28 = vpop.eup %10960  ;;  %10980 = vrcp.f32 %v8940_v10  ;;  %v9151_v22 = vrot.slane %v10959_v60, %v16968_v39 }
 0x901   : > { %v10963_v3 = vpop.eup %10962  ;;  %10982 = vrcp.f32 %v8941_v54  ;;  %v9156_v32 = vrot.slane %v10961_v28, %v16984_v38  ;;  %v8952_v28 = vadd.f32 1.0, %v18021_v7 }
 0x902   : > { %v10965_v36 = vpop.eup %10964  ;;  %10984 = vrcp.f32 %v8942_v55  ;;  %v9152_v52 = vsel %vm8263_vm7, %v9151_v22, %v9147_v12  ;;  %v9161_v19 = vrot.slane %v10963_v3, %v16976_v29  ;;  %v8953_v3 = vadd.f32 1.0, %v18025_v49 }
 0x903   : > { %v10967_v46 = vpop.eup %10966  ;;  %10986 = vrcp.f32 %v8943_v34  ;;  %v9165_v2 = vrot.slane %v10965_v36, %v16968_v39  ;;  %v9157_v43 = vsel %vm8270_vm8, %v9156_v32, %v9152_v52  ;;  %v8951_v34 = vadd.f32 1.0, %v18017_v45 }
 0x904   : > { %v10969_v4 = vpop.eup %10968  ;;  %10988 = vrcp.f32 %v8944_v41  ;;  %v9170_v31 = vrot.slane %v10967_v46, %v16984_v38  ;;  %v8955_v52 = vadd.f32 1.0, %v18033_v56 }
 0x905   : > { %v10971_v10 = vpop.eup %10970  ;;  %10990 = vrcp.f32 %v8945_v21  ;;  %v9166_v18 = vsel %vm8263_vm7, %v9165_v2, %v9161_v19  ;;  %v9175_v8 = vrot.slane %v10969_v4, %v16976_v29 }
 0x906   : > { %v10973_v54 = vpop.eup %10972  ;;  %10992 = vrcp.f32 %v8946_v13  ;;  %v9171_v55 = vsel %vm8270_vm8, %v9170_v31, %v9166_v18  ;;  %v9179_v37 = vrot.slane %v10971_v10, %v16968_v39  ;;  %v8958_v10 = vadd.f32 1.0, %v18045_v48 }
 0x907   : > { %v10975_v60 = vpop.eup %10974  ;;  %10994 = vrcp.f32 %v8947_v59  ;;  %v9184_v12 = vrot.slane %v10973_v54, %v16984_v38  ;;  %v9396_v61 = vsel %vm8510_vm9, %v9171_v55, %v9157_v43  ;;  %v8956_v59 = vadd.f32 1.0, %v18037_v23 }
 0x908   : > { %v10977_v15 = vpop.eup %10976  ;;  %10996 = vrcp.f32 %v8948_v63  ;;  %v9180_v41 = vsel %vm8263_vm7, %v9179_v37, %v9175_v8  ;;  %v9189_v57 = vrot.slane %v10975_v60, %v16976_v29  ;;  %v8957_v63 = vadd.f32 1.0, %v18041_v9 }
 0x909   : > { %v10979_v22 = vpop.eup %10978  ;;  %10998 = vrcp.f32 %v8949_v16  ;;  %v9185_v21 = vsel %vm8270_vm8, %v9184_v12, %v9180_v41  ;;  %v9193_v45 = vrot.slane %v10977_v15, %v16968_v39  ;;  %v8959_v8 = vadd.f32 1.0, %v18047_v47 }
 0x90a   : > { %v10981_v32 = vpop.eup %10980  ;;  %11000 = vrcp.f32 %v8950_v51  ;;  %v9198_v36 = vrot.slane %v10979_v22, %v16984_v38  ;;  %v9397_v7 = vsel %vm8512_vm10, %v9185_v21, %v9396_v61  ;;  %v8960_v55 = vadd.f32 1.0, %v18049_v6 }
 0x90b   : > { %v10983_v13 = vpop.eup %10982  ;;  %11002 = vrcp.f32 %v8951_v34  ;;  %v9194_v19 = vsel %vm8263_vm7, %v9193_v45, %v9189_v57  ;;  %v9203_v49 = vrot.slane %v10981_v32, %v16976_v29  ;;  %v8961_v34 = vadd.f32 1.0, %v18051_v50 }
 0x90c   : > { %v10985_v46 = vpop.eup %10984  ;;  %11004 = vrcp.f32 %v8952_v28  ;;  %v9199_v2 = vsel %vm8270_vm8, %v9198_v36, %v9194_v19  ;;  %v9207_v24 = vrot.slane %v10983_v13, %v16968_v39  ;;  %v8962_v15 = vadd.f32 1.0, %v18053_v35 }
 0x90d   : > { %v10987_v4 = vpop.eup %10986  ;;  %11006 = vrcp.f32 %v8953_v3  ;;  %v9212_v43 = vrot.slane %v10985_v46, %v16984_v38  ;;  %v9398_v56 = vsel %vm8514_vm11, %v9199_v2, %v9397_v7  ;;  %v8963_v57 = vadd.f32 1.0, %v18056_v14 }
 0x90e   : > { %v10989_v31 = vpop.eup %10988  ;;  %11008 = vrcp.f32 %v8954_v1  ;;  %v9208_v16 = vsel %vm8263_vm7, %v9207_v24, %v9203_v49  ;;  %v9217_v23 = vrot.slane %v10987_v4, %v16976_v29  ;;  %v8964_v21 = vadd.f32 1.0, %v18059_v40 }
 0x90f   : > { %v10991_v18 = vpop.eup %10990  ;;  %11010 = vrcp.f32 %v8955_v52  ;;  %v9213_v54 = vsel %vm8270_vm8, %v9212_v43, %v9208_v16  ;;  %v9221_v9 = vrot.slane %v10989_v31, %v16968_v39  ;;  %v8965_v1 = vadd.f32 1.0, %v18062_v44 }
 0x910   : > { %v10993_v51 = vpop.eup %10992  ;;  %11012 = vrcp.f32 %v8956_v59  ;;  %v9226_v37 = vrot.slane %v10991_v18, %v16984_v38  ;;  %v9399_v48 = vsel %vm8516_vm12, %v9213_v54, %v9398_v56  ;;  %v8966_v13 = vadd.f32 1.0, %v18065_v11  ;;  %v19830_v18 = vld [vmem:[#allocation119_spill] sm:$0xff] }
 0x911   : > { %v10995_v60 = vpop.eup %10994  ;;  %11014 = vrcp.f32 %v8957_v63  ;;  %v9222_v12 = vsel %vm8263_vm7, %v9221_v9, %v9217_v23  ;;  %v9231_v47 = vrot.slane %v10993_v51, %v16976_v29  ;;  %v8967_v49 = vadd.f32 1.0, %v18068_v33 }
 0x912   : > { %v10997_v61 = vpop.eup %10996  ;;  %11016 = vrcp.f32 %v8958_v10  ;;  %v9227_v28 = vsel %vm8270_vm8, %v9226_v37, %v9222_v12  ;;  %v9235_v6 = vrot.slane %v10995_v60, %v16968_v39  ;;  %v8968_v2 = vadd.f32 1.0, %v18071_v0 }
 0x913   : > { %v10999_v41 = vpop.eup %10998  ;;  %11018 = vrcp.f32 %v8959_v8  ;;  %v9240_v22 = vrot.slane %v10997_v61, %v16984_v38  ;;  %v9400_v50 = vsel %vm8518_vm13, %v9227_v28, %v9399_v48  ;;  %v8969_v63 = vadd.f32 1.0, %v18074_v26 }
 0x914   : > { %v11001_v3 = vpop.eup %11000  ;;  %11020 = vrcp.f32 %v8960_v55  ;;  %v9236_v45 = vsel %vm8263_vm7, %v9235_v6, %v9231_v47  ;;  %v9245_v35 = vrot.slane %v10999_v41, %v16976_v29  ;;  %v8970_v31 = vadd.f32 1.0, %v18077_v58  ;;  %v8701_v47 = vpop.xlane.xlu0 %8700 }
 0x915   : > { %v11003_v32 = vpop.eup %11002  ;;  %11022 = vrcp.f32 %v8961_v34  ;;  %v9241_v36 = vsel %vm8270_vm8, %v9240_v22, %v9236_v45  ;;  %v9249_v14 = vrot.slane %v11001_v3, %v16968_v39  ;;  %v8971_v23 = vadd.f32 1.0, %v18080_v30 }
 0x916   : > { %v11005_v7 = vpop.eup %11004  ;;  %11024 = vrcp.f32 %v8962_v15  ;;  %v9254_v52 = vrot.slane %v11003_v32, %v16984_v38  ;;  %v9401_v40 = vsel %vm8520_vm14, %v9241_v36, %v9400_v50  ;;  %v8761_v8 = vadd.f32 %v17832_v5, %v19830_v18 }
 0x917   : > { %v11007_v19 = vpop.eup %11006  ;;  %11026 = vrcp.f32 %v8963_v57  ;;  %v9250_v46 = vsel %vm8263_vm7, %v9249_v14, %v9245_v35  ;;  %v9259_v44 = vrot.slane %v11005_v7, %v16976_v29  ;;  %v8972_v9 = vadd.f32 1.0, %v18083_v53  ;;  %v19831_v57 = vld [vmem:[#allocation47_spill] sm:$0xff] }
 0x918   : > { %v11009_v59 = vpop.eup %11008  ;;  %11028 = vrcp.f32 %v8964_v21  ;;  %v9255_v11 = vsel %vm8270_vm8, %v9254_v52, %v9250_v46  ;;  %v9263_v24 = vrot.slane %v11007_v19, %v16968_v39  ;;  %v8973_v37 = vadd.f32 1.0, %v18086_v25 }
 0x919   : > { %v11011_v4 = vpop.eup %11010  ;;  %11030 = vrcp.f32 %v8965_v1  ;;  %v9268_v33 = vrot.slane %v11009_v59, %v16984_v38  ;;  %v9402_v43 = vsel %vm8522_vm15, %v9255_v11, %v9401_v40  ;;  %v8974_v34 = vadd.f32 1.0, %v18089_v42 }
 0x91a   : > { %v11013_v56 = vpop.eup %11012  ;;  %11032 = vrcp.f32 %v8966_v13  ;;  %v9264_v10 = vsel %vm8263_vm7, %v9263_v24, %v9259_v44  ;;  %v9273_v0 = vrot.slane %v11011_v4, %v16976_v29  ;;  %10184 = vst.msk [vmem:[%s17524_s16 + $0x18] sm:$0xff] %vm8535_vm0, %v9402_v43  ;;  %v8975_v15 = vadd.f32 1.0, %v18094_v20 }
 0x91b   : > { %v11015_v16 = vpop.eup %11014  ;;  %11034 = vrcp.f32 %v8967_v49  ;;  %v9277_v26 = vrot.slane %v11013_v56, %v16968_v39  ;;  %v9269_v58 = vsel %vm8270_vm8, %v9268_v33, %v9264_v10  ;;  %v8762_v22 = vadd.f32 %v17832_v5, %v19831_v57 }
 0x91c   : > { %v11017_v54 = vpop.eup %11016  ;;  %11036 = vrcp.f32 %v8968_v2  ;;  %v9282_v51 = vrot.slane %v11015_v16, %v16984_v38  ;;  %v8765_v21 = vadd.f32 %v17832_v5, %v8701_v47  ;;  %v10178_v1 = vmul.f32 -1.442695, %v18109_v27 }
 0x91d   : > { %v11019_v55 = vpop.eup %11018  ;;  %11038 = vrcp.f32 %v8969_v63  ;;  %v9278_v30 = vsel %vm8263_vm7, %v9277_v26, %v9273_v0  ;;  %v9287_v48 = vrot.slane %v11017_v54, %v16976_v29  ;;  %v10179_v13 = vmul.f32 -1.442695, %v8761_v8 }
 0x91e   : > { %v11021_v60 = vpop.eup %11020  ;;  %11040 = vrcp.f32 %v8970_v31  ;;  %v9283_v12 = vsel %vm8270_vm8, %v9282_v51, %v9278_v30  ;;  %v9291_v53 = vrot.slane %v11019_v55, %v16968_v39  ;;  %v10180_v19 = vmul.f32 -1.442695, %v8762_v22 }
 0x91f   : > { %v11023_v61 = vpop.eup %11022  ;;  %11042 = vrcp.f32 %v8971_v23  ;;  %v9296_v25 = vrot.slane %v11021_v60, %v16984_v38  ;;  %v9403_v28 = vsel %vm8510_vm9, %v9283_v12, %v9269_v58  ;;  %v10183_v44 = vmul.f32 -1.442695, %v8765_v21 }
 0x920   : > { %v11025_v6 = vpop.eup %11024  ;;  %11044 = vrcp.f32 %v8972_v9  ;;  %v9292_v41 = vsel %vm8263_vm7, %v9291_v53, %v9287_v48  ;;  %v9301_v42 = vrot.slane %v11023_v61, %v16976_v29 }
 0x921   : > { %v11027_v50 = vpop.eup %11026  ;;  %11046 = vrcp.f32 %v8973_v37  ;;  %v9297_v3 = vsel %vm8270_vm8, %v9296_v25, %v9292_v41  ;;  %v9305_v20 = vrot.slane %v11025_v6, %v16968_v39 }
 0x922   : > { %v11029_v45 = vpop.eup %11028  ;;  %11048 = vrcp.f32 %v8974_v34  ;;  %v9310_v35 = vrot.slane %v11027_v50, %v16984_v38  ;;  %v9404_v32 = vsel %vm8512_vm10, %v9297_v3, %v9403_v28 }
 0x923   : > { %v11031_v36 = vpop.eup %11030  ;;  %11050 = vrcp.f32 %v8975_v15  ;;  %v9306_v14 = vsel %vm8263_vm7, %v9305_v20, %v9301_v42  ;;  %v9315_v7 = vrot.slane %v11029_v45, %v16976_v29 }
 0x924   : > { %v11033_v52 = vpop.eup %11032  ;;  %v9311_v40 = vsel %vm8270_vm8, %v9310_v35, %v9306_v14  ;;  %v9319_v5 = vrot.slane %v11031_v36, %v16968_v39  ;;  %11052 = vpow2.f32 %v18103_v62 }
 0x925   : > { %v11035_v49 = vpop.eup %11034  ;;  %v9324_v46 = vrot.slane %v11033_v52, %v16984_v38  ;;  %v9405_v27 = vsel %vm8514_vm11, %v9311_v40, %v9404_v32  ;;  %11054 = vpow2.f32 %v18116_v17 }
 0x926   : > { %v11037_v59 = vpop.eup %11036  ;;  %v9320_v2 = vsel %vm8263_vm7, %v9319_v5, %v9315_v7  ;;  %v9329_v11 = vrot.slane %v11035_v49, %v16976_v29  ;;  %11056 = vpow2.f32 %v10178_v1 }
 0x927   : > { %v11039_v24 = vpop.eup %11038  ;;  %v9325_v4 = vsel %vm8270_vm8, %v9324_v46, %v9320_v2  ;;  %v9333_v62 = vrot.slane %v11037_v59, %v16968_v39  ;;  %11058 = vpow2.f32 %v10179_v13 }
 0x928   : > { %v11041_v63 = vpop.eup %11040  ;;  %v9338_v33 = vrot.slane %v11039_v24, %v16984_v38  ;;  %v9406_v43 = vsel %vm8516_vm12, %v9325_v4, %v9405_v27  ;;  %11060 = vpow2.f32 %v10180_v19 }
 0x929   : > { %v11043_v17 = vpop.eup %11042  ;;  %v9334_v56 = vsel %vm8263_vm7, %v9333_v62, %v9329_v11  ;;  %v9343_v31 = vrot.slane %v11041_v63, %v16976_v29  ;;  %11062 = vpow2.f32 %v10183_v44 }
 0x92a   : > { %v11045_v10 = vpop.eup %11044  ;;  %v9339_v0 = vsel %vm8270_vm8, %v9338_v33, %v9334_v56  ;;  %v9347_v16 = vrot.slane %v11043_v17, %v16968_v39 }
 0x92b   : > { %v11047_v23 = vpop.eup %11046  ;;  %v9352_v26 = vrot.slane %v11045_v10, %v16984_v38  ;;  %v9407_v18 = vsel %vm8518_vm13, %v9339_v0, %v9406_v43 }
 0x92c   : > { %v11049_v8 = vpop.eup %11048  ;;  %v9348_v54 = vsel %vm8263_vm7, %v9347_v16, %v9343_v31  ;;  %v9357_v9 = vrot.slane %v11047_v23, %v16976_v29 }
 0x92d   : > { %v11051_v58 = vpop.eup %11050  ;;  %v9353_v51 = vsel %vm8270_vm8, %v9352_v26, %v9348_v54  ;;  %v9361_v55 = vrot.slane %v11049_v8, %v16968_v39 }
 0x92e   : > { %v11053_v37 = vpop.eup %11052  ;;  %v9366_v30 = vrot.slane %v11051_v58, %v16984_v38  ;;  %v9408_v48 = vsel %vm8520_vm14, %v9353_v51, %v9407_v18 }
 0x92f   : > { %v11055_v60 = vpop.eup %11054  ;;  %v9362_v34 = vsel %vm8263_vm7, %v9361_v55, %v9357_v9  ;;  %v8979_v12 = vadd.f32 1.0, %v11053_v37 }
 0x930   : > { %v11057_v53 = vpop.eup %11056  ;;  %v9367_v47 = vsel %vm8270_vm8, %v9366_v30, %v9362_v34  ;;  %v8980_v61 = vadd.f32 1.0, %v11055_v60 }
 0x931   : > { %v11059_v15 = vpop.eup %11058  ;;  %v9409_v25 = vsel %vm8522_vm15, %v9367_v47, %v9408_v48  ;;  %11064 = vrcp.f32 %v8979_v12  ;;  %v8976_v28 = vadd.f32 1.0, %v11057_v53 }
 0x932   : > { %v11061_v6 = vpop.eup %11060  ;;  %10185 = vst.msk [vmem:[%s17524_s16 + $0x20] sm:$0xff] %vm8535_vm0, %v9409_v25  ;;  %11066 = vrcp.f32 %v8980_v61  ;;  %v8977_v41 = vadd.f32 1.0, %v11059_v15 }
 0x933   : > { %v11063_v42 = vpop.eup %11062  ;;  %v8978_v57 = vadd.f32 1.0, %v11061_v6  ;;  %11068 = vrcp.f32 %v8976_v28 }
 0x934   : > { %11070 = vrcp.f32 %v8977_v41  ;;  %v8981_v22 = vadd.f32 1.0, %v11063_v42 }
 0x935   : > { %11072 = vrcp.f32 %v8978_v57 }
 0x936   : > { %11074 = vrcp.f32 %v8981_v22 }
 0x93b   : > { %v11065_v50 = vpop.eup %11064 }
 0x93c   : > { %v11067_v3 = vpop.eup %11066  ;;  %v9385_v14 = vrot.slane %v11065_v50, %v16976_v29 }
 0x93d   : > { %v11069_v20 = vpop.eup %11068  ;;  %v9389_v45 = vrot.slane %v11067_v3, %v16968_v39 }
 0x93e   : > { %v11071_v21 = vpop.eup %11070  ;;  %v9371_v35 = vrot.slane %v11069_v20, %v16976_v29 }
 0x93f   : > { %v11073_v32 = vpop.eup %11072  ;;  %v9375_v1 = vrot.slane %v11071_v21, %v16968_v39  ;;  %v9390_v40 = vsel %vm8263_vm7, %v9389_v45, %v9385_v14 }
 0x940   : > { %v11075_v36 = vpop.eup %11074  ;;  %v9380_v7 = vrot.slane %v11073_v32, %v16984_v38 }
 0x941   : > { %v9376_v13 = vsel %vm8263_vm7, %v9375_v1, %v9371_v35  ;;  %v9394_v52 = vrot.slane %v11075_v36, %v16984_v38 }
 0x942   : > { %v9381_v5 = vsel %vm8270_vm8, %v9380_v7, %v9376_v13 }
 0x943   : > { %v9395_v19 = vsel %vm8270_vm8, %v9394_v52, %v9390_v40 }
 0x944   : > { %v9410_v49 = vsel %vm8510_vm9, %v9395_v19, %v9381_v5 }
 0x945   : > { %10186 = vst.msk [vmem:[%s17524_s16 + $0x28] sm:$0x3] %vm8538_vm1, %v9410_v49 }
 0x946 PF: > { %s19_s26 = sadd.s32 1, %s11110_s26  }
 0x947   : > { %p16_p5 = scmp.ge.s32.totalorder %s19_s26, 4  }
 0x949   :  { %18 = sbr.rel (!%p16_p5) target bundleno = 3 (0x3), region = 81 }

</bundles_post_ra>
